<compile_context>
chip_gen: v7x
topology: tpu7x:2x2x1
jax: 0.10.0
libtpu: 0.0.40
codegen_flags: <defaults>
</compile_context>

<pallas_src>
import functools

import jax
import jax.numpy as jnp
from jax.experimental import pallas as pl
from jax.experimental.pallas import tpu as pltpu

LEAKY_SLOPE = 0.01  # PyTorch nn.LeakyReLU default negative_slope


def _leaky(x):
    return jnp.where(x > 0, x, LEAKY_SLOPE * x)


# ----------------------------------------------------------------------------
# Fused kernel: the whole ResidualBlock for Bt batch elements.
# ----------------------------------------------------------------------------
def _residual_block_kernel(x_ref, wa_ref, ba_ref, w2_ref, b2_ref,
                           aw1_ref, aw2_ref, o_ref,
                           xpad_sc, ypad_sc, *, Bt, H, W, shortcut):
    # x_ref   : (Bt, H, W, Cin)       f32   NHWC batch tile
    # wa_ref  : (9*Cin, CoutA)        bf16  conv1 (|| conv3 if not shortcut),
    #                                        BN scale folded, rows = (tap, ci)
    # ba_ref  : (1, CoutA)            f32   folded BN bias (b1 || b3)
    # w2_ref  : (9*Cout, Cout)        bf16  conv2 weights (BN2 folded)
    # b2_ref  : (1, Cout)             f32
    # aw1_ref : (Cout, Cr)            f32   SE squeeze 1x1 weight
    # aw2_ref : (Cr, Cout)            f32   SE excite 1x1 weight
    # o_ref   : (Bt, H, W, Cout)      f32
    # xpad_sc : (Bt, H+2, W+2, Cin)   f32   VMEM halo-padded input
    # ypad_sc : (Bt, H+2, W+2, Cout)  f32   VMEM halo-padded conv1 output
    Cin = x_ref.shape[-1]
    Cout = o_ref.shape[-1]
    M = Bt * H * W

    def conv3x3(pad_ref, w_ref, b_ref):
        # Tap-packed im2col: one (M, 9C) x (9C, CoutA) MXU matmul per conv.
        C = pad_ref.shape[-1]
        taps = [pad_ref[:, ky:ky + H, kx:kx + W, :].reshape(M, C)
                for ky in range(3) for kx in range(3)]
        im2col = jnp.concatenate(taps, axis=1)               # (M, 9C) f32
        # Single bf16 cast of the packed LHS (each element cast exactly once).
        return jnp.dot(im2col.astype(jnp.bfloat16), w_ref[...],
                       preferred_element_type=jnp.float32) + b_ref[...]

    # ---- in-kernel halo padding of the input (no wrapper-side jnp.pad) ----
    x = x_ref[...]                                            # (Bt,H,W,Cin)
    xpad_sc[...] = jnp.zeros_like(xpad_sc)
    xpad_sc[:, 1:H + 1, 1:W + 1, :] = x

    # ---- conv1 (+ conv3 projection fused along Cout when not shortcut) ----
    t = conv3x3(xpad_sc, wa_ref, ba_ref)                      # (M, CoutA)
    if shortcut:
        y1 = _leaky(t)                                        # conv1+BN1+leaky
        res3 = x.reshape(Bt, H * W, Cin)                      # identity path
    else:
        y1 = _leaky(t[:, :Cout])                              # conv1 half
        res3 = t[:, Cout:].reshape(Bt, H * W, Cout)           # block2 proj

    # ---- conv2 + BN2 (input stays in VMEM) ----
    ypad_sc[...] = jnp.zeros_like(ypad_sc)
    ypad_sc[:, 1:H + 1, 1:W + 1, :] = y1.reshape(Bt, H, W, Cout)
    y2 = conv3x3(ypad_sc, w2_ref, b2_ref)                     # (M, Cout)
    y2_3 = y2.reshape(Bt, H * W, Cout)

    # ---- channel attention (squeeze-excite), per image ----
    pooled = jnp.sum(y2_3, axis=1) * (1.0 / (H * W))          # (Bt, Cout)
    h = _leaky(jnp.dot(pooled, aw1_ref[...],
                       preferred_element_type=jnp.float32))    # (Bt, Cr)
    logit = jnp.dot(h, aw2_ref[...], preferred_element_type=jnp.float32)
    s = 1.0 / (1.0 + jnp.exp(-logit))                          # exact sigmoid

    # ---- residual add + final leaky ----
    out3 = _leaky(res3 + y2_3 * s[:, None, :])                 # (Bt, HW, Cout)
    o_ref[...] = out3.reshape(Bt, H, W, Cout).astype(o_ref.dtype)


# ----------------------------------------------------------------------------
# Wrapper: NHWC in / NHWC out, one fused pallas_call, Bt images per grid step
# ----------------------------------------------------------------------------
def _pick_batch_tile(n):
    # Largest divisor of N that still leaves >= 2 grid steps (megacore) and
    # keeps the tile modest; capped at 8 images per step.
    cap = max(1, min(8, n // 2))
    for bt in range(cap, 0, -1):
        if n % bt == 0:
            return bt
    return 1


@functools.partial(jax.jit, static_argnames=("shortcut", "batch_tile"))
def residual_block_forward(x, params, shortcut=True, batch_tile=None):
    """x: (N, H, W, Cin) float32 NHWC -> (N, H, W, Cout) float32 NHWC."""
    N, H, W, Cin = x.shape
    Cout = params["w1"].shape[-1]
    Cr = params["att_w1"].shape[-1]

    if shortcut:
        assert Cin == Cout, "shortcut=True requires nin == nout"
        wa, ba = params["w1"], params["b1"]                    # (9*Cin, Cout)
    else:
        # Fuse conv1 and the block2 projection: identical im2col patches.
        wa = jnp.concatenate([params["w1"], params["w3"]], axis=1)
        ba = jnp.concatenate([params["b1"], params["b3"]], axis=1)
    CoutA = wa.shape[-1]

    bt = batch_tile if batch_tile is not None else _pick_batch_tile(N)
    assert N % bt == 0, (N, bt)

    kern = functools.partial(_residual_block_kernel, Bt=bt, H=H, W=W,
                             shortcut=shortcut)
    return pl.pallas_call(
        kern,
        out_shape=jax.ShapeDtypeStruct((N, H, W, Cout), jnp.float32),
        grid=(N // bt,),
        in_specs=[
            pl.BlockSpec((bt, H, W, Cin), lambda n: (n, 0, 0, 0)),
            pl.BlockSpec((9 * Cin, CoutA), lambda n: (0, 0)),
            pl.BlockSpec((1, CoutA), lambda n: (0, 0)),
            pl.BlockSpec((9 * Cout, Cout), lambda n: (0, 0)),
            pl.BlockSpec((1, Cout), lambda n: (0, 0)),
            pl.BlockSpec((Cout, Cr), lambda n: (0, 0)),
            pl.BlockSpec((Cr, Cout), lambda n: (0, 0)),
        ],
        out_specs=pl.BlockSpec((bt, H, W, Cout), lambda n: (n, 0, 0, 0)),
        scratch_shapes=[
            pltpu.VMEM((bt, H + 2, W + 2, Cin), jnp.float32),
            pltpu.VMEM((bt, H + 2, W + 2, Cout), jnp.float32),
        ],
        compiler_params=pltpu.CompilerParams(
            dimension_semantics=("parallel",),
            # ~3 MiB actually used at these shapes; raise to 64-100 MiB on
            # v5e/v6e when enabling much larger batch/spatial tiles.
            vmem_limit_bytes=32 * 1024 * 1024),
    )(x, wa, ba, params["w2"], params["b2"],
      params["att_w1"], params["att_w2"])


# ----------------------------------------------------------------------------
# Deterministic parameters (synthetic, BN folded in inference mode)
# ----------------------------------------------------------------------------
def make_params(key, nin, nout, ratio):
    ks = jax.random.split(key, 8)
    eps = 1e-5
    cr = max(nout // ratio, 1)

    def bn(k):
        kg, kb, km, kv = jax.random.split(k, 4)
        gamma = 1.0 + 0.1 * jax.random.normal(kg, (nout,), jnp.float32)
        beta = 0.1 * jax.random.normal(kb, (nout,), jnp.float32)
        mean = 0.1 * jax.random.normal(km, (nout,), jnp.float32)
        var = 1.0 + 0.1 * jax.random.uniform(kv, (nout,), jnp.float32)
        scale = gamma / jnp.sqrt(var + eps)
        bias = beta - mean * scale
        return scale, bias

    def conv_bn_folded(k, cin, scale):
        # PyTorch OIHW -> HWIO, fold BN scale along Cout, round once to bf16.
        # Kernel form: a single (9*cin, nout) matrix, rows = (ky, kx, ci).
        # The f32 upcast of the SAME bf16 values is used by the pure-JAX
        # reference so the comparison isolates kernel math.
        w = 0.1 * jax.random.normal(k, (nout, cin, 3, 3), jnp.float32)
        w_hwio = jnp.transpose(w, (2, 3, 1, 0))                # (3,3,cin,nout)
        w_bf = (w_hwio * scale.reshape(1, 1, 1, nout)).astype(jnp.bfloat16)
        return w_bf.reshape(9 * cin, nout), w_bf.astype(jnp.float32)

    s1, b1 = bn(ks[0])
    s2, b2 = bn(ks[1])
    s3, b3 = bn(ks[2])
    w1m, w1r = conv_bn_folded(ks[3], nin, s1)
    w2m, w2r = conv_bn_folded(ks[4], nout, s2)
    w3m, w3r = conv_bn_folded(ks[5], nin, s3)
    # 1x1 SE conv weights (Cout//r, Cout, 1, 1) / (Cout, Cout//r, 1, 1)
    att_w1 = 0.3 * jax.random.normal(ks[6], (cr, nout), jnp.float32)
    att_w2 = 0.3 * jax.random.normal(ks[7], (nout, cr), jnp.float32)
    return {
        "w1": w1m, "b1": b1.reshape(1, nout), "w1_ref": w1r,
        "w2": w2m, "b2": b2.reshape(1, nout), "w2_ref": w2r,
        "w3": w3m, "b3": b3.reshape(1, nout), "w3_ref": w3r,
        "att_w1": jnp.transpose(att_w1),   # (Cout, Cr)
        "att_w2": jnp.transpose(att_w2),   # (Cr, Cout)
    }


# ----------------------------------------------------------------------------
# Pure-JAX reference (NHWC) for validation
# ----------------------------------------------------------------------------
def ref_forward(x, params, shortcut=True):
    def conv(inp, w_hwio, b, act):
        y = jax.lax.conv_general_dilated(
            inp, w_hwio, (1, 1), "SAME",
            dimension_numbers=("NHWC", "HWIO", "NHWC"))
        y = y + b.reshape(1, 1, 1, -1)
        return _leaky(y) if act else y

    def conv_from_mat(inp, w_mat, b, act, cin):
        w_hwio = w_mat.reshape(3, 3, cin, -1)
        return conv(inp, w_hwio, b, act)

    del conv_from_mat  # (reference uses the *_ref HWIO copies directly)
    y = conv(x, params["w1_ref"], params["b1"], True)
    y = conv(y, params["w2_ref"], params["b2"], False)
    pooled = jnp.mean(y, axis=(1, 2))                          # (N, C)
    h = _leaky(pooled @ params["att_w1"])
    s = jax.nn.sigmoid(h @ params["att_w2"])                   # (N, C)
    res = x if shortcut else conv(x, params["w3_ref"], params["b3"], False)
    return _leaky(res + y * s[:, None, None, :])


if __name__ == "__main__":
    # batch=4 (-> batch tile 2, 2 grid steps), nin=nout=32 (ratio=16 -> Cr=2),
    # spatial 16x16, stride=1.
    N, C, H, W = 4, 32, 16, 16
    RATIO = 16

    key = jax.random.PRNGKey(0)
    kx_, kp_ = jax.random.split(key)
    x_nchw = jax.random.normal(kx_, (N, C, H, W), jnp.float32)
    params = make_params(kp_, C, C, RATIO)

    # Layout change done once at the network boundary (a chain of blocks
    # would stay NHWC throughout), not per block.
    x_nhwc = jnp.transpose(x_nchw, (0, 2, 3, 1))

    for shortcut in (True, False):
        out = jax.block_until_ready(
            residual_block_forward(x_nhwc, params, shortcut=shortcut))
        ref = jax.block_until_ready(
            ref_forward(x_nhwc, params, shortcut=shortcut))
        assert out.shape == (N, H, W, C), out.shape
        # bf16 MXU operands (activations + weights) vs the f32 XLA reference:
        # max abs error is ~2e-2 at these magnitudes, so keep a 2x margin.
        assert jnp.allclose(out, ref, rtol=2e-2, atol=4e-2), (
            shortcut, float(jnp.max(jnp.abs(out - ref))))

    print("KERNEL_OK")
</pallas_src>

<mosaic_0001>
module attributes {stable_mosaic.version = 11 : i64} {
  func.func @_residual_block_kernel(%arg0: i32, %arg1: memref<2x16x16x32xf32, #tpu.memory_space<vmem>>, %arg2: memref<288x32xbf16, #tpu.memory_space<vmem>>, %arg3: memref<1x32xf32, #tpu.memory_space<vmem>>, %arg4: memref<288x32xbf16, #tpu.memory_space<vmem>>, %arg5: memref<1x32xf32, #tpu.memory_space<vmem>>, %arg6: memref<32x2xf32, #tpu.memory_space<vmem>>, %arg7: memref<2x32xf32, #tpu.memory_space<vmem>>, %arg8: memref<2x16x16x32xf32, #tpu.memory_space<vmem>>, %arg9: memref<2x18x18x32xf32, #tpu.memory_space<vmem>>, %arg10: memref<2x18x18x32xf32, #tpu.memory_space<vmem>>) attributes {dimension_semantics = [#tpu.dimension_semantics<parallel>], iteration_bounds = array<i64: 2>, scalar_prefetch = 0 : i64, scratch_operands = 2 : i64, tpu.core_type = #tpu.core_type<tc>, window_params = [{transform_indices = @transform_0, window_bounds = array<i64: 2, 16, 16, 32>}, {pipeline_mode = #tpu.pipeline_mode<synchronous>, transform_indices = @transform_1, window_bounds = array<i64: 288, 32>}, {pipeline_mode = #tpu.pipeline_mode<synchronous>, transform_indices = @transform_2, window_bounds = array<i64: 1, 32>}, {pipeline_mode = #tpu.pipeline_mode<synchronous>, transform_indices = @transform_3, window_bounds = array<i64: 288, 32>}, {pipeline_mode = #tpu.pipeline_mode<synchronous>, transform_indices = @transform_4, window_bounds = array<i64: 1, 32>}, {pipeline_mode = #tpu.pipeline_mode<synchronous>, transform_indices = @transform_5, window_bounds = array<i64: 32, 2>}, {pipeline_mode = #tpu.pipeline_mode<synchronous>, transform_indices = @transform_6, window_bounds = array<i64: 2, 32>}, {transform_indices = @transform_7, window_bounds = array<i64: 2, 16, 16, 32>}]} {
    %c0 = arith.constant 0 : index
    %c0_0 = arith.constant 0 : index
    %c0_1 = arith.constant 0 : index
    %c0_2 = arith.constant 0 : index
    %0 = vector.load %arg1[%c0, %c0_0, %c0_1, %c0_2] : memref<2x16x16x32xf32, #tpu.memory_space<vmem>>, vector<2x16x16x32xf32>
    %cst = arith.constant 0.000000e+00 : f32
    %1 = vector.broadcast %cst : f32 to vector<2x18x18x32xf32>
    %c0_3 = arith.constant 0 : index
    %c0_4 = arith.constant 0 : index
    %c0_5 = arith.constant 0 : index
    %c0_6 = arith.constant 0 : index
    %2 = vector.load %arg9[%c0_3, %c0_4, %c0_5, %c0_6] : memref<2x18x18x32xf32, #tpu.memory_space<vmem>>, vector<2x18x18x32xf32>
    tpu.vector_store %arg9[%c0_3, %c0_4, %c0_5, %c0_6], %1 {strides = array<i32>} : memref<2x18x18x32xf32, #tpu.memory_space<vmem>>, vector<2x18x18x32xf32>,
    %c0_7 = arith.constant 0 : index
    %c1 = arith.constant 1 : index
    %c1_8 = arith.constant 1 : index
    %c0_9 = arith.constant 0 : index
    %3 = vector.load %arg9[%c0_7, %c1, %c1_8, %c0_9] : memref<2x18x18x32xf32, #tpu.memory_space<vmem>>, vector<2x16x16x32xf32>
    tpu.vector_store %arg9[%c0_7, %c1, %c1_8, %c0_9], %0 {strides = array<i32>} : memref<2x18x18x32xf32, #tpu.memory_space<vmem>>, vector<2x16x16x32xf32>,
    %c0_10 = arith.constant 0 : index
    %c0_11 = arith.constant 0 : index
    %c0_12 = arith.constant 0 : index
    %c0_13 = arith.constant 0 : index
    %4 = vector.load %arg9[%c0_10, %c0_11, %c0_12, %c0_13] : memref<2x18x18x32xf32, #tpu.memory_space<vmem>>, vector<2x16x16x32xf32>
    %5 = vector.shape_cast %4 : vector<2x16x16x32xf32> to vector<512x32xf32>
    %c0_14 = arith.constant 0 : index
    %c0_15 = arith.constant 0 : index
    %c1_16 = arith.constant 1 : index
    %c0_17 = arith.constant 0 : index
    %6 = vector.load %arg9[%c0_14, %c0_15, %c1_16, %c0_17] : memref<2x18x18x32xf32, #tpu.memory_space<vmem>>, vector<2x16x16x32xf32>
    %7 = vector.shape_cast %6 : vector<2x16x16x32xf32> to vector<512x32xf32>
    %c0_18 = arith.constant 0 : index
    %c0_19 = arith.constant 0 : index
    %c2 = arith.constant 2 : index
    %c0_20 = arith.constant 0 : index
    %8 = vector.load %arg9[%c0_18, %c0_19, %c2, %c0_20] : memref<2x18x18x32xf32, #tpu.memory_space<vmem>>, vector<2x16x16x32xf32>
    %9 = vector.shape_cast %8 : vector<2x16x16x32xf32> to vector<512x32xf32>
    %c0_21 = arith.constant 0 : index
    %c1_22 = arith.constant 1 : index
    %c0_23 = arith.constant 0 : index
    %c0_24 = arith.constant 0 : index
    %10 = vector.load %arg9[%c0_21, %c1_22, %c0_23, %c0_24] : memref<2x18x18x32xf32, #tpu.memory_space<vmem>>, vector<2x16x16x32xf32>
    %11 = vector.shape_cast %10 : vector<2x16x16x32xf32> to vector<512x32xf32>
    %c0_25 = arith.constant 0 : index
    %c1_26 = arith.constant 1 : index
    %c1_27 = arith.constant 1 : index
    %c0_28 = arith.constant 0 : index
    %12 = vector.load %arg9[%c0_25, %c1_26, %c1_27, %c0_28] : memref<2x18x18x32xf32, #tpu.memory_space<vmem>>, vector<2x16x16x32xf32>
    %13 = vector.shape_cast %12 : vector<2x16x16x32xf32> to vector<512x32xf32>
    %c0_29 = arith.constant 0 : index
    %c1_30 = arith.constant 1 : index
    %c2_31 = arith.constant 2 : index
    %c0_32 = arith.constant 0 : index
    %14 = vector.load %arg9[%c0_29, %c1_30, %c2_31, %c0_32] : memref<2x18x18x32xf32, #tpu.memory_space<vmem>>, vector<2x16x16x32xf32>
    %15 = vector.shape_cast %14 : vector<2x16x16x32xf32> to vector<512x32xf32>
    %c0_33 = arith.constant 0 : index
    %c2_34 = arith.constant 2 : index
    %c0_35 = arith.constant 0 : index
    %c0_36 = arith.constant 0 : index
    %16 = vector.load %arg9[%c0_33, %c2_34, %c0_35, %c0_36] : memref<2x18x18x32xf32, #tpu.memory_space<vmem>>, vector<2x16x16x32xf32>
    %17 = vector.shape_cast %16 : vector<2x16x16x32xf32> to vector<512x32xf32>
    %c0_37 = arith.constant 0 : index
    %c2_38 = arith.constant 2 : index
    %c1_39 = arith.constant 1 : index
    %c0_40 = arith.constant 0 : index
    %18 = vector.load %arg9[%c0_37, %c2_38, %c1_39, %c0_40] : memref<2x18x18x32xf32, #tpu.memory_space<vmem>>, vector<2x16x16x32xf32>
    %19 = vector.shape_cast %18 : vector<2x16x16x32xf32> to vector<512x32xf32>
    %c0_41 = arith.constant 0 : index
    %c2_42 = arith.constant 2 : index
    %c2_43 = arith.constant 2 : index
    %c0_44 = arith.constant 0 : index
    %20 = vector.load %arg9[%c0_41, %c2_42, %c2_43, %c0_44] : memref<2x18x18x32xf32, #tpu.memory_space<vmem>>, vector<2x16x16x32xf32>
    %21 = vector.shape_cast %20 : vector<2x16x16x32xf32> to vector<512x32xf32>
    %22 = tpu.concatenate %5, %7, %9, %11, %13, %15, %17, %19, %21 in 1 : vector<512x32xf32>, vector<512x32xf32>, vector<512x32xf32>, vector<512x32xf32>, vector<512x32xf32>, vector<512x32xf32>, vector<512x32xf32>, vector<512x32xf32>, vector<512x32xf32> -> vector<512x288xf32>
    %23 = arith.truncf %22 : vector<512x288xf32> to vector<512x288xbf16>
    %c0_45 = arith.constant 0 : index
    %c0_46 = arith.constant 0 : index
    %24 = vector.load %arg2[%c0_45, %c0_46] : memref<288x32xbf16, #tpu.memory_space<vmem>>, vector<288x32xbf16>
    %cst_47 = arith.constant dense<0.000000e+00> : vector<512x32xf32>
    %25 = tpu.matmul %23, %24, %cst_47 {dimension_numbers = #tpu.dot_dimension_numbers<[1], [0], [0], [1], [0, 0, 1, 1], [], []>} : vector<512x288xbf16>, vector<288x32xbf16>, vector<512x32xf32> -> vector<512x32xf32>
    %c0_48 = arith.constant 0 : index
    %c0_49 = arith.constant 0 : index
    %26 = vector.load %arg3[%c0_48, %c0_49] : memref<1x32xf32, #tpu.memory_space<vmem>>, vector<1x32xf32>
    %27 = vector.broadcast %26 : vector<1x32xf32> to vector<512x32xf32>
    %28 = arith.addf %25, %27 : vector<512x32xf32>
    %cst_50 = arith.constant 0.000000e+00 : f32
    %29 = vector.broadcast %cst_50 : f32 to vector<512x32xf32>
    %30 = arith.cmpf ogt, %28, %29 : vector<512x32xf32>
    %cst_51 = arith.constant 0.00999999977 : f32
    %31 = vector.broadcast %cst_51 : f32 to vector<512x32xf32>
    %32 = arith.mulf %31, %28 : vector<512x32xf32>
    %33 = arith.select %30, %28, %32 : vector<512x32xi1>, vector<512x32xf32>
    %34 = vector.shape_cast %0 : vector<2x16x16x32xf32> to vector<2x256x32xf32>
    %cst_52 = arith.constant 0.000000e+00 : f32
    %35 = vector.broadcast %cst_52 : f32 to vector<2x18x18x32xf32>
    %c0_53 = arith.constant 0 : index
    %c0_54 = arith.constant 0 : index
    %c0_55 = arith.constant 0 : index
    %c0_56 = arith.constant 0 : index
    %36 = vector.load %arg10[%c0_53, %c0_54, %c0_55, %c0_56] : memref<2x18x18x32xf32, #tpu.memory_space<vmem>>, vector<2x18x18x32xf32>
    tpu.vector_store %arg10[%c0_53, %c0_54, %c0_55, %c0_56], %35 {strides = array<i32>} : memref<2x18x18x32xf32, #tpu.memory_space<vmem>>, vector<2x18x18x32xf32>,
    %37 = vector.shape_cast %33 : vector<512x32xf32> to vector<2x16x16x32xf32>
    %c0_57 = arith.constant 0 : index
    %c1_58 = arith.constant 1 : index
    %c1_59 = arith.constant 1 : index
    %c0_60 = arith.constant 0 : index
    %38 = vector.load %arg10[%c0_57, %c1_58, %c1_59, %c0_60] : memref<2x18x18x32xf32, #tpu.memory_space<vmem>>, vector<2x16x16x32xf32>
    tpu.vector_store %arg10[%c0_57, %c1_58, %c1_59, %c0_60], %37 {strides = array<i32>} : memref<2x18x18x32xf32, #tpu.memory_space<vmem>>, vector<2x16x16x32xf32>,
    %c0_61 = arith.constant 0 : index
    %c0_62 = arith.constant 0 : index
    %c0_63 = arith.constant 0 : index
    %c0_64 = arith.constant 0 : index
    %39 = vector.load %arg10[%c0_61, %c0_62, %c0_63, %c0_64] : memref<2x18x18x32xf32, #tpu.memory_space<vmem>>, vector<2x16x16x32xf32>
    %40 = vector.shape_cast %39 : vector<2x16x16x32xf32> to vector<512x32xf32>
    %c0_65 = arith.constant 0 : index
    %c0_66 = arith.constant 0 : index
    %c1_67 = arith.constant 1 : index
    %c0_68 = arith.constant 0 : index
    %41 = vector.load %arg10[%c0_65, %c0_66, %c1_67, %c0_68] : memref<2x18x18x32xf32, #tpu.memory_space<vmem>>, vector<2x16x16x32xf32>
    %42 = vector.shape_cast %41 : vector<2x16x16x32xf32> to vector<512x32xf32>
    %c0_69 = arith.constant 0 : index
    %c0_70 = arith.constant 0 : index
    %c2_71 = arith.constant 2 : index
    %c0_72 = arith.constant 0 : index
    %43 = vector.load %arg10[%c0_69, %c0_70, %c2_71, %c0_72] : memref<2x18x18x32xf32, #tpu.memory_space<vmem>>, vector<2x16x16x32xf32>
    %44 = vector.shape_cast %43 : vector<2x16x16x32xf32> to vector<512x32xf32>
    %c0_73 = arith.constant 0 : index
    %c1_74 = arith.constant 1 : index
    %c0_75 = arith.constant 0 : index
    %c0_76 = arith.constant 0 : index
    %45 = vector.load %arg10[%c0_73, %c1_74, %c0_75, %c0_76] : memref<2x18x18x32xf32, #tpu.memory_space<vmem>>, vector<2x16x16x32xf32>
    %46 = vector.shape_cast %45 : vector<2x16x16x32xf32> to vector<512x32xf32>
    %c0_77 = arith.constant 0 : index
    %c1_78 = arith.constant 1 : index
    %c1_79 = arith.constant 1 : index
    %c0_80 = arith.constant 0 : index
    %47 = vector.load %arg10[%c0_77, %c1_78, %c1_79, %c0_80] : memref<2x18x18x32xf32, #tpu.memory_space<vmem>>, vector<2x16x16x32xf32>
    %48 = vector.shape_cast %47 : vector<2x16x16x32xf32> to vector<512x32xf32>
    %c0_81 = arith.constant 0 : index
    %c1_82 = arith.constant 1 : index
    %c2_83 = arith.constant 2 : index
    %c0_84 = arith.constant 0 : index
    %49 = vector.load %arg10[%c0_81, %c1_82, %c2_83, %c0_84] : memref<2x18x18x32xf32, #tpu.memory_space<vmem>>, vector<2x16x16x32xf32>
    %50 = vector.shape_cast %49 : vector<2x16x16x32xf32> to vector<512x32xf32>
    %c0_85 = arith.constant 0 : index
    %c2_86 = arith.constant 2 : index
    %c0_87 = arith.constant 0 : index
    %c0_88 = arith.constant 0 : index
    %51 = vector.load %arg10[%c0_85, %c2_86, %c0_87, %c0_88] : memref<2x18x18x32xf32, #tpu.memory_space<vmem>>, vector<2x16x16x32xf32>
    %52 = vector.shape_cast %51 : vector<2x16x16x32xf32> to vector<512x32xf32>
    %c0_89 = arith.constant 0 : index
    %c2_90 = arith.constant 2 : index
    %c1_91 = arith.constant 1 : index
    %c0_92 = arith.constant 0 : index
    %53 = vector.load %arg10[%c0_89, %c2_90, %c1_91, %c0_92] : memref<2x18x18x32xf32, #tpu.memory_space<vmem>>, vector<2x16x16x32xf32>
    %54 = vector.shape_cast %53 : vector<2x16x16x32xf32> to vector<512x32xf32>
    %c0_93 = arith.constant 0 : index
    %c2_94 = arith.constant 2 : index
    %c2_95 = arith.constant 2 : index
    %c0_96 = arith.constant 0 : index
    %55 = vector.load %arg10[%c0_93, %c2_94, %c2_95, %c0_96] : memref<2x18x18x32xf32, #tpu.memory_space<vmem>>, vector<2x16x16x32xf32>
    %56 = vector.shape_cast %55 : vector<2x16x16x32xf32> to vector<512x32xf32>
    %57 = tpu.concatenate %40, %42, %44, %46, %48, %50, %52, %54, %56 in 1 : vector<512x32xf32>, vector<512x32xf32>, vector<512x32xf32>, vector<512x32xf32>, vector<512x32xf32>, vector<512x32xf32>, vector<512x32xf32>, vector<512x32xf32>, vector<512x32xf32> -> vector<512x288xf32>
    %58 = arith.truncf %57 : vector<512x288xf32> to vector<512x288xbf16>
    %c0_97 = arith.constant 0 : index
    %c0_98 = arith.constant 0 : index
    %59 = vector.load %arg4[%c0_97, %c0_98] : memref<288x32xbf16, #tpu.memory_space<vmem>>, vector<288x32xbf16>
    %cst_99 = arith.constant dense<0.000000e+00> : vector<512x32xf32>
    %60 = tpu.matmul %58, %59, %cst_99 {dimension_numbers = #tpu.dot_dimension_numbers<[1], [0], [0], [1], [0, 0, 1, 1], [], []>} : vector<512x288xbf16>, vector<288x32xbf16>, vector<512x32xf32> -> vector<512x32xf32>
    %c0_100 = arith.constant 0 : index
    %c0_101 = arith.constant 0 : index
    %61 = vector.load %arg5[%c0_100, %c0_101] : memref<1x32xf32, #tpu.memory_space<vmem>>, vector<1x32xf32>
    %62 = vector.broadcast %61 : vector<1x32xf32> to vector<512x32xf32>
    %63 = arith.addf %60, %62 : vector<512x32xf32>
    %64 = vector.shape_cast %63 : vector<512x32xf32> to vector<2x256x32xf32>
    %cst_102 = arith.constant dense<0.000000e+00> : vector<2x32xf32>
    %65 = vector.multi_reduction <add>, %64, %cst_102 [1] : vector<2x256x32xf32> to vector<2x32xf32>
    %cst_103 = arith.constant 3.906250e-03 : f32
    %66 = vector.broadcast %cst_103 : f32 to vector<2x32xf32>
    %67 = arith.mulf %65, %66 : vector<2x32xf32>
    %c0_104 = arith.constant 0 : index
    %c0_105 = arith.constant 0 : index
    %68 = vector.load %arg6[%c0_104, %c0_105] : memref<32x2xf32, #tpu.memory_space<vmem>>, vector<32x2xf32>
    %cst_106 = arith.constant dense<0.000000e+00> : vector<2x2xf32>
    %69 = tpu.matmul %67, %68, %cst_106 {dimension_numbers = #tpu.dot_dimension_numbers<[1], [0], [0], [1], [0, 0, 1, 1], [], []>} : vector<2x32xf32>, vector<32x2xf32>, vector<2x2xf32> -> vector<2x2xf32>
    %cst_107 = arith.constant 0.000000e+00 : f32
    %70 = vector.broadcast %cst_107 : f32 to vector<2x2xf32>
    %71 = arith.cmpf ogt, %69, %70 : vector<2x2xf32>
    %cst_108 = arith.constant 0.00999999977 : f32
    %72 = vector.broadcast %cst_108 : f32 to vector<2x2xf32>
    %73 = arith.mulf %72, %69 : vector<2x2xf32>
    %74 = arith.select %71, %69, %73 : vector<2x2xi1>, vector<2x2xf32>
    %c0_109 = arith.constant 0 : index
    %c0_110 = arith.constant 0 : index
    %75 = vector.load %arg7[%c0_109, %c0_110] : memref<2x32xf32, #tpu.memory_space<vmem>>, vector<2x32xf32>
    %cst_111 = arith.constant dense<0.000000e+00> : vector<2x32xf32>
    %76 = tpu.matmul %74, %75, %cst_111 {dimension_numbers = #tpu.dot_dimension_numbers<[1], [0], [0], [1], [0, 0, 1, 1], [], []>} : vector<2x2xf32>, vector<2x32xf32>, vector<2x32xf32> -> vector<2x32xf32>
    %cst_112 = arith.constant 0.000000e+00 : f32
    %77 = vector.broadcast %cst_112 : f32 to vector<2x32xf32>
    %78 = arith.subf %77, %76 : vector<2x32xf32>
    %79 = math.exp %78 : vector<2x32xf32>
    %cst_113 = arith.constant 1.000000e+00 : f32
    %80 = vector.broadcast %cst_113 : f32 to vector<2x32xf32>
    %81 = arith.addf %80, %79 : vector<2x32xf32>
    %cst_114 = arith.constant 1.000000e+00 : f32
    %82 = vector.broadcast %cst_114 : f32 to vector<2x32xf32>
    %83 = arith.divf %82, %81 : vector<2x32xf32>
    %84 = vector.shape_cast %83 : vector<2x32xf32> to vector<2x1x32xf32>
    %85 = vector.broadcast %84 : vector<2x1x32xf32> to vector<2x256x32xf32>
    %86 = arith.mulf %64, %85 : vector<2x256x32xf32>
    %87 = arith.addf %34, %86 : vector<2x256x32xf32>
    %cst_115 = arith.constant 0.000000e+00 : f32
    %88 = vector.broadcast %cst_115 : f32 to vector<2x256x32xf32>
    %89 = arith.cmpf ogt, %87, %88 : vector<2x256x32xf32>
    %cst_116 = arith.constant 0.00999999977 : f32
    %90 = vector.broadcast %cst_116 : f32 to vector<2x256x32xf32>
    %91 = arith.mulf %90, %87 : vector<2x256x32xf32>
    %92 = arith.select %89, %87, %91 : vector<2x256x32xi1>, vector<2x256x32xf32>
    %93 = vector.shape_cast %92 : vector<2x256x32xf32> to vector<2x16x16x32xf32>
    %c0_117 = arith.constant 0 : index
    %c0_118 = arith.constant 0 : index
    %c0_119 = arith.constant 0 : index
    %c0_120 = arith.constant 0 : index
    %94 = vector.load %arg8[%c0_117, %c0_118, %c0_119, %c0_120] : memref<2x16x16x32xf32, #tpu.memory_space<vmem>>, vector<2x16x16x32xf32>
    tpu.vector_store %arg8[%c0_117, %c0_118, %c0_119, %c0_120], %93 {strides = array<i32>} : memref<2x16x16x32xf32, #tpu.memory_space<vmem>>, vector<2x16x16x32xf32>,
    return
  }
  func.func @transform_0(%arg0: i32) -> (i32, i32, i32, i32) {
    %c0_i32 = arith.constant 0 : i32
    %c0_i32_0 = arith.constant 0 : i32
    %c0_i32_1 = arith.constant 0 : i32
    %c0_i32_2 = arith.constant 0 : i32
    return %arg0, %c0_i32, %c0_i32_0, %c0_i32_1 : i32, i32, i32, i32
  }
  func.func @transform_1(%arg0: i32) -> (i32, i32) {
    %c0_i32 = arith.constant 0 : i32
    %c0_i32_0 = arith.constant 0 : i32
    %c0_i32_1 = arith.constant 0 : i32
    return %c0_i32, %c0_i32_0 : i32, i32
  }
  func.func @transform_2(%arg0: i32) -> (i32, i32) {
    %c0_i32 = arith.constant 0 : i32
    %c0_i32_0 = arith.constant 0 : i32
    %c0_i32_1 = arith.constant 0 : i32
    return %c0_i32, %c0_i32_0 : i32, i32
  }
  func.func @transform_3(%arg0: i32) -> (i32, i32) {
    %c0_i32 = arith.constant 0 : i32
    %c0_i32_0 = arith.constant 0 : i32
    %c0_i32_1 = arith.constant 0 : i32
    return %c0_i32, %c0_i32_0 : i32, i32
  }
  func.func @transform_4(%arg0: i32) -> (i32, i32) {
    %c0_i32 = arith.constant 0 : i32
    %c0_i32_0 = arith.constant 0 : i32
    %c0_i32_1 = arith.constant 0 : i32
    return %c0_i32, %c0_i32_0 : i32, i32
  }
  func.func @transform_5(%arg0: i32) -> (i32, i32) {
    %c0_i32 = arith.constant 0 : i32
    %c0_i32_0 = arith.constant 0 : i32
    %c0_i32_1 = arith.constant 0 : i32
    return %c0_i32, %c0_i32_0 : i32, i32
  }
  func.func @transform_6(%arg0: i32) -> (i32, i32) {
    %c0_i32 = arith.constant 0 : i32
    %c0_i32_0 = arith.constant 0 : i32
    %c0_i32_1 = arith.constant 0 : i32
    return %c0_i32, %c0_i32_0 : i32, i32
  }
  func.func @transform_7(%arg0: i32) -> (i32, i32, i32, i32) {
    %c0_i32 = arith.constant 0 : i32
    %c0_i32_0 = arith.constant 0 : i32
    %c0_i32_1 = arith.constant 0 : i32
    %c0_i32_2 = arith.constant 0 : i32
    return %arg0, %c0_i32, %c0_i32_0, %c0_i32_1 : i32, i32, i32, i32
  }
}

</mosaic_0001>

<bundles_post_ra>
// kernel: residual_block_forward.1
= control target key start
LH: loop header
LB: loop body
LE: loop exit
PB: predicated region body
PF: predicated region fallthrough
CT: control target
= control target key end

     0   :  { %12 = vsyncpa [#allocation5], 0  ;;  %s16375_s0 = inlined_call_operand.hbm [shape: f32[4,16,16,32], index: 0, kind: input, shape index: {}]   ;;  %s16376_s1 = inlined_call_operand.vmem [shape: bf16[288,32], index: 1, kind: input, shape index: {}]   ;;  %s16377_s2 = inlined_call_operand.vmem [shape: f32[1,32], index: 2, kind: input, shape index: {}]   ;;  %s16378_s3 = inlined_call_operand.vmem [shape: bf16[288,32], index: 3, kind: input, shape index: {}]   ;;  %s16379_s4 = inlined_call_operand.vmem [shape: f32[1,32], index: 4, kind: input, shape index: {}]   ;;  %s16380_s5 = inlined_call_operand.vmem [shape: f32[32,2], index: 5, kind: input, shape index: {}]   ;;  %s16381_s6 = inlined_call_operand.vmem [shape: f32[2,32], index: 6, kind: input, shape index: {}]   ;;  %s16382_s7 = inlined_call_operand.hbm [shape: f32[4,16,16,32], index: 7, kind: output, shape index: {}]  }
   0x1   :  { %14 = vsyncpa [#allocation5 + $0x1], 0 }
   0x2   :  { %15 = vsyncpa [#allocation6], 0 }
   0x3   :  { %17 = vsyncpa [#allocation6 + $0x1], 0  ;;  %s11124_s24 = smov 0   ;;  %s11126_s25 = smov 0  }
   0x4   :  { %s11128_s26 = smov 0   ;;  %s11130_s27 = smov 0  }
   0x5 LB: > { %s11145_s28 = sadd.s32 4294967295, %s11068_s27   ;;  %s8556_s29 = sadd.s32 4294967294, %s11068_s27   ;;  %s11068_s27 = sphi %s11130_s27, %s16948_s27   ;;  %s11064_s26 = sphi %s11128_s26, %s16947_s26   ;;  %s11060_s25 = sphi %s11126_s25, %s16946_s25   ;;  %s11056_s24 = sphi %s11124_s24, %s16945_s24  }
   0x6   : > { %s11149_s30 = sadd.s32 1, %s11068_s27   ;;  %s30_s8 = sadd.s32 1, %s11064_s26 }
   0x7   : > { %s27_s9 = ssub.s32 %s11068_s27, %s11149_s30  ;;  %p37_p0 = scmp.ne.s32.totalorder %s11064_s26, %s11060_s25 }
   0x8   : > { %p28_p1 = scmp.eq.s32.totalorder %s27_s9, 0  ;;  %p38_p2 = scmp.eq.s32.totalorder %s11068_s27, 0 }
   0x9   : > { %p43_p3 = scmp.ne.s32.totalorder %s11060_s25, %s11056_s24  ;;  %p44_p4 = scmp.eq.s32.totalorder %s11145_s28, 0 }
   0xa   : > { %s11161_s10 = scalar_select %p28_p1, %s11064_s26, %s30_s8  }
   0xb   : > { %p11163_p5 = por %p38_p2, %p37_p0  ;;  %p11167_p6 = por %p44_p4, %p43_p3 }
   0xc   : > { %p193_p7 = scmp.eq.s32.totalorder %s11145_s28, 1  ;;  %p199_p8 = scmp.eq.s32.totalorder %s8556_s29, 1 }
   0xd   : > { %p8930_p10 = scmp.lt.s32.totalorder %s11068_s27, 2  ;;  %s237_s15 = sand.u32 1, %s11064_s26  }
   0xe   : > { %p11174_p11 = por %p193_p7, %p37_p0  ;;  %p11178_p12 = por %p199_p8, %p43_p3 }
   0xf   : > { %s8678_s16 = sshll.u32 %s11068_s27, 13  ;;  %s8559_s17 = sshll.u32 %s237_s15, 9 }
  0x10   : > { %s16530_s13 = scalar_select %p11174_p11, 1, 0 }
  0x11   : > { %s16531_s14 = scalar_select %p11178_p12, 1, 0 }
  0x12   : > { %s11187_s20 = scalar_lea.hbm %s16375_s0, %s8678_s16  ;;  %s241_s21 = scalar_lea.vmem [#allocation4], %s8559_s17 }
  0x13   : > { %s249_s22 = sshll.u32 %s241_s21, 4  ;;  %p11191_p13 = pnand %p8930_p10, %p11163_p5  ;;  %s11195_s22 = int_to_ptr.vmem [resolvable:$true] %s249_s22 }
  0x14   : > { %s11197_s29 = scalar_lea.sflag [#allocation5], %s237_s15  ;;  %s10972_s8 = scalar_lea.hbm %s11187_s20, 8192 }
  0x15   : > { %p10973_p0 = scmp.ne.s32.totalorder %s11187_s20, %s10972_s8  ;;  %p10974_p1 = pneg %p11191_p13 }
  0x16   : > { %s10977_s16 = scalar_lea.hbm %s16375_s0, 16384  ;;  %p10978_p4 = scmp.lt.u32.totalorder %s11187_s20, %s16375_s0 }
  0x17   : > { %p10975_p2 = pnand %p10974_p1, %p10973_p0  ;;  %p10979_p5 = scmp.lt.u32.totalorder %s10977_s16, %s10972_s8 }
  0x18   : > { %p10981_p8 = scmp.lt.u32.totalorder %s10972_s8, %s11187_s20 }
  0x19   : > { %p10976_p3 = pneg %p10975_p2  ;;  %p10980_p7 = por %p10979_p5, %p10978_p4 }
  0x1b   : > { %p10982_p10 = por %p10981_p8, %p10980_p7 }
  0x1d   : > { %p10983_p9 = pnand %p10982_p10, %p10976_p3 }
  0x1f   : > { %10986 = shalt.err (!%p10983_p9)
}
  0x20   : > { %s10987_s15 = scalar_lea.vmem %s11195_s22, 8192  ;;  %s11070_s19 = smov [#allocation4]  }
  0x21   : > { %p10988_p0 = scmp.ne.s32.totalorder %s11195_s22, %s10987_s15  ;;  %s10992_s21 = sshll.u32 %s11070_s19, 4  ;;  %s10993_s21 = int_to_ptr.vmem [resolvable:$false] %s10992_s21 }
  0x22   : > { %s10994_s9 = scalar_lea.vmem %s10993_s21, 16384  ;;  %p10995_p11 = scmp.lt.s32.totalorder %s11195_s22, %s10993_s21 }
  0x23   : > { %p10990_p2 = pnand %p10988_p0, %p10974_p1  ;;  %p10996_p4 = scmp.lt.s32.totalorder %s10994_s9, %s10987_s15 }
  0x25   : > { %p10991_p12 = pneg %p10990_p2  ;;  %p10997_p5 = por %p10996_p4, %p10995_p11 }
  0x27   : > { %p10998_p7 = pnand %p10997_p5, %p10991_p12 }
  0x29   : > { %11001 = shalt.err (!%p10998_p7)
}
  0x2a   : > { %s11071_s8 = smov 128   ;;  %s11072_s11 = smov 8  }
  0x2b   : > { %8925 = dma.hbm_to_vmem [thread:$0]  (!%p11191_p13), %s11187_s20, 8192, %s11195_s22, %s11197_s29, %s11071_s8, %s11071_s8, %s11072_s11  }
  0x2c   : > { %p8563_p9 = scmp.ge.s32.totalorder %s11068_s27, 1  ;;  %p257_p1 = scmp.lt.s32.totalorder %s11068_s27, 3 }
  0x2e   : > { %p258_p3 = pnand %p8563_p9, %p257_p1 }
  0x30   : > { %261 = sbr.rel (%p258_p3) target bundleno = 1994 (0x7ca), region = 48 }
  0x37   : > { %s11228_s16 = sand.u32 1, %s11060_s25  }
  0x38   : > { %s8564_s17 = sshll.u32 %s11228_s16, 9  ;;  %s264_s18 = scalar_lea.sflag [#allocation5], %s11228_s16 }
  0x39   : > { %s11234_s15 = scalar_lea.vmem [#allocation4], %s8564_s17 }
  0x3a   : > { %11047 = dma.done.wait (%p11167_p6), %s264_s18, 8192  }
  0x3b   : > { %11049 = vsyncadd (%p11167_p6), %s264_s18, 4294959104  ;;  %vm365_vm0 = vcmask 261120   ;;  %vm368_vm1 = vcmask 254976   ;;  %v16384_v0 = vmov 0.0   ;;  %v11673_v1 = vld [vmem:[%s11234_s15 + $0x10] sm:$0xff]  ;;  %v11676_v2 = vld [vmem:[%s11234_s15 + $0x18] sm:$0xff] }
  0x3c   : > { %366 = vst.msk [vmem:[#allocation2] sm:$0xff] %vm365_vm0, %v16384_v0  ;;  %367 = vst.msk [vmem:[#allocation2 + $0x8] sm:$0xff] %vm365_vm0, %v16384_v0  ;;  %v11679_v3 = vld [vmem:[%s11234_s15] sm:$0xff]  ;;  %v11686_v6 = vld [vmem:[%s11234_s15 + $0x8] sm:$0xff]  ;;  %s11074_s12 = smov 32   ;;  %s11076_s19 = smov 64  }
  0x3d   : > { %369 = vst.msk [vmem:[#allocation2 + $0x10] sm:$0x3] %vm368_vm1, %v16384_v0  ;;  %372 = vst.msk [vmem:[#allocation2 + $0x28] sm:$0x3] %vm368_vm1, %v16384_v0  ;;  %v11693_v8 = vld [vmem:[%s11234_s15 + $0x20] sm:$0xff]  ;;  %v11696_v9 = vld [vmem:[%s11234_s15 + $0x28] sm:$0xff] }
  0x3e   : > { %370 = vst.msk [vmem:[#allocation2 + $0x18] sm:$0xff] %vm365_vm0, %v16384_v0  ;;  %371 = vst.msk [vmem:[#allocation2 + $0x20] sm:$0xff] %vm365_vm0, %v16384_v0  ;;  %v11699_v10 = vld [vmem:[%s11234_s15 + $0x30] sm:$0xff]  ;;  %v11706_v11 = vld [vmem:[%s11234_s15 + $0x38] sm:$0xff]  ;;  %s11077_s18 = smov 96   ;;  %vm2717_vm2 = vcmask 523264  }
  0x3f   : > { %373 = vst.msk [vmem:[#allocation2 + $0x30] sm:$0xff] %vm365_vm0, %v16384_v0  ;;  %374 = vst.msk [vmem:[#allocation2 + $0x38] sm:$0xff] %vm365_vm0, %v16384_v0  ;;  %v11711_v12 = vld [vmem:[%s11234_s15 + $0x40] sm:$0xff]  ;;  %v11714_v13 = vld [vmem:[%s11234_s15 + $0x48] sm:$0xff]  ;;  %vm2782_vm3 = vcmask 785408   ;;  %s8469_s11 = scalar_lea.sflag [#allocation6], %s11228_s16 }
  0x40   : > { %375 = vst.msk [vmem:[#allocation2 + $0x40] sm:$0x3] %vm368_vm1, %v16384_v0  ;;  %378 = vst.msk [vmem:[#allocation2 + $0x58] sm:$0x3] %vm368_vm1, %v16384_v0  ;;  %v11724_v14 = vld [vmem:[%s11234_s15 + $0x50] sm:$0xff]  ;;  %v11727_v15 = vld [vmem:[%s11234_s15 + $0x58] sm:$0xff] }
  0x41   : > { %376 = vst.msk [vmem:[#allocation2 + $0x48] sm:$0xff] %vm365_vm0, %v16384_v0  ;;  %377 = vst.msk [vmem:[#allocation2 + $0x50] sm:$0xff] %vm365_vm0, %v16384_v0  ;;  %v11730_v16 = vld [vmem:[%s11234_s15 + $0x60] sm:$0xff]  ;;  %v11737_v17 = vld [vmem:[%s11234_s15 + $0x68] sm:$0xff]  ;;  %p16942_p11 = scmp.ne.s32.totalorder %s16530_s13, 0  ;;  %s11081_s22 = smov [#allocation7]  }
  0x42   : > { %379 = vst.msk [vmem:[#allocation2 + $0x60] sm:$0xff] %vm365_vm0, %v16384_v0  ;;  %380 = vst.msk [vmem:[#allocation2 + $0x68] sm:$0xff] %vm365_vm0, %v16384_v0  ;;  %v11742_v18 = vld [vmem:[%s11234_s15 + $0x70] sm:$0xff]  ;;  %v11745_v19 = vld [vmem:[%s11234_s15 + $0x78] sm:$0xff] }
  0x43   : > { %381 = vst.msk [vmem:[#allocation2 + $0x70] sm:$0x3] %vm368_vm1, %v16384_v0  ;;  %384 = vst.msk [vmem:[#allocation2 + $0x88] sm:$0x3] %vm368_vm1, %v16384_v0  ;;  %v604_v4 = vld [vmem:[#allocation2 + $0x1] sm:$0xff]  ;;  %v11760_v22 = vld [vmem:[%s11234_s15 + $0x90] sm:$0xff] }
  0x44   : > { %382 = vst.msk [vmem:[#allocation2 + $0x78] sm:$0xff] %vm365_vm0, %v16384_v0  ;;  %383 = vst.msk [vmem:[#allocation2 + $0x80] sm:$0xff] %vm365_vm0, %v16384_v0  ;;  %v605_v5 = vld [vmem:[#allocation2 + $0x9] sm:$0xff]  ;;  %v11754_v20 = vld [vmem:[%s11234_s15 + $0x80] sm:$0xff] }
  0x45   : > { %385 = vst.msk [vmem:[#allocation2 + $0x90] sm:$0xff] %vm365_vm0, %v16384_v0  ;;  %386 = vst.msk [vmem:[#allocation2 + $0x98] sm:$0xff] %vm365_vm0, %v16384_v0  ;;  %v8976_v7 = vpack.i.bf16 %v605_v5, %v604_v4  ;;  %v11757_v21 = vld [vmem:[%s11234_s15 + $0x88] sm:$0xff]  ;;  %v11767_v23 = vld [vmem:[%s11234_s15 + $0x98] sm:$0xff] }
  0x46   : > { %387 = vst.msk [vmem:[#allocation2 + $0xa0] sm:$0x3] %vm368_vm1, %v16384_v0  ;;  %390 = vst.msk [vmem:[#allocation2 + $0xb8] sm:$0x3] %vm368_vm1, %v16384_v0  ;;  %v11772_v24 = vld [vmem:[%s11234_s15 + $0xa0] sm:$0xff]  ;;  %v11775_v25 = vld [vmem:[%s11234_s15 + $0xa8] sm:$0xff] }
  0x47   : > { %388 = vst.msk [vmem:[#allocation2 + $0xa8] sm:$0xff] %vm365_vm0, %v16384_v0  ;;  %389 = vst.msk [vmem:[#allocation2 + $0xb0] sm:$0xff] %vm365_vm0, %v16384_v0  ;;  %8977 = vrot.lane.b32.xlu0 %v8976_v7, %s11074_s12  ;;  %v11786_v31 = vld [vmem:[%s11234_s15 + $0xb0] sm:$0xff]  ;;  %v11789_v32 = vld [vmem:[%s11234_s15 + $0xb8] sm:$0xff] }
  0x48   : > { %391 = vst.msk [vmem:[#allocation2 + $0xc0] sm:$0xff] %vm365_vm0, %v16384_v0  ;;  %392 = vst.msk [vmem:[#allocation2 + $0xc8] sm:$0xff] %vm365_vm0, %v16384_v0  ;;  %v11811_v48 = vld [vmem:[%s11234_s15 + $0xc0] sm:$0xff]  ;;  %v11814_v49 = vld [vmem:[%s11234_s15 + $0xc8] sm:$0xff] }
  0x49   : > { %393 = vst.msk [vmem:[#allocation2 + $0xd0] sm:$0x3] %vm368_vm1, %v16384_v0  ;;  %396 = vst.msk [vmem:[#allocation2 + $0xe8] sm:$0x3] %vm368_vm1, %v16384_v0  ;;  %v11817_v50 = vld [vmem:[%s11234_s15 + $0xd0] sm:$0xff]  ;;  %v11824_v53 = vld [vmem:[%s11234_s15 + $0xd8] sm:$0xff] }
  0x4a   : > { %394 = vst.msk [vmem:[#allocation2 + $0xd8] sm:$0xff] %vm365_vm0, %v16384_v0  ;;  %395 = vst.msk [vmem:[#allocation2 + $0xe0] sm:$0xff] %vm365_vm0, %v16384_v0  ;;  %v11831_v56 = vld [vmem:[%s11234_s15 + $0xe0] sm:$0xff]  ;;  %v11834_v57 = vld [vmem:[%s11234_s15 + $0xe8] sm:$0xff] }
  0x4b   : > { %397 = vst.msk [vmem:[#allocation2 + $0xf0] sm:$0xff] %vm365_vm0, %v16384_v0  ;;  %398 = vst.msk [vmem:[#allocation2 + $0xf8] sm:$0xff] %vm365_vm0, %v16384_v0  ;;  %v11845_v61 = vld [vmem:[%s11234_s15 + $0x100] sm:$0xff]  ;;  %v11848_v62 = vld [vmem:[%s11234_s15 + $0x108] sm:$0xff] }
  0x4c   : > { %399 = vst.msk [vmem:[#allocation2 + $0x100] sm:$0x3] %vm368_vm1, %v16384_v0  ;;  %402 = vst.msk [vmem:[#allocation2 + $0x118] sm:$0x3] %vm368_vm1, %v16384_v0  ;;  %v11859_v4 = vld [vmem:[%s11234_s15 + $0x110] sm:$0xff]  ;;  %v11862_v5 = vld [vmem:[%s11234_s15 + $0x118] sm:$0xff] }
  0x4d   : > { %400 = vst.msk [vmem:[#allocation2 + $0x108] sm:$0xff] %vm365_vm0, %v16384_v0  ;;  %401 = vst.msk [vmem:[#allocation2 + $0x110] sm:$0xff] %vm365_vm0, %v16384_v0  ;;  %v11865_v7 = vld [vmem:[%s11234_s15 + $0x120] sm:$0xff] }
  0x4e   : > { %403 = vst.msk [vmem:[#allocation2 + $0x120] sm:$0xff] %vm365_vm0, %v16384_v0  ;;  %404 = vst.msk [vmem:[#allocation2 + $0x128] sm:$0xff] %vm365_vm0, %v16384_v0 }
  0x4f   : > { %405 = vst.msk [vmem:[#allocation2 + $0x130] sm:$0x3] %vm368_vm1, %v16384_v0  ;;  %408 = vst.msk [vmem:[#allocation2 + $0x148] sm:$0x3] %vm368_vm1, %v16384_v0 }
  0x50   : > { %406 = vst.msk [vmem:[#allocation2 + $0x138] sm:$0xff] %vm365_vm0, %v16384_v0  ;;  %407 = vst.msk [vmem:[#allocation2 + $0x140] sm:$0xff] %vm365_vm0, %v16384_v0 }
  0x51   : > { %409 = vst.msk [vmem:[#allocation2 + $0x150] sm:$0xff] %vm365_vm0, %v16384_v0  ;;  %410 = vst.msk [vmem:[#allocation2 + $0x158] sm:$0xff] %vm365_vm0, %v16384_v0 }
  0x52   : > { %411 = vst.msk [vmem:[#allocation2 + $0x160] sm:$0x3] %vm368_vm1, %v16384_v0  ;;  %414 = vst.msk [vmem:[#allocation2 + $0x178] sm:$0x3] %vm368_vm1, %v16384_v0 }
  0x53   : > { %412 = vst.msk [vmem:[#allocation2 + $0x168] sm:$0xff] %vm365_vm0, %v16384_v0  ;;  %413 = vst.msk [vmem:[#allocation2 + $0x170] sm:$0xff] %vm365_vm0, %v16384_v0 }
  0x54   : > { %415 = vst.msk [vmem:[#allocation2 + $0x180] sm:$0xff] %vm365_vm0, %v16384_v0  ;;  %416 = vst.msk [vmem:[#allocation2 + $0x188] sm:$0xff] %vm365_vm0, %v16384_v0 }
  0x55   : > { %417 = vst.msk [vmem:[#allocation2 + $0x190] sm:$0x3] %vm368_vm1, %v16384_v0  ;;  %420 = vst.msk [vmem:[#allocation2 + $0x1a8] sm:$0x3] %vm368_vm1, %v16384_v0 }
  0x56   : > { %418 = vst.msk [vmem:[#allocation2 + $0x198] sm:$0xff] %vm365_vm0, %v16384_v0  ;;  %419 = vst.msk [vmem:[#allocation2 + $0x1a0] sm:$0xff] %vm365_vm0, %v16384_v0 }
  0x57   : > { %421 = vst.msk [vmem:[#allocation2 + $0x1b0] sm:$0xff] %vm365_vm0, %v16384_v0  ;;  %422 = vst.msk [vmem:[#allocation2 + $0x1b8] sm:$0xff] %vm365_vm0, %v16384_v0 }
  0x58   : > { %423 = vst.msk [vmem:[#allocation2 + $0x1c0] sm:$0x3] %vm368_vm1, %v16384_v0  ;;  %426 = vst.msk [vmem:[#allocation2 + $0x1d8] sm:$0x3] %vm368_vm1, %v16384_v0 }
  0x59   : > { %424 = vst.msk [vmem:[#allocation2 + $0x1c8] sm:$0xff] %vm365_vm0, %v16384_v0  ;;  %425 = vst.msk [vmem:[#allocation2 + $0x1d0] sm:$0xff] %vm365_vm0, %v16384_v0 }
  0x5a   : > { %427 = vst.msk [vmem:[#allocation2 + $0x1e0] sm:$0xff] %vm365_vm0, %v16384_v0  ;;  %428 = vst.msk [vmem:[#allocation2 + $0x1e8] sm:$0xff] %vm365_vm0, %v16384_v0 }
  0x5b   : > { %429 = vst.msk [vmem:[#allocation2 + $0x1f0] sm:$0x3] %vm368_vm1, %v16384_v0  ;;  %432 = vst.msk [vmem:[#allocation2 + $0x208] sm:$0x3] %vm368_vm1, %v16384_v0 }
  0x5c   : > { %430 = vst.msk [vmem:[#allocation2 + $0x1f8] sm:$0xff] %vm365_vm0, %v16384_v0  ;;  %431 = vst.msk [vmem:[#allocation2 + $0x200] sm:$0xff] %vm365_vm0, %v16384_v0 }
  0x5d   : > { %433 = vst.msk [vmem:[#allocation2 + $0x210] sm:$0xff] %vm365_vm0, %v16384_v0  ;;  %434 = vst.msk [vmem:[#allocation2 + $0x218] sm:$0xff] %vm365_vm0, %v16384_v0 }
  0x5e   : > { %435 = vst.msk [vmem:[#allocation2 + $0x220] sm:$0x3] %vm368_vm1, %v16384_v0  ;;  %438 = vst.msk [vmem:[#allocation2 + $0x238] sm:$0x3] %vm368_vm1, %v16384_v0 }
  0x5f   : > { %436 = vst.msk [vmem:[#allocation2 + $0x228] sm:$0xff] %vm365_vm0, %v16384_v0  ;;  %437 = vst.msk [vmem:[#allocation2 + $0x230] sm:$0xff] %vm365_vm0, %v16384_v0 }
  0x60   : > { %439 = vst.msk [vmem:[#allocation2 + $0x240] sm:$0xff] %vm365_vm0, %v16384_v0  ;;  %440 = vst.msk [vmem:[#allocation2 + $0x248] sm:$0xff] %vm365_vm0, %v16384_v0 }
  0x61   : > { %441 = vst.msk [vmem:[#allocation2 + $0x250] sm:$0x3] %vm368_vm1, %v16384_v0  ;;  %444 = vst.msk [vmem:[#allocation2 + $0x268] sm:$0x3] %vm368_vm1, %v16384_v0 }
  0x62   : > { %442 = vst.msk [vmem:[#allocation2 + $0x258] sm:$0xff] %vm365_vm0, %v16384_v0  ;;  %443 = vst.msk [vmem:[#allocation2 + $0x260] sm:$0xff] %vm365_vm0, %v16384_v0 }
  0x63   : > { %445 = vst.msk [vmem:[#allocation2 + $0x270] sm:$0xff] %vm365_vm0, %v16384_v0  ;;  %446 = vst.msk [vmem:[#allocation2 + $0x278] sm:$0xff] %vm365_vm0, %v16384_v0 }
  0x64   : > { %447 = vst.msk [vmem:[#allocation2 + $0x280] sm:$0x3] %vm368_vm1, %v16384_v0  ;;  %450 = vst.msk [vmem:[#allocation2 + $0x298] sm:$0x3] %vm368_vm1, %v16384_v0 }
  0x65   : > { %448 = vst.msk [vmem:[#allocation2 + $0x288] sm:$0xff] %vm365_vm0, %v16384_v0  ;;  %449 = vst.msk [vmem:[#allocation2 + $0x290] sm:$0xff] %vm365_vm0, %v16384_v0 }
  0x66   : > { %451 = vst.msk [vmem:[#allocation2 + $0x2a0] sm:$0xff] %vm365_vm0, %v16384_v0  ;;  %452 = vst.msk [vmem:[#allocation2 + $0x2a8] sm:$0xff] %vm365_vm0, %v16384_v0 }
  0x67   : > { %453 = vst.msk [vmem:[#allocation2 + $0x2b0] sm:$0x3] %vm368_vm1, %v16384_v0  ;;  %456 = vst.msk [vmem:[#allocation2 + $0x2c8] sm:$0x3] %vm368_vm1, %v16384_v0 }
  0x68   : > { %454 = vst.msk [vmem:[#allocation2 + $0x2b8] sm:$0xff] %vm365_vm0, %v16384_v0  ;;  %455 = vst.msk [vmem:[#allocation2 + $0x2c0] sm:$0xff] %vm365_vm0, %v16384_v0 }
  0x69   : > { %457 = vst.msk [vmem:[#allocation2 + $0x2d0] sm:$0xff] %vm365_vm0, %v16384_v0  ;;  %458 = vst.msk [vmem:[#allocation2 + $0x2d8] sm:$0xff] %vm365_vm0, %v16384_v0 }
  0x6a   : > { %459 = vst.msk [vmem:[#allocation2 + $0x2e0] sm:$0x3] %vm368_vm1, %v16384_v0  ;;  %462 = vst.msk [vmem:[#allocation2 + $0x2f8] sm:$0x3] %vm368_vm1, %v16384_v0 }
  0x6b   : > { %460 = vst.msk [vmem:[#allocation2 + $0x2e8] sm:$0xff] %vm365_vm0, %v16384_v0  ;;  %461 = vst.msk [vmem:[#allocation2 + $0x2f0] sm:$0xff] %vm365_vm0, %v16384_v0 }
  0x6c   : > { %463 = vst.msk [vmem:[#allocation2 + $0x300] sm:$0xff] %vm365_vm0, %v16384_v0  ;;  %464 = vst.msk [vmem:[#allocation2 + $0x308] sm:$0xff] %vm365_vm0, %v16384_v0 }
  0x6d   : > { %465 = vst.msk [vmem:[#allocation2 + $0x310] sm:$0x3] %vm368_vm1, %v16384_v0  ;;  %468 = vst.msk [vmem:[#allocation2 + $0x328] sm:$0x3] %vm368_vm1, %v16384_v0 }
  0x6e   : > { %466 = vst.msk [vmem:[#allocation2 + $0x318] sm:$0xff] %vm365_vm0, %v16384_v0  ;;  %467 = vst.msk [vmem:[#allocation2 + $0x320] sm:$0xff] %vm365_vm0, %v16384_v0 }
  0x6f   : > { %469 = vst.msk [vmem:[#allocation2 + $0x330] sm:$0xff] %vm365_vm0, %v16384_v0  ;;  %470 = vst.msk [vmem:[#allocation2 + $0x338] sm:$0xff] %vm365_vm0, %v16384_v0 }
  0x70   : > { %471 = vst.msk [vmem:[#allocation2 + $0x340] sm:$0x3] %vm368_vm1, %v16384_v0  ;;  %474 = vst.msk [vmem:[#allocation2 + $0x358] sm:$0x3] %vm368_vm1, %v16384_v0 }
  0x71   : > { %472 = vst.msk [vmem:[#allocation2 + $0x348] sm:$0xff] %vm365_vm0, %v16384_v0  ;;  %473 = vst.msk [vmem:[#allocation2 + $0x350] sm:$0xff] %vm365_vm0, %v16384_v0 }
  0x72   : > { %4152 = vst.msk [vmem:[#allocation3] sm:$0xff] %vm365_vm0, %v16384_v0  ;;  %4153 = vst.msk [vmem:[#allocation3 + $0x8] sm:$0xff] %vm365_vm0, %v16384_v0 }
  0x73   : > { %4154 = vst.msk [vmem:[#allocation3 + $0x10] sm:$0x3] %vm368_vm1, %v16384_v0  ;;  %4157 = vst.msk [vmem:[#allocation3 + $0x28] sm:$0x3] %vm368_vm1, %v16384_v0 }
  0x74   : > { %4155 = vst.msk [vmem:[#allocation3 + $0x18] sm:$0xff] %vm365_vm0, %v16384_v0  ;;  %4156 = vst.msk [vmem:[#allocation3 + $0x20] sm:$0xff] %vm365_vm0, %v16384_v0 }
  0x75   : > { %4158 = vst.msk [vmem:[#allocation3 + $0x30] sm:$0xff] %vm365_vm0, %v16384_v0  ;;  %4159 = vst.msk [vmem:[#allocation3 + $0x38] sm:$0xff] %vm365_vm0, %v16384_v0 }
  0x76   : > { %4160 = vst.msk [vmem:[#allocation3 + $0x40] sm:$0x3] %vm368_vm1, %v16384_v0  ;;  %4163 = vst.msk [vmem:[#allocation3 + $0x58] sm:$0x3] %vm368_vm1, %v16384_v0 }
  0x77   : > { %4161 = vst.msk [vmem:[#allocation3 + $0x48] sm:$0xff] %vm365_vm0, %v16384_v0  ;;  %4162 = vst.msk [vmem:[#allocation3 + $0x50] sm:$0xff] %vm365_vm0, %v16384_v0 }
  0x78   : > { %4164 = vst.msk [vmem:[#allocation3 + $0x60] sm:$0xff] %vm365_vm0, %v16384_v0  ;;  %4165 = vst.msk [vmem:[#allocation3 + $0x68] sm:$0xff] %vm365_vm0, %v16384_v0 }
  0x79   : > { %4166 = vst.msk [vmem:[#allocation3 + $0x70] sm:$0x3] %vm368_vm1, %v16384_v0  ;;  %4169 = vst.msk [vmem:[#allocation3 + $0x88] sm:$0x3] %vm368_vm1, %v16384_v0 }
  0x7a   : > { %4167 = vst.msk [vmem:[#allocation3 + $0x78] sm:$0xff] %vm365_vm0, %v16384_v0  ;;  %4168 = vst.msk [vmem:[#allocation3 + $0x80] sm:$0xff] %vm365_vm0, %v16384_v0 }
  0x7b   : > { %4170 = vst.msk [vmem:[#allocation3 + $0x90] sm:$0xff] %vm365_vm0, %v16384_v0  ;;  %4171 = vst.msk [vmem:[#allocation3 + $0x98] sm:$0xff] %vm365_vm0, %v16384_v0 }
  0x7c   : > { %4172 = vst.msk [vmem:[#allocation3 + $0xa0] sm:$0x3] %vm368_vm1, %v16384_v0  ;;  %4175 = vst.msk [vmem:[#allocation3 + $0xb8] sm:$0x3] %vm368_vm1, %v16384_v0 }
  0x7d   : > { %4173 = vst.msk [vmem:[#allocation3 + $0xa8] sm:$0xff] %vm365_vm0, %v16384_v0  ;;  %4174 = vst.msk [vmem:[#allocation3 + $0xb0] sm:$0xff] %vm365_vm0, %v16384_v0 }
  0x7e   : > { %4176 = vst.msk [vmem:[#allocation3 + $0xc0] sm:$0xff] %vm365_vm0, %v16384_v0  ;;  %4177 = vst.msk [vmem:[#allocation3 + $0xc8] sm:$0xff] %vm365_vm0, %v16384_v0 }
  0x7f   : > { %4178 = vst.msk [vmem:[#allocation3 + $0xd0] sm:$0x3] %vm368_vm1, %v16384_v0  ;;  %4181 = vst.msk [vmem:[#allocation3 + $0xe8] sm:$0x3] %vm368_vm1, %v16384_v0 }
  0x80   : > { %4179 = vst.msk [vmem:[#allocation3 + $0xd8] sm:$0xff] %vm365_vm0, %v16384_v0  ;;  %4180 = vst.msk [vmem:[#allocation3 + $0xe0] sm:$0xff] %vm365_vm0, %v16384_v0 }
  0x81   : > { %4182 = vst.msk [vmem:[#allocation3 + $0xf0] sm:$0xff] %vm365_vm0, %v16384_v0  ;;  %4183 = vst.msk [vmem:[#allocation3 + $0xf8] sm:$0xff] %vm365_vm0, %v16384_v0 }
  0x82   : > { %4184 = vst.msk [vmem:[#allocation3 + $0x100] sm:$0x3] %vm368_vm1, %v16384_v0  ;;  %4187 = vst.msk [vmem:[#allocation3 + $0x118] sm:$0x3] %vm368_vm1, %v16384_v0 }
  0x83   : > { %4185 = vst.msk [vmem:[#allocation3 + $0x108] sm:$0xff] %vm365_vm0, %v16384_v0  ;;  %4186 = vst.msk [vmem:[#allocation3 + $0x110] sm:$0xff] %vm365_vm0, %v16384_v0 }
  0x84   : > { %4188 = vst.msk [vmem:[#allocation3 + $0x120] sm:$0xff] %vm365_vm0, %v16384_v0  ;;  %4189 = vst.msk [vmem:[#allocation3 + $0x128] sm:$0xff] %vm365_vm0, %v16384_v0 }
  0x85   : > { %4190 = vst.msk [vmem:[#allocation3 + $0x130] sm:$0x3] %vm368_vm1, %v16384_v0  ;;  %4193 = vst.msk [vmem:[#allocation3 + $0x148] sm:$0x3] %vm368_vm1, %v16384_v0 }
  0x86   : > { %4191 = vst.msk [vmem:[#allocation3 + $0x138] sm:$0xff] %vm365_vm0, %v16384_v0  ;;  %4192 = vst.msk [vmem:[#allocation3 + $0x140] sm:$0xff] %vm365_vm0, %v16384_v0 }
  0x87   : > { %4194 = vst.msk [vmem:[#allocation3 + $0x150] sm:$0xff] %vm365_vm0, %v16384_v0  ;;  %4195 = vst.msk [vmem:[#allocation3 + $0x158] sm:$0xff] %vm365_vm0, %v16384_v0 }
  0x88   : > { %4196 = vst.msk [vmem:[#allocation3 + $0x160] sm:$0x3] %vm368_vm1, %v16384_v0  ;;  %4199 = vst.msk [vmem:[#allocation3 + $0x178] sm:$0x3] %vm368_vm1, %v16384_v0 }
  0x89   : > { %4197 = vst.msk [vmem:[#allocation3 + $0x168] sm:$0xff] %vm365_vm0, %v16384_v0  ;;  %4198 = vst.msk [vmem:[#allocation3 + $0x170] sm:$0xff] %vm365_vm0, %v16384_v0 }
  0x8a   : > { %4200 = vst.msk [vmem:[#allocation3 + $0x180] sm:$0xff] %vm365_vm0, %v16384_v0  ;;  %4201 = vst.msk [vmem:[#allocation3 + $0x188] sm:$0xff] %vm365_vm0, %v16384_v0 }
  0x8b   : > { %4202 = vst.msk [vmem:[#allocation3 + $0x190] sm:$0x3] %vm368_vm1, %v16384_v0  ;;  %4205 = vst.msk [vmem:[#allocation3 + $0x1a8] sm:$0x3] %vm368_vm1, %v16384_v0 }
  0x8c   : > { %4203 = vst.msk [vmem:[#allocation3 + $0x198] sm:$0xff] %vm365_vm0, %v16384_v0  ;;  %4204 = vst.msk [vmem:[#allocation3 + $0x1a0] sm:$0xff] %vm365_vm0, %v16384_v0 }
  0x8d   : > { %4206 = vst.msk [vmem:[#allocation3 + $0x1b0] sm:$0xff] %vm365_vm0, %v16384_v0  ;;  %4207 = vst.msk [vmem:[#allocation3 + $0x1b8] sm:$0xff] %vm365_vm0, %v16384_v0 }
  0x8e   : > { %4208 = vst.msk [vmem:[#allocation3 + $0x1c0] sm:$0x3] %vm368_vm1, %v16384_v0  ;;  %4211 = vst.msk [vmem:[#allocation3 + $0x1d8] sm:$0x3] %vm368_vm1, %v16384_v0 }
  0x8f   : > { %4209 = vst.msk [vmem:[#allocation3 + $0x1c8] sm:$0xff] %vm365_vm0, %v16384_v0  ;;  %4210 = vst.msk [vmem:[#allocation3 + $0x1d0] sm:$0xff] %vm365_vm0, %v16384_v0 }
  0x90   : > { %4212 = vst.msk [vmem:[#allocation3 + $0x1e0] sm:$0xff] %vm365_vm0, %v16384_v0  ;;  %4213 = vst.msk [vmem:[#allocation3 + $0x1e8] sm:$0xff] %vm365_vm0, %v16384_v0 }
  0x91   : > { %4214 = vst.msk [vmem:[#allocation3 + $0x1f0] sm:$0x3] %vm368_vm1, %v16384_v0  ;;  %4217 = vst.msk [vmem:[#allocation3 + $0x208] sm:$0x3] %vm368_vm1, %v16384_v0 }
  0x92   : > { %4215 = vst.msk [vmem:[#allocation3 + $0x1f8] sm:$0xff] %vm365_vm0, %v16384_v0  ;;  %4216 = vst.msk [vmem:[#allocation3 + $0x200] sm:$0xff] %vm365_vm0, %v16384_v0 }
  0x93   : > { %4218 = vst.msk [vmem:[#allocation3 + $0x210] sm:$0xff] %vm365_vm0, %v16384_v0  ;;  %4219 = vst.msk [vmem:[#allocation3 + $0x218] sm:$0xff] %vm365_vm0, %v16384_v0 }
  0x94   : > { %4220 = vst.msk [vmem:[#allocation3 + $0x220] sm:$0x3] %vm368_vm1, %v16384_v0  ;;  %4223 = vst.msk [vmem:[#allocation3 + $0x238] sm:$0x3] %vm368_vm1, %v16384_v0 }
  0x95   : > { %4221 = vst.msk [vmem:[#allocation3 + $0x228] sm:$0xff] %vm365_vm0, %v16384_v0  ;;  %4222 = vst.msk [vmem:[#allocation3 + $0x230] sm:$0xff] %vm365_vm0, %v16384_v0 }
  0x96   : > { %4224 = vst.msk [vmem:[#allocation3 + $0x240] sm:$0xff] %vm365_vm0, %v16384_v0  ;;  %4225 = vst.msk [vmem:[#allocation3 + $0x248] sm:$0xff] %vm365_vm0, %v16384_v0 }
  0x97   : > { %4226 = vst.msk [vmem:[#allocation3 + $0x250] sm:$0x3] %vm368_vm1, %v16384_v0  ;;  %4229 = vst.msk [vmem:[#allocation3 + $0x268] sm:$0x3] %vm368_vm1, %v16384_v0 }
  0x98   : > { %4227 = vst.msk [vmem:[#allocation3 + $0x258] sm:$0xff] %vm365_vm0, %v16384_v0  ;;  %4228 = vst.msk [vmem:[#allocation3 + $0x260] sm:$0xff] %vm365_vm0, %v16384_v0 }
  0x99   : > { %4230 = vst.msk [vmem:[#allocation3 + $0x270] sm:$0xff] %vm365_vm0, %v16384_v0  ;;  %4231 = vst.msk [vmem:[#allocation3 + $0x278] sm:$0xff] %vm365_vm0, %v16384_v0 }
  0x9a   : > { %4232 = vst.msk [vmem:[#allocation3 + $0x280] sm:$0x3] %vm368_vm1, %v16384_v0  ;;  %4235 = vst.msk [vmem:[#allocation3 + $0x298] sm:$0x3] %vm368_vm1, %v16384_v0 }
  0x9b   : > { %4233 = vst.msk [vmem:[#allocation3 + $0x288] sm:$0xff] %vm365_vm0, %v16384_v0  ;;  %4234 = vst.msk [vmem:[#allocation3 + $0x290] sm:$0xff] %vm365_vm0, %v16384_v0 }
  0x9c   : > { %4236 = vst.msk [vmem:[#allocation3 + $0x2a0] sm:$0xff] %vm365_vm0, %v16384_v0  ;;  %4237 = vst.msk [vmem:[#allocation3 + $0x2a8] sm:$0xff] %vm365_vm0, %v16384_v0 }
  0x9d   : > { %4238 = vst.msk [vmem:[#allocation3 + $0x2b0] sm:$0x3] %vm368_vm1, %v16384_v0  ;;  %4241 = vst.msk [vmem:[#allocation3 + $0x2c8] sm:$0x3] %vm368_vm1, %v16384_v0 }
  0x9e   : > { %4239 = vst.msk [vmem:[#allocation3 + $0x2b8] sm:$0xff] %vm365_vm0, %v16384_v0  ;;  %4240 = vst.msk [vmem:[#allocation3 + $0x2c0] sm:$0xff] %vm365_vm0, %v16384_v0 }
  0x9f   : > { %4242 = vst.msk [vmem:[#allocation3 + $0x2d0] sm:$0xff] %vm365_vm0, %v16384_v0  ;;  %4243 = vst.msk [vmem:[#allocation3 + $0x2d8] sm:$0xff] %vm365_vm0, %v16384_v0 }
  0xa0   : > { %4244 = vst.msk [vmem:[#allocation3 + $0x2e0] sm:$0x3] %vm368_vm1, %v16384_v0  ;;  %4247 = vst.msk [vmem:[#allocation3 + $0x2f8] sm:$0x3] %vm368_vm1, %v16384_v0 }
  0xa1   : > { %4245 = vst.msk [vmem:[#allocation3 + $0x2e8] sm:$0xff] %vm365_vm0, %v16384_v0  ;;  %4246 = vst.msk [vmem:[#allocation3 + $0x2f0] sm:$0xff] %vm365_vm0, %v16384_v0 }
  0xa2   : > { %4248 = vst.msk [vmem:[#allocation3 + $0x300] sm:$0xff] %vm365_vm0, %v16384_v0  ;;  %4249 = vst.msk [vmem:[#allocation3 + $0x308] sm:$0xff] %vm365_vm0, %v16384_v0 }
  0xa3   : > { %4250 = vst.msk [vmem:[#allocation3 + $0x310] sm:$0x3] %vm368_vm1, %v16384_v0  ;;  %4253 = vst.msk [vmem:[#allocation3 + $0x328] sm:$0x3] %vm368_vm1, %v16384_v0 }
  0xa4   : > { %4251 = vst.msk [vmem:[#allocation3 + $0x318] sm:$0xff] %vm365_vm0, %v16384_v0  ;;  %4252 = vst.msk [vmem:[#allocation3 + $0x320] sm:$0xff] %vm365_vm0, %v16384_v0 }
  0xa5   : > { %4254 = vst.msk [vmem:[#allocation3 + $0x330] sm:$0xff] %vm365_vm0, %v16384_v0  ;;  %4255 = vst.msk [vmem:[#allocation3 + $0x338] sm:$0xff] %vm365_vm0, %v16384_v0 }
  0xa6   : > { %4256 = vst.msk [vmem:[#allocation3 + $0x340] sm:$0x3] %vm368_vm1, %v16384_v0  ;;  %4259 = vst.msk [vmem:[#allocation3 + $0x358] sm:$0x3] %vm368_vm1, %v16384_v0 }
  0xa7   : > { %4257 = vst.msk [vmem:[#allocation3 + $0x348] sm:$0xff] %vm365_vm0, %v16384_v0  ;;  %4258 = vst.msk [vmem:[#allocation3 + $0x350] sm:$0xff] %vm365_vm0, %v16384_v0 }
  0xa8   : > { %16533 = vst [vmem:[#allocation10_spill] sm:$0xff] %v11673_v1  ;;  %16534 = vst [vmem:[#allocation11_spill] sm:$0xff] %v11676_v2 }
  0xa9   : > { %16535 = vst [vmem:[#allocation12_spill] sm:$0xff] %v11679_v3  ;;  %478 = vst.msk [vmem:[#allocation2 + $0x31] sm:$0xff] %vm365_vm0, %v11673_v1 }
  0xaa   : > { %479 = vst.msk [vmem:[#allocation2 + $0x39] sm:$0xff] %vm365_vm0, %v11676_v2  ;;  %16536 = vst [vmem:[#allocation13_spill] sm:$0xff] %v11686_v6 }
  0xab   : > { %476 = vst.msk [vmem:[#allocation2 + $0x19] sm:$0xff] %vm365_vm0, %v11679_v3  ;;  %477 = vst.msk [vmem:[#allocation2 + $0x21] sm:$0xff] %vm365_vm0, %v11686_v6 }
  0xac   : > { %16537 = vst [vmem:[#allocation14_spill] sm:$0xff] %v11693_v8  ;;  %16538 = vst [vmem:[#allocation15_spill] sm:$0xff] %v11696_v9 }
  0xad   : > { %16539 = vst [vmem:[#allocation16_spill] sm:$0xff] %v11699_v10  ;;  %480 = vst.msk [vmem:[#allocation2 + $0x49] sm:$0xff] %vm365_vm0, %v11693_v8 }
  0xae   : > { %481 = vst.msk [vmem:[#allocation2 + $0x51] sm:$0xff] %vm365_vm0, %v11696_v9  ;;  %16540 = vst [vmem:[#allocation17_spill] sm:$0xff] %v11706_v11 }
  0xaf   : > { %482 = vst.msk [vmem:[#allocation2 + $0x61] sm:$0xff] %vm365_vm0, %v11699_v10  ;;  %16541 = vst [vmem:[#allocation18_spill] sm:$0xff] %v11711_v12 }
  0xb0   : > { %16542 = vst [vmem:[#allocation19_spill] sm:$0xff] %v11714_v13  ;;  %483 = vst.msk [vmem:[#allocation2 + $0x69] sm:$0xff] %vm365_vm0, %v11706_v11  ;;  %v608_v26 = vld [vmem:[#allocation2 + $0x31] sm:$0xff] }
  0xb1   : > { %484 = vst.msk [vmem:[#allocation2 + $0x79] sm:$0xff] %vm365_vm0, %v11711_v12  ;;  %485 = vst.msk [vmem:[#allocation2 + $0x81] sm:$0xff] %vm365_vm0, %v11714_v13  ;;  %v609_v27 = vld [vmem:[#allocation2 + $0x39] sm:$0xff] }
  0xb2   : > { %16543 = vst [vmem:[#allocation20_spill] sm:$0xff] %v11724_v14  ;;  %16544 = vst [vmem:[#allocation21_spill] sm:$0xff] %v11727_v15  ;;  %v606_v28 = vld [vmem:[#allocation2 + $0x19] sm:$0xff]  ;;  %v11783_v29 = vpack.i.bf16 %v609_v27, %v608_v26  ;;  %v607_v30 = vld [vmem:[#allocation2 + $0x21] sm:$0xff] }
  0xb3   : > { %16545 = vst [vmem:[#allocation22_spill] sm:$0xff] %v11730_v16  ;;  %486 = vst.msk [vmem:[#allocation2 + $0x91] sm:$0xff] %vm365_vm0, %v11724_v14  ;;  %v8981_v33 = vpack.i.bf16 %v607_v30, %v606_v28  ;;  %v11872_v26 = vld [vmem:[%s11234_s15 + $0x128] sm:$0xff]  ;;  %v11877_v27 = vld [vmem:[%s11234_s15 + $0x130] sm:$0xff] }
  0xb4   : > { %487 = vst.msk [vmem:[#allocation2 + $0x99] sm:$0xff] %vm365_vm0, %v11727_v15  ;;  %16546 = vst [vmem:[#allocation23_spill] sm:$0xff] %v11737_v17  ;;  %v610_v34 = vld [vmem:[#allocation2 + $0x49] sm:$0xff]  ;;  %8987 = vrot.lane.b32.xlu1 %v11783_v29, %s11074_s12  ;;  %v11880_v28 = vld [vmem:[%s11234_s15 + $0x138] sm:$0xff] }
  0xb5   : > { %488 = vst.msk [vmem:[#allocation2 + $0xa9] sm:$0xff] %vm365_vm0, %v11730_v16  ;;  %16547 = vst [vmem:[#allocation24_spill] sm:$0xff] %v11742_v18  ;;  %v611_v35 = vld [vmem:[#allocation2 + $0x51] sm:$0xff]  ;;  %8982 = vrot.lane.b32.xlu0 %v8981_v33, %s11074_s12  ;;  %v11889_v30 = vld [vmem:[%s11234_s15 + $0x140] sm:$0xff] }
  0xb6   : > { %16548 = vst [vmem:[#allocation25_spill] sm:$0xff] %v11745_v19  ;;  %489 = vst.msk [vmem:[#allocation2 + $0xb1] sm:$0xff] %vm365_vm0, %v11737_v17  ;;  %v612_v36 = vld [vmem:[#allocation2 + $0x61] sm:$0xff]  ;;  %v11797_v37 = vpack.i.bf16 %v611_v35, %v610_v34  ;;  %v11895_v34 = vld [vmem:[%s11234_s15 + $0x150] sm:$0xff] }
  0xb7   : > { %490 = vst.msk [vmem:[#allocation2 + $0xc1] sm:$0xff] %vm365_vm0, %v11742_v18  ;;  %491 = vst.msk [vmem:[#allocation2 + $0xc9] sm:$0xff] %vm365_vm0, %v11745_v19  ;;  %v613_v38 = vld [vmem:[#allocation2 + $0x69] sm:$0xff] }
  0xb8   : > { %16549 = vst [vmem:[#allocation26_spill] sm:$0xff] %v11754_v20  ;;  %16550 = vst [vmem:[#allocation27_spill] sm:$0xff] %v11757_v21  ;;  %v11800_v39 = vpack.i.bf16 %v613_v38, %v612_v36  ;;  %v614_v40 = vld [vmem:[#allocation2 + $0x79] sm:$0xff]  ;;  %v615_v41 = vld [vmem:[#allocation2 + $0x81] sm:$0xff]  ;;  %8992 = vrot.lane.b32.xlu1 %v11797_v37, %s11074_s12 }
  0xb9   : > { %16551 = vst [vmem:[#allocation28_spill] sm:$0xff] %v11760_v22  ;;  %492 = vst.msk [vmem:[#allocation2 + $0xd9] sm:$0xff] %vm365_vm0, %v11754_v20  ;;  %v11804_v44 = vpack.i.bf16 %v615_v41, %v614_v40  ;;  %v11892_v33 = vld [vmem:[%s11234_s15 + $0x148] sm:$0xff]  ;;  %v11906_v36 = vld [vmem:[%s11234_s15 + $0x158] sm:$0xff] }
  0xba   : > { %493 = vst.msk [vmem:[#allocation2 + $0xe1] sm:$0xff] %vm365_vm0, %v11757_v21  ;;  %16552 = vst [vmem:[#allocation29_spill] sm:$0xff] %v11767_v23  ;;  %v616_v42 = vld [vmem:[#allocation2 + $0x91] sm:$0xff]  ;;  %8997 = vrot.lane.b32.xlu0 %v11800_v39, %s11074_s12  ;;  %v11911_v38 = vld [vmem:[%s11234_s15 + $0x160] sm:$0xff] }
  0xbb   : > { %494 = vst.msk [vmem:[#allocation2 + $0xf1] sm:$0xff] %vm365_vm0, %v11760_v22  ;;  %16553 = vst [vmem:[#allocation30_spill] sm:$0xff] %v11772_v24  ;;  %v617_v43 = vld [vmem:[#allocation2 + $0x99] sm:$0xff]  ;;  %v11914_v40 = vld [vmem:[%s11234_s15 + $0x168] sm:$0xff] }
  0xbc   : > { %16554 = vst [vmem:[#allocation31_spill] sm:$0xff] %v11775_v25  ;;  %495 = vst.msk [vmem:[#allocation2 + $0xf9] sm:$0xff] %vm365_vm0, %v11767_v23  ;;  %v618_v45 = vld [vmem:[#allocation2 + $0xa9] sm:$0xff]  ;;  %v11808_v47 = vpack.i.bf16 %v617_v43, %v616_v42  ;;  %9002 = vrot.lane.b32.xlu1 %v11804_v44, %s11074_s12 }
  0xbd   : > { %496 = vst.msk [vmem:[#allocation2 + $0x109] sm:$0xff] %vm365_vm0, %v11772_v24  ;;  %497 = vst.msk [vmem:[#allocation2 + $0x111] sm:$0xff] %vm365_vm0, %v11775_v25  ;;  %v619_v46 = vld [vmem:[#allocation2 + $0xb1] sm:$0xff] }
  0xbe   : > { %16555 = vst [vmem:[#allocation32_spill] sm:$0xff] %v11786_v31  ;;  %16556 = vst [vmem:[#allocation33_spill] sm:$0xff] %v11789_v32  ;;  %v620_v51 = vld [vmem:[#allocation2 + $0xc1] sm:$0xff]  ;;  %v621_v52 = vld [vmem:[#allocation2 + $0xc9] sm:$0xff]  ;;  %v11838_v58 = vpack.i.bf16 %v619_v46, %v618_v45  ;;  %9007 = vrot.lane.b32.xlu0 %v11808_v47, %s11074_s12 }
  0xbf   : > { %498 = vst.msk [vmem:[#allocation2 + $0x121] sm:$0xff] %vm365_vm0, %v11786_v31  ;;  %499 = vst.msk [vmem:[#allocation2 + $0x129] sm:$0xff] %vm365_vm0, %v11789_v32  ;;  %v11852_v63 = vpack.i.bf16 %v621_v52, %v620_v51  ;;  %v11925_v51 = vld [vmem:[%s11234_s15 + $0x170] sm:$0xff]  ;;  %v11928_v52 = vld [vmem:[%s11234_s15 + $0x178] sm:$0xff] }
  0xc0   : > { %16557 = vst [vmem:[#allocation34_spill] sm:$0xff] %v11811_v48  ;;  %16558 = vst [vmem:[#allocation35_spill] sm:$0xff] %v11814_v49  ;;  %v622_v54 = vld [vmem:[#allocation2 + $0xd9] sm:$0xff]  ;;  %9012 = vrot.lane.b32.xlu1 %v11838_v58, %s11074_s12  ;;  %v1063_v32 = vld [vmem:[#allocation2 + $0xaa] sm:$0xff] }
  0xc1   : > { %16559 = vst [vmem:[#allocation36_spill] sm:$0xff] %v11817_v50  ;;  %500 = vst.msk [vmem:[#allocation2 + $0x139] sm:$0xff] %vm365_vm0, %v11811_v48  ;;  %v623_v55 = vld [vmem:[#allocation2 + $0xe1] sm:$0xff] }
  0xc2   : > { %501 = vst.msk [vmem:[#allocation2 + $0x141] sm:$0xff] %vm365_vm0, %v11814_v49  ;;  %16560 = vst [vmem:[#allocation37_spill] sm:$0xff] %v11824_v53  ;;  %v624_v59 = vld [vmem:[#allocation2 + $0xf1] sm:$0xff]  ;;  %v11899_v35 = vpack.i.bf16 %v623_v55, %v622_v54  ;;  %9017 = vrot.lane.b32.xlu0 %v11852_v63, %s11074_s12  ;;  %v11935_v54 = vld [vmem:[%s11234_s15 + $0x180] sm:$0xff] }
  0xc3   : > { %502 = vst.msk [vmem:[#allocation2 + $0x151] sm:$0xff] %vm365_vm0, %v11817_v50  ;;  %503 = vst.msk [vmem:[#allocation2 + $0x159] sm:$0xff] %vm365_vm0, %v11824_v53  ;;  %v625_v60 = vld [vmem:[#allocation2 + $0xf9] sm:$0xff]  ;;  %v10906_v50 = vld [vmem:[%s16376_s1 + $0x50] sm:$0xff]  }
  0xc4   : > { %16561 = vst [vmem:[#allocation38_spill] sm:$0xff] %v11831_v56  ;;  %16562 = vst [vmem:[#allocation39_spill] sm:$0xff] %v11834_v57  ;;  %v9026_v41 = vpack.i.bf16 %v625_v60, %v624_v59  ;;  %v626_v42 = vld [vmem:[#allocation2 + $0x109] sm:$0xff]  ;;  %v627_v43 = vld [vmem:[#allocation2 + $0x111] sm:$0xff]  ;;  %9022 = vrot.lane.b32.xlu1 %v11899_v35, %s11074_s12 }
  0xc5   : > { %504 = vst.msk [vmem:[#allocation2 + $0x169] sm:$0xff] %vm365_vm0, %v11831_v56  ;;  %505 = vst.msk [vmem:[#allocation2 + $0x171] sm:$0xff] %vm365_vm0, %v11834_v57  ;;  %v9031_v55 = vpack.i.bf16 %v627_v43, %v626_v42  ;;  %v11940_v59 = vld [vmem:[%s11234_s15 + $0x188] sm:$0xff]  ;;  %v1056_v56 = vld [vmem:[#allocation2 + $0x52] sm:$0xff] }
  0xc6   : > { %16563 = vst [vmem:[#allocation40_spill] sm:$0xff] %v11845_v61  ;;  %16564 = vst [vmem:[#allocation41_spill] sm:$0xff] %v11848_v62  ;;  %v628_v45 = vld [vmem:[#allocation2 + $0x121] sm:$0xff]  ;;  %v629_v46 = vld [vmem:[#allocation2 + $0x129] sm:$0xff]  ;;  %9027 = vrot.lane.b32.xlu0 %v9026_v41, %s11074_s12 }
  0xc7   : > { %508 = vst.msk [vmem:[#allocation2 + $0x1c9] sm:$0xff] %vm365_vm0, %v11845_v61  ;;  %509 = vst.msk [vmem:[#allocation2 + $0x1d1] sm:$0xff] %vm365_vm0, %v11848_v62  ;;  %v9036_v60 = vpack.i.bf16 %v629_v46, %v628_v45  ;;  %v11950_v41 = vld [vmem:[%s11234_s15 + $0x190] sm:$0xff]  ;;  %v11953_v45 = vld [vmem:[%s11234_s15 + $0x198] sm:$0xff] }
  0xc8   : > { %16565 = vst [vmem:[#allocation42_spill] sm:$0xff] %v11859_v4  ;;  %16566 = vst [vmem:[#allocation43_spill] sm:$0xff] %v11862_v5  ;;  %v630_v0 = vld [vmem:[#allocation2 + $0x139] sm:$0xff]  ;;  %9032 = vrot.lane.b32.xlu1 %v9031_v55, %s11074_s12  ;;  %v1068_v22 = vld [vmem:[#allocation2 + $0xe2] sm:$0xff] }
  0xc9   : > { %16567 = vst [vmem:[#allocation44_spill] sm:$0xff] %v11865_v7  ;;  %510 = vst.msk [vmem:[#allocation2 + $0x1e1] sm:$0xff] %vm365_vm0, %v11859_v4  ;;  %v11956_v46 = vld [vmem:[%s11234_s15 + $0x1a0] sm:$0xff]  ;;  %v10903_v62 = vld [vmem:[%s16376_s1 + $0x38] sm:$0xff]  }
  0xca   : > { %511 = vst.msk [vmem:[#allocation2 + $0x1e9] sm:$0xff] %vm365_vm0, %v11862_v5  ;;  %16568 = vst [vmem:[#allocation45_spill] sm:$0xff] %v11872_v26  ;;  %9037 = vrot.lane.b32.xlu0 %v9036_v60, %s11074_s12  ;;  %v12103_v5 = vld [vmem:[%s11234_s15 + $0xf8] sm:$0xff]  ;;  %v10904_v61 = vld [vmem:[%s16376_s1 + $0x40] sm:$0xff]  }
  0xcb   : > { %512 = vst.msk [vmem:[#allocation2 + $0x1f9] sm:$0xff] %vm365_vm0, %v11865_v7  ;;  %16569 = vst [vmem:[#allocation46_spill] sm:$0xff] %v11877_v27  ;;  %v10902_v7 = vld [vmem:[%s16376_s1 + $0x30] sm:$0xff]   ;;  %v697_v4 = vld [vmem:[#allocation2 + $0x15a] sm:$0xff] }
  0xcc   : > { %16570 = vst [vmem:[#allocation47_spill] sm:$0xff] %v11880_v28  ;;  %513 = vst.msk [vmem:[#allocation2 + $0x201] sm:$0xff] %vm365_vm0, %v11872_v26  ;;  %v634_v43 = vld [vmem:[#allocation2 + $0x169] sm:$0xff]  ;;  %v12160_v49 = vld [vmem:[#allocation2 + $0x60] sm:$0xff] }
  0xcd   : > { %514 = vst.msk [vmem:[#allocation2 + $0x211] sm:$0xff] %vm365_vm0, %v11877_v27  ;;  %515 = vst.msk [vmem:[#allocation2 + $0x219] sm:$0xff] %vm365_vm0, %v11880_v28  ;;  %v10901_v28 = vld [vmem:[%s16376_s1 + $0x28] sm:$0xff]   ;;  %v12090_v26 = vld [vmem:[%s11234_s15 + $0xf0] sm:$0xff] }
  0xce   : > { %16571 = vst [vmem:[#allocation48_spill] sm:$0xff] %v11889_v30  ;;  %16572 = vst [vmem:[#allocation49_spill] sm:$0xff] %v11892_v33  ;;  %v639_v60 = vld [vmem:[#allocation2 + $0x1d1] sm:$0xff]  ;;  %v562_v19 = vld [vmem:[#allocation2 + $0x108] sm:$0xff] }
  0xcf   : > { %16573 = vst [vmem:[#allocation50_spill] sm:$0xff] %v11895_v34  ;;  %516 = vst.msk [vmem:[#allocation2 + $0x229] sm:$0xff] %vm365_vm0, %v11889_v30  ;;  %v690_v27 = vld [vmem:[#allocation2 + $0x10a] sm:$0xff]  ;;  %v1072_v16 = vld [vmem:[#allocation2 + $0x112] sm:$0xff] }
  0xd0   : > { %517 = vst.msk [vmem:[#allocation2 + $0x231] sm:$0xff] %vm365_vm0, %v11892_v33  ;;  %16574 = vst [vmem:[#allocation51_spill] sm:$0xff] %v11906_v36  ;;  %v1071_v17 = vld [vmem:[#allocation2 + $0x10a] sm:$0xff]  ;;  %v12325_v11 = vld [vmem:[#allocation2 + $0x138] sm:$0xff] }
  0xd1   : > { %518 = vst.msk [vmem:[#allocation2 + $0x241] sm:$0xff] %vm365_vm0, %v11895_v34  ;;  %16575 = vst [vmem:[#allocation52_spill] sm:$0xff] %v11911_v38  ;;  %v1010_v13 = vld [vmem:[#allocation2 + $0x129] sm:$0xff]  ;;  %v1077_v2 = vld [vmem:[#allocation2 + $0x152] sm:$0xff] }
  0xd2   : > { %16576 = vst [vmem:[#allocation53_spill] sm:$0xff] %v11914_v40  ;;  %519 = vst.msk [vmem:[#allocation2 + $0x249] sm:$0xff] %vm365_vm0, %v11906_v36  ;;  %v637_v36 = vld [vmem:[#allocation2 + $0x1b9] sm:$0xff]  ;;  %v1074_v12 = vld [vmem:[#allocation2 + $0x12a] sm:$0xff] }
  0xd3   : > { %520 = vst.msk [vmem:[#allocation2 + $0x259] sm:$0xff] %vm365_vm0, %v11911_v38  ;;  %521 = vst.msk [vmem:[#allocation2 + $0x261] sm:$0xff] %vm365_vm0, %v11914_v40  ;;  %v633_v40 = vld [vmem:[#allocation2 + $0x159] sm:$0xff]  ;;  %v635_v38 = vld [vmem:[#allocation2 + $0x171] sm:$0xff] }
  0xd4   : > { %16577 = vst [vmem:[#allocation54_spill] sm:$0xff] %v11925_v51  ;;  %16578 = vst [vmem:[#allocation55_spill] sm:$0xff] %v11928_v52  ;;  %v9051_v55 = vpack.i.bf16 %v635_v38, %v634_v43  ;;  %v11992_v38 = vld [vmem:[%s11234_s15 + $0x1d0] sm:$0xff]  ;;  %v11998_v43 = vld [vmem:[%s11234_s15 + $0x1e0] sm:$0xff] }
  0xd5   : > { %522 = vst.msk [vmem:[#allocation2 + $0x271] sm:$0xff] %vm365_vm0, %v11925_v51  ;;  %523 = vst.msk [vmem:[#allocation2 + $0x279] sm:$0xff] %vm365_vm0, %v11928_v52  ;;  %v631_v51 = vld [vmem:[#allocation2 + $0x141] sm:$0xff]  ;;  %v632_v52 = vld [vmem:[#allocation2 + $0x151] sm:$0xff] }
  0xd6   : > { %16579 = vst [vmem:[#allocation56_spill] sm:$0xff] %v11935_v54  ;;  %16580 = vst [vmem:[#allocation57_spill] sm:$0xff] %v11940_v59  ;;  %v9041_v42 = vpack.i.bf16 %v631_v51, %v630_v0  ;;  %v11963_v0 = vld [vmem:[%s11234_s15 + $0x1a8] sm:$0xff]  ;;  %v11970_v51 = vld [vmem:[%s11234_s15 + $0x1b0] sm:$0xff] }
  0xd7   : > { %524 = vst.msk [vmem:[#allocation2 + $0x289] sm:$0xff] %vm365_vm0, %v11935_v54  ;;  %525 = vst.msk [vmem:[#allocation2 + $0x291] sm:$0xff] %vm365_vm0, %v11940_v59  ;;  %v9046_v54 = vpack.i.bf16 %v633_v40, %v632_v52  ;;  %v636_v59 = vld [vmem:[#allocation2 + $0x1b1] sm:$0xff]  ;;  %v638_v40 = vld [vmem:[#allocation2 + $0x1c9] sm:$0xff] }
  0xd8   : > { %16581 = vst [vmem:[#allocation58_spill] sm:$0xff] %v11950_v41  ;;  %16582 = vst [vmem:[#allocation59_spill] sm:$0xff] %v11953_v45  ;;  %v11973_v52 = vld [vmem:[%s11234_s15 + $0x1b8] sm:$0xff]  ;;  %9042 = vrot.lane.b32.xlu1 %v9041_v42, %s11074_s12  ;;  %v1076_v10 = vld [vmem:[#allocation2 + $0x142] sm:$0xff] }
  0xd9   : > { %16583 = vst [vmem:[#allocation60_spill] sm:$0xff] %v11956_v46  ;;  %526 = vst.msk [vmem:[#allocation2 + $0x2a1] sm:$0xff] %vm365_vm0, %v11950_v41  ;;  %9047 = vrot.lane.b32.xlu0 %v9046_v54, %s11074_s12  ;;  %v11995_v42 = vld [vmem:[%s11234_s15 + $0x1d8] sm:$0xff]  ;;  %v9061_v54 = vpack.i.bf16 %v639_v60, %v638_v40  ;;  %v649_v40 = vld [vmem:[#allocation2 + $0x249] sm:$0xff] }
  0xda   : > { %527 = vst.msk [vmem:[#allocation2 + $0x2a9] sm:$0xff] %vm365_vm0, %v11953_v45  ;;  %16584 = vst [vmem:[#allocation61_spill] sm:$0xff] %v11963_v0  ;;  %v11984_v45 = vld [vmem:[%s11234_s15 + $0x1c8] sm:$0xff]  ;;  %v645_v41 = vld [vmem:[#allocation2 + $0x219] sm:$0xff] }
  0xdb   : > { %528 = vst.msk [vmem:[#allocation2 + $0x2b9] sm:$0xff] %vm365_vm0, %v11956_v46  ;;  %529 = vst.msk [vmem:[#allocation2 + $0x2c1] sm:$0xff] %vm365_vm0, %v11963_v0  ;;  %v11981_v46 = vld [vmem:[%s11234_s15 + $0x1c0] sm:$0xff]  ;;  %v9056_v0 = vpack.i.bf16 %v637_v36, %v636_v59  ;;  %v12005_v36 = vld [vmem:[%s11234_s15 + $0x1e8] sm:$0xff] }
  0xdc   : > { %16585 = vst [vmem:[#allocation62_spill] sm:$0xff] %v11970_v51  ;;  %16586 = vst [vmem:[#allocation63_spill] sm:$0xff] %v11973_v52  ;;  %9052 = vrot.lane.b32.xlu1 %v9051_v55, %s11074_s12  ;;  %v647_v33 = vld [vmem:[#allocation2 + $0x231] sm:$0xff]  ;;  %v648_v55 = vld [vmem:[#allocation2 + $0x241] sm:$0xff] }
  0xdd   : > { %530 = vst.msk [vmem:[#allocation2 + $0x2d1] sm:$0xff] %vm365_vm0, %v11970_v51  ;;  %531 = vst.msk [vmem:[#allocation2 + $0x2d9] sm:$0xff] %vm365_vm0, %v11973_v52  ;;  %v640_v52 = vld [vmem:[#allocation2 + $0x1e1] sm:$0xff]  ;;  %v641_v51 = vld [vmem:[#allocation2 + $0x1e9] sm:$0xff]  ;;  %9057 = vrot.lane.b32.xlu0 %v9056_v0, %s11074_s12 }
  0xde   : > { %16587 = vst [vmem:[#allocation64_spill] sm:$0xff] %v11981_v46  ;;  %16588 = vst [vmem:[#allocation65_spill] sm:$0xff] %v11984_v45  ;;  %v9066_v59 = vpack.i.bf16 %v641_v51, %v640_v52  ;;  %v9086_v51 = vpack.i.bf16 %v649_v40, %v648_v55  ;;  %v650_v52 = vld [vmem:[#allocation2 + $0x259] sm:$0xff]  ;;  %v651_v60 = vld [vmem:[#allocation2 + $0x261] sm:$0xff] }
  0xdf   : > { %532 = vst.msk [vmem:[#allocation2 + $0x2e9] sm:$0xff] %vm365_vm0, %v11981_v46  ;;  %533 = vst.msk [vmem:[#allocation2 + $0x2f1] sm:$0xff] %vm365_vm0, %v11984_v45  ;;  %v642_v45 = vld [vmem:[#allocation2 + $0x1f9] sm:$0xff]  ;;  %v643_v46 = vld [vmem:[#allocation2 + $0x201] sm:$0xff] }
  0xe0   : > { %16589 = vst [vmem:[#allocation66_spill] sm:$0xff] %v11992_v38  ;;  %16590 = vst [vmem:[#allocation67_spill] sm:$0xff] %v11995_v42  ;;  %9062 = vrot.lane.b32.xlu1 %v9061_v54, %s11074_s12  ;;  %v9071_v34 = vpack.i.bf16 %v643_v46, %v642_v45  ;;  %v653_v30 = vld [vmem:[#allocation2 + $0x279] sm:$0xff]  ;;  %v9091_v45 = vpack.i.bf16 %v651_v60, %v650_v52  ;;  %v654_v46 = vld [vmem:[#allocation2 + $0x289] sm:$0xff] }
  0xe1   : > { %16591 = vst [vmem:[#allocation68_spill] sm:$0xff] %v11998_v43  ;;  %534 = vst.msk [vmem:[#allocation2 + $0x301] sm:$0xff] %vm365_vm0, %v11992_v38  ;;  %v16407_v38 = vmov 0   ;;  %9067 = vrot.lane.b32.xlu0 %v9066_v59, %s11074_s12  ;;  %v656_v54 = vld [vmem:[#allocation2 + $0x2a1] sm:$0xff]  ;;  %v657_v59 = vld [vmem:[#allocation2 + $0x2a9] sm:$0xff] }
  0xe2   : > { %535 = vst.msk [vmem:[#allocation2 + $0x309] sm:$0xff] %vm365_vm0, %v11995_v42  ;;  %16592 = vst [vmem:[#allocation69_spill] sm:$0xff] %v12005_v36  ;;  %3382 = vmatprep.subr.bf16.mxu0 %v16407_v38  ;;  %v644_v42 = vld [vmem:[#allocation2 + $0x211] sm:$0xff]  ;;  %v1078_v1 = vld [vmem:[#allocation2 + $0x15a] sm:$0xff] }
  0xe3   : > { %536 = vst.msk [vmem:[#allocation2 + $0x319] sm:$0xff] %vm365_vm0, %v11998_v43  ;;  %537 = vst.msk [vmem:[#allocation2 + $0x321] sm:$0xff] %vm365_vm0, %v12005_v36  ;;  %v9076_v43 = vpack.i.bf16 %v645_v41, %v644_v42  ;;  %v646_v36 = vld [vmem:[#allocation2 + $0x229] sm:$0xff]  ;;  %v652_v38 = vld [vmem:[#allocation2 + $0x271] sm:$0xff] }
  0xe4   : > { %9072 = vrot.lane.b32.xlu1 %v9071_v34, %s11074_s12  ;;  %v9081_v0 = vpack.i.bf16 %v647_v33, %v646_v36  ;;  %v9096_v41 = vpack.i.bf16 %v653_v30, %v652_v38  ;;  %v655_v42 = vld [vmem:[#allocation2 + $0x291] sm:$0xff]  ;;  %v9106_v34 = vpack.i.bf16 %v657_v59, %v656_v54  ;;  %v659_v36 = vld [vmem:[#allocation2 + $0x2c1] sm:$0xff]  ;;  %v661_v40 = vld [vmem:[#allocation2 + $0x2d9] sm:$0xff]  ;;  %16594 = vst [vmem:[#allocation70_spill] sm:$0xff] %v12090_v26 }
  0xe5   : > { %9077 = vrot.lane.b32.xlu0 %v9076_v43, %s11074_s12  ;;  %v9101_v33 = vpack.i.bf16 %v655_v42, %v654_v46  ;;  %v658_v43 = vld [vmem:[#allocation2 + $0x2b9] sm:$0xff]  ;;  %v660_v55 = vld [vmem:[#allocation2 + $0x2d1] sm:$0xff]  ;;  %v668_v54 = vld [vmem:[#allocation2 + $0x2] sm:$0xff]  ;;  %506 = vst.msk [vmem:[#allocation2 + $0x181] sm:$0xff] %vm365_vm0, %v12090_v26 }
  0xe6   : > { %v9116_v30 = vpack.i.bf16 %v661_v40, %v660_v55  ;;  %v662_v38 = vld [vmem:[#allocation2 + $0x2e9] sm:$0xff]  ;;  %v672_v40 = vld [vmem:[#allocation2 + $0x32] sm:$0xff]  ;;  %16595 = vst [vmem:[#allocation71_spill] sm:$0xff] %v12103_v5  ;;  %507 = vst.msk [vmem:[#allocation2 + $0x189] sm:$0xff] %vm365_vm0, %v12103_v5 }
  0xe7   : > { %v669_v59 = vld [vmem:[#allocation2 + $0xa] sm:$0xff]  ;;  %v671_v55 = vld [vmem:[#allocation2 + $0x22] sm:$0xff]  ;;  %v12144_v5 = vld [vmem:[#allocation2 + $0x18] sm:$0xff] }
  0xe8   : > { %9082 = vrot.lane.b32.xlu1 %v9081_v0, %s11074_s12  ;;  %v9111_v0 = vpack.i.bf16 %v659_v36, %v658_v43  ;;  %v664_v52 = vld [vmem:[#allocation2 + $0x301] sm:$0xff]  ;;  %v9136_v43 = vpack.i.bf16 %v669_v59, %v668_v54  ;;  %v1080_v3 = vld [vmem:[#allocation2 + $0x172] sm:$0xff] }
  0xe9   : > { %9087 = vrot.lane.b32.xlu0 %v9086_v51, %s11074_s12  ;;  %v663_v51 = vld [vmem:[#allocation2 + $0x2f1] sm:$0xff]  ;;  %v665_v60 = vld [vmem:[#allocation2 + $0x309] sm:$0xff]  ;;  %v670_v36 = vld [vmem:[#allocation2 + $0x1a] sm:$0xff] }
  0xea   : > { %v666_v46 = vld [vmem:[#allocation2 + $0x319] sm:$0xff]  ;;  %v667_v42 = vld [vmem:[#allocation2 + $0x321] sm:$0xff] }
  0xeb   : > { %v12146_v26 = vld [vmem:[#allocation2 + $0x20] sm:$0xff]  ;;  %v12359_v6 = vld [vmem:[#allocation2 + $0x168] sm:$0xff] }
  0xec   : > { %9092 = vrot.lane.b32.xlu1 %v9091_v45, %s11074_s12  ;;  %v9121_v45 = vpack.i.bf16 %v663_v51, %v662_v38  ;;  %v10897_v38 = vld [vmem:[%s16376_s1 + $0x8] sm:$0xff]   ;;  %v12036_v51 = vpack.i.bf16 %v671_v55, %v670_v36  ;;  %v681_v36 = vld [vmem:[#allocation2 + $0x9a] sm:$0xff] }
  0xed   : > { %9097 = vrot.lane.b32.xlu0 %v9096_v41, %s11074_s12  ;;  %v9126_v41 = vpack.i.bf16 %v665_v60, %v664_v52  ;;  %v674_v52 = vld [vmem:[#allocation2 + $0x4a] sm:$0xff]  ;;  %v10899_v55 = vld [vmem:[%s16376_s1 + $0x18] sm:$0xff]  }
  0xf0   : > { %9102 = vrot.lane.b32.xlu1 %v9101_v33, %s11074_s12  ;;  %v9131_v33 = vpack.i.bf16 %v667_v42, %v666_v46  ;;  %v677_v46 = vld [vmem:[#allocation2 + $0x6a] sm:$0xff] }
  0xf1   : > { %9107 = vrot.lane.b32.xlu0 %v9106_v34, %s11074_s12  ;;  %v10896_v34 = vld [vmem:[%s16376_s1] sm:$0xff]   ;;  %v10898_v42 = vld [vmem:[%s16376_s1 + $0x10] sm:$0xff]  }
  0xf2   : > { %3383 = vmatpush1.bf16.msra.mxu0 %v10896_v34  ;;  %v679_v34 = vld [vmem:[#allocation2 + $0x82] sm:$0xff] }
  0xf4   : > { %9112 = vrot.lane.b32.xlu1 %v9111_v0, %s11074_s12  ;;  %v673_v0 = vld [vmem:[#allocation2 + $0x3a] sm:$0xff] }
  0xf5   : > { %9117 = vrot.lane.b32.xlu0 %v9116_v30, %s11074_s12  ;;  %v16593_v30 = vmov 0   ;;  %v12039_v60 = vpack.i.bf16 %v673_v0, %v672_v40  ;;  %v682_v0 = vld [vmem:[#allocation2 + $0xaa] sm:$0xff] }
  0xf6   : > { %3384 = vmatprep.subr.bf16.mxu0 %v16593_v30 }
  0xf7   : > { %3385 = vmatpush1.bf16.msra.mxu0 %v10897_v38  ;;  %v683_v38 = vld [vmem:[#allocation2 + $0xb2] sm:$0xff] }
  0xf8   : > { %9122 = vrot.lane.b32.xlu1 %v9121_v45, %s11074_s12  ;;  %v675_v45 = vld [vmem:[#allocation2 + $0x52] sm:$0xff]  ;;  %3386 = vmatprep.subr.bf16.mxu0 %v16593_v30 }
  0xf9   : > { %9127 = vrot.lane.b32.xlu0 %v9126_v41, %s11074_s12  ;;  %v676_v41 = vld [vmem:[#allocation2 + $0x62] sm:$0xff]  ;;  %v12047_v54 = vpack.i.bf16 %v675_v45, %v674_v52 }
  0xfa   : > { %v12051_v59 = vpack.i.bf16 %v677_v46, %v676_v41  ;;  %v684_v52 = vld [vmem:[#allocation2 + $0xc2] sm:$0xff]  ;;  %v685_v41 = vld [vmem:[#allocation2 + $0xca] sm:$0xff] }
  0xfb   : > { %3387 = vmatpush1.bf16.msra.mxu0 %v10898_v42  ;;  %v10900_v46 = vld [vmem:[%s16376_s1 + $0x20] sm:$0xff]  }
  0xfc   : > { %9132 = vrot.lane.b32.xlu1 %v9131_v33, %s11074_s12  ;;  %v678_v33 = vld [vmem:[#allocation2 + $0x7a] sm:$0xff]  ;;  %3388 = vmatprep.subr.bf16.mxu0 %v16593_v30 }
  0xfd   : > { %9137 = vrot.lane.b32.xlu0 %v9136_v43, %s11076_s19  ;;  %v680_v43 = vld [vmem:[#allocation2 + $0x92] sm:$0xff]  ;;  %v12059_v40 = vpack.i.bf16 %v679_v34, %v678_v33  ;;  %v686_v42 = vld [vmem:[#allocation2 + $0xda] sm:$0xff]  ;;  %v12071_v33 = vpack.i.bf16 %v683_v38, %v682_v0  ;;  %v687_v34 = vld [vmem:[#allocation2 + $0xe2] sm:$0xff] }
  0xfe   : > { %v12063_v45 = vpack.i.bf16 %v681_v36, %v680_v43  ;;  %v12075_v43 = vpack.i.bf16 %v685_v41, %v684_v52  ;;  %v688_v36 = vld [vmem:[#allocation2 + $0xf2] sm:$0xff]  ;;  %v12083_v0 = vpack.i.bf16 %v687_v34, %v686_v42  ;;  %v692_v41 = vld [vmem:[#allocation2 + $0x122] sm:$0xff]  ;;  %v694_v42 = vld [vmem:[#allocation2 + $0x13a] sm:$0xff] }
  0xff   : > { %3389 = vmatpush1.bf16.msra.mxu0 %v10899_v55  ;;  %v689_v55 = vld [vmem:[#allocation2 + $0xfa] sm:$0xff]  ;;  %v691_v38 = vld [vmem:[#allocation2 + $0x112] sm:$0xff]  ;;  %v695_v34 = vld [vmem:[#allocation2 + $0x142] sm:$0xff] }
 0x100   : > { %9142 = vrot.lane.b32.xlu1 %v12036_v51, %s11076_s19  ;;  %3390 = vmatprep.subr.bf16.mxu0 %v16593_v30  ;;  %v12087_v52 = vpack.i.bf16 %v689_v55, %v688_v36  ;;  %v12100_v36 = vpack.i.bf16 %v691_v38, %v690_v27  ;;  %v696_v55 = vld [vmem:[#allocation2 + $0x152] sm:$0xff]  ;;  %v12117_v27 = vpack.i.bf16 %v695_v34, %v694_v42  ;;  %v10911_v38 = vld [vmem:[%s16376_s1 + $0x80] sm:$0xff]  }
 0x101   : > { %9147 = vrot.lane.b32.xlu0 %v12039_v60, %s11076_s19  ;;  %8756 = vmatprep.subr.bf16.mxu1 %v10911_v38  ;;  %v12133_v34 = vld [vmem:[#allocation2 + $0x38] sm:$0xff] }
 0x102   : > { %8757 = vmatpush3.bf16.msra.mxu1 %v10911_v38  ;;  %v1053_v38 = vld [vmem:[#allocation2 + $0x32] sm:$0xff] }
 0x103   : > { %3391 = vmatpush1.bf16.msra.mxu0 %v10900_v46  ;;  %v693_v46 = vld [vmem:[#allocation2 + $0x12a] sm:$0xff] }
 0x104   : > { %9152 = vrot.lane.b32.xlu1 %v12047_v54, %s11076_s19  ;;  %3392 = vmatprep.subr.bf16.mxu0 %v16593_v30 }
 0x105   : > { %9157 = vrot.lane.b32.xlu0 %v12051_v59, %s11076_s19 }
 0x107   : > { %3393 = vmatpush1.bf16.msra.mxu0 %v10901_v28  ;;  %v12107_v28 = vpack.i.bf16 %v693_v46, %v692_v41  ;;  %v9206_v41 = vpack.i.bf16 %v697_v4, %v696_v55  ;;  %v12124_v46 = vld [vmem:[#allocation2 + $0x30] sm:$0xff]  ;;  %v12136_v4 = vld [vmem:[#allocation2 + $0x48] sm:$0xff] }
 0x108   : > { %9162 = vrot.lane.b32.xlu1 %v12059_v40, %s11076_s19  ;;  %3394 = vmatprep.subr.bf16.mxu0 %v16593_v30  ;;  %v10913_v55 = vld [vmem:[%s16376_s1 + $0x88] sm:$0xff]  }
 0x109   : > { %9167 = vrot.lane.b32.xlu0 %v12063_v45, %s11076_s19  ;;  %8758 = vmatprep.subr.bf16.mxu1 %v10913_v55 }
 0x10a   : > { %8759 = vmatpush3.bf16.msra.mxu1 %v10913_v55  ;;  %v1057_v55 = vld [vmem:[#allocation2 + $0x62] sm:$0xff] }
 0x10b   : > { %3395 = vmatpush1.bf16.msra.mxu0 %v10902_v7  ;;  %v698_v7 = vld [vmem:[#allocation2 + $0x16a] sm:$0xff]  ;;  %7165 = vmatprep.subr.bf16.mxu1 %v16593_v30 }
 0x10c   : > { %9172 = vrot.lane.b32.xlu1 %v12071_v33, %s11076_s19  ;;  %3396 = vmatprep.subr.bf16.mxu0 %v16593_v30  ;;  %v9211_v42 = vpack.i.bf16 %v12124_v46, %v698_v7  ;;  %v1054_v7 = vld [vmem:[#allocation2 + $0x3a] sm:$0xff] }
 0x10d   : > { %9177 = vrot.lane.b32.xlu0 %v12075_v43, %s11076_s19  ;;  %v3041_v57 = vpack.c.bf16 %v1054_v7, %v1053_v38  ;;  %v1058_v38 = vld [vmem:[#allocation2 + $0x6a] sm:$0xff] }
 0x10e   : > { %v3047_v7 = vpack.c.bf16 %v1058_v38, %v1057_v55 }
 0x10f   : > { %3397 = vmatpush1.bf16.msra.mxu0 %v10903_v62  ;;  %v10905_v62 = vld [vmem:[%s16376_s1 + $0x48] sm:$0xff]   ;;  %8760 = vmatprep.mubr.msk.bf16.mxu1 %vm365_vm0, %v3041_v57  ;;  %v10907_v57 = vld [vmem:[%s16376_s1 + $0x58] sm:$0xff]  }
 0x110   : > { %9182 = vrot.lane.b32.xlu1 %v12083_v0, %s11076_s19  ;;  %3398 = vmatprep.subr.bf16.mxu0 %v16593_v30 }
 0x111   : > { %9187 = vrot.lane.b32.xlu0 %v12087_v52, %s11076_s19 }
 0x113   : > { %3399 = vmatpush1.bf16.msra.mxu0 %v10904_v61  ;;  %v1055_v61 = vld [vmem:[#allocation2 + $0x4a] sm:$0xff] }
 0x114   : > { %9192 = vrot.lane.b32.xlu1 %v12100_v36, %s11076_s19  ;;  %3400 = vmatprep.subr.bf16.mxu0 %v16593_v30  ;;  %v3044_v53 = vpack.c.bf16 %v1056_v56, %v1055_v61  ;;  %v9231_v56 = vpack.i.bf16 %v12146_v26, %v12144_v5  ;;  %v1060_v61 = vld [vmem:[#allocation2 + $0x82] sm:$0xff] }
 0x115   : > { %9197 = vrot.lane.b32.xlu0 %v12107_v28, %s11076_s19 }
 0x116   : > { %8761 = vmatmul.mubr.msk.bf16.vlgmr.msra.gmra.mrb[0].mxu1 %vm365_vm0, %v3044_v53  ;;  %v12184_v53 = vld [vmem:[#allocation2 + $0x78] sm:$0xff] }
 0x117   : > { %3401 = vmatpush1.bf16.msra.mxu0 %v10905_v62  ;;  %v9251_v62 = vpack.i.bf16 %v12133_v34, %v12124_v46  ;;  %8764 = vmatprep.mubr.msk.bf16.mxu1 %vm365_vm0, %v3047_v7 }
 0x118   : > { %9202 = vrot.lane.b32.xlu1 %v12117_v27, %s11076_s19  ;;  %3402 = vmatprep.subr.bf16.mxu0 %v16593_v30 }
 0x119   : > { %9207 = vrot.lane.b32.xlu0 %v9206_v41, %s11076_s19  ;;  %v9221_v41 = vpack.i.bf16 %v12136_v4, %v12133_v34 }
 0x11b   : > { %3403 = vmatpush1.bf16.msra.mxu0 %v10906_v50  ;;  %v12182_v50 = vld [vmem:[#allocation2 + $0x68] sm:$0xff] }
 0x11c   : > { %9212 = vrot.lane.b32.xlu1 %v9211_v42, %s11076_s19  ;;  %v12158_v42 = vld [vmem:[#allocation2 + $0x50] sm:$0xff]  ;;  %3404 = vmatprep.subr.bf16.mxu0 %v16593_v30 }
 0x11d   : > { %9217 = vrot.lane.b32.xlu0 %v12036_v51, %s11074_s12  ;;  %v9241_v51 = vpack.i.bf16 %v12160_v49, %v12158_v42 }
 0x11f   : > { %3405 = vmatpush1.bf16.msra.mxu0 %v10907_v57 }
 0x120   : > { %9222 = vrot.lane.b32.xlu1 %v9221_v41, %s11076_s19  ;;  %3406 = vmatprep.subr.bf16.mxu0 %v16593_v30  ;;  %v1059_v41 = vld [vmem:[#allocation2 + $0x7a] sm:$0xff] }
 0x121   : > { %9227 = vrot.lane.b32.xlu0 %v11783_v29, %s11077_s18  ;;  %v10908_v29 = vld [vmem:[%s16376_s1 + $0x60] sm:$0xff]   ;;  %v3050_v57 = vpack.c.bf16 %v1060_v61, %v1059_v41  ;;  %v9291_v41 = vpack.i.bf16 %v12182_v50, %v12160_v49  ;;  %v553_v61 = vld [vmem:[#allocation2 + $0x98] sm:$0xff] }
 0x123   : > { %3407 = vmatpush1.bf16.msra.mxu0 %v10908_v29  ;;  %8765 = vmatmul.mubr.msk.bf16.gmra.mrb[4].mxu1 %vm365_vm0, %v3050_v57  ;;  %v9271_v29 = vpack.i.bf16 %v12158_v42, %v12136_v4 }
 0x124   : > { %9232 = vrot.lane.b32.xlu1 %v9231_v56, %s11077_s18  ;;  %3408 = vmatprep.subr.bf16.mxu0 %v16593_v30  ;;  %v9261_v56 = vpack.i.bf16 %v12184_v53, %v12182_v50 }
 0x125   : > { %9237 = vrot.lane.b32.xlu0 %v12039_v60, %s11074_s12  ;;  %v10909_v60 = vld [vmem:[%s16376_s1 + $0x68] sm:$0xff]  }
 0x126   : > { %v12214_v55 = vpop.permute.xlu1 %8987 }
 0x127   : > { %3409 = vmatpush1.bf16.msra.mxu0 %v10909_v60  ;;  %v10912_v60 = vld [vmem:[%s16376_s1 + $0x78] sm:$0xff]  }
 0x128   : > { %9242 = vrot.lane.b32.xlu1 %v9241_v51, %s11076_s19  ;;  %v10910_v51 = vld [vmem:[%s16376_s1 + $0x70] sm:$0xff]   ;;  %3410 = vmatprep.subr.bf16.mxu0 %v16593_v30 }
 0x129   : > { %9247 = vrot.lane.b32.xlu0 %v11797_v37, %s11077_s18  ;;  %v12201_v37 = vpop.permute.xlu0 %8977 }
 0x12b   : > { %3411 = vmatpush1.bf16.msra.mxu0 %v10910_v51  ;;  %v1061_v51 = vld [vmem:[#allocation2 + $0x92] sm:$0xff] }
 0x12c   : > { %9252 = vrot.lane.b32.xlu1 %v9251_v62, %s11077_s18  ;;  %v933_v62 = vld [vmem:[#allocation2 + $0x90] sm:$0xff]  ;;  %3412 = vmatprep.subr.bf16.mxu0 %v16593_v30  ;;  %v890_v30 = vld [vmem:[#allocation2 + $0x182] sm:$0xff] }
 0x12d   : > { %9257 = vrot.lane.b32.xlu0 %v12047_v54, %s11074_s12  ;;  %v932_v54 = vld [vmem:[#allocation2 + $0x80] sm:$0xff]  ;;  %v12219_v38 = vpop.permute.xlu0 %8982 }
 0x12e   : > { %v9281_v7 = vpack.i.bf16 %v933_v62, %v932_v54 }
 0x12f   : > { %3413 = vmatpush1.bf16.msra.mxu0 %v10912_v60 }
 0x130   : > { %9262 = vrot.lane.b32.xlu1 %v9261_v56, %s11076_s19  ;;  %v554_v56 = vld [vmem:[#allocation2 + $0xa8] sm:$0xff] }
 0x131   : > { %9267 = vrot.lane.b32.xlu0 %v11800_v39, %s11077_s18  ;;  %v12225_v39 = vpop.permute.xlu1 %8992  ;;  %v12227_v4 = vpop.permute.xlu0 %8997  ;;  %v9301_v60 = vpack.i.bf16 %v554_v56, %v553_v61 }
 0x134   : > { %9272 = vrot.lane.b32.xlu1 %v9271_v29, %s11077_s18  ;;  %v1062_v29 = vld [vmem:[#allocation2 + $0x9a] sm:$0xff] }
 0x135   : > { %9277 = vrot.lane.b32.xlu0 %v12051_v59, %s11074_s12  ;;  %v12234_v57 = vpop.permute.xlu1 %9002  ;;  %v12236_v59 = vpop.permute.xlu0 %9007  ;;  %v3053_v48 = vpack.c.bf16 %v1062_v29, %v1061_v51  ;;  %v9311_v51 = vpack.i.bf16 %v932_v54, %v12184_v53  ;;  %v555_v29 = vld [vmem:[#allocation2 + $0xb0] sm:$0xff]  ;;  %v9331_v53 = vpack.i.bf16 %v553_v61, %v933_v62 }
 0x136   : > { %v9351_v61 = vpack.i.bf16 %v555_v29, %v554_v56  ;;  %v1005_v56 = vld [vmem:[#allocation2 + $0xf1] sm:$0xff] }
 0x137   : > { %8768 = vmatprep.mubr.msk.bf16.mxu1 %vm365_vm0, %v3053_v48 }
 0x138   : > { %9282 = vrot.lane.b32.xlu1 %v9281_v7, %s11076_s19  ;;  %v1064_v7 = vld [vmem:[#allocation2 + $0xb2] sm:$0xff] }
 0x139   : > { %9287 = vrot.lane.b32.xlu0 %v11804_v44, %s11077_s18  ;;  %v3056_v44 = vpack.c.bf16 %v1064_v7, %v1063_v32  ;;  %v12242_v49 = vpop.permute.xlu1 %9012  ;;  %v12244_v31 = vpop.permute.xlu0 %9017  ;;  %v1065_v7 = vld [vmem:[#allocation2 + $0xc2] sm:$0xff] }
 0x13b   : > { %8769 = vmatmul.mubr.msk.bf16.gmra.mrb[8].mxu1 %vm365_vm0, %v3056_v44  ;;  %v1066_v44 = vld [vmem:[#allocation2 + $0xca] sm:$0xff] }
 0x13c   : > { %9292 = vrot.lane.b32.xlu1 %v9291_v41, %s11077_s18  ;;  %v3059_v23 = vpack.c.bf16 %v1066_v44, %v1065_v7  ;;  %v1006_v44 = vld [vmem:[#allocation2 + $0xf9] sm:$0xff] }
 0x13d   : > { %9297 = vrot.lane.b32.xlu0 %v12059_v40, %s11074_s12  ;;  %v12251_v41 = vpop.permute.xlu1 %9022  ;;  %v556_v40 = vld [vmem:[#allocation2 + $0xc0] sm:$0xff]  ;;  %v12253_v25 = vpop.permute.xlu0 %9027 }
 0x13e   : > { %v9321_v32 = vpack.i.bf16 %v556_v40, %v555_v29  ;;  %8772 = vmatprep.mubr.msk.bf16.mxu1 %vm365_vm0, %v3059_v23 }
 0x140   : > { %9302 = vrot.lane.b32.xlu1 %v9301_v60, %s11076_s19 }
 0x141   : > { %9307 = vrot.lane.b32.xlu0 %v11808_v47, %s11077_s18  ;;  %v12258_v48 = vpop.permute.xlu1 %9032  ;;  %v12260_v60 = vpop.permute.xlu0 %9037  ;;  %v557_v47 = vld [vmem:[#allocation2 + $0xc8] sm:$0xff] }
 0x144   : > { %9312 = vrot.lane.b32.xlu1 %v9311_v51, %s11077_s18  ;;  %v558_v51 = vld [vmem:[#allocation2 + $0xd8] sm:$0xff] }
 0x145   : > { %9317 = vrot.lane.b32.xlu0 %v12063_v45, %s11074_s12  ;;  %v1067_v45 = vld [vmem:[#allocation2 + $0xda] sm:$0xff]  ;;  %v9341_v21 = vpack.i.bf16 %v558_v51, %v557_v47 }
 0x146   : > { %v3062_v20 = vpack.c.bf16 %v1068_v22, %v1067_v45  ;;  %v559_v22 = vld [vmem:[#allocation2 + $0xe0] sm:$0xff]  ;;  %v1069_v45 = vld [vmem:[#allocation2 + $0xf2] sm:$0xff] }
 0x148   : > { %9322 = vrot.lane.b32.xlu1 %v9321_v32, %s11076_s19  ;;  %8773 = vmatmul.mubr.msk.bf16.gmra.mrb[12].mxu1 %vm365_vm0, %v3062_v20 }
 0x149   : > { %9327 = vrot.lane.b32.xlu0 %v11838_v58, %s11077_s18 }
 0x14a   : > { %v12265_v54 = vpop.permute.xlu1 %9042 }
 0x14b   : > { %v12267_v24 = vpop.permute.xlu0 %9047 }
 0x14c   : > { %16596 = vst [vmem:[#allocation72_spill] sm:$0xff] %v12267_v24  ;;  %9332 = vrot.lane.b32.xlu1 %v9331_v53, %s11077_s18  ;;  %v560_v53 = vld [vmem:[#allocation2 + $0xf0] sm:$0xff]  ;;  %v577_v24 = vld [vmem:[#allocation2 + $0x1e8] sm:$0xff] }
 0x14d   : > { %9337 = vrot.lane.b32.xlu0 %v12071_v33, %s11074_s12  ;;  %v9361_v23 = vpack.i.bf16 %v560_v53, %v559_v22 }
 0x14e   : > { %v12273_v58 = vpop.permute.xlu1 %9052 }
 0x14f   : > { %16597 = vst [vmem:[#allocation73_spill] sm:$0xff] %v12273_v58  ;;  %v12276_v62 = vpop.permute.xlu0 %9057 }
 0x150   : > { %16598 = vst [vmem:[#allocation74_spill] sm:$0xff] %v12276_v62  ;;  %9342 = vrot.lane.b32.xlu1 %v9341_v21, %s11076_s19  ;;  %v9371_v21 = vpack.i.bf16 %v557_v47, %v556_v40  ;;  %v3068_v40 = vpack.c.bf16 %v1072_v16, %v1071_v17  ;;  %v1007_v16 = vld [vmem:[#allocation2 + $0x109] sm:$0xff]  ;;  %v1008_v17 = vld [vmem:[#allocation2 + $0x111] sm:$0xff] }
 0x151   : > { %9347 = vrot.lane.b32.xlu0 %v11852_v63, %s11077_s18  ;;  %v561_v63 = vld [vmem:[#allocation2 + $0xf8] sm:$0xff] }
 0x152   : > { %v12281_v32 = vpop.permute.xlu1 %9062 }
 0x153   : > { %16599 = vst [vmem:[#allocation75_spill] sm:$0xff] %v12281_v32  ;;  %v12283_v7 = vpop.permute.xlu0 %9067  ;;  %v540_v32 = vld [vmem:[#allocation2] sm:$0xff] }
 0x154   : > { %16600 = vst [vmem:[#allocation76_spill] sm:$0xff] %v12283_v7  ;;  %9352 = vrot.lane.b32.xlu1 %v9351_v61, %s11077_s18  ;;  %v1070_v61 = vld [vmem:[#allocation2 + $0xfa] sm:$0xff] }
 0x155   : > { %9357 = vrot.lane.b32.xlu0 %v12075_v43, %s11074_s12  ;;  %v3065_v43 = vpack.c.bf16 %v1070_v61, %v1069_v45  ;;  %v9391_v45 = vpack.i.bf16 %v559_v22, %v558_v51  ;;  %v563_v61 = vld [vmem:[#allocation2 + $0x110] sm:$0xff]  ;;  %v9411_v22 = vpack.i.bf16 %v561_v63, %v560_v53 }
 0x156   : > { %v12288_v20 = vpop.permute.xlu1 %9072 }
 0x157   : > { %16601 = vst [vmem:[#allocation77_spill] sm:$0xff] %v12288_v20  ;;  %v12290_v33 = vpop.permute.xlu0 %9077  ;;  %8776 = vmatprep.mubr.msk.bf16.mxu1 %vm365_vm0, %v3065_v43  ;;  %v9406_v43 = vpack.i.bf16 %v1008_v17, %v1007_v16  ;;  %v1075_v17 = vld [vmem:[#allocation2 + $0x13a] sm:$0xff] }
 0x158   : > { %16602 = vst [vmem:[#allocation78_spill] sm:$0xff] %v12290_v33  ;;  %9362 = vrot.lane.b32.xlu1 %v9361_v23, %s11076_s19  ;;  %v9381_v23 = vpack.i.bf16 %v562_v19, %v561_v63  ;;  %8777 = vmatmul.mubr.msk.bf16.gmra.mrb[16].mxu1 %vm365_vm0, %v3068_v40  ;;  %v3074_v63 = vpack.c.bf16 %v1076_v10, %v1075_v17  ;;  %v1011_v10 = vld [vmem:[#allocation2 + $0x139] sm:$0xff]  ;;  %v797_v20 = vld [vmem:[#allocation2 + $0x21] sm:$0xff] }
 0x159   : > { %9367 = vrot.lane.b32.xlu0 %v11899_v35, %s11077_s18  ;;  %v9386_v35 = vpack.i.bf16 %v1006_v44, %v1005_v56  ;;  %v567_v17 = vld [vmem:[#allocation2 + $0x140] sm:$0xff] }
 0x15a   : > { %v12295_v29 = vpop.permute.xlu1 %9082  ;;  %v796_v33 = vld [vmem:[#allocation2 + $0x19] sm:$0xff] }
 0x15b   : > { %16603 = vst [vmem:[#allocation79_spill] sm:$0xff] %v12295_v29  ;;  %v12297_v18 = vpop.permute.xlu0 %9087 }
 0x15c   : > { %16604 = vst [vmem:[#allocation80_spill] sm:$0xff] %v12297_v18  ;;  %9372 = vrot.lane.b32.xlu1 %v9371_v21, %s11077_s18  ;;  %v891_v18 = vld [vmem:[#allocation2 + $0x18a] sm:$0xff] }
 0x15d   : > { %9377 = vrot.lane.b32.xlu0 %v12083_v0, %s11074_s12  ;;  %v564_v0 = vld [vmem:[#allocation2 + $0x120] sm:$0xff] }
 0x15e   : > { %v12303_v47 = vpop.permute.xlu1 %9092  ;;  %v9401_v44 = vpack.i.bf16 %v564_v0, %v563_v61 }
 0x15f   : > { %16605 = vst [vmem:[#allocation81_spill] sm:$0xff] %v12303_v47  ;;  %v12306_v15 = vpop.permute.xlu0 %9097 }
 0x160   : > { %16606 = vst [vmem:[#allocation82_spill] sm:$0xff] %v12306_v15  ;;  %9382 = vrot.lane.b32.xlu1 %v9381_v23, %s11076_s19  ;;  %v565_v23 = vld [vmem:[#allocation2 + $0x128] sm:$0xff] }
 0x161   : > { %9387 = vrot.lane.b32.xlu0 %v9386_v35, %s11077_s18  ;;  %v1009_v35 = vld [vmem:[#allocation2 + $0x121] sm:$0xff]  ;;  %v9421_v53 = vpack.i.bf16 %v12325_v11, %v565_v23 }
 0x162   : > { %v12310_v21 = vpop.permute.xlu1 %9102 }
 0x163   : > { %16607 = vst [vmem:[#allocation83_spill] sm:$0xff] %v12310_v21  ;;  %v12312_v56 = vpop.permute.xlu0 %9107 }
 0x164   : > { %16608 = vst [vmem:[#allocation84_spill] sm:$0xff] %v12312_v56  ;;  %9392 = vrot.lane.b32.xlu1 %v9391_v45, %s11077_s18  ;;  %v1073_v45 = vld [vmem:[#allocation2 + $0x122] sm:$0xff]  ;;  %v1082_v56 = vld [vmem:[#allocation2 + $0x18a] sm:$0xff] }
 0x165   : > { %9397 = vrot.lane.b32.xlu0 %v12087_v52, %s11074_s12  ;;  %v3071_v16 = vpack.c.bf16 %v1074_v12, %v1073_v45  ;;  %v9431_v12 = vpack.i.bf16 %v563_v61, %v562_v19  ;;  %v1012_v45 = vld [vmem:[#allocation2 + $0x141] sm:$0xff] }
 0x166   : > { %v12317_v40 = vpop.permute.xlu1 %9112 }
 0x167   : > { %16609 = vst [vmem:[#allocation85_spill] sm:$0xff] %v12317_v40  ;;  %v12319_v51 = vpop.permute.xlu0 %9117  ;;  %8780 = vmatprep.mubr.msk.bf16.mxu1 %vm365_vm0, %v3071_v16  ;;  %v9446_v16 = vpack.i.bf16 %v1012_v45, %v1011_v10  ;;  %v3077_v10 = vpack.c.bf16 %v1078_v1, %v1077_v2  ;;  %v1079_v45 = vld [vmem:[#allocation2 + $0x16a] sm:$0xff]  ;;  %v9471_v2 = vpack.i.bf16 %v567_v17, %v12325_v11  ;;  %v1081_v40 = vld [vmem:[#allocation2 + $0x182] sm:$0xff] }
 0x168   : > { %16610 = vst [vmem:[#allocation86_spill] sm:$0xff] %v12319_v51  ;;  %9402 = vrot.lane.b32.xlu1 %v9401_v44, %s11076_s19  ;;  %v9426_v44 = vpack.i.bf16 %v1010_v13, %v1009_v35  ;;  %8781 = vmatmul.mubr.msk.bf16.gmra.mrb[20].mxu1 %vm365_vm0, %v3074_v63  ;;  %v569_v63 = vld [vmem:[#allocation2 + $0x158] sm:$0xff]  ;;  %v3083_v15 = vpack.c.bf16 %v1082_v56, %v1081_v40 }
 0x169   : > { %9407 = vrot.lane.b32.xlu0 %v9406_v43, %s11077_s18  ;;  %8784 = vmatprep.mubr.msk.bf16.mxu1 %vm365_vm0, %v3077_v10  ;;  %v12380_v10 = vld [vmem:[#allocation2 + $0x170] sm:$0xff]  ;;  %v955_v51 = vld [vmem:[#allocation2 + $0x198] sm:$0xff] }
 0x16a   : > { %v12323_v14 = vpop.permute.xlu1 %9122 }
 0x16b   : > { %16611 = vst [vmem:[#allocation87_spill] sm:$0xff] %v12323_v14  ;;  %v12327_v52 = vpop.permute.xlu0 %9127  ;;  %v12398_v14 = vld [vmem:[#allocation2 + $0x188] sm:$0xff] }
 0x16c   : > { %16612 = vst [vmem:[#allocation88_spill] sm:$0xff] %v12327_v52  ;;  %9412 = vrot.lane.b32.xlu1 %v9411_v22, %s11077_s18  ;;  %v887_v52 = vld [vmem:[#allocation2 + $0x15a] sm:$0xff] }
 0x16d   : > { %9417 = vrot.lane.b32.xlu0 %v12100_v36, %s11074_s12  ;;  %v12343_v36 = vld [vmem:[#allocation2 + $0x150] sm:$0xff] }
 0x16e   : > { %v12334_v43 = vpop.permute.xlu1 %9132  ;;  %v9441_v35 = vpack.i.bf16 %v12343_v36, %v567_v17 }
 0x16f   : > { %16613 = vst [vmem:[#allocation89_spill] sm:$0xff] %v12334_v43  ;;  %v12337_v9 = vpop.permute.xlu0 %9137  ;;  %v886_v43 = vld [vmem:[#allocation2 + $0x152] sm:$0xff] }
 0x170   : > { %9422 = vrot.lane.b32.xlu1 %v9421_v53, %s11076_s19  ;;  %v9451_v53 = vpack.i.bf16 %v565_v23, %v564_v0  ;;  %v9461_v0 = vpack.i.bf16 %v12359_v6, %v569_v63  ;;  %v3080_v23 = vpack.c.bf16 %v1080_v3, %v1079_v45  ;;  %v9476_v3 = vpack.i.bf16 %v887_v52, %v886_v43  ;;  %v888_v52 = vld [vmem:[#allocation2 + $0x16a] sm:$0xff]  ;;  %v12390_v43 = vld [vmem:[#allocation2 + $0x172] sm:$0xff] }
 0x171   : > { %9427 = vrot.lane.b32.xlu0 %v9426_v44, %s11077_s18  ;;  %v1013_v44 = vld [vmem:[#allocation2 + $0x151] sm:$0xff]  ;;  %v9140_v62 = vunpack.i.h.bf16 %v12337_v9 }
 0x172   : > { %v12341_v22 = vpop.permute.xlu1 %9142  ;;  %8785 = vmatmul.mubr.msk.bf16.gmra.mrb[24].mxu1 %vm365_vm0, %v3080_v23 }
 0x173   : > { %v12345_v13 = vpop.permute.xlu0 %9147  ;;  %8788 = vmatprep.mubr.msk.bf16.mxu1 %vm365_vm0, %v3083_v15 }
 0x174   : > { %9432 = vrot.lane.b32.xlu1 %v9431_v12, %s11077_s18  ;;  %v1014_v12 = vld [vmem:[#allocation2 + $0x159] sm:$0xff] }
 0x175   : > { %9437 = vrot.lane.b32.xlu0 %v12107_v28, %s11074_s12 }
 0x176   : > { %v12351_v19 = vpop.permute.xlu1 %9152 }
 0x177   : > { %v12353_v61 = vpop.permute.xlu0 %9157 }
 0x178   : > { %9442 = vrot.lane.b32.xlu1 %v9441_v35, %s11076_s19  ;;  %v9466_v35 = vpack.i.bf16 %v1014_v12, %v1013_v44  ;;  %v1015_v44 = vld [vmem:[#allocation2 + $0x169] sm:$0xff]  ;;  %v1016_v12 = vld [vmem:[#allocation2 + $0x171] sm:$0xff] }
 0x179   : > { %9447 = vrot.lane.b32.xlu0 %v9446_v16, %s11077_s18  ;;  %v9486_v11 = vpack.i.bf16 %v1016_v12, %v1015_v44  ;;  %v1018_v12 = vld [vmem:[#allocation2 + $0x189] sm:$0xff] }
 0x17a   : > { %v12357_v8 = vpop.permute.xlu1 %9162 }
 0x17b   : > { %v12361_v28 = vpop.permute.xlu0 %9167 }
 0x17c   : > { %9452 = vrot.lane.b32.xlu1 %v9451_v53, %s11077_s18  ;;  %v12376_v53 = vld [vmem:[#allocation2 + $0x180] sm:$0xff] }
 0x17d   : > { %9457 = vrot.lane.b32.xlu0 %v12117_v27, %s11074_s12 }
 0x17e   : > { %v12368_v16 = vpop.permute.xlu1 %9172 }
 0x17f   : > { %v12371_v1 = vpop.permute.xlu0 %9177 }
 0x180   : > { %9462 = vrot.lane.b32.xlu1 %v9461_v0, %s11076_s19  ;;  %v9481_v0 = vpack.i.bf16 %v12376_v53, %v12380_v10 }
 0x181   : > { %9467 = vrot.lane.b32.xlu0 %v9466_v35, %s11077_s18  ;;  %v9491_v35 = vpack.i.bf16 %v569_v63, %v12343_v36  ;;  %v9501_v36 = vpack.i.bf16 %v955_v51, %v12398_v14  ;;  %v1083_v63 = vld [vmem:[#allocation2 + $0x19a] sm:$0xff]  ;;  %v9511_v51 = vpack.i.bf16 %v12380_v10, %v12359_v6  ;;  %v8979_v6 = vunpack.i.l.bf16 %v12201_v37 }
 0x182   : > { %v12378_v27 = vpop.permute.xlu1 %9182 }
 0x183   : > { %v12382_v45 = vpop.permute.xlu0 %9187 }
 0x184   : > { %9472 = vrot.lane.b32.xlu1 %v9471_v2, %s11077_s18  ;;  %v9496_v2 = vpack.i.bf16 %v12390_v43, %v888_v52 }
 0x185   : > { %9477 = vrot.lane.b32.xlu0 %v9476_v3, %s11074_s12  ;;  %v1017_v3 = vld [vmem:[#allocation2 + $0x181] sm:$0xff] }
 0x186   : > { %v12388_v17 = vpop.permute.xlu1 %9192 }
 0x187   : > { %v12392_v23 = vpop.permute.xlu0 %9197 }
 0x188   : > { %9482 = vrot.lane.b32.xlu1 %v9481_v0, %s11076_s19  ;;  %v1084_v0 = vld [vmem:[#allocation2 + $0x1a2] sm:$0xff] }
 0x189   : > { %9487 = vrot.lane.b32.xlu0 %v9486_v11, %s11077_s18  ;;  %v9506_v11 = vpack.i.bf16 %v1018_v12, %v1017_v3  ;;  %v3086_v52 = vpack.c.bf16 %v1084_v0, %v1083_v63  ;;  %v8980_v3 = vunpack.i.h.bf16 %v12201_v37  ;;  %v1019_v63 = vld [vmem:[#allocation2 + $0x199] sm:$0xff]  ;;  %v1020_v0 = vld [vmem:[#allocation2 + $0x1a1] sm:$0xff] }
 0x18a   : > { %v12400_v44 = vpop.permute.xlu1 %9202  ;;  %v9526_v37 = vpack.i.bf16 %v1020_v0, %v1019_v63  ;;  %v798_v0 = vld [vmem:[#allocation2 + $0x31] sm:$0xff] }
 0x18b   : > { %v12402_v21 = vpop.permute.xlu0 %9207  ;;  %8789 = vmatmul.mubr.msk.bf16.gmra.mrb[28].mxu1 %vm365_vm0, %v3086_v52  ;;  %v541_v52 = vld [vmem:[#allocation2 + $0x8] sm:$0xff] }
 0x18c   : > { %16614 = vst [vmem:[#allocation90_spill] sm:$0xff] %v12402_v21  ;;  %9492 = vrot.lane.b32.xlu1 %v9491_v35, %s11077_s18  ;;  %v956_v35 = vld [vmem:[#allocation2 + $0x1a0] sm:$0xff] }
 0x18d   : > { %9497 = vrot.lane.b32.xlu0 %v9496_v2, %s11074_s12  ;;  %v9516_v2 = vpack.i.bf16 %v891_v18, %v890_v30  ;;  %v892_v18 = vld [vmem:[#allocation2 + $0x1ca] sm:$0xff]  ;;  %v893_v30 = vld [vmem:[#allocation2 + $0x1d2] sm:$0xff] }
 0x18e   : > { %v12408_v47 = vpop.permute.xlu1 %9212 }
 0x18f   : > { %16615 = vst [vmem:[#allocation91_spill] sm:$0xff] %v12408_v47  ;;  %v9218_v29 = vpop.permute.xlu0 %9217  ;;  %v9215_v15 = vunpack.i.h.bf16 %v12408_v47  ;;  %v9139_v47 = vunpack.i.l.bf16 %v12337_v9 }
 0x190   : > { %v9220_v56 = vunpack.i.h.bf16 %v9218_v29  ;;  %v9219_v40 = vunpack.i.l.bf16 %v9218_v29  ;;  %9502 = vrot.lane.b32.xlu1 %v9501_v36, %s11076_s19 }
 0x191   : > { %9507 = vrot.lane.b32.xlu0 %v9506_v11, %s11077_s18  ;;  %v9521_v11 = vpack.i.bf16 %v12390_v43, %v956_v35  ;;  %v9531_v43 = vpack.i.bf16 %v12398_v14, %v12376_v53 }
 0x192   : > { %v12417_v12 = vpop.permute.xlu1 %9222  ;;  %v2847_v29 = vsel %vm365_vm0, %v796_v33, %v9219_v40  ;;  %v2848_v36 = vsel %vm365_vm0, %v797_v20, %v9220_v56  ;;  %v2654_v40 = vsel %vm365_vm0, %v541_v52, %v8980_v3 }
 0x193   : > { %v9224_v10 = vunpack.i.l.bf16 %v12417_v12  ;;  %v9228_v7 = vpop.permute.xlu0 %9227  ;;  %v2911_v20 = vsel %vm2717_vm2, %v2847_v29, %v9215_v15  ;;  %v799_v15 = vld [vmem:[#allocation2 + $0x39] sm:$0xff] }
 0x194   : > { %v9230_v58 = vunpack.i.h.bf16 %v9228_v7  ;;  %v9229_v33 = vunpack.i.l.bf16 %v9228_v7  ;;  %9512 = vrot.lane.b32.xlu1 %v9511_v51, %s11077_s18  ;;  %v12435_v7 = vpack.i.bf16 %v893_v30, %v892_v18  ;;  %v2653_v51 = vsel %vm365_vm0, %v540_v32, %v8979_v6 }
 0x195   : > { %9517 = vrot.lane.b32.xlu0 %v9516_v2, %s11074_s12  ;;  %v2912_v56 = vsel %vm2717_vm2, %v2848_v36, %v9224_v10  ;;  %v576_v10 = vld [vmem:[#allocation2 + $0x1e0] sm:$0xff]  ;;  %v2718_v3 = vsel %vm2717_vm2, %v2653_v51, %v9139_v47  ;;  %v700_v47 = vld [vmem:[#allocation2 + $0x1b2] sm:$0xff] }
 0x196   : > { %v9233_v35 = vpop.permute.xlu1 %9232  ;;  %v2975_v21 = vsel %vm2782_vm3, %v2911_v20, %v9229_v33  ;;  %v2976_v9 = vsel %vm2782_vm3, %v2912_v56, %v9230_v58  ;;  %v2719_v58 = vsel %vm2717_vm2, %v2654_v40, %v9140_v62  ;;  %v9541_v6 = vpack.i.bf16 %v577_v24, %v576_v10  ;;  %v701_v20 = vld [vmem:[#allocation2 + $0x1ba] sm:$0xff]  ;;  %v1085_v51 = vld [vmem:[#allocation2 + $0x1e2] sm:$0xff] }
 0x197   : > { %v9235_v2 = vunpack.i.h.bf16 %v9233_v35  ;;  %v9234_v63 = vunpack.i.l.bf16 %v9233_v35  ;;  %v9238_v29 = vpop.permute.xlu0 %9237  ;;  %v3040_v36 = vpack.c.bf16 %v2976_v9, %v2975_v21  ;;  %v8984_v21 = vunpack.i.l.bf16 %v12219_v38  ;;  %v12449_v62 = vld [vmem:[#allocation2 + $0x1e1] sm:$0xff]  ;;  %v12455_v9 = vld [vmem:[#allocation2 + $0x1e9] sm:$0xff] }
 0x198   : > { %v9240_v14 = vunpack.i.h.bf16 %v9238_v29  ;;  %v9239_v53 = vunpack.i.l.bf16 %v9238_v29  ;;  %9522 = vrot.lane.b32.xlu1 %v9521_v11, %s11076_s19  ;;  %v9145_v56 = vunpack.i.h.bf16 %v12341_v22  ;;  %v9225_v40 = vunpack.i.h.bf16 %v12417_v12 }
 0x199   : > { %9527 = vrot.lane.b32.xlu0 %v9526_v37, %s11077_s18  ;;  %3414 = vmatprep.mubr.bf16.mxu0 %v3040_v36  ;;  %v2783_v32 = vsel %vm2782_vm3, %v2718_v3, %v9234_v63  ;;  %v2784_v52 = vsel %vm2782_vm3, %v2719_v58, %v9235_v2  ;;  %v8985_v37 = vunpack.i.h.bf16 %v12219_v38  ;;  %v1086_v2 = vld [vmem:[#allocation2 + $0x1ea] sm:$0xff]  ;;  %v9144_v63 = vunpack.i.l.bf16 %v12341_v22  ;;  %v1087_v38 = vld [vmem:[#allocation2 + $0x1fa] sm:$0xff]  ;;  %v1088_v36 = vld [vmem:[#allocation2 + $0x202] sm:$0xff] }
 0x19a   : > { %v2850_v18 = vsel %vm365_vm0, %v799_v15, %v9240_v14  ;;  %v2849_v30 = vsel %vm365_vm0, %v798_v0, %v9239_v53  ;;  %v12447_v33 = vpop.permute.xlu1 %9242  ;;  %v3039_v11 = vpack.c.bf16 %v2784_v52, %v2783_v32  ;;  %v3089_v29 = vpack.c.bf16 %v1086_v2, %v1085_v51 }
 0x19b   : > { %v9244_v24 = vunpack.i.l.bf16 %v12447_v33  ;;  %v9248_v35 = vpop.permute.xlu0 %9247  ;;  %v9546_v12 = vpack.i.bf16 %v701_v20, %v700_v47  ;;  %v2913_v10 = vsel %vm2717_vm2, %v2849_v30, %v9225_v40  ;;  %v3092_v53 = vpack.c.bf16 %v1088_v36, %v1087_v38  ;;  %v574_v30 = vld [vmem:[#allocation2 + $0x1c8] sm:$0xff]  ;;  %v801_v20 = vld [vmem:[#allocation2 + $0x51] sm:$0xff]  ;;  %v12485_v36 = vld [vmem:[#allocation2 + $0x1f9] sm:$0xff] }
 0x19c   : > { %v9250_v0 = vunpack.i.h.bf16 %v9248_v35  ;;  %v9249_v15 = vunpack.i.l.bf16 %v9248_v35  ;;  %9532 = vrot.lane.b32.xlu1 %v9531_v43, %s11077_s18  ;;  %3415 = vmatmul.mubr.bf16.vlgmr.msra.gmra.mrb[0].mxu0 %v3039_v11  ;;  %v2655_v22 = vsel %vm365_vm0, %v12144_v5, %v8984_v21  ;;  %v9551_v32 = vpack.i.bf16 %v12455_v9, %v12449_v62  ;;  %v800_v47 = vld [vmem:[#allocation2 + $0x49] sm:$0xff] }
 0x19d   : > { %9537 = vrot.lane.b32.xlu0 %v12435_v7, %s11074_s12  ;;  %v2914_v14 = vsel %vm2717_vm2, %v2850_v18, %v9244_v24  ;;  %8792 = vmatprep.mubr.msk.bf16.mxu1 %vm365_vm0, %v3089_v29  ;;  %v2656_v52 = vsel %vm365_vm0, %v12146_v26, %v8985_v37  ;;  %v575_v21 = vld [vmem:[#allocation2 + $0x1d0] sm:$0xff]  ;;  %v2720_v62 = vsel %vm2717_vm2, %v2655_v22, %v9144_v63  ;;  %v894_v26 = vld [vmem:[#allocation2 + $0x1e2] sm:$0xff]  ;;  %v8990_v51 = vunpack.i.h.bf16 %v12214_v55 }
 0x19e   : > { %v9253_v3 = vpop.permute.xlu1 %9252  ;;  %v2977_v58 = vsel %vm2782_vm3, %v2913_v10, %v9249_v15  ;;  %v2978_v43 = vsel %vm2782_vm3, %v2914_v14, %v9250_v0  ;;  %8793 = vmatmul.mubr.msk.bf16.gmra.mrb[32].mxu1 %vm365_vm0, %v3092_v53  ;;  %v2721_v9 = vsel %vm2717_vm2, %v2656_v52, %v9145_v56  ;;  %v895_v37 = vld [vmem:[#allocation2 + $0x1ea] sm:$0xff]  ;;  %v9556_v2 = vpack.i.bf16 %v575_v21, %v574_v30  ;;  %v12487_v10 = vld [vmem:[#allocation2 + $0x201] sm:$0xff] }
 0x19f   : > { %v9255_v11 = vunpack.i.h.bf16 %v9253_v3  ;;  %v9254_v18 = vunpack.i.l.bf16 %v9253_v3  ;;  %v9258_v40 = vpop.permute.xlu0 %9257  ;;  %v3043_v5 = vpack.c.bf16 %v2978_v43, %v2977_v58  ;;  %v9245_v14 = vunpack.i.h.bf16 %v12447_v33  ;;  %v578_v58 = vld [vmem:[#allocation2 + $0x1f8] sm:$0xff]  ;;  %v579_v43 = vld [vmem:[#allocation2 + $0x200] sm:$0xff] }
 0x1a0   : > { %v9260_v24 = vunpack.i.h.bf16 %v9258_v40  ;;  %v9259_v35 = vunpack.i.l.bf16 %v9258_v40  ;;  %9542 = vrot.lane.b32.xlu1 %v9541_v6, %s11076_s19  ;;  %v8989_v6 = vunpack.i.l.bf16 %v12214_v55  ;;  %v12494_v3 = vpack.i.bf16 %v895_v37, %v894_v26  ;;  %v12497_v55 = vld [vmem:[%s11234_s15 + $0x1f8] sm:$0xff]  ;;  %v802_v26 = vld [vmem:[#allocation2 + $0x61] sm:$0xff]  ;;  %v803_v37 = vld [vmem:[#allocation2 + $0x69] sm:$0xff] }
 0x1a1   : > { %9547 = vrot.lane.b32.xlu0 %v9546_v12, %s11076_s19  ;;  %3422 = vmatprep.mubr.bf16.mxu0 %v3043_v5  ;;  %v2785_v0 = vsel %vm2782_vm3, %v2720_v62, %v9254_v18  ;;  %v2786_v15 = vsel %vm2782_vm3, %v2721_v9, %v9255_v11  ;;  %v12490_v12 = vld [vmem:[%s11234_s15 + $0x1f0] sm:$0xff]  ;;  %16617 = vst [vmem:[#allocation93_spill] sm:$0xff] %v12497_v55  ;;  %v9150_v52 = vunpack.i.h.bf16 %v12345_v13  ;;  %v9149_v30 = vunpack.i.l.bf16 %v12345_v13  ;;  %s11006_s15 = sshll.u32 %s11081_s22, 4  ;;  %s11007_s15 = int_to_ptr.vmem [resolvable:$false] %s11006_s15 }
 0x1a2   : > { %v2852_v63 = vsel %vm365_vm0, %v801_v20, %v9260_v24  ;;  %v2851_v56 = vsel %vm365_vm0, %v800_v47, %v9259_v35  ;;  %v12483_v29 = vpop.permute.xlu1 %9262  ;;  %v3042_v38 = vpack.c.bf16 %v2786_v15, %v2785_v0  ;;  %16616 = vst [vmem:[#allocation92_spill] sm:$0xff] %v12490_v12  ;;  %538 = vst.msk [vmem:[#allocation2 + $0x331] sm:$0xff] %vm365_vm0, %v12490_v12  ;;  %v8995_v35 = vunpack.i.h.bf16 %v12225_v39  ;;  %s11008_s23 = scalar_lea.vmem %s11007_s15, 16384 }
 0x1a3   : > { %v9264_v53 = vunpack.i.l.bf16 %v12483_v29  ;;  %v9268_v22 = vpop.permute.xlu0 %9267  ;;  %539 = vst.msk [vmem:[#allocation2 + $0x339] sm:$0xff] %vm365_vm0, %v12497_v55  ;;  %v9566_v33 = vpack.i.bf16 %v579_v43, %v578_v58  ;;  %v2915_v47 = vsel %vm2717_vm2, %v2851_v56, %v9245_v14  ;;  %v9576_v40 = vpack.i.bf16 %v12487_v10, %v12485_v36  ;;  %v896_v14 = vld [vmem:[#allocation2 + $0x1fa] sm:$0xff] }
 0x1a4   : > { %v9270_v11 = vunpack.i.h.bf16 %v9268_v22  ;;  %v9269_v18 = vunpack.i.l.bf16 %v9268_v22  ;;  %9552 = vrot.lane.b32.xlu1 %v9551_v32, %s11077_s18  ;;  %3423 = vmatmul.mubr.bf16.gmra.mrb[4].mxu0 %v3042_v38  ;;  %v2657_v13 = vsel %vm365_vm0, %v12124_v46, %v8989_v6  ;;  %v2658_v32 = vsel %vm365_vm0, %v12133_v34, %v8990_v51  ;;  %v766_v51 = vld [vmem:[#allocation2 + $0x1e0] sm:$0xff]  ;;  %v767_v6 = vld [vmem:[#allocation2 + $0x1e8] sm:$0xff] }
 0x1a5   : > { %9557 = vrot.lane.b32.xlu0 %v9556_v2, %s11077_s18  ;;  %v2916_v20 = vsel %vm2717_vm2, %v2852_v63, %v9264_v53  ;;  %v2722_v46 = vsel %vm2717_vm2, %v2657_v13, %v9149_v30  ;;  %v2723_v34 = vsel %vm2717_vm2, %v2658_v32, %v9150_v52  ;;  %v8994_v56 = vunpack.i.l.bf16 %v12225_v39  ;;  %v897_v53 = vld [vmem:[#allocation2 + $0x202] sm:$0xff]  ;;  %v961_v39 = vld [vmem:[#allocation2 + $0x210] sm:$0xff] }
 0x1a6   : > { %v9273_v5 = vpop.permute.xlu1 %9272  ;;  %v2979_v21 = vsel %vm2782_vm3, %v2915_v47, %v9269_v18  ;;  %v2980_v24 = vsel %vm2782_vm3, %v2916_v20, %v9270_v11  ;;  %v9265_v38 = vunpack.i.h.bf16 %v12483_v29  ;;  %v9154_v22 = vunpack.i.l.bf16 %v12351_v19  ;;  %v962_v11 = vld [vmem:[#allocation2 + $0x218] sm:$0xff] }
 0x1a7   : > { %v9275_v62 = vunpack.i.h.bf16 %v9273_v5  ;;  %v9274_v9 = vunpack.i.l.bf16 %v9273_v5  ;;  %v9278_v2 = vpop.permute.xlu0 %9277  ;;  %v3046_v0 = vpack.c.bf16 %v2980_v24, %v2979_v21  ;;  %v9155_v47 = vunpack.i.h.bf16 %v12351_v19  ;;  %v10936_v5 = vld [vmem:[#allocation2 + $0x48] sm:$0xff] }
 0x1a8   : > { %v9280_v15 = vunpack.i.h.bf16 %v9278_v2  ;;  %v9279_v63 = vunpack.i.l.bf16 %v9278_v2  ;;  %9562 = vrot.lane.b32.xlu1 %v12494_v3, %s11074_s12  ;;  %v12533_v32 = vpack.i.bf16 %v897_v53, %v896_v14  ;;  %v2659_v21 = vsel %vm365_vm0, %v10936_v5, %v8994_v56  ;;  %v1089_v56 = vld [vmem:[#allocation2 + $0x212] sm:$0xff]  ;;  %v1091_v53 = vld [vmem:[#allocation2 + $0x22a] sm:$0xff] }
 0x1a9   : > { %9567 = vrot.lane.b32.xlu0 %v9566_v33, %s11076_s19  ;;  %3430 = vmatprep.mubr.bf16.mxu0 %v3046_v0  ;;  %v2787_v36 = vsel %vm2782_vm3, %v2722_v46, %v9274_v9  ;;  %v2788_v10 = vsel %vm2782_vm3, %v2723_v34, %v9275_v62  ;;  %v9581_v33 = vpack.i.bf16 %v767_v6, %v766_v51  ;;  %v1025_v6 = vld [vmem:[#allocation2 + $0x211] sm:$0xff] }
 0x1aa   : > { %v2854_v58 = vsel %vm365_vm0, %v803_v37, %v9280_v15  ;;  %v2853_v43 = vsel %vm365_vm0, %v802_v26, %v9279_v63  ;;  %v9283_v52 = vpop.permute.xlu1 %9282  ;;  %v3045_v30 = vpack.c.bf16 %v2788_v10, %v2787_v36  ;;  %v12539_v9 = vpack.i.bf16 %v962_v11, %v961_v39  ;;  %v804_v37 = vld [vmem:[#allocation2 + $0x79] sm:$0xff] }
 0x1ab   : > { %v9284_v29 = vunpack.i.l.bf16 %v9283_v52  ;;  %v9288_v18 = vpop.permute.xlu0 %9287  ;;  %v2917_v24 = vsel %vm2717_vm2, %v2853_v43, %v9265_v38  ;;  %v2660_v19 = vsel %vm365_vm0, %v12158_v42, %v8995_v35  ;;  %v2724_v15 = vsel %vm2717_vm2, %v2659_v21, %v9154_v22  ;;  %v1090_v38 = vld [vmem:[#allocation2 + $0x21a] sm:$0xff] }
 0x1ac   : > { %v9290_v20 = vunpack.i.h.bf16 %v9288_v18  ;;  %v9289_v13 = vunpack.i.l.bf16 %v9288_v18  ;;  %9572 = vrot.lane.b32.xlu1 %v12435_v7, %s11076_s19  ;;  %3431 = vmatmul.mubr.bf16.gmra.mrb[8].mxu0 %v3045_v30  ;;  %v805_v7 = vld [vmem:[#allocation2 + $0x81] sm:$0xff]  ;;  %v9285_v63 = vunpack.i.h.bf16 %v9283_v52  ;;  %v2725_v42 = vsel %vm2717_vm2, %v2660_v19, %v9155_v47  ;;  %v1026_v35 = vld [vmem:[#allocation2 + $0x219] sm:$0xff] }
 0x1ad   : > { %9577 = vrot.lane.b32.xlu0 %v9576_v40, %s11077_s18  ;;  %v2918_v62 = vsel %vm2717_vm2, %v2854_v58, %v9284_v29  ;;  %v3095_v14 = vpack.c.bf16 %v1090_v38, %v1089_v56  ;;  %v1092_v58 = vld [vmem:[#allocation2 + $0x232] sm:$0xff]  ;;  %v9000_v22 = vunpack.i.h.bf16 %v12227_v4  ;;  %v8999_v39 = vunpack.i.l.bf16 %v12227_v4  ;;  %v899_v19 = vld [vmem:[#allocation2 + $0x21a] sm:$0xff] }
 0x1ae   : > { %v9293_v26 = vpop.permute.xlu1 %9292  ;;  %v2981_v2 = vsel %vm2782_vm3, %v2917_v24, %v9289_v13  ;;  %v2982_v0 = vsel %vm2782_vm3, %v2918_v62, %v9290_v20  ;;  %v3098_v30 = vpack.c.bf16 %v1092_v58, %v1091_v53  ;;  %v768_v47 = vld [vmem:[#allocation2 + $0x1f8] sm:$0xff]  ;;  %v769_v20 = vld [vmem:[#allocation2 + $0x200] sm:$0xff]  ;;  %v9601_v21 = vpack.i.bf16 %v1026_v35, %v1025_v6  ;;  %v963_v6 = vld [vmem:[#allocation2 + $0x228] sm:$0xff] }
 0x1af   : > { %v9295_v40 = vunpack.i.h.bf16 %v9293_v26  ;;  %v9294_v46 = vunpack.i.l.bf16 %v9293_v26  ;;  %v9298_v34 = vpop.permute.xlu0 %9297  ;;  %v3049_v51 = vpack.c.bf16 %v2982_v0, %v2981_v2  ;;  %8796 = vmatprep.mubr.msk.bf16.mxu1 %vm365_vm0, %v3095_v14  ;;  %v898_v62 = vld [vmem:[#allocation2 + $0x212] sm:$0xff]  ;;  %v9160_v4 = vunpack.i.h.bf16 %v12353_v61 }
 0x1b0   : > { %v9300_v36 = vunpack.i.h.bf16 %v9298_v34  ;;  %v9299_v10 = vunpack.i.l.bf16 %v9298_v34  ;;  %9582 = vrot.lane.b32.xlu1 %v9581_v33, %s11077_s18  ;;  %8797 = vmatmul.mubr.msk.bf16.gmra.mrb[36].mxu1 %vm365_vm0, %v3098_v30  ;;  %v9159_v26 = vunpack.i.l.bf16 %v12353_v61  ;;  %v2662_v2 = vsel %vm365_vm0, %v12182_v50, %v9000_v22  ;;  %v964_v56 = vld [vmem:[#allocation2 + $0x230] sm:$0xff] }
 0x1b1   : > { %9587 = vrot.lane.b32.xlu0 %v12533_v32, %s11074_s12  ;;  %3438 = vmatprep.mubr.bf16.mxu0 %v3049_v51  ;;  %v2789_v43 = vsel %vm2782_vm3, %v2724_v15, %v9294_v46  ;;  %v2790_v52 = vsel %vm2782_vm3, %v2725_v42, %v9295_v40  ;;  %v9606_v0 = vpack.i.bf16 %v769_v20, %v768_v47  ;;  %v1027_v20 = vld [vmem:[#allocation2 + $0x229] sm:$0xff] }
 0x1b2   : > { %v2856_v11 = vsel %vm365_vm0, %v805_v7, %v9300_v36  ;;  %v2855_v29 = vsel %vm365_vm0, %v804_v37, %v9299_v10  ;;  %v9303_v18 = vpop.permute.xlu1 %9302  ;;  %v3048_v33 = vpack.c.bf16 %v2790_v52, %v2789_v43  ;;  %v12571_v51 = vpack.i.bf16 %v899_v19, %v898_v62  ;;  %v806_v10 = vld [vmem:[#allocation2 + $0x91] sm:$0xff] }
 0x1b3   : > { %v9304_v13 = vunpack.i.l.bf16 %v9303_v18  ;;  %v9308_v5 = vpop.permute.xlu0 %9307  ;;  %v2919_v24 = vsel %vm2717_vm2, %v2855_v29, %v9285_v63  ;;  %v10937_v63 = vld [vmem:[#allocation2 + $0x60] sm:$0xff]  ;;  %v9305_v38 = vunpack.i.h.bf16 %v9303_v18  ;;  %v2727_v22 = vsel %vm2717_vm2, %v2662_v2, %v9160_v4 }
 0x1b4   : > { %v9310_v37 = vunpack.i.h.bf16 %v9308_v5  ;;  %v9309_v7 = vunpack.i.l.bf16 %v9308_v5  ;;  %9592 = vrot.lane.b32.xlu1 %v12539_v9, %s11076_s19  ;;  %3439 = vmatmul.mubr.bf16.gmra.mrb[12].mxu0 %v3048_v33  ;;  %v2661_v40 = vsel %vm365_vm0, %v10937_v63, %v8999_v39  ;;  %v9005_v43 = vunpack.i.h.bf16 %v12234_v57 }
 0x1b5   : > { %9597 = vrot.lane.b32.xlu0 %v12494_v3, %s11076_s19  ;;  %v2920_v15 = vsel %vm2717_vm2, %v2856_v11, %v9304_v13  ;;  %v807_v3 = vld [vmem:[#allocation2 + $0x99] sm:$0xff]  ;;  %v2726_v58 = vsel %vm2717_vm2, %v2661_v40, %v9159_v26  ;;  %v12578_v52 = vpack.i.bf16 %v964_v56, %v963_v6  ;;  %v9004_v11 = vunpack.i.l.bf16 %v12234_v57  ;;  %v1028_v13 = vld [vmem:[#allocation2 + $0x231] sm:$0xff] }
 0x1b6   : > { %v9313_v46 = vpop.permute.xlu1 %9312  ;;  %v2983_v61 = vsel %vm2782_vm3, %v2919_v24, %v9309_v7  ;;  %v2984_v34 = vsel %vm2782_vm3, %v2920_v15, %v9310_v37  ;;  %v9165_v62 = vunpack.i.h.bf16 %v12357_v8  ;;  %v9164_v19 = vunpack.i.l.bf16 %v12357_v8  ;;  %v10938_v7 = vld [vmem:[#allocation2 + $0x80] sm:$0xff] }
 0x1b7   : > { %v9315_v50 = vunpack.i.h.bf16 %v9313_v46  ;;  %v9314_v36 = vunpack.i.l.bf16 %v9313_v46  ;;  %v9318_v42 = vpop.permute.xlu0 %9317  ;;  %v3052_v35 = vpack.c.bf16 %v2984_v34, %v2983_v61  ;;  %v9626_v57 = vpack.i.bf16 %v1028_v13, %v1027_v20  ;;  %v900_v46 = vld [vmem:[#allocation2 + $0x22a] sm:$0xff]  ;;  %v901_v61 = vld [vmem:[#allocation2 + $0x232] sm:$0xff] }
 0x1b8   : > { %v9320_v14 = vunpack.i.h.bf16 %v9318_v42  ;;  %v9319_v53 = vunpack.i.l.bf16 %v9318_v42  ;;  %9602 = vrot.lane.b32.xlu1 %v9601_v21, %s11077_s18  ;;  %v2664_v2 = vsel %vm365_vm0, %v10938_v7, %v9005_v43  ;;  %v12603_v43 = vpack.i.bf16 %v901_v61, %v900_v46  ;;  %v1095_v7 = vld [vmem:[#allocation2 + $0x25a] sm:$0xff] }
 0x1b9   : > { %9607 = vrot.lane.b32.xlu0 %v9606_v0, %s11077_s18  ;;  %3446 = vmatprep.mubr.bf16.mxu0 %v3052_v35  ;;  %v2791_v30 = vsel %vm2782_vm3, %v2726_v58, %v9314_v36  ;;  %v2792_v39 = vsel %vm2782_vm3, %v2727_v22, %v9315_v50  ;;  %v10939_v0 = vld [vmem:[#allocation2 + $0x78] sm:$0xff]  ;;  %v966_v58 = vld [vmem:[#allocation2 + $0x248] sm:$0xff]  ;;  %v9010_v22 = vunpack.i.h.bf16 %v12236_v59  ;;  %v9170_v20 = vunpack.i.h.bf16 %v12361_v28 }
 0x1ba   : > { %v2858_v29 = vsel %vm365_vm0, %v807_v3, %v9320_v14  ;;  %v2857_v18 = vsel %vm365_vm0, %v806_v10, %v9319_v53  ;;  %v9323_v33 = vpop.permute.xlu1 %9322  ;;  %v3051_v47 = vpack.c.bf16 %v2792_v39, %v2791_v30  ;;  %v2663_v15 = vsel %vm365_vm0, %v10939_v0, %v9004_v11  ;;  %v809_v50 = vld [vmem:[#allocation2 + $0xb1] sm:$0xff]  ;;  %v965_v53 = vld [vmem:[#allocation2 + $0x240] sm:$0xff] }
 0x1bb   : > { %v9324_v5 = vunpack.i.l.bf16 %v9323_v33  ;;  %v9328_v21 = vpop.permute.xlu0 %9327  ;;  %v2921_v24 = vsel %vm2717_vm2, %v2857_v18, %v9305_v38  ;;  %v9325_v34 = vunpack.i.h.bf16 %v9323_v33  ;;  %v808_v38 = vld [vmem:[#allocation2 + $0xa9] sm:$0xff]  ;;  %v2728_v35 = vsel %vm2717_vm2, %v2663_v15, %v9164_v19  ;;  %v10940_v0 = vld [vmem:[#allocation2 + $0x98] sm:$0xff] }
 0x1bc   : > { %v9330_v4 = vunpack.i.h.bf16 %v9328_v21  ;;  %v9329_v26 = vunpack.i.l.bf16 %v9328_v21  ;;  %9612 = vrot.lane.b32.xlu1 %v12571_v51, %s11074_s12  ;;  %3447 = vmatmul.mubr.bf16.gmra.mrb[16].mxu0 %v3051_v47  ;;  %v2729_v14 = vsel %vm2717_vm2, %v2664_v2, %v9165_v62  ;;  %v9009_v11 = vunpack.i.l.bf16 %v12236_v59  ;;  %v12612_v47 = vld [vmem:[#allocation2 + $0x241] sm:$0xff]  ;;  %v1030_v62 = vld [vmem:[#allocation2 + $0x249] sm:$0xff] }
 0x1bd   : > { %9617 = vrot.lane.b32.xlu0 %v12578_v52, %s11076_s19  ;;  %v2922_v37 = vsel %vm2717_vm2, %v2858_v29, %v9324_v5  ;;  %v12616_v21 = vpack.i.bf16 %v966_v58, %v965_v53  ;;  %v1093_v59 = vld [vmem:[#allocation2 + $0x242] sm:$0xff]  ;;  %v1094_v19 = vld [vmem:[#allocation2 + $0x24a] sm:$0xff]  ;;  %v2666_v15 = vsel %vm365_vm0, %v10940_v0, %v9010_v22 }
 0x1be   : > { %v9333_v63 = vpop.permute.xlu1 %9332  ;;  %v2985_v8 = vsel %vm2782_vm3, %v2921_v24, %v9329_v26  ;;  %v2986_v40 = vsel %vm2782_vm3, %v2922_v37, %v9330_v4  ;;  %v9169_v4 = vunpack.i.l.bf16 %v12361_v28  ;;  %v3101_v37 = vpack.c.bf16 %v1094_v19, %v1093_v59  ;;  %v1096_v2 = vld [vmem:[#allocation2 + $0x262] sm:$0xff]  ;;  %v903_v22 = vld [vmem:[#allocation2 + $0x24a] sm:$0xff] }
 0x1bf   : > { %v9335_v6 = vunpack.i.h.bf16 %v9333_v63  ;;  %v9334_v56 = vunpack.i.l.bf16 %v9333_v63  ;;  %v9338_v36 = vpop.permute.xlu0 %9337  ;;  %v3055_v10 = vpack.c.bf16 %v2986_v40, %v2985_v8  ;;  %v3104_v8 = vpack.c.bf16 %v1096_v2, %v1095_v7  ;;  %v10941_v40 = vld [vmem:[#allocation2 + $0x90] sm:$0xff]  ;;  %v902_v58 = vld [vmem:[#allocation2 + $0x242] sm:$0xff] }
 0x1c0   : > { %v9340_v3 = vunpack.i.h.bf16 %v9338_v36  ;;  %v9339_v42 = vunpack.i.l.bf16 %v9338_v36  ;;  %9622 = vrot.lane.b32.xlu1 %v12533_v32, %s11076_s19  ;;  %v2665_v28 = vsel %vm365_vm0, %v10941_v40, %v9009_v11  ;;  %8800 = vmatprep.mubr.msk.bf16.mxu1 %vm365_vm0, %v3101_v37  ;;  %v811_v36 = vld [vmem:[#allocation2 + $0xc9] sm:$0xff]  ;;  %v2731_v53 = vsel %vm2717_vm2, %v2666_v15, %v9170_v20  ;;  %v967_v20 = vld [vmem:[#allocation2 + $0x258] sm:$0xff] }
 0x1c1   : > { %9627 = vrot.lane.b32.xlu0 %v9626_v57, %s11077_s18  ;;  %3454 = vmatprep.mubr.bf16.mxu0 %v3055_v10  ;;  %v2793_v30 = vsel %vm2782_vm3, %v2728_v35, %v9334_v56  ;;  %v2794_v39 = vsel %vm2782_vm3, %v2729_v14, %v9335_v6  ;;  %v2730_v14 = vsel %vm2717_vm2, %v2665_v28, %v9169_v4  ;;  %v9175_v59 = vunpack.i.h.bf16 %v12368_v16  ;;  %v10942_v7 = vld [vmem:[#allocation2 + $0xb0] sm:$0xff]  ;;  %v10943_v0 = vld [vmem:[#allocation2 + $0xa8] sm:$0xff]  ;;  %v1031_v40 = vld [vmem:[#allocation2 + $0x259] sm:$0xff] }
 0x1c2   : > { %v2860_v32 = vsel %vm365_vm0, %v809_v50, %v9340_v3  ;;  %v2859_v29 = vsel %vm365_vm0, %v808_v38, %v9339_v42  ;;  %v12610_v18 = vpop.permute.xlu1 %9342  ;;  %v3054_v33 = vpack.c.bf16 %v2794_v39, %v2793_v30  ;;  %v810_v50 = vld [vmem:[#allocation2 + $0xc1] sm:$0xff]  ;;  %8801 = vmatmul.mubr.msk.bf16.gmra.mrb[40].mxu1 %vm365_vm0, %v3104_v8  ;;  %v9015_v30 = vunpack.i.h.bf16 %v12242_v49 }
 0x1c3   : > { %v9344_v13 = vunpack.i.l.bf16 %v12610_v18  ;;  %v9348_v5 = vpop.permute.xlu0 %9347  ;;  %v2923_v24 = vsel %vm2717_vm2, %v2859_v29, %v9325_v34  ;;  %v9651_v34 = vpack.i.bf16 %v1030_v62, %v12612_v47  ;;  %v9345_v6 = vunpack.i.h.bf16 %v12610_v18  ;;  %v1032_v28 = vld [vmem:[#allocation2 + $0x261] sm:$0xff] }
 0x1c4   : > { %v9350_v26 = vunpack.i.h.bf16 %v9348_v5  ;;  %v9349_v57 = vunpack.i.l.bf16 %v9348_v5  ;;  %9632 = vrot.lane.b32.xlu1 %v12539_v9, %s11077_s18  ;;  %3455 = vmatmul.mubr.bf16.gmra.mrb[20].mxu0 %v3054_v33  ;;  %v12645_v62 = vpack.i.bf16 %v903_v22, %v902_v58  ;;  %v9174_v19 = vunpack.i.l.bf16 %v12368_v16 }
 0x1c5   : > { %9637 = vrot.lane.b32.xlu0 %v12603_v43, %s11074_s12  ;;  %v2924_v63 = vsel %vm2717_vm2, %v2860_v32, %v9344_v13  ;;  %v9014_v32 = vunpack.i.l.bf16 %v12242_v49  ;;  %v968_v13 = vld [vmem:[#allocation2 + $0x260] sm:$0xff]  ;;  %v2668_v2 = vsel %vm365_vm0, %v10942_v7, %v9015_v30 }
 0x1c6   : > { %v9353_v46 = vpop.permute.xlu1 %9352  ;;  %v2987_v61 = vsel %vm2782_vm3, %v2923_v24, %v9349_v57  ;;  %v2988_v9 = vsel %vm2782_vm3, %v2924_v63, %v9350_v26  ;;  %v9020_v26 = vunpack.i.h.bf16 %v12244_v31  ;;  %v12654_v57 = vpack.i.bf16 %v968_v13, %v967_v20  ;;  %v815_v7 = vld [vmem:[#allocation2 + $0xf9] sm:$0xff] }
 0x1c7   : > { %v9355_v56 = vunpack.i.h.bf16 %v9353_v46  ;;  %v9354_v38 = vunpack.i.l.bf16 %v9353_v46  ;;  %v9358_v10 = vpop.permute.xlu0 %9357  ;;  %v3058_v3 = vpack.c.bf16 %v2988_v9, %v2987_v61  ;;  %v2667_v16 = vsel %vm365_vm0, %v10943_v0, %v9014_v32  ;;  %v812_v9 = vld [vmem:[#allocation2 + $0xd9] sm:$0xff]  ;;  %v905_v32 = vld [vmem:[#allocation2 + $0x262] sm:$0xff] }
 0x1c8   : > { %v9360_v42 = vunpack.i.h.bf16 %v9358_v10  ;;  %v9359_v35 = vunpack.i.l.bf16 %v9358_v10  ;;  %9642 = vrot.lane.b32.xlu1 %v12616_v21, %s11076_s19  ;;  %v2733_v10 = vsel %vm2717_vm2, %v2668_v2, %v9175_v59  ;;  %v9180_v20 = vunpack.i.h.bf16 %v12371_v1  ;;  %v10945_v59 = vld [vmem:[#allocation2 + $0xc0] sm:$0xff] }
 0x1c9   : > { %9647 = vrot.lane.b32.xlu0 %v12571_v51, %s11076_s19  ;;  %3462 = vmatprep.mubr.bf16.mxu0 %v3058_v3  ;;  %v2795_v39 = vsel %vm2782_vm3, %v2730_v14, %v9354_v38  ;;  %v2796_v11 = vsel %vm2782_vm3, %v2731_v53, %v9355_v56  ;;  %v9019_v3 = vunpack.i.l.bf16 %v12244_v31  ;;  %v9179_v53 = vunpack.i.l.bf16 %v12371_v1  ;;  %v814_v1 = vld [vmem:[#allocation2 + $0xf1] sm:$0xff] }
 0x1ca   : > { %v2862_v29 = vsel %vm365_vm0, %v811_v36, %v9360_v42  ;;  %v2861_v18 = vsel %vm365_vm0, %v810_v50, %v9359_v35  ;;  %v9363_v33 = vpop.permute.xlu1 %9362  ;;  %v3057_v47 = vpack.c.bf16 %v2796_v11, %v2795_v39  ;;  %v2732_v36 = vsel %vm2717_vm2, %v2667_v16, %v9174_v19  ;;  %v904_v11 = vld [vmem:[#allocation2 + $0x25a] sm:$0xff] }
 0x1cb   : > { %v9364_v5 = vunpack.i.l.bf16 %v9363_v33  ;;  %v9368_v24 = vpop.permute.xlu0 %9367  ;;  %v2925_v51 = vsel %vm2717_vm2, %v2861_v18, %v9345_v6  ;;  %v9365_v46 = vunpack.i.h.bf16 %v9363_v33  ;;  %v9676_v42 = vpack.i.bf16 %v1032_v28, %v1031_v40  ;;  %v969_v33 = vld [vmem:[#allocation2 + $0x270] sm:$0xff] }
 0x1cc   : > { %v9370_v4 = vunpack.i.h.bf16 %v9368_v24  ;;  %v9369_v49 = vunpack.i.l.bf16 %v9368_v24  ;;  %9652 = vrot.lane.b32.xlu1 %v9651_v34, %s11077_s18  ;;  %3463 = vmatmul.mubr.bf16.gmra.mrb[24].mxu0 %v3057_v47  ;;  %v813_v34 = vld [vmem:[#allocation2 + $0xe1] sm:$0xff]  ;;  %v970_v47 = vld [vmem:[#allocation2 + $0x278] sm:$0xff]  ;;  %v2669_v19 = vsel %vm365_vm0, %v10945_v59, %v9019_v3 }
 0x1cd   : > { %9657 = vrot.lane.b32.xlu0 %v12578_v52, %s11077_s18  ;;  %v2926_v37 = vsel %vm2717_vm2, %v2862_v29, %v9364_v5  ;;  %v10944_v24 = vld [vmem:[#allocation2 + $0xc8] sm:$0xff]  ;;  %v12685_v0 = vpack.i.bf16 %v970_v47, %v969_v33  ;;  %v1033_v28 = vld [vmem:[#allocation2 + $0x271] sm:$0xff]  ;;  %v10946_v47 = vld [vmem:[#allocation2 + $0xe0] sm:$0xff] }
 0x1ce   : > { %v9373_v15 = vpop.permute.xlu1 %9372  ;;  %v2989_v63 = vsel %vm2782_vm3, %v2925_v51, %v9369_v49  ;;  %v2990_v8 = vsel %vm2782_vm3, %v2926_v37, %v9370_v4  ;;  %v2670_v51 = vsel %vm365_vm0, %v10944_v24, %v9020_v26  ;;  %v12680_v4 = vpack.i.bf16 %v905_v32, %v904_v11  ;;  %v906_v32 = vld [vmem:[#allocation2 + $0x272] sm:$0xff] }
 0x1cf   : > { %v9375_v61 = vunpack.i.h.bf16 %v9373_v15  ;;  %v9374_v52 = vunpack.i.l.bf16 %v9373_v15  ;;  %v9378_v6 = vpop.permute.xlu0 %9377  ;;  %v3061_v56 = vpack.c.bf16 %v2990_v8, %v2989_v63  ;;  %v2734_v26 = vsel %vm2717_vm2, %v2669_v19, %v9179_v53 }
 0x1d0   : > { %v9380_v38 = vunpack.i.h.bf16 %v9378_v6  ;;  %v9379_v50 = vunpack.i.l.bf16 %v9378_v6  ;;  %9662 = vrot.lane.b32.xlu1 %v12645_v62, %s11074_s12  ;;  %v1034_v6 = vld [vmem:[#allocation2 + $0x279] sm:$0xff] }
 0x1d1   : > { %9667 = vrot.lane.b32.xlu0 %v12654_v57, %s11076_s19  ;;  %3470 = vmatprep.mubr.bf16.mxu0 %v3061_v56  ;;  %v2797_v35 = vsel %vm2782_vm3, %v2732_v36, %v9374_v52  ;;  %v2798_v14 = vsel %vm2782_vm3, %v2733_v10, %v9375_v61  ;;  %v1098_v61 = vld [vmem:[#allocation2 + $0x27a] sm:$0xff]  ;;  %v9025_v36 = vunpack.i.h.bf16 %v12251_v41 }
 0x1d2   : > { %v2864_v58 = vsel %vm365_vm0, %v813_v34, %v9380_v38  ;;  %v2863_v22 = vsel %vm365_vm0, %v812_v9, %v9379_v50  ;;  %v9383_v30 = vpop.permute.xlu1 %9382  ;;  %v3060_v39 = vpack.c.bf16 %v2798_v14, %v2797_v35  ;;  %v2735_v34 = vsel %vm2717_vm2, %v2670_v51, %v9180_v20  ;;  %v1099_v38 = vld [vmem:[#allocation2 + $0x28a] sm:$0xff]  ;;  %v1100_v50 = vld [vmem:[#allocation2 + $0x292] sm:$0xff] }
 0x1d3   : > { %v9384_v31 = vunpack.i.l.bf16 %v9383_v30  ;;  %v9388_v29 = vpop.permute.xlu0 %9387  ;;  %v2927_v18 = vsel %vm2717_vm2, %v2863_v22, %v9365_v46  ;;  %v9385_v16 = vunpack.i.h.bf16 %v9383_v30  ;;  %v1097_v46 = vld [vmem:[#allocation2 + $0x272] sm:$0xff]  ;;  %v9024_v35 = vunpack.i.l.bf16 %v12251_v41 }
 0x1d4   : > { %v9390_v13 = vunpack.i.h.bf16 %v9388_v29  ;;  %v9389_v5 = vunpack.i.l.bf16 %v9388_v29  ;;  %9672 = vrot.lane.b32.xlu1 %v12603_v43, %s11076_s19  ;;  %3471 = vmatmul.mubr.bf16.gmra.mrb[28].mxu0 %v3060_v39  ;;  %v3107_v56 = vpack.c.bf16 %v1098_v61, %v1097_v46  ;;  %v9701_v39 = vpack.i.bf16 %v1034_v6, %v1033_v28 }
 0x1d5   : > { %9677 = vrot.lane.b32.xlu0 %v9676_v42, %s11077_s18  ;;  %v2928_v49 = vsel %vm2717_vm2, %v2864_v58, %v9384_v31  ;;  %v3110_v42 = vpack.c.bf16 %v1100_v50, %v1099_v38  ;;  %v907_v31 = vld [vmem:[#allocation2 + $0x27a] sm:$0xff]  ;;  %v9185_v29 = vunpack.i.h.bf16 %v12378_v27  ;;  %v9184_v41 = vunpack.i.l.bf16 %v12378_v27  ;;  %v1035_v50 = vld [vmem:[#allocation2 + $0x289] sm:$0xff] }
 0x1d6   : > { %v9393_v37 = vpop.permute.xlu1 %9392  ;;  %v2991_v2 = vsel %vm2782_vm3, %v2927_v18, %v9389_v5  ;;  %v2992_v43 = vsel %vm2782_vm3, %v2928_v49, %v9390_v13  ;;  %8804 = vmatprep.mubr.msk.bf16.mxu1 %vm365_vm0, %v3107_v56  ;;  %v2672_v20 = vsel %vm365_vm0, %v10946_v47, %v9025_v36  ;;  %v10947_v5 = vld [vmem:[#allocation2 + $0xd8] sm:$0xff]  ;;  %v12713_v19 = vpack.i.bf16 %v907_v31, %v906_v32  ;;  %v971_v49 = vld [vmem:[#allocation2 + $0x288] sm:$0xff] }
 0x1d7   : > { %v9395_v15 = vunpack.i.h.bf16 %v9393_v37  ;;  %v9394_v63 = vunpack.i.l.bf16 %v9393_v37  ;;  %v9398_v8 = vpop.permute.xlu0 %9397  ;;  %v3064_v40 = vpack.c.bf16 %v2992_v43, %v2991_v2  ;;  %8805 = vmatmul.mubr.msk.bf16.gmra.mrb[44].mxu1 %vm365_vm0, %v3110_v42  ;;  %v2671_v24 = vsel %vm365_vm0, %v10947_v5, %v9024_v35  ;;  %v972_v37 = vld [vmem:[#allocation2 + $0x290] sm:$0xff]  ;;  %v818_v47 = vld [vmem:[#allocation2 + $0x121] sm:$0xff] }
 0x1d8   : > { %v9400_v52 = vunpack.i.h.bf16 %v9398_v8  ;;  %v9399_v9 = vunpack.i.l.bf16 %v9398_v8  ;;  %9682 = vrot.lane.b32.xlu1 %v12616_v21, %s11077_s18  ;;  %v816_v43 = vld [vmem:[#allocation2 + $0x109] sm:$0xff]  ;;  %v2736_v8 = vsel %vm2717_vm2, %v2671_v24, %v9184_v41  ;;  %v9030_v28 = vunpack.i.h.bf16 %v12253_v25  ;;  %v1036_v36 = vld [vmem:[#allocation2 + $0x291] sm:$0xff] }
 0x1d9   : > { %9687 = vrot.lane.b32.xlu0 %v12680_v4, %s11074_s12  ;;  %3478 = vmatprep.mubr.bf16.mxu0 %v3064_v40  ;;  %v2799_v10 = vsel %vm2782_vm3, %v2734_v26, %v9394_v63  ;;  %v2800_v3 = vsel %vm2782_vm3, %v2735_v34, %v9395_v15  ;;  %v817_v26 = vld [vmem:[#allocation2 + $0x111] sm:$0xff]  ;;  %v2737_v40 = vsel %vm2717_vm2, %v2672_v20, %v9185_v29  ;;  %v9190_v42 = vunpack.i.h.bf16 %v12382_v45  ;;  %v819_v20 = vld [vmem:[#allocation2 + $0x129] sm:$0xff] }
 0x1da   : > { %v2866_v21 = vsel %vm365_vm0, %v815_v7, %v9400_v52  ;;  %v2865_v14 = vsel %vm365_vm0, %v814_v1, %v9399_v9  ;;  %v9403_v53 = vpop.permute.xlu1 %9402  ;;  %v3063_v58 = vpack.c.bf16 %v2800_v3, %v2799_v10  ;;  %v12721_v46 = vpack.i.bf16 %v972_v37, %v971_v49  ;;  %v908_v31 = vld [vmem:[#allocation2 + $0x28a] sm:$0xff]  ;;  %v909_v29 = vld [vmem:[#allocation2 + $0x292] sm:$0xff]  ;;  %v973_v49 = vld [vmem:[#allocation2 + $0x2a0] sm:$0xff] }
 0x1db   : > { %v9404_v22 = vunpack.i.l.bf16 %v9403_v53  ;;  %v9408_v30 = vpop.permute.xlu0 %9407  ;;  %v2929_v11 = vsel %vm2717_vm2, %v2865_v14, %v9385_v16  ;;  %v9405_v1 = vunpack.i.h.bf16 %v9403_v53  ;;  %v9029_v9 = vunpack.i.l.bf16 %v12253_v25  ;;  %v974_v37 = vld [vmem:[#allocation2 + $0x2a8] sm:$0xff] }
 0x1dc   : > { %v9410_v18 = vunpack.i.h.bf16 %v9408_v30  ;;  %v9409_v33 = vunpack.i.l.bf16 %v9408_v30  ;;  %9692 = vrot.lane.b32.xlu1 %v12685_v0, %s11076_s19  ;;  %3479 = vmatmul.mubr.bf16.gmra.mrb[32].mxu0 %v3063_v58  ;;  %v9189_v35 = vunpack.i.l.bf16 %v12382_v45  ;;  %v9726_v25 = vpack.i.bf16 %v1036_v36, %v1035_v50  ;;  %v10948_v58 = vld [vmem:[#allocation2 + $0xf8] sm:$0xff]  ;;  %v10949_v30 = vld [vmem:[#allocation2 + $0xf0] sm:$0xff] }
 0x1dd   : > { %9697 = vrot.lane.b32.xlu0 %v12645_v62, %s11076_s19  ;;  %v2930_v13 = vsel %vm2717_vm2, %v2866_v21, %v9404_v22  ;;  %v2674_v22 = vsel %vm365_vm0, %v10948_v58, %v9030_v28  ;;  %v1103_v36 = vld [vmem:[#allocation2 + $0x2ba] sm:$0xff] }
 0x1de   : > { %v9413_v51 = vpop.permute.xlu1 %9412  ;;  %v2993_v27 = vsel %vm2782_vm3, %v2929_v11, %v9409_v33  ;;  %v2994_v59 = vsel %vm2782_vm3, %v2930_v13, %v9410_v18 }
 0x1df   : > { %v9415_v7 = vunpack.i.h.bf16 %v9413_v51  ;;  %v9414_v2 = vunpack.i.l.bf16 %v9413_v51  ;;  %v9418_v62 = vpop.permute.xlu0 %9417  ;;  %v3067_v16 = vpack.c.bf16 %v2994_v59, %v2993_v27  ;;  %v2739_v59 = vsel %vm2717_vm2, %v2674_v22, %v9190_v42 }
 0x1e0   : > { %v9420_v15 = vunpack.i.h.bf16 %v9418_v62  ;;  %v9419_v63 = vunpack.i.l.bf16 %v9418_v62  ;;  %9702 = vrot.lane.b32.xlu1 %v9701_v39, %s11077_s18  ;;  %v2673_v39 = vsel %vm365_vm0, %v10949_v30, %v9029_v9  ;;  %v1038_v9 = vld [vmem:[#allocation2 + $0x2a9] sm:$0xff] }
 0x1e1   : > { %9707 = vrot.lane.b32.xlu0 %v12654_v57, %s11077_s18  ;;  %3486 = vmatprep.mubr.bf16.mxu0 %v3067_v16  ;;  %v2801_v61 = vsel %vm2782_vm3, %v2736_v8, %v9414_v2  ;;  %v2802_v52 = vsel %vm2782_vm3, %v2737_v40, %v9415_v7  ;;  %v2738_v27 = vsel %vm2717_vm2, %v2673_v39, %v9189_v35  ;;  %v9195_v8 = vunpack.i.h.bf16 %v12388_v17  ;;  %v820_v39 = vld [vmem:[#allocation2 + $0x139] sm:$0xff] }
 0x1e2   : > { %v2868_v34 = vsel %vm365_vm0, %v817_v26, %v9420_v15  ;;  %v2867_v6 = vsel %vm365_vm0, %v816_v43, %v9419_v63  ;;  %v9423_v56 = vpop.permute.xlu1 %9422  ;;  %v3066_v38 = vpack.c.bf16 %v2802_v52, %v2801_v61  ;;  %v12746_v7 = vpack.i.bf16 %v909_v29, %v908_v31  ;;  %v12755_v63 = vld [vmem:[#allocation2 + $0x2a1] sm:$0xff] }
 0x1e3   : > { %v9424_v10 = vunpack.i.l.bf16 %v9423_v56  ;;  %v9428_v3 = vpop.permute.xlu0 %9427  ;;  %v2931_v57 = vsel %vm2717_vm2, %v2867_v6, %v9405_v1  ;;  %v9425_v41 = vunpack.i.h.bf16 %v9423_v56  ;;  %v9035_v1 = vunpack.i.h.bf16 %v12258_v48 }
 0x1e4   : > { %v9430_v21 = vunpack.i.h.bf16 %v9428_v3  ;;  %v9429_v14 = vunpack.i.l.bf16 %v9428_v3  ;;  %9712 = vrot.lane.b32.xlu1 %v12713_v19, %s11074_s12  ;;  %3487 = vmatmul.mubr.bf16.gmra.mrb[36].mxu0 %v3066_v38  ;;  %v9034_v26 = vunpack.i.l.bf16 %v12258_v48  ;;  %v12759_v61 = vpack.i.bf16 %v974_v37, %v973_v49  ;;  %v1101_v48 = vld [vmem:[#allocation2 + $0x2a2] sm:$0xff]  ;;  %v10950_v3 = vld [vmem:[#allocation2 + $0x110] sm:$0xff]  ;;  %v975_v37 = vld [vmem:[#allocation2 + $0x2b8] sm:$0xff] }
 0x1e5   : > { %9717 = vrot.lane.b32.xlu0 %v12721_v46, %s11076_s19  ;;  %v2932_v53 = vsel %vm2717_vm2, %v2868_v34, %v9424_v10  ;;  %v1102_v34 = vld [vmem:[#allocation2 + $0x2aa] sm:$0xff]  ;;  %v9194_v6 = vunpack.i.l.bf16 %v12388_v17  ;;  %v1104_v10 = vld [vmem:[#allocation2 + $0x2c2] sm:$0xff] }
 0x1e6   : > { %v9433_v11 = vpop.permute.xlu1 %9432  ;;  %v2995_v45 = vsel %vm2782_vm3, %v2931_v57, %v9429_v14  ;;  %v2996_v32 = vsel %vm2782_vm3, %v2932_v53, %v9430_v21  ;;  %v3113_v50 = vpack.c.bf16 %v1102_v34, %v1101_v48  ;;  %v2676_v57 = vsel %vm365_vm0, %v10950_v3, %v9035_v1  ;;  %v10951_v21 = vld [vmem:[#allocation2 + $0x108] sm:$0xff]  ;;  %v976_v1 = vld [vmem:[#allocation2 + $0x2c0] sm:$0xff] }
 0x1e7   : > { %v9435_v18 = vunpack.i.h.bf16 %v9433_v11  ;;  %v9434_v33 = vunpack.i.l.bf16 %v9433_v11  ;;  %v9438_v13 = vpop.permute.xlu0 %9437  ;;  %v3070_v5 = vpack.c.bf16 %v2996_v32, %v2995_v45  ;;  %v3116_v35 = vpack.c.bf16 %v1104_v10, %v1103_v36  ;;  %v821_v11 = vld [vmem:[#allocation2 + $0x141] sm:$0xff] }
 0x1e8   : > { %v9440_v24 = vunpack.i.h.bf16 %v9438_v13  ;;  %v9439_v51 = vunpack.i.l.bf16 %v9438_v13  ;;  %9722 = vrot.lane.b32.xlu1 %v12680_v4, %s11076_s19  ;;  %v2675_v17 = vsel %vm365_vm0, %v10951_v21, %v9034_v26  ;;  %v9751_v53 = vpack.i.bf16 %v1038_v9, %v12755_v63  ;;  %8808 = vmatprep.mubr.msk.bf16.mxu1 %vm365_vm0, %v3113_v50  ;;  %v1040_v50 = vld [vmem:[#allocation2 + $0x2c1] sm:$0xff] }
 0x1e9   : > { %9727 = vrot.lane.b32.xlu0 %v9726_v25, %s11077_s18  ;;  %3494 = vmatprep.mubr.bf16.mxu0 %v3070_v5  ;;  %v2803_v2 = vsel %vm2782_vm3, %v2738_v27, %v9434_v33  ;;  %v2804_v43 = vsel %vm2782_vm3, %v2739_v59, %v9435_v18  ;;  %v2741_v18 = vsel %vm2717_vm2, %v2676_v57, %v9195_v8  ;;  %v910_v33 = vld [vmem:[#allocation2 + $0x2a2] sm:$0xff]  ;;  %v822_v57 = vld [vmem:[#allocation2 + $0x151] sm:$0xff] }
 0x1ea   : > { %v2870_v4 = vsel %vm365_vm0, %v819_v20, %v9440_v24  ;;  %v2869_v62 = vsel %vm365_vm0, %v818_v47, %v9439_v51  ;;  %v12753_v16 = vpop.permute.xlu1 %9442  ;;  %v3069_v15 = vpack.c.bf16 %v2804_v43, %v2803_v2  ;;  %8809 = vmatmul.mubr.msk.bf16.gmra.mrb[48].mxu1 %vm365_vm0, %v3116_v35  ;;  %v911_v47 = vld [vmem:[#allocation2 + $0x2aa] sm:$0xff]  ;;  %v9040_v20 = vunpack.i.h.bf16 %v12260_v60 }
 0x1eb   : > { %v9444_v40 = vunpack.i.l.bf16 %v12753_v16  ;;  %v9448_v28 = vpop.permute.xlu0 %9447  ;;  %v2933_v52 = vsel %vm2717_vm2, %v2869_v62, %v9425_v41  ;;  %v9445_v58 = vunpack.i.h.bf16 %v12753_v16  ;;  %v2740_v41 = vsel %vm2717_vm2, %v2675_v17, %v9194_v6 }
 0x1ec   : > { %v9450_v56 = vunpack.i.h.bf16 %v9448_v28  ;;  %v9449_v38 = vunpack.i.l.bf16 %v9448_v28  ;;  %9732 = vrot.lane.b32.xlu1 %v12685_v0, %s11077_s18  ;;  %3495 = vmatmul.mubr.bf16.gmra.mrb[40].mxu0 %v3069_v15  ;;  %v9039_v24 = vunpack.i.l.bf16 %v12260_v60  ;;  %v12788_v26 = vpack.i.bf16 %v911_v47, %v910_v33 }
 0x1ed   : > { %9737 = vrot.lane.b32.xlu0 %v12746_v7, %s11074_s12  ;;  %v2934_v42 = vsel %vm2717_vm2, %v2870_v4, %v9444_v40  ;;  %v12791_v4 = vpop.f32.mrb[0].mxu1  ;;  %v9200_v62 = vunpack.i.h.bf16 %v12392_v23  ;;  %v9199_v60 = vunpack.i.l.bf16 %v12392_v23  ;;  %v12800_v8 = vpack.i.bf16 %v976_v1, %v975_v37  ;;  %v10953_v23 = vld [vmem:[#allocation2 + $0x120] sm:$0xff]  ;;  %v10955_v1 = vld [vmem:[#allocation2 + $0x138] sm:$0xff] }
 0x1ee   : > { %v9453_v14 = vpop.permute.xlu1 %9452  ;;  %v2997_v25 = vsel %vm2782_vm3, %v2933_v52, %v9449_v38  ;;  %v2998_v0 = vsel %vm2782_vm3, %v2934_v42, %v9450_v56  ;;  %v12796_v63 = vpop.f32.mrb[1].mxu1  ;;  %v10952_v52 = vld [vmem:[#allocation2 + $0x128] sm:$0xff]  ;;  %v2677_v48 = vsel %vm365_vm0, %v10953_v23, %v9039_v24  ;;  %v1039_v38 = vld [vmem:[#allocation2 + $0x2b9] sm:$0xff]  ;;  %v9204_v24 = vunpack.i.l.bf16 %v12400_v44  ;;  %v1041_v23 = vld [vmem:[#allocation2 + $0x2d1] sm:$0xff] }
 0x1ef   : > { %v9455_v22 = vunpack.i.h.bf16 %v9453_v14  ;;  %v9454_v30 = vunpack.i.l.bf16 %v9453_v14  ;;  %v9458_v45 = vpop.permute.xlu0 %9457  ;;  %v3073_v32 = vpack.c.bf16 %v2998_v0, %v2997_v25  ;;  %v12803_v28 = vpop.f32.mrb[2].mxu1  ;;  %v2678_v9 = vsel %vm365_vm0, %v10952_v52, %v9040_v20  ;;  %v823_v42 = vld [vmem:[#allocation2 + $0x159] sm:$0xff]  ;;  %v977_v20 = vld [vmem:[#allocation2 + $0x2d0] sm:$0xff] }
 0x1f0   : > { %v9460_v31 = vunpack.i.h.bf16 %v9458_v45  ;;  %v9459_v29 = vunpack.i.l.bf16 %v9458_v45  ;;  %9742 = vrot.lane.b32.xlu1 %v12759_v61, %s11076_s19  ;;  %v2742_v25 = vsel %vm2717_vm2, %v2677_v48, %v9199_v60  ;;  %v2743_v0 = vsel %vm2717_vm2, %v2678_v9, %v9200_v62  ;;  %v1042_v48 = vld [vmem:[#allocation2 + $0x2d9] sm:$0xff] }
 0x1f1   : > { %9747 = vrot.lane.b32.xlu0 %v12713_v19, %s11076_s19  ;;  %3502 = vmatprep.mubr.bf16.mxu0 %v3073_v32  ;;  %v2805_v13 = vsel %vm2782_vm3, %v2740_v41, %v9454_v30  ;;  %v2806_v5 = vsel %vm2782_vm3, %v2741_v18, %v9455_v22  ;;  %v913_v41 = vld [vmem:[#allocation2 + $0x2c2] sm:$0xff] }
 0x1f2   : > { %v2872_v51 = vsel %vm365_vm0, %v821_v11, %v9460_v31  ;;  %v2871_v27 = vsel %vm365_vm0, %v820_v39, %v9459_v29  ;;  %v9463_v59 = vpop.permute.xlu1 %9462  ;;  %v3072_v49 = vpack.c.bf16 %v2806_v5, %v2805_v13  ;;  %v9044_v39 = vunpack.i.l.bf16 %v12265_v54  ;;  %v912_v29 = vld [vmem:[#allocation2 + $0x2ba] sm:$0xff] }
 0x1f3   : > { %v9464_v2 = vunpack.i.l.bf16 %v9463_v59  ;;  %v9468_v43 = vpop.permute.xlu0 %9467  ;;  %v2935_v19 = vsel %vm2717_vm2, %v2871_v27, %v9445_v58  ;;  %v9465_v36 = vunpack.i.h.bf16 %v9463_v59  ;;  %v9776_v58 = vpack.i.bf16 %v1040_v50, %v1039_v38  ;;  %v978_v13 = vld [vmem:[#allocation2 + $0x2d8] sm:$0xff]  ;;  %v10954_v27 = vld [vmem:[#allocation2 + $0x140] sm:$0xff]  ;;  %v16618_v50 = vld [vmem:[#allocation72_spill] sm:$0xff] }
 0x1f4   : > { %v9470_v16 = vunpack.i.h.bf16 %v9468_v43  ;;  %v9469_v15 = vunpack.i.l.bf16 %v9468_v43  ;;  %9752 = vrot.lane.b32.xlu1 %v9751_v53, %s11077_s18  ;;  %3503 = vmatmul.mubr.bf16.gmra.mrb[44].mxu0 %v3072_v49  ;;  %v9045_v53 = vunpack.i.h.bf16 %v12265_v54  ;;  %v9205_v5 = vunpack.i.h.bf16 %v12400_v44  ;;  %v824_v44 = vld [vmem:[#allocation2 + $0x169] sm:$0xff] }
 0x1f5   : > { %9757 = vrot.lane.b32.xlu0 %v12721_v46, %s11077_s18  ;;  %v2936_v40 = vsel %vm2717_vm2, %v2872_v51, %v9464_v2  ;;  %v12809_v46 = vpop.f32.mrb[3].mxu1  ;;  %v12830_v49 = vpack.i.bf16 %v913_v41, %v912_v29  ;;  %v2679_v2 = vsel %vm365_vm0, %v10955_v1, %v9044_v39 }
 0x1f6   : > { %v9473_v34 = vpop.permute.xlu1 %9472  ;;  %v2999_v6 = vsel %vm2782_vm3, %v2935_v19, %v9469_v15  ;;  %v3000_v56 = vsel %vm2782_vm3, %v2936_v40, %v9470_v16  ;;  %v2680_v59 = vsel %vm365_vm0, %v10954_v27, %v9045_v53  ;;  %v825_v40 = vld [vmem:[#allocation2 + $0x171] sm:$0xff] }
 0x1f7   : > { %v9475_v10 = vunpack.i.h.bf16 %v9473_v34  ;;  %v9474_v3 = vunpack.i.l.bf16 %v9473_v34  ;;  %v9478_v35 = vpop.permute.xlu0 %9477  ;;  %v3076_v21 = vpack.c.bf16 %v3000_v56, %v2999_v6  ;;  %v2744_v56 = vsel %vm2717_vm2, %v2679_v2, %v9204_v24  ;;  %v1107_v53 = vld [vmem:[#allocation2 + $0x2ea] sm:$0xff] }
 0x1f8   : > { %v9480_v17 = vunpack.i.h.bf16 %v9478_v35  ;;  %v9479_v14 = vunpack.i.l.bf16 %v9478_v35  ;;  %9762 = vrot.lane.b32.xlu1 %v12788_v26, %s11074_s12  ;;  %v2745_v38 = vsel %vm2717_vm2, %v2680_v59, %v9205_v5  ;;  %v1105_v35 = vld [vmem:[#allocation2 + $0x2d2] sm:$0xff] }
 0x1f9   : > { %9767 = vrot.lane.b32.xlu0 %v12800_v8, %s11076_s19  ;;  %3510 = vmatprep.mubr.bf16.mxu0 %v3076_v21  ;;  %v2807_v22 = vsel %vm2782_vm3, %v2742_v25, %v9474_v3  ;;  %v2808_v30 = vsel %vm2782_vm3, %v2743_v0, %v9475_v10  ;;  %v9049_v10 = vunpack.i.l.bf16 %v16618_v50  ;;  %v9801_v25 = vpack.i.bf16 %v1042_v48, %v1041_v23  ;;  %v1106_v0 = vld [vmem:[#allocation2 + $0x2da] sm:$0xff] }
 0x1fa   : > { %v2874_v11 = vsel %vm365_vm0, %v823_v42, %v9480_v17  ;;  %v2873_v45 = vsel %vm365_vm0, %v822_v57, %v9479_v14  ;;  %v9483_v32 = vpop.permute.xlu1 %9482  ;;  %v3075_v31 = vpack.c.bf16 %v2808_v30, %v2807_v22  ;;  %v12848_v42 = vpop.f32.mrb[4].mxu1  ;;  %v16619_v22 = vld [vmem:[#allocation90_spill] sm:$0xff]  ;;  %v3119_v41 = vpack.c.bf16 %v1106_v0, %v1105_v35  ;;  %v16621_v0 = vld [vmem:[#allocation91_spill] sm:$0xff] }
 0x1fb   : > { %v9484_v18 = vunpack.i.l.bf16 %v9483_v32  ;;  %v9488_v33 = vpop.permute.xlu0 %9487  ;;  %v2937_v47 = vsel %vm2717_vm2, %v2873_v45, %v9465_v36  ;;  %v9485_v60 = vunpack.i.h.bf16 %v9483_v32  ;;  %v9050_v36 = vunpack.i.h.bf16 %v16618_v50  ;;  %v914_v32 = vld [vmem:[#allocation2 + $0x2d2] sm:$0xff]  ;;  %v12857_v29 = vpop.f32.mrb[5].mxu1 }
 0x1fc   : > { %v9490_v51 = vunpack.i.h.bf16 %v9488_v33  ;;  %v9489_v54 = vunpack.i.l.bf16 %v9488_v33  ;;  %9772 = vrot.lane.b32.xlu1 %v12746_v7, %s11076_s19  ;;  %3511 = vmatmul.mubr.bf16.gmra.mrb[48].mxu0 %v3075_v31  ;;  %v12836_v7 = vpack.i.bf16 %v978_v13, %v977_v20  ;;  %v9210_v30 = vunpack.i.h.bf16 %v16619_v22  ;;  %v915_v31 = vld [vmem:[#allocation2 + $0x2da] sm:$0xff] }
 0x1fd   : > { %9777 = vrot.lane.b32.xlu0 %v9776_v58, %s11077_s18  ;;  %v2938_v37 = vsel %vm2717_vm2, %v2874_v11, %v9484_v18  ;;  %v1108_v58 = vld [vmem:[#allocation2 + $0x2f2] sm:$0xff]  ;;  %v9209_v18 = vunpack.i.l.bf16 %v16619_v22  ;;  %8812 = vmatprep.mubr.msk.bf16.mxu1 %vm365_vm0, %v3119_v41  ;;  %v12872_v2 = vpack.i.bf16 %v915_v31, %v914_v32 }
 0x1fe   : > { %v9493_v43 = vpop.permute.xlu1 %9492  ;;  %v3001_v19 = vsel %vm2782_vm3, %v2937_v47, %v9489_v54  ;;  %v3002_v62 = vsel %vm2782_vm3, %v2938_v37, %v9490_v51  ;;  %v3122_v20 = vpack.c.bf16 %v1108_v58, %v1107_v53  ;;  %v10956_v13 = vld [vmem:[#allocation2 + $0x158] sm:$0xff]  ;;  %v12867_v51 = vpop.f32.mrb[6].mxu1  ;;  %v10957_v54 = vld [vmem:[#allocation2 + $0x150] sm:$0xff]  ;;  %v9214_v53 = vunpack.i.l.bf16 %v16621_v0 }
 0x1ff   : > { %v9495_v16 = vunpack.i.h.bf16 %v9493_v43  ;;  %v9494_v15 = vunpack.i.l.bf16 %v9493_v43  ;;  %v9498_v52 = vpop.permute.xlu0 %9497  ;;  %v3079_v9 = vpack.c.bf16 %v3002_v62, %v3001_v19  ;;  %v2682_v5 = vsel %vm365_vm0, %v10956_v13, %v9050_v36  ;;  %v979_v43 = vld [vmem:[#allocation2 + $0x2e8] sm:$0xff]  ;;  %v16620_v50 = vld [vmem:[#allocation73_spill] sm:$0xff] }
 0x200   : > { %v9500_v34 = vunpack.i.h.bf16 %v9498_v52  ;;  %v9499_v6 = vunpack.i.l.bf16 %v9498_v52  ;;  %9782 = vrot.lane.b32.xlu1 %v12759_v61, %s11077_s18  ;;  %v2681_v27 = vsel %vm365_vm0, %v10957_v54, %v9049_v10  ;;  %8813 = vmatmul.mubr.msk.bf16.gmra.mrb[52].mxu1 %vm365_vm0, %v3122_v20  ;;  %v9055_v36 = vunpack.i.h.bf16 %v16620_v50  ;;  %v10959_v20 = vld [vmem:[#allocation2 + $0x168] sm:$0xff] }
 0x201   : > { %9787 = vrot.lane.b32.xlu0 %v12830_v49, %s11074_s12  ;;  %3518 = vmatprep.mubr.bf16.mxu0 %v3079_v9  ;;  %v2809_v3 = vsel %vm2782_vm3, %v2744_v56, %v9494_v15  ;;  %v2810_v57 = vsel %vm2782_vm3, %v2745_v38, %v9495_v16  ;;  %v826_v16 = vld [vmem:[#allocation2 + $0x181] sm:$0xff]  ;;  %v827_v15 = vld [vmem:[#allocation2 + $0x189] sm:$0xff]  ;;  %v2746_v48 = vsel %vm2717_vm2, %v2681_v27, %v9209_v18 }
 0x202   : > { %v2876_v61 = vsel %vm365_vm0, %v825_v40, %v9500_v34  ;;  %v2875_v21 = vsel %vm365_vm0, %v824_v44, %v9499_v6  ;;  %v12852_v17 = vpop.permute.xlu1 %9502  ;;  %v3078_v14 = vpack.c.bf16 %v2810_v57, %v2809_v3  ;;  %v980_v44 = vld [vmem:[#allocation2 + $0x2f0] sm:$0xff]  ;;  %v2747_v34 = vsel %vm2717_vm2, %v2682_v5, %v9210_v30 }
 0x203   : > { %v9504_v39 = vunpack.i.l.bf16 %v12852_v17  ;;  %v9508_v11 = vpop.permute.xlu0 %9507  ;;  %v2939_v45 = vsel %vm2717_vm2, %v2875_v21, %v9485_v60  ;;  %v9505_v19 = vunpack.i.h.bf16 %v12852_v17  ;;  %v12883_v6 = vpack.i.bf16 %v980_v44, %v979_v43  ;;  %v1044_v21 = vld [vmem:[#allocation2 + $0x2f1] sm:$0xff] }
 0x204   : > { %v9510_v33 = vunpack.i.h.bf16 %v9508_v11  ;;  %v9509_v47 = vunpack.i.l.bf16 %v9508_v11  ;;  %9792 = vrot.lane.b32.xlu1 %v12836_v7, %s11076_s19  ;;  %3519 = vmatmul.mubr.bf16.gmra.mrb[52].mxu0 %v3078_v14  ;;  %v9054_v17 = vunpack.i.l.bf16 %v16620_v50 }
 0x205   : > { %9797 = vrot.lane.b32.xlu0 %v12788_v26, %s11076_s19  ;;  %v2940_v24 = vsel %vm2717_vm2, %v2876_v61, %v9504_v39  ;;  %v12875_v26 = vpop.f32.mrb[7].mxu1  ;;  %v1043_v61 = vld [vmem:[#allocation2 + $0x2e9] sm:$0xff] }
 0x206   : > { %v9513_v59 = vpop.permute.xlu1 %9512  ;;  %v3003_v37 = vsel %vm2782_vm3, %v2939_v45, %v9509_v47  ;;  %v3004_v1 = vsel %vm2782_vm3, %v2940_v24, %v9510_v33  ;;  %v9826_v39 = vpack.i.bf16 %v1044_v21, %v1043_v61  ;;  %v10958_v45 = vld [vmem:[#allocation2 + $0x170] sm:$0xff]  ;;  %v2683_v13 = vsel %vm365_vm0, %v10959_v20, %v9054_v17 }
 0x207   : > { %v9515_v62 = vunpack.i.h.bf16 %v9513_v59  ;;  %v9514_v60 = vunpack.i.l.bf16 %v9513_v59  ;;  %v9518_v40 = vpop.permute.xlu0 %9517  ;;  %v3082_v52 = vpack.c.bf16 %v3004_v1, %v3003_v37  ;;  %v2684_v32 = vsel %vm365_vm0, %v10958_v45, %v9055_v36  ;;  %v916_v33 = vld [vmem:[#allocation2 + $0x2ea] sm:$0xff]  ;;  %v917_v47 = vld [vmem:[#allocation2 + $0x2f2] sm:$0xff] }
 0x208   : > { %v9520_v9 = vunpack.i.h.bf16 %v9518_v40  ;;  %v9519_v23 = vunpack.i.l.bf16 %v9518_v40  ;;  %9802 = vrot.lane.b32.xlu1 %v9801_v25, %s11077_s18  ;;  %v828_v59 = vld [vmem:[#allocation2 + $0x1c9] sm:$0xff]  ;;  %v829_v37 = vld [vmem:[#allocation2 + $0x1d1] sm:$0xff]  ;;  %v2748_v44 = vsel %vm2717_vm2, %v2683_v13, %v9214_v53 }
 0x209   : > { %9807 = vrot.lane.b32.xlu0 %v12800_v8, %s11077_s18  ;;  %3526 = vmatprep.mubr.bf16.mxu0 %v3082_v52  ;;  %v2811_v56 = vsel %vm2782_vm3, %v2746_v48, %v9514_v60  ;;  %v2812_v38 = vsel %vm2782_vm3, %v2747_v34, %v9515_v62  ;;  %v12907_v62 = vpack.i.bf16 %v917_v47, %v916_v33  ;;  %v982_v40 = vld [vmem:[#allocation2 + $0x308] sm:$0xff]  ;;  %v16622_v52 = vld [vmem:[#allocation74_spill] sm:$0xff] }
 0x20a   : > { %v2878_v10 = vsel %vm365_vm0, %v827_v15, %v9520_v9  ;;  %v2877_v3 = vsel %vm365_vm0, %v826_v16, %v9519_v23  ;;  %v9523_v57 = vpop.permute.xlu1 %9522  ;;  %v3081_v35 = vpack.c.bf16 %v2812_v38, %v2811_v56  ;;  %v981_v15 = vld [vmem:[#allocation2 + $0x300] sm:$0xff]  ;;  %v9060_v9 = vunpack.i.h.bf16 %v16622_v52  ;;  %v572_v56 = vld [vmem:[#allocation2 + $0x1b0] sm:$0xff]  ;;  %v573_v38 = vld [vmem:[#allocation2 + $0x1b8] sm:$0xff] }
 0x20b   : > { %v9524_v8 = vunpack.i.l.bf16 %v9523_v57  ;;  %v9528_v14 = vpop.permute.xlu0 %9527  ;;  %v2941_v25 = vsel %vm2717_vm2, %v2877_v3, %v9505_v19  ;;  %v9525_v58 = vunpack.i.h.bf16 %v9523_v57  ;;  %v9059_v23 = vunpack.i.l.bf16 %v16622_v52  ;;  %v1111_v33 = vld [vmem:[#allocation2 + $0x31a] sm:$0xff] }
 0x20c   : > { %v9530_v22 = vunpack.i.h.bf16 %v9528_v14  ;;  %v9529_v30 = vunpack.i.l.bf16 %v9528_v14  ;;  %9812 = vrot.lane.b32.xlu1 %v12872_v2, %s11074_s12  ;;  %3527 = vmatmul.mubr.bf16.gmra.mrb[56].mxu0 %v3081_v35  ;;  %v12921_v17 = vpack.i.bf16 %v982_v40, %v981_v15  ;;  %v1046_v14 = vld [vmem:[#allocation2 + $0x309] sm:$0xff]  ;;  %v2686_v0 = vsel %vm365_vm0, %v573_v38, %v9060_v9  ;;  %v983_v40 = vld [vmem:[#allocation2 + $0x318] sm:$0xff]  ;;  %v984_v52 = vld [vmem:[#allocation2 + $0x320] sm:$0xff] }
 0x20d   : > { %9817 = vrot.lane.b32.xlu0 %v12883_v6, %s11076_s19  ;;  %v2942_v11 = vsel %vm2717_vm2, %v2878_v10, %v9524_v8  ;;  %v2749_v19 = vsel %vm2717_vm2, %v2684_v32, %v9525_v58  ;;  %v1045_v8 = vld [vmem:[#allocation2 + $0x301] sm:$0xff]  ;;  %v2685_v53 = vsel %vm365_vm0, %v572_v56, %v9059_v23 }
 0x20e   : > { %v9533_v31 = vpop.permute.xlu1 %9532  ;;  %v3005_v41 = vsel %vm2782_vm3, %v2941_v25, %v9529_v30  ;;  %v3006_v18 = vsel %vm2782_vm3, %v2942_v11, %v9530_v22  ;;  %v12913_v34 = vpop.f32.mrb[8].mxu1  ;;  %v1110_v11 = vld [vmem:[#allocation2 + $0x30a] sm:$0xff] }
 0x20f   : > { %v9535_v5 = vunpack.i.h.bf16 %v9533_v31  ;;  %v9534_v24 = vunpack.i.l.bf16 %v9533_v31  ;;  %v9538_v54 = vpop.permute.xlu0 %9537  ;;  %v3085_v27 = vpack.c.bf16 %v3006_v18, %v3005_v41  ;;  %v12917_v35 = vpop.f32.mrb[9].mxu1  ;;  %v9851_v41 = vpack.i.bf16 %v1046_v14, %v1045_v8  ;;  %v1048_v8 = vld [vmem:[#allocation2 + $0x321] sm:$0xff] }
 0x210   : > { %v9540_v1 = vunpack.i.h.bf16 %v9538_v54  ;;  %v9539_v43 = vunpack.i.l.bf16 %v9538_v54  ;;  %9822 = vrot.lane.b32.xlu1 %v12830_v49, %s11076_s19  ;;  %v12925_v25 = vpop.f32.mrb[10].mxu1  ;;  %v830_v54 = vld [vmem:[#allocation2 + $0x1e1] sm:$0xff] }
 0x211   : > { %9827 = vrot.lane.b32.xlu0 %v9826_v39, %s11077_s18  ;;  %3534 = vmatprep.mubr.bf16.mxu0 %v3085_v27  ;;  %v2813_v60 = vsel %vm2782_vm3, %v2748_v44, %v9534_v24  ;;  %v2814_v16 = vsel %vm2782_vm3, %v2749_v19, %v9535_v5  ;;  %v1109_v39 = vld [vmem:[#allocation2 + $0x302] sm:$0xff] }
 0x212   : > { %v9543_v49 = vpop.permute.xlu1 %9542  ;;  %v3084_v48 = vpack.c.bf16 %v2814_v16, %v2813_v60  ;;  %v2880_v50 = vsel %vm365_vm0, %v829_v37, %v9540_v1  ;;  %v2879_v36 = vsel %vm365_vm0, %v828_v59, %v9539_v43  ;;  %v3125_v18 = vpack.c.bf16 %v1110_v11, %v1109_v39  ;;  %v1112_v24 = vld [vmem:[#allocation2 + $0x322] sm:$0xff]  ;;  %v919_v1 = vld [vmem:[#allocation2 + $0x30a] sm:$0xff] }
 0x213   : > { %v9545_v10 = vunpack.i.h.bf16 %v9543_v49  ;;  %v9544_v3 = vunpack.i.l.bf16 %v9543_v49  ;;  %v9548_v57 = vpop.permute.xlu0 %9547  ;;  %v918_v37 = vld [vmem:[#allocation2 + $0x302] sm:$0xff]  ;;  %v3128_v43 = vpack.c.bf16 %v1112_v24, %v1111_v33 }
 0x214   : > { %v9550_v61 = vunpack.i.h.bf16 %v9548_v57  ;;  %v9549_v21 = vunpack.i.l.bf16 %v9548_v57  ;;  %9832 = vrot.lane.b32.xlu1 %v12836_v7, %s11077_s18  ;;  %3535 = vmatmul.mubr.bf16.gmra.mrb[60].mxu0 %v3084_v48  ;;  %v12931_v7 = vpop.f32.mrb[11].mxu1  ;;  %v831_v44 = vld [vmem:[#allocation2 + $0x1e9] sm:$0xff]  ;;  %v12946_v38 = vpack.i.bf16 %v919_v1, %v918_v37  ;;  %v832_v1 = vld [vmem:[#allocation2 + $0x1f9] sm:$0xff] }
 0x215   : > { %9837 = vrot.lane.b32.xlu0 %v12907_v62, %s11074_s12  ;;  %v2943_v22 = vsel %vm2717_vm2, %v2879_v36, %v9544_v3  ;;  %v2944_v30 = vsel %vm2717_vm2, %v2880_v50, %v9545_v10  ;;  %8816 = vmatprep.mubr.msk.bf16.mxu1 %vm365_vm0, %v3125_v18  ;;  %v12952_v10 = vpack.i.bf16 %v984_v52, %v983_v40  ;;  %v16623_v3 = vld [vmem:[#allocation75_spill] sm:$0xff] }
 0x216   : > { %v9553_v58 = vpop.permute.xlu1 %9552  ;;  %v2750_v13 = vsel %vm2717_vm2, %v2685_v53, %v9549_v21  ;;  %v2751_v5 = vsel %vm2717_vm2, %v2686_v0, %v9550_v61  ;;  %8817 = vmatmul.mubr.msk.bf16.gmra.mrb[56].mxu1 %vm365_vm0, %v3128_v43  ;;  %v9065_v57 = vunpack.i.h.bf16 %v16623_v3  ;;  %v1047_v21 = vld [vmem:[#allocation2 + $0x319] sm:$0xff]  ;;  %v9064_v14 = vunpack.i.l.bf16 %v16623_v3  ;;  %v833_v43 = vld [vmem:[#allocation2 + $0x201] sm:$0xff] }
 0x217   : > { %v9555_v45 = vunpack.i.h.bf16 %v9553_v58  ;;  %v9554_v32 = vunpack.i.l.bf16 %v9553_v58  ;;  %v9558_v31 = vpop.permute.xlu0 %9557 }
 0x218   : > { %v9560_v47 = vunpack.i.h.bf16 %v9558_v31  ;;  %v9559_v20 = vunpack.i.l.bf16 %v9558_v31  ;;  %9842 = vrot.lane.b32.xlu1 %v12921_v17, %s11076_s19 }
 0x219   : > { %9847 = vrot.lane.b32.xlu0 %v12872_v2, %s11076_s19  ;;  %v3007_v27 = vsel %vm2782_vm3, %v2943_v22, %v9554_v32  ;;  %v3008_v59 = vsel %vm2782_vm3, %v2944_v30, %v9555_v45  ;;  %v10960_v32 = vld [vmem:[#allocation2 + $0x1d0] sm:$0xff] }
 0x21a   : > { %v9563_v19 = vpop.permute.xlu1 %9562  ;;  %v3088_v60 = vpack.c.bf16 %v3008_v59, %v3007_v27  ;;  %v2815_v16 = vsel %vm2782_vm3, %v2750_v13, %v9559_v20  ;;  %v2816_v15 = vsel %vm2782_vm3, %v2751_v5, %v9560_v47  ;;  %v2688_v31 = vsel %vm365_vm0, %v10960_v32, %v9065_v57  ;;  %v920_v47 = vld [vmem:[#allocation2 + $0x31a] sm:$0xff]  ;;  %v921_v20 = vld [vmem:[#allocation2 + $0x322] sm:$0xff] }
 0x21b   : > { %v9565_v2 = vunpack.i.h.bf16 %v9563_v19  ;;  %v9564_v9 = vunpack.i.l.bf16 %v9563_v19  ;;  %v9568_v23 = vpop.permute.xlu0 %9567  ;;  %v3087_v49 = vpack.c.bf16 %v2816_v15, %v2815_v16  ;;  %v12962_v45 = vpop.f32.mrb[12].mxu1  ;;  %v10961_v5 = vld [vmem:[#allocation2 + $0x1c8] sm:$0xff]  ;;  %v12975_v15 = vpack.i.bf16 %v921_v20, %v920_v47 }
 0x21c   : > { %v9570_v48 = vunpack.i.h.bf16 %v9568_v23  ;;  %v9569_v56 = vunpack.i.l.bf16 %v9568_v23  ;;  %9852 = vrot.lane.b32.xlu1 %v9851_v41, %s11077_s18  ;;  %3542 = vmatprep.mubr.bf16.mxu0 %v3088_v60  ;;  %v12967_v13 = vpop.f32.mrb[13].mxu1  ;;  %v2687_v24 = vsel %vm365_vm0, %v10961_v5, %v9064_v14  ;;  %v16624_v23 = vld [vmem:[#allocation76_spill] sm:$0xff] }
 0x21d   : > { %v2882_v50 = vsel %vm365_vm0, %v831_v44, %v9565_v2  ;;  %v2881_v36 = vsel %vm365_vm0, %v830_v54, %v9564_v9  ;;  %9857 = vrot.lane.b32.xlu0 %v12883_v6, %s11077_s18  ;;  %3543 = vmatmul.mubr.bf16.gmra.mrb[64].mxu0 %v3087_v49  ;;  %v9876_v6 = vpack.i.bf16 %v1048_v8, %v1047_v21  ;;  %v985_v2 = vld [vmem:[#allocation2 + $0x330] sm:$0xff]  ;;  %v986_v9 = vld [vmem:[#allocation2 + $0x338] sm:$0xff]  ;;  %v9070_v49 = vunpack.i.h.bf16 %v16624_v23 }
 0x21e   : > { %v9573_v61 = vpop.permute.xlu1 %9572  ;;  %v2945_v53 = vsel %vm2717_vm2, %v2881_v36, %v9569_v56  ;;  %v2946_v58 = vsel %vm2717_vm2, %v2882_v50, %v9570_v48  ;;  %v9069_v21 = vunpack.i.l.bf16 %v16624_v23  ;;  %v12987_v8 = vpack.i.bf16 %v986_v9, %v985_v2  ;;  %v834_v5 = vld [vmem:[#allocation2 + $0x211] sm:$0xff] }
 0x21f   : > { %v9578_v0 = vpop.permute.xlu0 %9577  ;;  %v9575_v22 = vunpack.i.h.bf16 %v9573_v61  ;;  %v9574_v30 = vunpack.i.l.bf16 %v9573_v61  ;;  %v12982_v61 = vpop.f32.mrb[14].mxu1  ;;  %v988_v23 = vld [vmem:[#allocation2 + $0x350] sm:$0xff] }
 0x220   : > { %v9580_v39 = vunpack.i.h.bf16 %v9578_v0  ;;  %v9579_v11 = vunpack.i.l.bf16 %v9578_v0  ;;  %9862 = vrot.lane.b32.xlu1 %v12946_v38, %s11074_s12  ;;  %v12989_v14 = vpop.f32.mrb[15].mxu1 }
 0x221   : > { %9867 = vrot.lane.b32.xlu0 %v12952_v10, %s11076_s19  ;;  %v2752_v60 = vsel %vm2717_vm2, %v2687_v24, %v9574_v30  ;;  %v2753_v16 = vsel %vm2717_vm2, %v2688_v31, %v9575_v22  ;;  %v1050_v22 = vld [vmem:[#allocation2 + $0x339] sm:$0xff] }
 0x222   : > { %v9583_v41 = vpop.permute.xlu1 %9582  ;;  %v3009_v18 = vsel %vm2782_vm3, %v2945_v53, %v9579_v11  ;;  %v3010_v33 = vsel %vm2782_vm3, %v2946_v58, %v9580_v39  ;;  %v1049_v58 = vld [vmem:[#allocation2 + $0x331] sm:$0xff]  ;;  %v835_v24 = vld [vmem:[#allocation2 + $0x219] sm:$0xff] }
 0x223   : > { %v9585_v54 = vunpack.i.h.bf16 %v9583_v41  ;;  %v9584_v27 = vunpack.i.l.bf16 %v9583_v41  ;;  %v9588_v59 = vpop.permute.xlu0 %9587  ;;  %v3091_v37 = vpack.c.bf16 %v3010_v33, %v3009_v18  ;;  %v10963_v18 = vld [vmem:[#allocation2 + $0x1e0] sm:$0xff] }
 0x224   : > { %v9590_v44 = vunpack.i.h.bf16 %v9588_v59  ;;  %v9589_v19 = vunpack.i.l.bf16 %v9588_v59  ;;  %9872 = vrot.lane.b32.xlu1 %v12907_v62, %s11076_s19  ;;  %v2689_v33 = vsel %vm365_vm0, %v10963_v18, %v9069_v21  ;;  %v923_v59 = vld [vmem:[#allocation2 + $0x33a] sm:$0xff] }
 0x225   : > { %9877 = vrot.lane.b32.xlu0 %v9876_v6, %s11077_s18  ;;  %3550 = vmatprep.mubr.bf16.mxu0 %v3091_v37  ;;  %v2817_v40 = vsel %vm2782_vm3, %v2752_v60, %v9584_v27  ;;  %v2818_v52 = vsel %vm2782_vm3, %v2753_v16, %v9585_v54  ;;  %v10962_v6 = vld [vmem:[#allocation2 + $0x1e8] sm:$0xff]  ;;  %v9901_v54 = vpack.i.bf16 %v1050_v22, %v1049_v58  ;;  %v922_v27 = vld [vmem:[#allocation2 + $0x332] sm:$0xff]  ;;  %v1114_v16 = vld [vmem:[#allocation2 + $0x33a] sm:$0xff] }
 0x226   : > { %v9593_v48 = vpop.permute.xlu1 %9592  ;;  %v3090_v56 = vpack.c.bf16 %v2818_v52, %v2817_v40  ;;  %v2884_v62 = vsel %vm365_vm0, %v833_v43, %v9590_v44  ;;  %v2883_v50 = vsel %vm365_vm0, %v832_v1, %v9589_v19  ;;  %v987_v19 = vld [vmem:[#allocation2 + $0x348] sm:$0xff]  ;;  %v1113_v60 = vld [vmem:[#allocation2 + $0x332] sm:$0xff] }
 0x227   : > { %v9595_v36 = vunpack.i.h.bf16 %v9593_v48  ;;  %v9594_v3 = vunpack.i.l.bf16 %v9593_v48  ;;  %v9598_v57 = vpop.permute.xlu0 %9597  ;;  %v1116_v48 = vld [vmem:[#allocation2 + $0x352] sm:$0xff]  ;;  %v9916_v22 = vpack.i.bf16 %v988_v23, %v987_v19 }
 0x228   : > { %9882 = vrot.lane.b32.xlu1 %v12921_v17, %s11077_s18  ;;  %3551 = vmatmul.mubr.bf16.gmra.mrb[68].mxu0 %v3090_v56  ;;  %v9600_v0 = vunpack.i.h.bf16 %v9598_v57  ;;  %v9599_v53 = vunpack.i.l.bf16 %v9598_v57  ;;  %v2690_v17 = vsel %vm365_vm0, %v10962_v6, %v9070_v49  ;;  %v3131_v49 = vpack.c.bf16 %v1114_v16, %v1113_v60  ;;  %v837_v23 = vld [vmem:[#allocation2 + $0x231] sm:$0xff] }
 0x229   : > { %9887 = vrot.lane.b32.xlu0 %v12975_v15, %s11074_s12  ;;  %v2947_v39 = vsel %vm2717_vm2, %v2883_v50, %v9594_v3  ;;  %v2948_v11 = vsel %vm2717_vm2, %v2884_v62, %v9595_v36 }
 0x22a   : > { %v9603_v30 = vpop.permute.xlu1 %9602  ;;  %v2754_v43 = vsel %vm2717_vm2, %v2689_v33, %v9599_v53  ;;  %v2755_v44 = vsel %vm2717_vm2, %v2690_v17, %v9600_v0  ;;  %v9911_v0 = vpack.i.bf16 %v923_v59, %v922_v27  ;;  %v1051_v17 = vld [vmem:[#allocation2 + $0x349] sm:$0xff]  ;;  %8820 = vmatprep.mubr.msk.bf16.mxu1 %vm365_vm0, %v3131_v49  ;;  %v10964_v27 = vld [vmem:[#allocation2 + $0x200] sm:$0xff] }
 0x22b   : > { %v9605_v32 = vunpack.i.h.bf16 %v9603_v30  ;;  %v9604_v31 = vunpack.i.l.bf16 %v9603_v30  ;;  %v9608_v41 = vpop.permute.xlu0 %9607  ;;  %v13012_v30 = vpop.f32.mrb[16].mxu1 }
 0x22c   : > { %v9610_v47 = vunpack.i.h.bf16 %v9608_v41  ;;  %v9609_v20 = vunpack.i.l.bf16 %v9608_v41  ;;  %9892 = vrot.lane.b32.xlu1 %v12987_v8, %s11076_s19 }
 0x22d   : > { %9897 = vrot.lane.b32.xlu0 %v12946_v38, %s11076_s19  ;;  %v3011_v37 = vsel %vm2782_vm3, %v2947_v39, %v9604_v31  ;;  %v3012_v1 = vsel %vm2782_vm3, %v2948_v11, %v9605_v32  ;;  %v1115_v38 = vld [vmem:[#allocation2 + $0x34a] sm:$0xff]  ;;  %v16625_v39 = vld [vmem:[#allocation77_spill] sm:$0xff]  ;;  %v13016_v31 = vpop.f32.mrb[17].mxu1 }
 0x22e   : > { %v9613_v40 = vpop.permute.xlu1 %9612  ;;  %v3094_v52 = vpack.c.bf16 %v3012_v1, %v3011_v37  ;;  %v2819_v2 = vsel %vm2782_vm3, %v2754_v43, %v9609_v20  ;;  %v2820_v9 = vsel %vm2782_vm3, %v2755_v44, %v9610_v47  ;;  %v3134_v3 = vpack.c.bf16 %v1116_v48, %v1115_v38  ;;  %v1052_v32 = vld [vmem:[#allocation2 + $0x351] sm:$0xff] }
 0x22f   : > { %v9615_v56 = vunpack.i.h.bf16 %v9613_v40  ;;  %v9614_v62 = vunpack.i.l.bf16 %v9613_v40  ;;  %v9618_v50 = vpop.permute.xlu0 %9617  ;;  %v3093_v36 = vpack.c.bf16 %v2820_v9, %v2819_v2  ;;  %v9075_v11 = vunpack.i.h.bf16 %v16625_v39  ;;  %v10965_v44 = vld [vmem:[#allocation2 + $0x1f8] sm:$0xff]  ;;  %v13028_v2 = vpop.f32.mrb[18].mxu1  ;;  %v836_v9 = vld [vmem:[#allocation2 + $0x229] sm:$0xff] }
 0x230   : > { %v9620_v57 = vunpack.i.h.bf16 %v9618_v50  ;;  %v9619_v21 = vunpack.i.l.bf16 %v9618_v50  ;;  %9902 = vrot.lane.b32.xlu1 %v9901_v54, %s11077_s18  ;;  %3558 = vmatprep.mubr.bf16.mxu0 %v3094_v52  ;;  %v9074_v41 = vunpack.i.l.bf16 %v16625_v39  ;;  %v9926_v54 = vpack.i.bf16 %v1052_v32, %v1051_v17  ;;  %v580_v32 = vld [vmem:[#allocation2 + $0x210] sm:$0xff] }
 0x231   : > { %v2886_v53 = vsel %vm365_vm0, %v835_v24, %v9615_v56  ;;  %v2885_v58 = vsel %vm365_vm0, %v834_v5, %v9614_v62  ;;  %9907 = vrot.lane.b32.xlu0 %v12952_v10, %s11077_s18  ;;  %3559 = vmatmul.mubr.bf16.gmra.mrb[72].mxu0 %v3093_v36  ;;  %v2692_v59 = vsel %vm365_vm0, %v10964_v27, %v9075_v11  ;;  %v13034_v62 = vpop.f32.mrb[19].mxu1 }
 0x232   : > { %v9623_v6 = vpop.permute.xlu1 %9622  ;;  %v2949_v33 = vsel %vm2717_vm2, %v2885_v58, %v9619_v21  ;;  %v2950_v10 = vsel %vm2717_vm2, %v2886_v53, %v9620_v57  ;;  %8821 = vmatmul.mubr.msk.bf16.gmra.mrb[60].mxu1 %vm365_vm0, %v3134_v3  ;;  %v2691_v19 = vsel %vm365_vm0, %v10965_v44, %v9074_v41  ;;  %v4389_v3 = vld [vmem:[#allocation3 + $0x1] sm:$0xff]  ;;  %v4390_v57 = vld [vmem:[#allocation3 + $0x9] sm:$0xff]  ;;  %v581_v41 = vld [vmem:[#allocation2 + $0x218] sm:$0xff] }
 0x233   : > { %v9628_v18 = vpop.permute.xlu0 %9627  ;;  %v9625_v47 = vunpack.i.h.bf16 %v9623_v6  ;;  %v9624_v20 = vunpack.i.l.bf16 %v9623_v6  ;;  %v13042_v21 = vld [vmem:[%s16378_s3 + $0x80] sm:$0xff]  }
 0x234   : > { %v9630_v5 = vunpack.i.h.bf16 %v9628_v18  ;;  %v9629_v24 = vunpack.i.l.bf16 %v9628_v18  ;;  %9912 = vrot.lane.b32.xlu1 %v9911_v0, %s11074_s12  ;;  %8824 = vmatprep.subr.bf16.mxu0 %v13042_v21 }
 0x235   : > { %9917 = vrot.lane.b32.xlu0 %v9916_v22, %s11076_s19  ;;  %v2756_v48 = vsel %vm2717_vm2, %v2691_v19, %v9624_v20  ;;  %v2757_v56 = vsel %vm2717_vm2, %v2692_v59, %v9625_v47  ;;  %v4453_v20 = vld [vmem:[#allocation3 + $0x2] sm:$0xff]  ;;  %8825 = vmatpush3.bf16.msra.mxu0 %v13042_v21 }
 0x236   : > { %v9633_v37 = vpop.permute.xlu1 %9632  ;;  %v3013_v1 = vsel %vm2782_vm3, %v2949_v33, %v9629_v24  ;;  %v3014_v43 = vsel %vm2782_vm3, %v2950_v10, %v9630_v5  ;;  %v9941_v33 = vpack.i.bf16 %v4390_v57, %v4389_v3  ;;  %v4454_v5 = vld [vmem:[#allocation3 + $0xa] sm:$0xff] }
 0x237   : > { %v9635_v60 = vunpack.i.h.bf16 %v9633_v37  ;;  %v9634_v16 = vunpack.i.l.bf16 %v9633_v37  ;;  %v9638_v40 = vpop.permute.xlu0 %9637  ;;  %v3097_v52 = vpack.c.bf16 %v3014_v43, %v3013_v1  ;;  %v10915_v24 = vld [vmem:[%s16378_s3 + $0x88] sm:$0xff]  }
 0x238   : > { %v9640_v49 = vunpack.i.h.bf16 %v9638_v40  ;;  %v9639_v38 = vunpack.i.l.bf16 %v9638_v40  ;;  %9922 = vrot.lane.b32.xlu1 %v12975_v15, %s11076_s19  ;;  %v16626_v15 = vld [vmem:[#allocation78_spill] sm:$0xff]  ;;  %8826 = vmatprep.subr.bf16.mxu0 %v10915_v24 }
 0x239   : > { %9927 = vrot.lane.b32.xlu0 %v9926_v54, %s11077_s18  ;;  %3566 = vmatprep.mubr.bf16.mxu0 %v3097_v52  ;;  %v2821_v50 = vsel %vm2782_vm3, %v2756_v48, %v9634_v16  ;;  %v2822_v36 = vsel %vm2782_vm3, %v2757_v56, %v9635_v60  ;;  %v9080_v0 = vunpack.i.h.bf16 %v16626_v15  ;;  %v9079_v18 = vunpack.i.l.bf16 %v16626_v15  ;;  %v839_v48 = vld [vmem:[#allocation2 + $0x249] sm:$0xff] }
 0x23a   : > { %v9643_v53 = vpop.permute.xlu1 %9642  ;;  %v3096_v58 = vpack.c.bf16 %v2822_v36, %v2821_v50  ;;  %v2888_v22 = vsel %vm365_vm0, %v837_v23, %v9640_v49  ;;  %v2887_v39 = vsel %vm365_vm0, %v836_v9, %v9639_v38  ;;  %v9951_v16 = vpack.i.bf16 %v4454_v5, %v4453_v20  ;;  %8827 = vmatpush3.bf16.msra.mxu0 %v10915_v24  ;;  %v838_v38 = vld [vmem:[#allocation2 + $0x241] sm:$0xff] }
 0x23b   : > { %v9645_v11 = vunpack.i.h.bf16 %v9643_v53  ;;  %v9644_v6 = vunpack.i.l.bf16 %v9643_v53  ;;  %v9648_v17 = vpop.permute.xlu0 %9647  ;;  %v2694_v37 = vsel %vm365_vm0, %v581_v41, %v9080_v0  ;;  %v2693_v44 = vsel %vm365_vm0, %v580_v32, %v9079_v18  ;;  %v13064_v49 = vpop.f32.mrb[20].mxu1  ;;  %v583_v18 = vld [vmem:[#allocation2 + $0x230] sm:$0xff]  ;;  %v582_v24 = vld [vmem:[#allocation2 + $0x228] sm:$0xff] }
 0x23c   : > { %9932 = vrot.lane.b32.xlu1 %v12987_v8, %s11077_s18  ;;  %3567 = vmatmul.mubr.bf16.gmra.mrb[76].mxu0 %v3096_v58  ;;  %v9650_v10 = vunpack.i.h.bf16 %v9648_v17  ;;  %v9649_v47 = vunpack.i.l.bf16 %v9648_v17  ;;  %v13068_v57 = vpop.f32.mrb[21].mxu1  ;;  %v16627_v17 = vld [vmem:[#allocation79_spill] sm:$0xff] }
 0x23d   : > { %v2951_v27 = vsel %vm2717_vm2, %v2887_v39, %v9644_v6  ;;  %v2952_v59 = vsel %vm2717_vm2, %v2888_v22, %v9645_v11  ;;  %v9085_v32 = vunpack.i.h.bf16 %v16627_v17  ;;  %v13077_v5 = vpop.f32.mrb[22].mxu1 }
 0x23e   : > { %v9653_v54 = vpop.permute.xlu1 %9652  ;;  %v2758_v9 = vsel %vm2717_vm2, %v2693_v44, %v9649_v47  ;;  %v2759_v23 = vsel %vm2717_vm2, %v2694_v37, %v9650_v10 }
 0x23f   : > { %v9655_v8 = vunpack.i.h.bf16 %v9653_v54  ;;  %v9654_v1 = vunpack.i.l.bf16 %v9653_v54  ;;  %v9658_v43 = vpop.permute.xlu0 %9657 }
 0x240   : > { %v9660_v19 = vunpack.i.h.bf16 %v9658_v43  ;;  %v9659_v60 = vunpack.i.l.bf16 %v9658_v43  ;;  %9942 = vrot.lane.b32.xlu1 %v9941_v33, %s11074_s12  ;;  %v9084_v33 = vunpack.i.l.bf16 %v16627_v17  ;;  %v16628_v17 = vld [vmem:[#allocation80_spill] sm:$0xff] }
 0x241   : > { %v3015_v40 = vsel %vm2782_vm3, %v2951_v27, %v9654_v1  ;;  %v3016_v52 = vsel %vm2782_vm3, %v2952_v59, %v9655_v8  ;;  %v13079_v8 = vpop.f32.mrb[23].mxu1  ;;  %v2696_v1 = vsel %vm365_vm0, %v583_v18, %v9085_v32  ;;  %v9090_v32 = vunpack.i.h.bf16 %v16628_v17  ;;  %v584_v18 = vld [vmem:[#allocation2 + $0x240] sm:$0xff] }
 0x242   : > { %v9663_v56 = vpop.permute.xlu1 %9662  ;;  %v3100_v50 = vpack.c.bf16 %v3016_v52, %v3015_v40  ;;  %v2823_v36 = vsel %vm2782_vm3, %v2758_v9, %v9659_v60  ;;  %v2824_v3 = vsel %vm2782_vm3, %v2759_v23, %v9660_v19  ;;  %v2695_v60 = vsel %vm365_vm0, %v582_v24, %v9084_v33  ;;  %v840_v23 = vld [vmem:[#allocation2 + $0x259] sm:$0xff]  ;;  %v585_v33 = vld [vmem:[#allocation2 + $0x248] sm:$0xff] }
 0x243   : > { %v9665_v15 = vunpack.i.h.bf16 %v9663_v56  ;;  %v9664_v0 = vunpack.i.l.bf16 %v9663_v56  ;;  %v9668_v53 = vpop.permute.xlu0 %9667  ;;  %v3099_v58 = vpack.c.bf16 %v2824_v3, %v2823_v36 }
 0x244   : > { %v9670_v22 = vunpack.i.h.bf16 %v9668_v53  ;;  %v9669_v39 = vunpack.i.l.bf16 %v9668_v53  ;;  %3574 = vmatprep.mubr.bf16.mxu0 %v3100_v50  ;;  %9952 = vrot.lane.b32.xlu1 %v9951_v16, %s11076_s19 }
 0x245   : > { %v2890_v11 = vsel %vm365_vm0, %v839_v48, %v9665_v15  ;;  %v2889_v6 = vsel %vm365_vm0, %v838_v38, %v9664_v0  ;;  %3575 = vmatmul.mubr.bf16.gmra.mrb[80].mxu0 %v3099_v58  ;;  %v841_v38 = vld [vmem:[#allocation2 + $0x261] sm:$0xff]  ;;  %v13096_v24 = vpop.f32.mrb[24].mxu1 }
 0x246   : > { %v9673_v41 = vpop.permute.xlu1 %9672  ;;  %v2953_v47 = vsel %vm2717_vm2, %v2889_v6, %v9669_v39  ;;  %v2954_v20 = vsel %vm2717_vm2, %v2890_v11, %v9670_v22 }
 0x247   : > { %v9678_v10 = vpop.permute.xlu0 %9677  ;;  %v9675_v54 = vunpack.i.h.bf16 %v9673_v41  ;;  %v9674_v27 = vunpack.i.l.bf16 %v9673_v41  ;;  %v9089_v41 = vunpack.i.l.bf16 %v16628_v17 }
 0x248   : > { %v9680_v59 = vunpack.i.h.bf16 %v9678_v10  ;;  %v9679_v37 = vunpack.i.l.bf16 %v9678_v10 }
 0x249   : > { %v2760_v50 = vsel %vm2717_vm2, %v2695_v60, %v9674_v27  ;;  %v2761_v36 = vsel %vm2717_vm2, %v2696_v1, %v9675_v54  ;;  %v2698_v60 = vsel %vm365_vm0, %v585_v33, %v9090_v32 }
 0x24a   : > { %v9683_v43 = vpop.permute.xlu1 %9682  ;;  %v3017_v44 = vsel %vm2782_vm3, %v2953_v47, %v9679_v37  ;;  %v3018_v19 = vsel %vm2782_vm3, %v2954_v20, %v9680_v59  ;;  %v10916_v20 = vld [vmem:[%s16378_s3] sm:$0xff]   ;;  %v13100_v37 = vpop.f32.mrb[25].mxu1 }
 0x24b   : > { %v9685_v16 = vunpack.i.h.bf16 %v9683_v43  ;;  %v9684_v40 = vunpack.i.l.bf16 %v9683_v43  ;;  %v9688_v52 = vpop.permute.xlu0 %9687  ;;  %v3103_v9 = vpack.c.bf16 %v3018_v19, %v3017_v44  ;;  %7166 = vmatpush1.bf16.msra.mxu1 %v10916_v20  ;;  %v10917_v19 = vld [vmem:[%s16378_s3 + $0x8] sm:$0xff]   ;;  %v13117_v17 = vpop.f32.mrb[26].mxu1 }
 0x24c   : > { %v9690_v48 = vunpack.i.h.bf16 %v9688_v52  ;;  %v9689_v56 = vunpack.i.l.bf16 %v9688_v52 }
 0x24d   : > { %3582 = vmatprep.mubr.bf16.mxu0 %v3103_v9  ;;  %v2825_v3 = vsel %vm2782_vm3, %v2760_v50, %v9684_v40  ;;  %v2826_v15 = vsel %vm2782_vm3, %v2761_v36, %v9685_v16  ;;  %v2697_v16 = vsel %vm365_vm0, %v584_v18, %v9089_v41  ;;  %v16629_v9 = vmov 0   ;;  %v842_v50 = vld [vmem:[#allocation2 + $0x271] sm:$0xff]  ;;  %v843_v36 = vld [vmem:[#allocation2 + $0x279] sm:$0xff]  ;;  %v13120_v18 = vpop.f32.mrb[27].mxu1 }
 0x24e   : > { %v9693_v0 = vpop.permute.xlu1 %9692  ;;  %v3102_v53 = vpack.c.bf16 %v2826_v15, %v2825_v3  ;;  %v2892_v58 = vsel %vm365_vm0, %v841_v38, %v9690_v48  ;;  %v2891_v22 = vsel %vm365_vm0, %v840_v23, %v9689_v56  ;;  %7167 = vmatprep.subr.bf16.mxu1 %v16629_v9 }
 0x24f   : > { %v9695_v39 = vunpack.i.h.bf16 %v9693_v0  ;;  %v9694_v11 = vunpack.i.l.bf16 %v9693_v0  ;;  %v9698_v6 = vpop.permute.xlu0 %9697  ;;  %7168 = vmatpush1.bf16.msra.mxu1 %v10917_v19  ;;  %v10919_v19 = vld [vmem:[%s16378_s3 + $0x18] sm:$0xff]  }
 0x250   : > { %3583 = vmatmul.mubr.bf16.gmra.mrb[84].mxu0 %v3102_v53  ;;  %v9700_v10 = vunpack.i.h.bf16 %v9698_v6  ;;  %v9699_v47 = vunpack.i.l.bf16 %v9698_v6  ;;  %v10918_v6 = vld [vmem:[%s16378_s3 + $0x10] sm:$0xff]   ;;  %7169 = vmatprep.subr.bf16.mxu1 %v16629_v9 }
 0x251   : > { %v2955_v27 = vsel %vm2717_vm2, %v2891_v22, %v9694_v11  ;;  %v2956_v59 = vsel %vm2717_vm2, %v2892_v58, %v9695_v39 }
 0x252   : > { %v9703_v54 = vpop.permute.xlu1 %9702  ;;  %v2762_v48 = vsel %vm2717_vm2, %v2697_v16, %v9699_v47  ;;  %v2763_v56 = vsel %vm2717_vm2, %v2698_v60, %v9700_v10  ;;  %v16630_v47 = vld [vmem:[#allocation81_spill] sm:$0xff] }
 0x253   : > { %v9705_v1 = vunpack.i.h.bf16 %v9703_v54  ;;  %v9704_v43 = vunpack.i.l.bf16 %v9703_v54  ;;  %v9708_v44 = vpop.permute.xlu0 %9707  ;;  %v9095_v20 = vunpack.i.h.bf16 %v16630_v47  ;;  %7170 = vmatpush1.bf16.msra.mxu1 %v10918_v6  ;;  %v586_v60 = vld [vmem:[#allocation2 + $0x258] sm:$0xff] }
 0x254   : > { %v9710_v40 = vunpack.i.h.bf16 %v9708_v44  ;;  %v9709_v52 = vunpack.i.l.bf16 %v9708_v44  ;;  %7171 = vmatprep.subr.bf16.mxu1 %v16629_v9 }
 0x255   : > { %v3019_v23 = vsel %vm2782_vm3, %v2955_v27, %v9704_v43  ;;  %v3020_v38 = vsel %vm2782_vm3, %v2956_v59, %v9705_v1  ;;  %v587_v27 = vld [vmem:[#allocation2 + $0x260] sm:$0xff]  ;;  %v9094_v59 = vunpack.i.l.bf16 %v16630_v47 }
 0x256   : > { %v9713_v3 = vpop.permute.xlu1 %9712  ;;  %v3106_v15 = vpack.c.bf16 %v3020_v38, %v3019_v23  ;;  %v2827_v0 = vsel %vm2782_vm3, %v2762_v48, %v9709_v52  ;;  %v2828_v53 = vsel %vm2782_vm3, %v2763_v56, %v9710_v40  ;;  %v2700_v38 = vsel %vm365_vm0, %v587_v27, %v9095_v20 }
 0x257   : > { %v9715_v58 = vunpack.i.h.bf16 %v9713_v3  ;;  %v9714_v22 = vunpack.i.l.bf16 %v9713_v3  ;;  %v9718_v39 = vpop.permute.xlu0 %9717  ;;  %v3105_v11 = vpack.c.bf16 %v2828_v53, %v2827_v0  ;;  %7172 = vmatpush1.bf16.msra.mxu1 %v10919_v19  ;;  %v10921_v19 = vld [vmem:[%s16378_s3 + $0x28] sm:$0xff]  }
 0x258   : > { %v9720_v32 = vunpack.i.h.bf16 %v9718_v39  ;;  %v9719_v41 = vunpack.i.l.bf16 %v9718_v39  ;;  %3590 = vmatprep.mubr.bf16.mxu0 %v3106_v15  ;;  %7173 = vmatprep.subr.bf16.mxu1 %v16629_v9 }
 0x259   : > { %v2894_v33 = vsel %vm365_vm0, %v843_v36, %v9715_v58  ;;  %v2893_v10 = vsel %vm365_vm0, %v842_v50, %v9714_v22  ;;  %3591 = vmatmul.mubr.bf16.gmra.mrb[88].mxu0 %v3105_v11  ;;  %v2699_v36 = vsel %vm365_vm0, %v586_v60, %v9094_v59  ;;  %v844_v58 = vld [vmem:[#allocation2 + $0x289] sm:$0xff]  ;;  %v845_v22 = vld [vmem:[#allocation2 + $0x291] sm:$0xff] }
 0x25a   : > { %v9723_v54 = vpop.permute.xlu1 %9722  ;;  %v2957_v43 = vsel %vm2717_vm2, %v2893_v10, %v9719_v41  ;;  %v2958_v44 = vsel %vm2717_vm2, %v2894_v33, %v9720_v32  ;;  %v10920_v10 = vld [vmem:[%s16378_s3 + $0x20] sm:$0xff]  }
 0x25b   : > { %v9728_v1 = vpop.permute.xlu0 %9727  ;;  %v9725_v16 = vunpack.i.h.bf16 %v9723_v54  ;;  %v9724_v40 = vunpack.i.l.bf16 %v9723_v54  ;;  %7174 = vmatpush1.bf16.msra.mxu1 %v10920_v10 }
 0x25c   : > { %v9730_v52 = vunpack.i.h.bf16 %v9728_v1  ;;  %v9729_v23 = vunpack.i.l.bf16 %v9728_v1  ;;  %7175 = vmatprep.subr.bf16.mxu1 %v16629_v9 }
 0x25d   : > { %v2764_v6 = vsel %vm2717_vm2, %v2699_v36, %v9724_v40  ;;  %v2765_v32 = vsel %vm2717_vm2, %v2700_v38, %v9725_v16  ;;  %v16632_v16 = vld [vmem:[#allocation82_spill] sm:$0xff]  ;;  %v589_v38 = vld [vmem:[#allocation2 + $0x278] sm:$0xff] }
 0x25e   : > { %v9733_v48 = vpop.permute.xlu1 %9732  ;;  %v3021_v56 = vsel %vm2782_vm3, %v2957_v43, %v9729_v23  ;;  %v3022_v50 = vsel %vm2782_vm3, %v2958_v44, %v9730_v52  ;;  %v13144_v54 = vpop.f32.mrb[28].mxu1  ;;  %v9100_v40 = vunpack.i.h.bf16 %v16632_v16  ;;  %v9099_v52 = vunpack.i.l.bf16 %v16632_v16  ;;  %v588_v23 = vld [vmem:[#allocation2 + $0x270] sm:$0xff] }
 0x25f   : > { %v9735_v3 = vunpack.i.h.bf16 %v9733_v48  ;;  %v9734_v15 = vunpack.i.l.bf16 %v9733_v48  ;;  %v9738_v0 = vpop.permute.xlu0 %9737  ;;  %v3109_v53 = vpack.c.bf16 %v3022_v50, %v3021_v56  ;;  %16631 = vst [vmem:[#allocation72_spill] sm:$0xff] %v13144_v54  ;;  %v13151_v60 = vpop.f32.mrb[29].mxu1  ;;  %7176 = vmatpush1.bf16.msra.mxu1 %v10921_v19 }
 0x260   : > { %v9740_v39 = vunpack.i.h.bf16 %v9738_v0  ;;  %v9739_v11 = vunpack.i.l.bf16 %v9738_v0  ;;  %7177 = vmatprep.subr.bf16.mxu1 %v16629_v9 }
 0x261   : > { %3598 = vmatprep.mubr.bf16.mxu0 %v3109_v53  ;;  %v2829_v41 = vsel %vm2782_vm3, %v2764_v6, %v9734_v15  ;;  %v2830_v33 = vsel %vm2782_vm3, %v2765_v32, %v9735_v3 }
 0x262   : > { %v9743_v47 = vpop.permute.xlu1 %9742  ;;  %v3108_v20 = vpack.c.bf16 %v2830_v33, %v2829_v41  ;;  %v2896_v27 = vsel %vm365_vm0, %v845_v22, %v9740_v39  ;;  %v2895_v59 = vsel %vm365_vm0, %v844_v58, %v9739_v11  ;;  %v10922_v58 = vld [vmem:[%s16378_s3 + $0x30] sm:$0xff]   ;;  %v13161_v22 = vpop.f32.mrb[30].mxu1  ;;  %v2702_v39 = vsel %vm365_vm0, %v589_v38, %v9100_v40 }
 0x263   : > { %v9745_v1 = vunpack.i.h.bf16 %v9743_v47  ;;  %v9744_v43 = vunpack.i.l.bf16 %v9743_v47  ;;  %v9748_v44 = vpop.permute.xlu0 %9747  ;;  %16633 = vst [vmem:[#allocation90_spill] sm:$0xff] %v13161_v22  ;;  %v2701_v11 = vsel %vm365_vm0, %v588_v23, %v9099_v52  ;;  %v13166_v41 = vpop.f32.mrb[31].mxu1  ;;  %v591_v52 = vld [vmem:[#allocation2 + $0x290] sm:$0xff]  ;;  %7178 = vmatpush1.bf16.msra.mxu1 %v10922_v58  ;;  %v13186_v58 = vld [vmem:[%s16377_s2] ss:$0 sm:$0xff] }
 0x264   : > { %3599 = vmatmul.mubr.bf16.gmra.mrb[92].mxu0 %v3108_v20  ;;  %v9750_v48 = vunpack.i.h.bf16 %v9748_v44  ;;  %v9749_v56 = vunpack.i.l.bf16 %v9748_v44  ;;  %7179 = vmatprep.subr.bf16.mxu1 %v16629_v9 }
 0x265   : > { %v2959_v36 = vsel %vm2717_vm2, %v2895_v59, %v9744_v43  ;;  %v2960_v3 = vsel %vm2717_vm2, %v2896_v27, %v9745_v1  ;;  %v16634_v27 = vld [vmem:[#allocation83_spill] sm:$0xff] }
 0x266   : > { %v9753_v50 = vpop.permute.xlu1 %9752  ;;  %v2766_v47 = vsel %vm2717_vm2, %v2701_v11, %v9749_v56  ;;  %v2767_v20 = vsel %vm2717_vm2, %v2702_v39, %v9750_v48  ;;  %v9105_v59 = vunpack.i.h.bf16 %v16634_v27  ;;  %v846_v1 = vld [vmem:[#allocation2 + $0x2a1] sm:$0xff]  ;;  %v847_v43 = vld [vmem:[#allocation2 + $0x2a9] sm:$0xff]  ;;  %v10923_v48 = vld [vmem:[%s16378_s3 + $0x38] sm:$0xff]   ;;  %v9104_v56 = vunpack.i.l.bf16 %v16634_v27 }
 0x267   : > { %v9755_v15 = vunpack.i.h.bf16 %v9753_v50  ;;  %v9754_v0 = vunpack.i.l.bf16 %v9753_v50  ;;  %v9758_v53 = vpop.permute.xlu0 %9757  ;;  %7180 = vmatpush1.bf16.msra.mxu1 %v10923_v48  ;;  %v10924_v48 = vld [vmem:[%s16378_s3 + $0x40] sm:$0xff]  }
 0x268   : > { %v9760_v6 = vunpack.i.h.bf16 %v9758_v53  ;;  %v9759_v32 = vunpack.i.l.bf16 %v9758_v53  ;;  %v16635_v53 = vld [vmem:[#allocation84_spill] sm:$0xff]  ;;  %7181 = vmatprep.subr.bf16.mxu1 %v16629_v9 }
 0x269   : > { %v3023_v33 = vsel %vm2782_vm3, %v2959_v36, %v9754_v0  ;;  %v3024_v10 = vsel %vm2782_vm3, %v2960_v3, %v9755_v15  ;;  %v590_v0 = vld [vmem:[#allocation2 + $0x288] sm:$0xff]  ;;  %v9110_v39 = vunpack.i.h.bf16 %v16635_v53 }
 0x26a   : > { %v9763_v44 = vpop.permute.xlu1 %9762  ;;  %v3112_v19 = vpack.c.bf16 %v3024_v10, %v3023_v33  ;;  %v2831_v16 = vsel %vm2782_vm3, %v2766_v47, %v9759_v32  ;;  %v2832_v40 = vsel %vm2782_vm3, %v2767_v20, %v9760_v6  ;;  %v2704_v32 = vsel %vm365_vm0, %v591_v52, %v9105_v59  ;;  %v593_v33 = vld [vmem:[#allocation2 + $0x2a8] sm:$0xff] }
 0x26b   : > { %v9765_v23 = vunpack.i.h.bf16 %v9763_v44  ;;  %v9764_v38 = vunpack.i.l.bf16 %v9763_v44  ;;  %v9768_v50 = vpop.permute.xlu0 %9767  ;;  %v3111_v36 = vpack.c.bf16 %v2832_v40, %v2831_v16  ;;  %v2703_v16 = vsel %vm365_vm0, %v590_v0, %v9104_v56  ;;  %7182 = vmatpush1.bf16.msra.mxu1 %v10924_v48 }
 0x26c   : > { %v9770_v3 = vunpack.i.h.bf16 %v9768_v50  ;;  %v9769_v15 = vunpack.i.l.bf16 %v9768_v50  ;;  %3606 = vmatprep.mubr.bf16.mxu0 %v3112_v19  ;;  %v13196_v52 = vsel %vm365_vm0, %v593_v33, %v9110_v39  ;;  %v16636_v50 = vld [vmem:[#allocation85_spill] sm:$0xff]  ;;  %7183 = vmatprep.subr.bf16.mxu1 %v16629_v9 }
 0x26d   : > { %v2898_v11 = vsel %vm365_vm0, %v847_v43, %v9765_v23  ;;  %v2897_v6 = vsel %vm365_vm0, %v846_v1, %v9764_v38  ;;  %3607 = vmatmul.mubr.bf16.gmra.mrb[96].mxu0 %v3111_v36  ;;  %v9115_v36 = vunpack.i.h.bf16 %v16636_v50 }
 0x26e   : > { %v9773_v47 = vpop.permute.xlu1 %9772  ;;  %v2961_v43 = vsel %vm2717_vm2, %v2897_v6, %v9769_v15  ;;  %v2962_v1 = vsel %vm2717_vm2, %v2898_v11, %v9770_v3 }
 0x26f   : > { %v9775_v20 = vunpack.i.h.bf16 %v9773_v47  ;;  %v9774_v27 = vunpack.i.l.bf16 %v9773_v47  ;;  %v9778_v44 = vpop.permute.xlu0 %9777  ;;  %v3416_v19 = vpop.f32.mrb[0].mxu0  ;;  %v9114_v47 = vunpack.i.l.bf16 %v16636_v50  ;;  %v849_v50 = vld [vmem:[#allocation2 + $0x2c1] sm:$0xff] }
 0x270   : > { %v9780_v40 = vunpack.i.h.bf16 %v9778_v44  ;;  %v9779_v23 = vunpack.i.l.bf16 %v9778_v44  ;;  %v3417_v38 = vadd.f32 %v13186_v58, %v3416_v19  ;;  %v3418_v59 = vpop.f32.mrb[1].mxu0 }
 0x271   : > { %v3419_v15 = vpop.f32.mrb[2].mxu0  ;;  %v2768_v3 = vsel %vm2717_vm2, %v2703_v16, %v9774_v27  ;;  %v848_v59 = vld [vmem:[#allocation2 + $0x2b9] sm:$0xff]  ;;  %v2769_v16 = vsel %vm2717_vm2, %v2704_v32, %v9775_v20 }
 0x272   : > { %v3420_v56 = vadd.f32 %v13186_v58, %v3419_v15  ;;  %v3706_v0 = vadd.f32 %v12796_v63, %v3417_v38  ;;  %v9783_v11 = vpop.permute.xlu1 %9782  ;;  %v3421_v6 = vpop.f32.mrb[3].mxu0  ;;  %v3025_v39 = vsel %vm2782_vm3, %v2961_v43, %v9779_v23  ;;  %v3026_v33 = vsel %vm2782_vm3, %v2962_v1, %v9780_v40  ;;  %v10925_v15 = vld [vmem:[%s16378_s3 + $0x48] sm:$0xff]   ;;  %v592_v40 = vld [vmem:[#allocation2 + $0x2a0] sm:$0xff] }
 0x273   : > { %v9785_v44 = vunpack.i.h.bf16 %v9783_v11  ;;  %v9784_v19 = vunpack.i.l.bf16 %v9783_v11  ;;  %v9788_v10 = vpop.permute.xlu0 %9787  ;;  %v3115_v27 = vpack.c.bf16 %v3026_v33, %v3025_v39  ;;  %v13212_v63 = vpop.f32.mrb[32].mxu1  ;;  %v16639_v11 = vld [vmem:[#allocation86_spill] sm:$0xff]  ;;  %v594_v39 = vld [vmem:[#allocation2 + $0x2b8] sm:$0xff]  ;;  %7184 = vmatpush1.bf16.msra.mxu1 %v10925_v15 }
 0x274   : > { %16637 = vst [vmem:[#allocation73_spill] sm:$0xff] %v13212_v63  ;;  %vm3960_vm4 = vcmp.gt.f32.partialorder %v3706_v0, 0.0  ;;  %v4024_v38 = vmul.f32 0.01, %v3706_v0  ;;  %v9790_v43 = vunpack.i.h.bf16 %v9788_v10  ;;  %v9789_v23 = vunpack.i.l.bf16 %v9788_v10  ;;  %v13215_v1 = vpop.f32.mrb[33].mxu1  ;;  %v595_v33 = vld [vmem:[#allocation2 + $0x2c0] sm:$0xff]  ;;  %7185 = vmatprep.subr.bf16.mxu1 %v16629_v9 }
 0x275   : > { %16638 = vst [vmem:[#allocation91_spill] sm:$0xff] %v13215_v1  ;;  %v9120_v6 = vunpack.i.h.bf16 %v16639_v11  ;;  %v3709_v32 = vadd.f32 %v12809_v46, %v3420_v56  ;;  %3614 = vmatprep.mubr.bf16.mxu0 %v3115_v27  ;;  %v2833_v20 = vsel %vm2782_vm3, %v2768_v3, %v9784_v19  ;;  %v2834_v48 = vsel %vm2782_vm3, %v2769_v16, %v9785_v44  ;;  %v10926_v3 = vld [vmem:[%s16378_s3 + $0x50] sm:$0xff]   ;;  %v597_v19 = vld [vmem:[#allocation2 + $0x2d8] sm:$0xff] }
 0x276   : > { %v4088_v55 = vsel %vm3960_vm4, %v3706_v0, %v4024_v38  ;;  %v2900_v12 = vsel %vm365_vm0, %v849_v50, %v9790_v43  ;;  %v2899_v10 = vsel %vm365_vm0, %v848_v59, %v9789_v23  ;;  %v9793_v63 = vpop.permute.xlu1 %9792  ;;  %v3114_v22 = vpack.c.bf16 %v2834_v48, %v2833_v20 }
 0x277   : > { %4261 = vst.msk [vmem:[#allocation3 + $0x19] sm:$0xff] %vm365_vm0, %v4088_v55  ;;  %vm3961_vm5 = vcmp.gt.f32.partialorder %v3709_v32, 0.0  ;;  %v4025_v1 = vmul.f32 0.01, %v3709_v32  ;;  %v9795_v54 = vunpack.i.h.bf16 %v9793_v63  ;;  %v9794_v46 = vunpack.i.l.bf16 %v9793_v63  ;;  %v9798_v56 = vpop.permute.xlu0 %9797  ;;  %v3424_v27 = vpop.f32.mrb[4].mxu0  ;;  %7186 = vmatpush1.bf16.msra.mxu1 %v10926_v3 }
 0x278   : > { %v16640_v0 = vunpack.i.l.bf16 %v16635_v53  ;;  %v9119_v59 = vunpack.i.l.bf16 %v16639_v11  ;;  %v9799_v50 = vunpack.i.l.bf16 %v9798_v56  ;;  %v3425_v55 = vadd.f32 %v13186_v58, %v3424_v27  ;;  %v3426_v16 = vpop.f32.mrb[5].mxu0  ;;  %3615 = vmatmul.mubr.bf16.gmra.mrb[100].mxu0 %v3114_v22  ;;  %v13233_v63 = vpop.f32.mrb[34].mxu1  ;;  %7187 = vmatprep.subr.bf16.mxu1 %v16629_v9 }
 0x279   : > { %v13236_v15 = vsel %vm365_vm0, %v595_v33, %v9115_v36  ;;  %v13239_v38 = vsel %vm365_vm0, %v594_v39, %v9114_v47  ;;  %v4089_v53 = vsel %vm3961_vm5, %v3709_v32, %v4025_v1  ;;  %v9800_v43 = vunpack.i.h.bf16 %v9798_v56  ;;  %v3427_v23 = vpop.f32.mrb[6].mxu0 }
 0x27a   : > { %v2705_v44 = vsel %vm365_vm0, %v592_v40, %v16640_v0  ;;  %v13242_v40 = vpop.f32.mrb[35].mxu1  ;;  %4262 = vst.msk [vmem:[#allocation3 + $0x21] sm:$0xff] %vm365_vm0, %v4089_v53  ;;  %v3714_v22 = vadd.f32 %v12791_v4, %v3425_v55  ;;  %v3428_v11 = vadd.f32 %v13186_v58, %v3427_v23  ;;  %v9803_v20 = vpop.permute.xlu1 %9802  ;;  %v2963_v36 = vsel %vm2717_vm2, %v2899_v10, %v9794_v46  ;;  %v10927_v4 = vld [vmem:[%s16378_s3 + $0x58] sm:$0xff]  }
 0x27b   : > { %v3429_v48 = vpop.f32.mrb[7].mxu0  ;;  %v2964_v33 = vsel %vm2717_vm2, %v2900_v12, %v9795_v54  ;;  %v13250_v47 = vsel %vm365_vm0, %v597_v19, %v9120_v6  ;;  %v9805_v1 = vunpack.i.h.bf16 %v9803_v20  ;;  %v9804_v32 = vunpack.i.l.bf16 %v9803_v20  ;;  %v9808_v39 = vpop.permute.xlu0 %9807  ;;  %v596_v12 = vld [vmem:[#allocation2 + $0x2d0] sm:$0xff]  ;;  %v851_v55 = vld [vmem:[#allocation2 + $0x2d9] sm:$0xff]  ;;  %7188 = vmatpush1.bf16.msra.mxu1 %v10927_v4 }
 0x27c   : > { %v2770_v56 = vsel %vm2717_vm2, %v2705_v44, %v9799_v50  ;;  %vm3962_vm6 = vcmp.gt.f32.partialorder %v3714_v22, 0.0  ;;  %v4026_v27 = vmul.f32 0.01, %v3714_v22  ;;  %v3717_v0 = vadd.f32 %v12803_v28, %v3428_v11  ;;  %v850_v50 = vld [vmem:[#allocation2 + $0x2d1] sm:$0xff]  ;;  %7189 = vmatprep.subr.bf16.mxu1 %v16629_v9 }
 0x27d   : > { %v9810_v10 = vunpack.i.h.bf16 %v9808_v39  ;;  %v9809_v54 = vunpack.i.l.bf16 %v9808_v39  ;;  %v3027_v6 = vsel %vm2782_vm3, %v2963_v36, %v9804_v32  ;;  %v3028_v46 = vsel %vm2782_vm3, %v2964_v33, %v9805_v1 }
 0x27e   : > { %v2771_v3 = vsel %vm2717_vm2, %v13196_v52, %v9800_v43  ;;  %v4090_v44 = vsel %vm3962_vm6, %v3714_v22, %v4026_v27  ;;  %vm3963_vm7 = vcmp.gt.f32.partialorder %v3717_v0, 0.0  ;;  %v4027_v19 = vmul.f32 0.01, %v3717_v0  ;;  %v9813_v16 = vpop.permute.xlu1 %9812  ;;  %v10928_v52 = vld [vmem:[%s16378_s3 + $0x60] sm:$0xff]   ;;  %v4517_v39 = vld [vmem:[#allocation3 + $0x18] sm:$0xff] }
 0x27f   : > { %v3118_v53 = vpack.c.bf16 %v3028_v46, %v3027_v6  ;;  %4263 = vst.msk [vmem:[#allocation3 + $0x31] sm:$0xff] %vm365_vm0, %v4090_v44  ;;  %v9815_v28 = vunpack.i.h.bf16 %v9813_v16  ;;  %v9814_v23 = vunpack.i.l.bf16 %v9813_v16  ;;  %v9818_v11 = vpop.permute.xlu0 %9817  ;;  %v3432_v20 = vpop.f32.mrb[8].mxu0  ;;  %v2835_v48 = vsel %vm2782_vm3, %v2770_v56, %v9809_v54  ;;  %7190 = vmatpush1.bf16.msra.mxu1 %v10928_v52 }
 0x280   : > { %v2836_v36 = vsel %vm2782_vm3, %v2771_v3, %v9810_v10  ;;  %v13269_v43 = vsel %vm365_vm0, %v596_v12, %v9119_v59  ;;  %v4091_v22 = vsel %vm3963_vm7, %v3717_v0, %v4027_v19  ;;  %v9819_v33 = vunpack.i.l.bf16 %v9818_v11  ;;  %v3434_v32 = vpop.f32.mrb[9].mxu0  ;;  %7191 = vmatprep.subr.bf16.mxu1 %v16629_v9 }
 0x281   : > { %v3433_v1 = vadd.f32 %v13186_v58, %v3432_v20  ;;  %3622 = vmatprep.mubr.bf16.mxu0 %v3118_v53  ;;  %4264 = vst.msk [vmem:[#allocation3 + $0x39] sm:$0xff] %vm365_vm0, %v4091_v22  ;;  %v2902_v56 = vsel %vm365_vm0, %v851_v55, %v9815_v28  ;;  %v2901_v4 = vsel %vm365_vm0, %v850_v50, %v9814_v23  ;;  %v9820_v27 = vunpack.i.h.bf16 %v9818_v11  ;;  %v3435_v10 = vpop.f32.mrb[10].mxu0  ;;  %v4645_v12 = vld [vmem:[#allocation3 + $0x1a] sm:$0xff]  ;;  %v4646_v54 = vld [vmem:[#allocation3 + $0x22] sm:$0xff] }
 0x282   : > { %v3117_v59 = vpack.c.bf16 %v2836_v36, %v2835_v48  ;;  %v4518_v0 = vld [vmem:[#allocation3 + $0x20] sm:$0xff]  ;;  %v3436_v6 = vadd.f32 %v13186_v58, %v3435_v10  ;;  %v9823_v3 = vpop.permute.xlu1 %9822  ;;  %v3437_v44 = vpop.f32.mrb[11].mxu0  ;;  %v13279_v19 = vpack.i.bf16 %v4646_v54, %v4645_v12  ;;  %v16641_v20 = vld [vmem:[#allocation87_spill] sm:$0xff]  ;;  %v2965_v11 = vsel %vm2717_vm2, %v2901_v4, %v9819_v33 }
 0x283   : > { %v3722_v46 = vadd.f32 %v12857_v29, %v3433_v1  ;;  %v9961_v16 = vpack.i.bf16 %v4518_v0, %v4517_v39  ;;  %v4392_v53 = vld [vmem:[#allocation3 + $0x21] sm:$0xff]  ;;  %v9125_v55 = vunpack.i.h.bf16 %v16641_v20  ;;  %v9825_v50 = vunpack.i.h.bf16 %v9823_v3  ;;  %v9828_v23 = vpop.permute.xlu0 %9827  ;;  %v4391_v1 = vld [vmem:[#allocation3 + $0x19] sm:$0xff]  ;;  %v13298_v0 = vpop.f32.mrb[36].mxu1  ;;  %v853_v44 = vld [vmem:[#allocation2 + $0x2f1] sm:$0xff] }
 0x284   : > { %3623 = vmatmul.mubr.bf16.gmra.mrb[104].mxu0 %v3117_v59  ;;  %v9824_v28 = vunpack.i.l.bf16 %v9823_v3  ;;  %v10929_v48 = vld [vmem:[%s16378_s3 + $0x68] sm:$0xff]   ;;  %v9830_v36 = vunpack.i.h.bf16 %v9828_v23  ;;  %v9829_v22 = vunpack.i.l.bf16 %v9828_v23  ;;  %9937 = vrot.lane.b32.xlu0 %v13279_v19, %s11074_s12  ;;  %v3725_v32 = vadd.f32 %v12875_v26, %v3436_v6 }
 0x285   : > { %vm3964_vm8 = vcmp.gt.f32.partialorder %v3722_v46, 0.0  ;;  %v4028_v29 = vmul.f32 0.01, %v3722_v46  ;;  %9962 = vrot.lane.b32.xlu1 %v9961_v16, %s11077_s18  ;;  %v9971_v39 = vpack.i.bf16 %v4392_v53, %v4391_v1  ;;  %v2966_v33 = vsel %vm2717_vm2, %v2902_v56, %v9820_v27  ;;  %7192 = vmatpush1.bf16.msra.mxu1 %v10929_v48 }
 0x286   : > { %v2772_v52 = vsel %vm2717_vm2, %v13239_v38, %v9824_v28  ;;  %v9833_v10 = vpop.permute.xlu1 %9832  ;;  %v3029_v59 = vsel %vm2782_vm3, %v2965_v11, %v9829_v22  ;;  %v3030_v12 = vsel %vm2782_vm3, %v2966_v33, %v9830_v36  ;;  %v2773_v54 = vsel %vm2717_vm2, %v13236_v15, %v9825_v50  ;;  %v852_v38 = vld [vmem:[#allocation2 + $0x2e9] sm:$0xff]  ;;  %7193 = vmatprep.subr.bf16.mxu1 %v16629_v9  ;;  %v13310_v33 = vpop.f32.mrb[37].mxu1 }
 0x287   : > { %v4092_v4 = vsel %vm3964_vm8, %v3722_v46, %v4028_v29  ;;  %vm3965_vm9 = vcmp.gt.f32.partialorder %v3725_v32, 0.0  ;;  %v4029_v26 = vmul.f32 0.01, %v3725_v32  ;;  %v9835_v56 = vunpack.i.h.bf16 %v9833_v10  ;;  %v9838_v6 = vpop.permute.xlu0 %9837  ;;  %v3440_v3 = vpop.f32.mrb[12].mxu0  ;;  %v10930_v46 = vld [vmem:[%s16378_s3 + $0x70] sm:$0xff]  }
 0x288   : > { %4265 = vst.msk [vmem:[#allocation3 + $0x49] sm:$0xff] %vm365_vm0, %v4092_v4  ;;  %v9834_v27 = vunpack.i.l.bf16 %v9833_v10  ;;  %v9840_v16 = vunpack.i.h.bf16 %v9838_v6  ;;  %v9839_v53 = vunpack.i.l.bf16 %v9838_v6  ;;  %v3441_v15 = vadd.f32 %v13186_v58, %v3440_v3  ;;  %v3442_v50 = vpop.f32.mrb[13].mxu0  ;;  %v4710_v23 = vld [vmem:[#allocation3 + $0x30] sm:$0xff]  ;;  %v4711_v11 = vld [vmem:[#allocation3 + $0x38] sm:$0xff] }
 0x289   : > { %9972 = vrot.lane.b32.xlu1 %v9971_v39, %s11074_s12  ;;  %v3121_v28 = vpack.c.bf16 %v3030_v12, %v3029_v59  ;;  %v4093_v29 = vsel %vm3965_vm9, %v3725_v32, %v4029_v26  ;;  %v3443_v48 = vpop.f32.mrb[14].mxu0  ;;  %v9946_v36 = vpack.i.bf16 %v4711_v11, %v4710_v23  ;;  %v2838_v1 = vsel %vm2782_vm3, %v2773_v54, %v9835_v56  ;;  %v4775_v26 = vld [vmem:[#allocation3 + $0x39] sm:$0xff]  ;;  %v4774_v3 = vld [vmem:[#allocation3 + $0x31] sm:$0xff] }
 0x28a   : > { %v2837_v22 = vsel %vm2782_vm3, %v2772_v52, %v9834_v27  ;;  %v9124_v39 = vunpack.i.l.bf16 %v16641_v20  ;;  %4266 = vst.msk [vmem:[#allocation3 + $0x51] sm:$0xff] %vm365_vm0, %v4093_v29  ;;  %v2903_v4 = vsel %vm365_vm0, %v852_v38, %v9839_v53  ;;  %v3730_v10 = vadd.f32 %v12848_v42, %v3441_v15  ;;  %v9843_v12 = vpop.permute.xlu1 %9842  ;;  %v3445_v32 = vpop.f32.mrb[15].mxu0  ;;  %7194 = vmatpush1.bf16.msra.mxu1 %v10930_v46  ;;  %v10931_v42 = vld [vmem:[%s16378_s3 + $0x78] sm:$0xff]   ;;  %v16642_v38 = vld [vmem:[#allocation88_spill] sm:$0xff] }
 0x28b   : > { %v3444_v59 = vadd.f32 %v13186_v58, %v3443_v48  ;;  %3630 = vmatprep.mubr.bf16.mxu0 %v3121_v28  ;;  %v2904_v52 = vsel %vm365_vm0, %v853_v44, %v9840_v16  ;;  %v9845_v27 = vunpack.i.h.bf16 %v9843_v12  ;;  %v9844_v54 = vunpack.i.l.bf16 %v9843_v12  ;;  %v9848_v56 = vpop.permute.xlu0 %9847  ;;  %9947 = vrot.lane.b32.xlu0 %v9946_v36, %s11076_s19  ;;  %v13326_v44 = vld [vmem:[#allocation3 + $0x32] sm:$0xff]  ;;  %v13328_v16 = vld [vmem:[#allocation3 + $0x3a] sm:$0xff]  ;;  %v13331_v46 = vpop.f32.mrb[38].mxu1 }
 0x28c   : > { %v3120_v6 = vpack.c.bf16 %v2838_v1, %v2837_v22  ;;  %v9130_v53 = vunpack.i.h.bf16 %v16642_v38  ;;  %vm3966_vm10 = vcmp.gt.f32.partialorder %v3730_v10, 0.0  ;;  %v4030_v15 = vmul.f32 0.01, %v3730_v10  ;;  %7195 = vmatprep.subr.bf16.mxu1 %v16629_v9  ;;  %v13334_v48 = vpop.f32.mrb[39].mxu1 }
 0x28d   : > { %v3733_v50 = vadd.f32 %v12867_v51, %v3444_v59  ;;  %9982 = vrot.lane.b32.xlu1 %v13279_v19, %s11076_s19  ;;  %v9850_v28 = vunpack.i.h.bf16 %v9848_v56  ;;  %v9849_v23 = vunpack.i.l.bf16 %v9848_v56  ;;  %v9956_v11 = vpack.i.bf16 %v4775_v26, %v4774_v3 }
 0x28e   : > { %3631 = vmatmul.mubr.bf16.gmra.mrb[108].mxu0 %v3120_v6  ;;  %v2967_v29 = vsel %vm2717_vm2, %v2903_v4, %v9844_v54  ;;  %v4094_v51 = vsel %vm3966_vm10, %v3730_v10, %v4030_v15  ;;  %v9853_v19 = vpop.permute.xlu1 %9852  ;;  %v2968_v1 = vsel %vm2717_vm2, %v2904_v52, %v9845_v27  ;;  %v9129_v59 = vunpack.i.l.bf16 %v16642_v38  ;;  %7196 = vmatpush1.bf16.msra.mxu1 %v10931_v42 }
 0x28f   : > { %vm3967_vm11 = vcmp.gt.f32.partialorder %v3733_v50, 0.0  ;;  %v4031_v22 = vmul.f32 0.01, %v3733_v50  ;;  %4267 = vst.msk [vmem:[#allocation3 + $0x61] sm:$0xff] %vm365_vm0, %v4094_v51  ;;  %v9855_v9 = vunpack.i.h.bf16 %v9853_v19  ;;  %v9854_v12 = vunpack.i.l.bf16 %v9853_v19  ;;  %v9858_v32 = vpop.permute.xlu0 %9857  ;;  %v3448_v56 = vpop.f32.mrb[16].mxu0  ;;  %9957 = vrot.lane.b32.xlu0 %v9956_v11, %s11077_s18  ;;  %8914 = vmatprep.subr.bf16.mxu1 %v13042_v21  ;;  %v854_v19 = vld [vmem:[#allocation2 + $0x301] sm:$0xff] }
 0x290   : > { %v13342_v4 = vpack.i.bf16 %v13328_v16, %v13326_v44  ;;  %v9860_v26 = vunpack.i.h.bf16 %v9858_v32  ;;  %v9859_v54 = vunpack.i.l.bf16 %v9858_v32  ;;  %v3449_v52 = vadd.f32 %v13186_v58, %v3448_v56  ;;  %v3450_v27 = vpop.f32.mrb[17].mxu0  ;;  %v855_v21 = vld [vmem:[#allocation2 + $0x309] sm:$0xff] }
 0x291   : > { %v4095_v10 = vsel %vm3967_vm11, %v3733_v50, %v4031_v22  ;;  %9992 = vrot.lane.b32.xlu1 %v9946_v36, %s11077_s18  ;;  %v3451_v6 = vpop.f32.mrb[18].mxu0  ;;  %v3031_v3 = vsel %vm2782_vm3, %v2967_v29, %v9854_v12  ;;  %v3032_v15 = vsel %vm2782_vm3, %v2968_v1, %v9855_v9  ;;  %v2774_v42 = vsel %vm2717_vm2, %v13269_v43, %v9849_v23  ;;  %v4713_v51 = vld [vmem:[#allocation3 + $0x50] sm:$0xff]  ;;  %v4712_v12 = vld [vmem:[#allocation3 + $0x48] sm:$0xff] }
 0x292   : > { %4268 = vst.msk [vmem:[#allocation3 + $0x69] sm:$0xff] %vm365_vm0, %v4095_v10  ;;  %v2775_v50 = vsel %vm2717_vm2, %v13250_v47, %v9850_v28  ;;  %v3452_v22 = vadd.f32 %v13186_v58, %v3451_v6  ;;  %v3738_v36 = vadd.f32 %v12917_v35, %v3449_v52  ;;  %v9863_v32 = vpop.permute.xlu1 %9862  ;;  %v3453_v56 = vpop.f32.mrb[19].mxu0  ;;  %v3124_v10 = vpack.c.bf16 %v3032_v15, %v3031_v3  ;;  %v599_v1 = vld [vmem:[#allocation2 + $0x2f0] sm:$0xff]  ;;  %v598_v6 = vld [vmem:[#allocation2 + $0x2e8] sm:$0xff] }
 0x293   : > { %v2839_v29 = vsel %vm2782_vm3, %v2774_v42, %v9859_v54  ;;  %v9865_v9 = vunpack.i.h.bf16 %v9863_v32  ;;  %v9864_v27 = vunpack.i.l.bf16 %v9863_v32  ;;  %v9868_v43 = vpop.permute.xlu0 %9867  ;;  %9967 = vrot.lane.b32.xlu0 %v13342_v4, %s11074_s12  ;;  %v2840_v47 = vsel %vm2782_vm3, %v2775_v50, %v9860_v26  ;;  %v601_v50 = vld [vmem:[#allocation2 + $0x308] sm:$0xff]  ;;  %v4777_v56 = vld [vmem:[#allocation3 + $0x51] sm:$0xff] }
 0x294   : > { %v9976_v28 = vpack.i.bf16 %v4713_v51, %v4712_v12  ;;  %vm3968_vm12 = vcmp.gt.f32.partialorder %v3738_v36, 0.0  ;;  %v4032_v35 = vmul.f32 0.01, %v3738_v36  ;;  %v9870_v23 = vunpack.i.h.bf16 %v9868_v43  ;;  %3638 = vmatprep.mubr.bf16.mxu0 %v3124_v10 }
 0x295   : > { %v9869_v52 = vunpack.i.l.bf16 %v9868_v43  ;;  %10002 = vrot.lane.b32.xlu1 %v9956_v11, %s11074_s12  ;;  %v2906_v54 = vsel %vm365_vm0, %v855_v21, %v9865_v9  ;;  %v2905_v3 = vsel %vm365_vm0, %v854_v19, %v9864_v27  ;;  %v3741_v15 = vadd.f32 %v12931_v7, %v3452_v22  ;;  %v4776_v27 = vld [vmem:[#allocation3 + $0x49] sm:$0xff] }
 0x296   : > { %v3123_v42 = vpack.c.bf16 %v2840_v47, %v2839_v29  ;;  %v2712_v26 = vsel %vm365_vm0, %v599_v1, %v9125_v55  ;;  %v4096_v51 = vsel %vm3968_vm12, %v3738_v36, %v4032_v35  ;;  %v9873_v32 = vpop.permute.xlu1 %9872  ;;  %v2970_v11 = vsel %vm2717_vm2, %v2906_v54, %v9870_v23 }
 0x297   : > { %v2969_v12 = vsel %vm2717_vm2, %v2905_v3, %v9869_v52  ;;  %4269 = vst.msk [vmem:[#allocation3 + $0x79] sm:$0xff] %vm365_vm0, %v4096_v51  ;;  %vm3969_vm13 = vcmp.gt.f32.partialorder %v3741_v15, 0.0  ;;  %v4033_v21 = vmul.f32 0.01, %v3741_v15  ;;  %v9875_v19 = vunpack.i.h.bf16 %v9873_v32  ;;  %v9878_v22 = vpop.permute.xlu0 %9877  ;;  %v3456_v10 = vpop.f32.mrb[20].mxu0  ;;  %9977 = vrot.lane.b32.xlu0 %v9976_v28, %s11076_s19  ;;  %v857_v51 = vld [vmem:[#allocation2 + $0x321] sm:$0xff] }
 0x298   : > { %3639 = vmatmul.mubr.bf16.gmra.mrb[112].mxu0 %v3123_v42  ;;  %v9874_v7 = vunpack.i.l.bf16 %v9873_v32  ;;  %v2711_v55 = vsel %vm365_vm0, %v598_v6, %v9124_v39  ;;  %v9880_v36 = vunpack.i.h.bf16 %v9878_v22  ;;  %v9879_v29 = vunpack.i.l.bf16 %v9878_v22  ;;  %v3458_v9 = vpop.f32.mrb[21].mxu0  ;;  %v13391_v42 = vld [vmem:[#allocation3 + $0x52] sm:$0xff] }
 0x299   : > { %v3457_v1 = vadd.f32 %v13186_v58, %v3456_v10  ;;  %10012 = vrot.lane.b32.xlu1 %v13342_v4, %s11076_s19  ;;  %v13380_v43 = vsel %vm365_vm0, %v601_v50, %v9130_v53  ;;  %v4097_v47 = vsel %vm3969_vm13, %v3741_v15, %v4033_v21  ;;  %v3459_v35 = vpop.f32.mrb[22].mxu0  ;;  %v9986_v20 = vpack.i.bf16 %v4777_v56, %v4776_v27  ;;  %v13389_v53 = vld [vmem:[#allocation3 + $0x4a] sm:$0xff]  ;;  %v13395_v21 = vpop.f32.mrb[40].mxu1 }
 0x29a   : > { %v2776_v39 = vsel %vm2717_vm2, %v2711_v55, %v9874_v7  ;;  %4270 = vst.msk [vmem:[#allocation3 + $0x81] sm:$0xff] %vm365_vm0, %v4097_v47  ;;  %v3460_v52 = vadd.f32 %v13186_v58, %v3459_v35  ;;  %v9883_v4 = vpop.permute.xlu1 %9882  ;;  %v3461_v6 = vpop.f32.mrb[23].mxu0  ;;  %v3033_v54 = vsel %vm2782_vm3, %v2969_v12, %v9879_v29  ;;  %v3034_v3 = vsel %vm2782_vm3, %v2970_v11, %v9880_v36  ;;  %v856_v11 = vld [vmem:[#allocation2 + $0x319] sm:$0xff]  ;;  %v4715_v47 = vld [vmem:[#allocation3 + $0x68] sm:$0xff] }
 0x29b   : > { %v3746_v23 = vadd.f32 %v12913_v34, %v3457_v1  ;;  %v9885_v15 = vunpack.i.h.bf16 %v9883_v4  ;;  %v9884_v50 = vunpack.i.l.bf16 %v9883_v4  ;;  %v9888_v32 = vpop.permute.xlu0 %9887  ;;  %9987 = vrot.lane.b32.xlu0 %v9986_v20, %s11077_s18  ;;  %v3127_v56 = vpack.c.bf16 %v3034_v3, %v3033_v54  ;;  %v13399_v10 = vpop.f32.mrb[41].mxu1  ;;  %v600_v55 = vld [vmem:[#allocation2 + $0x300] sm:$0xff] }
 0x29c   : > { %v2777_v34 = vsel %vm2717_vm2, %v2712_v26, %v9875_v19  ;;  %v3749_v12 = vadd.f32 %v12925_v25, %v3460_v52  ;;  %v9890_v22 = vunpack.i.h.bf16 %v9888_v32  ;;  %v9889_v36 = vunpack.i.l.bf16 %v9888_v32  ;;  %v4779_v32 = vld [vmem:[#allocation3 + $0x69] sm:$0xff] }
 0x29d   : > { %vm3970_vm14 = vcmp.gt.f32.partialorder %v3746_v23, 0.0  ;;  %v4034_v7 = vmul.f32 0.01, %v3746_v23  ;;  %10022 = vrot.lane.b32.xlu1 %v9976_v28, %s11077_s18  ;;  %3646 = vmatprep.mubr.bf16.mxu0 %v3127_v56  ;;  %v9996_v29 = vpack.i.bf16 %v13391_v42, %v13389_v53  ;;  %v2841_v26 = vsel %vm2782_vm3, %v2776_v39, %v9884_v50  ;;  %v13414_v56 = vpop.f32.mrb[42].mxu1 }
 0x29e   : > { %v2842_v19 = vsel %vm2782_vm3, %v2777_v34, %v9885_v15  ;;  %vm3971_vm15 = vcmp.gt.f32.partialorder %v3749_v12, 0.0  ;;  %v4035_v9 = vmul.f32 0.01, %v3749_v12  ;;  %v2908_v25 = vsel %vm365_vm0, %v857_v51, %v9890_v22  ;;  %v9893_v27 = vpop.permute.xlu1 %9892  ;;  %v4714_v51 = vld [vmem:[#allocation3 + $0x60] sm:$0xff]  ;;  %v16643_v34 = vld [vmem:[#allocation89_spill] sm:$0xff]  ;;  %v13419_v22 = vpop.f32.mrb[43].mxu1 }
 0x29f   : > { %v4098_v1 = vsel %vm3970_vm14, %v3746_v23, %v4034_v7  ;;  %v2907_v28 = vsel %vm365_vm0, %v856_v11, %v9889_v36  ;;  %v9895_v35 = vunpack.i.h.bf16 %v9893_v27  ;;  %v9894_v52 = vunpack.i.l.bf16 %v9893_v27  ;;  %v9898_v4 = vpop.permute.xlu0 %9897  ;;  %v3464_v6 = vpop.f32.mrb[24].mxu0  ;;  %9997 = vrot.lane.b32.xlu0 %v9996_v29, %s11074_s12 }
 0x2a0   : > { %4271 = vst.msk [vmem:[#allocation3 + $0x91] sm:$0xff] %vm365_vm0, %v4098_v1  ;;  %v3126_v39 = vpack.c.bf16 %v2842_v19, %v2841_v26  ;;  %v2713_v23 = vsel %vm365_vm0, %v600_v55, %v9129_v59  ;;  %v4099_v54 = vsel %vm3971_vm15, %v3749_v12, %v4035_v9  ;;  %v9899_v3 = vunpack.i.l.bf16 %v9898_v4  ;;  %v3466_v50 = vpop.f32.mrb[25].mxu0  ;;  %v4778_v19 = vld [vmem:[#allocation3 + $0x61] sm:$0xff] }
 0x2a1   : > { %v3465_v15 = vadd.f32 %v13186_v58, %v3464_v6  ;;  %10032 = vrot.lane.b32.xlu1 %v9986_v20, %s11074_s12  ;;  %v9135_v7 = vunpack.i.h.bf16 %v16643_v34  ;;  %v9134_v11 = vunpack.i.l.bf16 %v16643_v34  ;;  %4272 = vst.msk [vmem:[#allocation3 + $0x99] sm:$0xff] %vm365_vm0, %v4099_v54  ;;  %v9900_v38 = vunpack.i.h.bf16 %v9898_v4  ;;  %v3467_v59 = vpop.f32.mrb[26].mxu0 }
 0x2a2   : > { %3647 = vmatmul.mubr.bf16.gmra.mrb[116].mxu0 %v3126_v39  ;;  %v10006_v12 = vpack.i.bf16 %v4715_v47, %v4714_v51  ;;  %v3468_v55 = vadd.f32 %v13186_v58, %v3467_v59  ;;  %v9903_v36 = vpop.permute.xlu1 %9902  ;;  %v3469_v26 = vpop.f32.mrb[27].mxu0  ;;  %v2971_v1 = vsel %vm2717_vm2, %v2907_v28, %v9894_v52  ;;  %v2972_v9 = vsel %vm2717_vm2, %v2908_v25, %v9895_v35 }
 0x2a3   : > { %v3754_v20 = vadd.f32 %v12967_v13, %v3465_v15  ;;  %v9905_v27 = vunpack.i.h.bf16 %v9903_v36  ;;  %v9904_v6 = vunpack.i.l.bf16 %v9903_v36  ;;  %v9908_v54 = vpop.permute.xlu0 %9907  ;;  %v10016_v4 = vpack.i.bf16 %v4779_v32, %v4778_v19  ;;  %v858_v15 = vld [vmem:[#allocation2 + $0x331] sm:$0xff]  ;;  %v859_v32 = vld [vmem:[#allocation2 + $0x339] sm:$0xff]  ;;  %v13435_v26 = vld [vmem:[#allocation3 + $0x62] sm:$0xff] }
 0x2a4   : > { %10007 = vrot.lane.b32.xlu0 %v10006_v12, %s11076_s19  ;;  %v2778_v47 = vsel %vm2717_vm2, %v2713_v23, %v9899_v3  ;;  %v9910_v50 = vunpack.i.h.bf16 %v9908_v54  ;;  %v9909_v51 = vunpack.i.l.bf16 %v9908_v54  ;;  %v3757_v13 = vadd.f32 %v12989_v14, %v3468_v55 }
 0x2a5   : > { %vm3972_vm1 = vcmp.gt.f32.partialorder %v3754_v20, 0.0  ;;  %v4036_v39 = vmul.f32 0.01, %v3754_v20  ;;  %10042 = vrot.lane.b32.xlu1 %v9996_v29, %s11076_s19  ;;  %v3035_v28 = vsel %vm2782_vm3, %v2971_v1, %v9904_v6  ;;  %v3036_v25 = vsel %vm2782_vm3, %v2972_v9, %v9905_v27  ;;  %v13437_v29 = vld [vmem:[#allocation3 + $0x6a] sm:$0xff] }
 0x2a6   : > { %v2779_v35 = vsel %vm2717_vm2, %v13380_v43, %v9900_v38  ;;  %v9913_v59 = vpop.permute.xlu1 %9912  ;;  %v3130_v23 = vpack.c.bf16 %v3036_v25, %v3035_v28  ;;  %v2843_v3 = vsel %vm2782_vm3, %v2778_v47, %v9909_v51  ;;  %vm3973_vm4 = vcmp.gt.f32.partialorder %v3757_v13, 0.0  ;;  %v602_v28 = vld [vmem:[#allocation2 + $0x318] sm:$0xff]  ;;  %v603_v25 = vld [vmem:[#allocation2 + $0x320] sm:$0xff] }
 0x2a7   : > { %v4100_v52 = vsel %vm3972_vm1, %v3754_v20, %v4036_v39  ;;  %v2844_v36 = vsel %vm2782_vm3, %v2779_v35, %v9910_v50  ;;  %v4037_v14 = vmul.f32 0.01, %v3757_v13  ;;  %v9915_v55 = vunpack.i.h.bf16 %v9913_v59  ;;  %v3472_v1 = vpop.f32.mrb[28].mxu0  ;;  %v9918_v43 = vpop.permute.xlu0 %9917 }
 0x2a8   : > { %4273 = vst.msk [vmem:[#allocation3 + $0xa9] sm:$0xff] %vm365_vm0, %v4100_v52  ;;  %v9914_v19 = vunpack.i.l.bf16 %v9913_v59  ;;  %10017 = vrot.lane.b32.xlu0 %v10016_v4, %s11077_s18  ;;  %v3473_v38 = vadd.f32 %v13186_v58, %v3472_v1  ;;  %v3474_v20 = vpop.f32.mrb[29].mxu0  ;;  %3654 = vmatprep.mubr.bf16.mxu0 %v3130_v23  ;;  %v9920_v9 = vunpack.i.h.bf16 %v9918_v43  ;;  %v9919_v27 = vunpack.i.l.bf16 %v9918_v43 }
 0x2a9   : > { %10052 = vrot.lane.b32.xlu1 %v10006_v12, %s11077_s18  ;;  %v3129_v6 = vpack.c.bf16 %v2844_v36, %v2843_v3  ;;  %v4101_v54 = vsel %vm3973_vm4, %v3757_v13, %v4037_v14  ;;  %v2910_v47 = vsel %vm365_vm0, %v859_v32, %v9915_v55  ;;  %v3475_v50 = vpop.f32.mrb[30].mxu0  ;;  %v10026_v51 = vpack.i.bf16 %v13437_v29, %v13435_v26  ;;  %v4717_v13 = vld [vmem:[#allocation3 + $0x80] sm:$0xff] }
 0x2aa   : > { %v2909_v39 = vsel %vm365_vm0, %v858_v15, %v9914_v19  ;;  %4274 = vst.msk [vmem:[#allocation3 + $0xb1] sm:$0xff] %vm365_vm0, %v4101_v54  ;;  %v3762_v12 = vadd.f32 %v12962_v45, %v3473_v38  ;;  %v3476_v35 = vadd.f32 %v13186_v58, %v3475_v50  ;;  %v9923_v52 = vpop.permute.xlu1 %9922  ;;  %v3477_v59 = vpop.f32.mrb[31].mxu0  ;;  %v2974_v36 = vsel %vm2717_vm2, %v2910_v47, %v9920_v9  ;;  %v4716_v19 = vld [vmem:[#allocation3 + $0x78] sm:$0xff]  ;;  %v4781_v54 = vld [vmem:[#allocation3 + $0x81] sm:$0xff] }
 0x2ab   : > { %3655 = vmatmul.mubr.bf16.gmra.mrb[120].mxu0 %v3129_v6  ;;  %v9925_v23 = vunpack.i.h.bf16 %v9923_v52  ;;  %v9924_v32 = vunpack.i.l.bf16 %v9923_v52  ;;  %v9928_v15 = vpop.permute.xlu0 %9927  ;;  %v2973_v3 = vsel %vm2717_vm2, %v2909_v39, %v9919_v27  ;;  %v2716_v1 = vsel %vm365_vm0, %v603_v25, %v9135_v7  ;;  %v4780_v52 = vld [vmem:[#allocation3 + $0x79] sm:$0xff] }
 0x2ac   : > { %10027 = vrot.lane.b32.xlu0 %v10026_v51, %s11074_s12  ;;  %vm3974_vm5 = vcmp.gt.f32.partialorder %v3762_v12, 0.0  ;;  %v4038_v14 = vmul.f32 0.01, %v3762_v12  ;;  %v3765_v55 = vadd.f32 %v12982_v61, %v3476_v35  ;;  %v9930_v45 = vunpack.i.h.bf16 %v9928_v15 }
 0x2ad   : > { %10062 = vrot.lane.b32.xlu1 %v10016_v4, %s11074_s12  ;;  %v2715_v43 = vsel %vm365_vm0, %v602_v28, %v9134_v11  ;;  %v9929_v38 = vunpack.i.l.bf16 %v9928_v15  ;;  %v10036_v20 = vpack.i.bf16 %v4717_v13, %v4716_v19  ;;  %v13462_v4 = vpop.f32.mrb[44].mxu1  ;;  %v2781_v59 = vsel %vm2717_vm2, %v2716_v1, %v9925_v23  ;;  %v13480_v19 = vld [vmem:[#allocation3 + $0x82] sm:$0xff] }
 0x2ae   : > { %v4102_v27 = vsel %vm3974_vm5, %v3762_v12, %v4038_v14  ;;  %vm3975_vm6 = vcmp.gt.f32.partialorder %v3765_v55, 0.0  ;;  %v4039_v9 = vmul.f32 0.01, %v3765_v55  ;;  %v9933_v6 = vpop.permute.xlu1 %9932  ;;  %v3038_v61 = vsel %vm2782_vm3, %v2974_v36, %v9930_v45  ;;  %v13468_v50 = vpop.f32.mrb[45].mxu1  ;;  %v13478_v45 = vld [vmem:[#allocation3 + $0x7a] sm:$0xff] }
 0x2af   : > { %4275 = vst.msk [vmem:[#allocation3 + $0xc1] sm:$0xff] %vm365_vm0, %v4102_v27  ;;  %v9935_v47 = vunpack.i.h.bf16 %v9933_v6  ;;  %v9934_v39 = vunpack.i.l.bf16 %v9933_v6  ;;  %v3480_v7 = vpop.f32.mrb[32].mxu0  ;;  %v3037_v34 = vsel %vm2782_vm3, %v2973_v3, %v9929_v38  ;;  %v2780_v11 = vsel %vm2717_vm2, %v2715_v43, %v9924_v32 }
 0x2b0   : > { %10037 = vrot.lane.b32.xlu0 %v10036_v20, %s11076_s19  ;;  %v4103_v28 = vsel %vm3975_vm6, %v3765_v55, %v4039_v9  ;;  %v3481_v25 = vadd.f32 %v13186_v58, %v3480_v7  ;;  %v3482_v12 = vpop.f32.mrb[33].mxu0  ;;  %v3133_v35 = vpack.c.bf16 %v3038_v61, %v3037_v34  ;;  %v10046_v15 = vpack.i.bf16 %v4781_v54, %v4780_v52  ;;  %v4718_v54 = vld [vmem:[#allocation3 + $0x90] sm:$0xff]  ;;  %v13503_v34 = vld [vmem:[%s16377_s2] ss:$0 sm:$0xff] }
 0x2b1   : > { %10072 = vrot.lane.b32.xlu1 %v10026_v51, %s11076_s19  ;;  %4276 = vst.msk [vmem:[#allocation3 + $0xc9] sm:$0xff] %vm365_vm0, %v4103_v28  ;;  %v3483_v13 = vpop.f32.mrb[34].mxu0  ;;  %v2845_v3 = vsel %vm2782_vm3, %v2780_v11, %v9934_v39  ;;  %v2846_v32 = vsel %vm2782_vm3, %v2781_v59, %v9935_v47  ;;  %v6824_v23 = vpack.c.bf16 %v13328_v16, %v13326_v44  ;;  %v4719_v44 = vld [vmem:[#allocation3 + $0x98] sm:$0xff] }
 0x2b2   : > { %v3484_v36 = vadd.f32 %v13186_v58, %v3483_v13  ;;  %v3770_v14 = vadd.f32 %v13016_v31, %v3481_v25  ;;  %v3485_v55 = vpop.f32.mrb[35].mxu0  ;;  %3662 = vmatprep.mubr.bf16.mxu0 %v3133_v35  ;;  %v3132_v51 = vpack.c.bf16 %v2846_v32, %v2845_v3  ;;  %v13487_v31 = vpop.f32.mrb[46].mxu1  ;;  %v10056_v38 = vpack.i.bf16 %v13480_v19, %v13478_v45  ;;  %v4783_v25 = vld [vmem:[#allocation3 + $0x99] sm:$0xff]  ;;  %v4782_v52 = vld [vmem:[#allocation3 + $0x91] sm:$0xff] }
 0x2b3   : > { %v13492_v27 = vpop.f32.mrb[47].mxu1  ;;  %v10066_v39 = vpack.i.bf16 %v4719_v44, %v4718_v54  ;;  %v6830_v12 = vpack.c.bf16 %v13437_v29, %v13435_v26  ;;  %v10076_v59 = vpack.i.bf16 %v4783_v25, %v4782_v52  ;;  %v4720_v44 = vld [vmem:[#allocation3 + $0xa8] sm:$0xff] }
 0x2b4   : > { %10047 = vrot.lane.b32.xlu0 %v10046_v15, %s11077_s18  ;;  %vm3976_vm7 = vcmp.gt.f32.partialorder %v3770_v14, 0.0  ;;  %v4040_v1 = vmul.f32 0.01, %v3770_v14  ;;  %v3773_v43 = vadd.f32 %v13034_v62, %v3484_v36  ;;  %3663 = vmatmul.mubr.bf16.gmra.mrb[124].mxu0 %v3132_v51 }
 0x2b5   : > { %10082 = vrot.lane.b32.xlu1 %v10036_v20, %s11077_s18  ;;  %8828 = vmatprep.mubr.msk.bf16.mxu0 %vm365_vm0, %v6824_v23  ;;  %v6833_v23 = vpack.c.bf16 %v13480_v19, %v13478_v45 }
 0x2b6   : > { %v4104_v9 = vsel %vm3976_vm7, %v3770_v14, %v4040_v1  ;;  %vm3977_vm8 = vcmp.gt.f32.partialorder %v3773_v43, 0.0  ;;  %v4041_v6 = vmul.f32 0.01, %v3773_v43  ;;  %v4721_v1 = vld [vmem:[#allocation3 + $0xb0] sm:$0xff] }
 0x2b7   : > { %4277 = vst.msk [vmem:[#allocation3 + $0xd9] sm:$0xff] %vm365_vm0, %v4104_v9  ;;  %v3488_v16 = vpop.f32.mrb[36].mxu0 }
 0x2b8   : > { %10057 = vrot.lane.b32.xlu0 %v10056_v38, %s11074_s12  ;;  %v4105_v62 = vsel %vm3977_vm8, %v3773_v43, %v4041_v6  ;;  %v3489_v20 = vadd.f32 %v13186_v58, %v3488_v16  ;;  %v3490_v61 = vpop.f32.mrb[37].mxu0  ;;  %v6827_v58 = vpack.c.bf16 %v13391_v42, %v13389_v53  ;;  %v4655_v42 = vld [vmem:[#allocation3 + $0x92] sm:$0xff] }
 0x2b9   : > { %10092 = vrot.lane.b32.xlu1 %v10046_v15, %s11074_s12  ;;  %4278 = vst.msk [vmem:[#allocation3 + $0xe1] sm:$0xff] %vm365_vm0, %v4105_v62  ;;  %v3491_v47 = vpop.f32.mrb[38].mxu0  ;;  %v4656_v15 = vld [vmem:[#allocation3 + $0x9a] sm:$0xff]  ;;  %v4785_v62 = vld [vmem:[#allocation3 + $0xb1] sm:$0xff] }
 0x2ba   : > { %v3778_v7 = vadd.f32 %v13012_v30, %v3489_v20  ;;  %v3492_v11 = vadd.f32 %v13503_v34, %v3491_v47  ;;  %v3493_v28 = vpop.f32.mrb[39].mxu0  ;;  %v10086_v36 = vpack.i.bf16 %v4656_v15, %v4655_v42  ;;  %v4849_v61 = vld [vmem:[#allocation3 + $0xb2] sm:$0xff] }
 0x2bb   : > { %v13539_v28 = vld [vmem:[#allocation3 + $0xca] sm:$0xff] }
 0x2bc   : > { %10067 = vrot.lane.b32.xlu0 %v10066_v39, %s11076_s19  ;;  %vm3978_vm9 = vcmp.gt.f32.partialorder %v3778_v7, 0.0  ;;  %v4042_v35 = vmul.f32 0.01, %v3778_v7  ;;  %v3781_v30 = vadd.f32 %v13028_v2, %v3492_v11  ;;  %8829 = vmatmul.mubr.msk.bf16.vlgmr.msra.gmra.mrb[128].mxu0 %vm365_vm0, %v6827_v58  ;;  %v13537_v11 = vld [vmem:[#allocation3 + $0xc2] sm:$0xff] }
 0x2bd   : > { %10102 = vrot.lane.b32.xlu1 %v10056_v38, %s11076_s19  ;;  %8832 = vmatprep.mubr.msk.bf16.mxu0 %vm365_vm0, %v6830_v12  ;;  %v13524_v43 = vpop.f32.mrb[48].mxu1  ;;  %v6836_v38 = vpack.c.bf16 %v4656_v15, %v4655_v42 }
 0x2be   : > { %v4106_v13 = vsel %vm3978_vm9, %v3778_v7, %v4042_v35  ;;  %vm3979_vm10 = vcmp.gt.f32.partialorder %v3781_v30, 0.0  ;;  %v4043_v53 = vmul.f32 0.01, %v3781_v30  ;;  %v13531_v16 = vpop.f32.mrb[49].mxu1  ;;  %v4784_v7 = vld [vmem:[#allocation3 + $0xa9] sm:$0xff] }
 0x2bf   : > { %4279 = vst.msk [vmem:[#allocation3 + $0xf1] sm:$0xff] %vm365_vm0, %v4106_v13  ;;  %v3496_v26 = vpop.f32.mrb[40].mxu0  ;;  %v13541_v58 = vpop.f32.mrb[50].mxu1  ;;  %v10106_v12 = vpack.i.bf16 %v4785_v62, %v4784_v7 }
 0x2c0   : > { %10077 = vrot.lane.b32.xlu0 %v10076_v59, %s11077_s18  ;;  %v4107_v29 = vsel %vm3979_vm10, %v3781_v30, %v4043_v53  ;;  %v3497_v2 = vadd.f32 %v13503_v34, %v3496_v26  ;;  %v3498_v3 = vpop.f32.mrb[41].mxu0  ;;  %v13544_v35 = vpop.f32.mrb[51].mxu1  ;;  %v6842_v53 = vpack.c.bf16 %v13539_v28, %v13537_v11 }
 0x2c1   : > { %10112 = vrot.lane.b32.xlu1 %v10066_v39, %s11077_s18  ;;  %4280 = vst.msk [vmem:[#allocation3 + $0xf9] sm:$0xff] %vm365_vm0, %v4107_v29  ;;  %v3499_v32 = vpop.f32.mrb[42].mxu0 }
 0x2c2   : > { %v3500_v14 = vadd.f32 %v13503_v34, %v3499_v32  ;;  %v3786_v55 = vadd.f32 %v13068_v57, %v3497_v2  ;;  %v3501_v51 = vpop.f32.mrb[43].mxu0  ;;  %v10096_v57 = vpack.i.bf16 %v4721_v1, %v4720_v44  ;;  %v4723_v2 = vld [vmem:[#allocation3 + $0xc8] sm:$0xff]  ;;  %v13557_v32 = vld [vmem:[#allocation3 + $0xda] sm:$0xff] }
 0x2c3   : > { %v4722_v51 = vld [vmem:[#allocation3 + $0xc0] sm:$0xff] }
 0x2c4   : > { %10087 = vrot.lane.b32.xlu0 %v10086_v36, %s11074_s12  ;;  %vm3980_vm11 = vcmp.gt.f32.partialorder %v3786_v55, 0.0  ;;  %v4044_v9 = vmul.f32 0.01, %v3786_v55  ;;  %v3789_v6 = vadd.f32 %v13079_v8, %v3500_v14  ;;  %8833 = vmatmul.mubr.msk.bf16.gmra.mrb[132].mxu0 %vm365_vm0, %v6833_v23  ;;  %v4848_v8 = vld [vmem:[#allocation3 + $0xaa] sm:$0xff] }
 0x2c5   : > { %10122 = vrot.lane.b32.xlu1 %v10076_v59, %s11074_s12  ;;  %8836 = vmatprep.mubr.msk.bf16.mxu0 %vm365_vm0, %v6836_v38  ;;  %v6839_v13 = vpack.c.bf16 %v4849_v61, %v4848_v8 }
 0x2c6   : > { %v4108_v45 = vsel %vm3980_vm11, %v3786_v55, %v4044_v9  ;;  %vm3981_vm12 = vcmp.gt.f32.partialorder %v3789_v6, 0.0  ;;  %v4045_v19 = vmul.f32 0.01, %v3789_v6  ;;  %v10126_v9 = vpack.i.bf16 %v4723_v2, %v4722_v51  ;;  %v4725_v2 = vld [vmem:[#allocation3 + $0xe0] sm:$0xff] }
 0x2c7   : > { %4281 = vst.msk [vmem:[#allocation3 + $0x109] sm:$0xff] %vm365_vm0, %v4108_v45  ;;  %v3504_v20 = vpop.f32.mrb[44].mxu0 }
 0x2c8   : > { %10097 = vrot.lane.b32.xlu0 %v10096_v57, %s11076_s19  ;;  %v4109_v54 = vsel %vm3981_vm12, %v3789_v6, %v4045_v19  ;;  %v3505_v47 = vadd.f32 %v13503_v34, %v3504_v20  ;;  %v3506_v39 = vpop.f32.mrb[45].mxu0  ;;  %v13563_v23 = vld [vmem:[#allocation3 + $0xf2] sm:$0xff]  ;;  %v13565_v1 = vld [vmem:[#allocation3 + $0xfa] sm:$0xff]  ;;  %v4787_v19 = vld [vmem:[#allocation3 + $0xc9] sm:$0xff] }
 0x2c9   : > { %10132 = vrot.lane.b32.xlu1 %v10086_v36, %s11076_s19  ;;  %4282 = vst.msk [vmem:[#allocation3 + $0x111] sm:$0xff] %vm365_vm0, %v4109_v54  ;;  %v3507_v25 = vpop.f32.mrb[46].mxu0  ;;  %v13559_v36 = vld [vmem:[#allocation3 + $0xe2] sm:$0xff]  ;;  %v6848_v62 = vpack.c.bf16 %v13565_v1, %v13563_v23 }
 0x2ca   : > { %v3794_v30 = vadd.f32 %v13064_v49, %v3505_v47  ;;  %v3508_v52 = vadd.f32 %v13503_v34, %v3507_v25  ;;  %v3509_v59 = vpop.f32.mrb[47].mxu0  ;;  %v10116_v49 = vpack.i.bf16 %v4849_v61, %v4848_v8  ;;  %v6845_v45 = vpack.c.bf16 %v13559_v36, %v13557_v32  ;;  %v4786_v61 = vld [vmem:[#allocation3 + $0xc1] sm:$0xff] }
 0x2cc   : > { %10107 = vrot.lane.b32.xlu0 %v10106_v12, %s11077_s18  ;;  %vm3982_vm13 = vcmp.gt.f32.partialorder %v3794_v30, 0.0  ;;  %v4046_v42 = vmul.f32 0.01, %v3794_v30  ;;  %v3797_v15 = vadd.f32 %v13077_v5, %v3508_v52  ;;  %8837 = vmatmul.mubr.msk.bf16.gmra.mrb[136].mxu0 %vm365_vm0, %v6839_v13 }
 0x2cd   : > { %10142 = vrot.lane.b32.xlu1 %v10096_v57, %s11077_s18  ;;  %8840 = vmatprep.mubr.msk.bf16.mxu0 %vm365_vm0, %v6842_v53  ;;  %v10146_v53 = vpack.i.bf16 %v13539_v28, %v13537_v11 }
 0x2ce   : > { %v4110_v26 = vsel %vm3982_vm13, %v3794_v30, %v4046_v42  ;;  %vm3983_vm14 = vcmp.gt.f32.partialorder %v3797_v15, 0.0  ;;  %v4047_v29 = vmul.f32 0.01, %v3797_v15 }
 0x2cf   : > { %4283 = vst.msk [vmem:[#allocation3 + $0x121] sm:$0xff] %vm365_vm0, %v4110_v26  ;;  %v3512_v3 = vpop.f32.mrb[48].mxu0 }
 0x2d0   : > { %10117 = vrot.lane.b32.xlu0 %v10116_v49, %s11074_s12  ;;  %v4111_v5 = vsel %vm3983_vm14, %v3797_v15, %v4047_v29  ;;  %v3513_v14 = vadd.f32 %v13503_v34, %v3512_v3  ;;  %v3514_v55 = vpop.f32.mrb[49].mxu0  ;;  %v13581_v7 = vld [vmem:[#allocation3 + $0x10a] sm:$0xff]  ;;  %v13583_v25 = vld [vmem:[#allocation3 + $0x112] sm:$0xff] }
 0x2d1   : > { %10152 = vrot.lane.b32.xlu1 %v10106_v12, %s11074_s12  ;;  %4284 = vst.msk [vmem:[#allocation3 + $0x129] sm:$0xff] %vm365_vm0, %v4111_v5  ;;  %v3515_v38 = vpop.f32.mrb[50].mxu0  ;;  %v6851_v29 = vpack.c.bf16 %v13583_v25, %v13581_v7 }
 0x2d2   : > { %v3516_v6 = vadd.f32 %v13503_v34, %v3515_v38  ;;  %v3802_v44 = vadd.f32 %v13100_v37, %v3513_v14  ;;  %v3517_v57 = vpop.f32.mrb[51].mxu0  ;;  %v10136_v37 = vpack.i.bf16 %v4787_v19, %v4786_v61  ;;  %v4789_v38 = vld [vmem:[#allocation3 + $0xe1] sm:$0xff]  ;;  %v4788_v19 = vld [vmem:[#allocation3 + $0xd9] sm:$0xff] }
 0x2d3   : > { %v13594_v42 = vpop.f32.mrb[52].mxu1  ;;  %v10166_v61 = vpack.i.bf16 %v4789_v38, %v4788_v19  ;;  %v4791_v38 = vld [vmem:[#allocation3 + $0xf9] sm:$0xff] }
 0x2d4   : > { %10127 = vrot.lane.b32.xlu0 %v10126_v9, %s11076_s19  ;;  %vm3984_vm15 = vcmp.gt.f32.partialorder %v3802_v44, 0.0  ;;  %v4048_v20 = vmul.f32 0.01, %v3802_v44  ;;  %v3805_v8 = vadd.f32 %v13120_v18, %v3516_v6  ;;  %8841 = vmatmul.mubr.msk.bf16.gmra.mrb[140].mxu0 %vm365_vm0, %v6845_v45  ;;  %v13600_v3 = vpop.f32.mrb[53].mxu1 }
 0x2d5   : > { %10162 = vrot.lane.b32.xlu1 %v10116_v49, %s11076_s19  ;;  %8844 = vmatprep.mubr.msk.bf16.mxu0 %vm365_vm0, %v6848_v62 }
 0x2d6   : > { %v4112_v54 = vsel %vm3984_vm15, %v3802_v44, %v4048_v20  ;;  %vm3985_vm1 = vcmp.gt.f32.partialorder %v3805_v8, 0.0  ;;  %v4049_v47 = vmul.f32 0.01, %v3805_v8 }
 0x2d7   : > { %4285 = vst.msk [vmem:[#allocation3 + $0x139] sm:$0xff] %vm365_vm0, %v4112_v54  ;;  %v3520_v39 = vpop.f32.mrb[52].mxu0 }
 0x2d8   : > { %10137 = vrot.lane.b32.xlu0 %v10136_v37, %s11077_s18  ;;  %v4113_v18 = vsel %vm3985_vm1, %v3805_v8, %v4049_v47  ;;  %v3521_v12 = vadd.f32 %v13503_v34, %v3520_v39  ;;  %v3522_v30 = vpop.f32.mrb[53].mxu0  ;;  %v13587_v52 = vld [vmem:[#allocation3 + $0x122] sm:$0xff]  ;;  %v13589_v59 = vld [vmem:[#allocation3 + $0x12a] sm:$0xff] }
 0x2d9   : > { %10172 = vrot.lane.b32.xlu1 %v10126_v9, %s11077_s18  ;;  %4286 = vst.msk [vmem:[#allocation3 + $0x141] sm:$0xff] %vm365_vm0, %v4113_v18  ;;  %v3523_v13 = vpop.f32.mrb[54].mxu0  ;;  %v6854_v5 = vpack.c.bf16 %v13589_v59, %v13587_v52  ;;  %v13609_v9 = vpop.f32.mrb[54].mxu1  ;;  %v10176_v30 = vpack.i.bf16 %v13559_v36, %v13557_v32  ;;  %v4726_v32 = vld [vmem:[#allocation3 + $0xf0] sm:$0xff] }
 0x2da   : > { %v3810_v15 = vadd.f32 %v13096_v24, %v3521_v12  ;;  %v3524_v49 = vadd.f32 %v13503_v34, %v3523_v13  ;;  %v3525_v26 = vpop.f32.mrb[55].mxu0  ;;  %v4724_v24 = vld [vmem:[#allocation3 + $0xd8] sm:$0xff] }
 0x2db   : > { %v10156_v14 = vpack.i.bf16 %v4725_v2, %v4724_v24 }
 0x2dc   : > { %10147 = vrot.lane.b32.xlu0 %v10146_v53, %s11074_s12  ;;  %vm3986_vm4 = vcmp.gt.f32.partialorder %v3810_v15, 0.0  ;;  %v4050_v11 = vmul.f32 0.01, %v3810_v15  ;;  %v3813_v28 = vadd.f32 %v13117_v17, %v3524_v49  ;;  %8845 = vmatmul.mubr.msk.bf16.gmra.mrb[144].mxu0 %vm365_vm0, %v6851_v29  ;;  %v13613_v17 = vpop.f32.mrb[55].mxu1 }
 0x2dd   : > { %10182 = vrot.lane.b32.xlu1 %v10136_v37, %s11074_s12  ;;  %8848 = vmatprep.mubr.msk.bf16.mxu0 %vm365_vm0, %v6854_v5 }
 0x2de   : > { %v4114_v55 = vsel %vm3986_vm4, %v3810_v15, %v4050_v11  ;;  %vm3987_vm5 = vcmp.gt.f32.partialorder %v3813_v28, 0.0  ;;  %v4051_v51 = vmul.f32 0.01, %v3813_v28  ;;  %v4727_v15 = vld [vmem:[#allocation3 + $0xf8] sm:$0xff] }
 0x2df   : > { %4287 = vst.msk [vmem:[#allocation3 + $0x151] sm:$0xff] %vm365_vm0, %v4114_v55  ;;  %v3528_v6 = vpop.f32.mrb[56].mxu0  ;;  %v10186_v11 = vpack.i.bf16 %v4727_v15, %v4726_v32 }
 0x2e0   : > { %10157 = vrot.lane.b32.xlu0 %v10156_v14, %s11076_s19  ;;  %v4115_v44 = vsel %vm3987_vm5, %v3813_v28, %v4051_v51  ;;  %v3529_v57 = vadd.f32 %v13503_v34, %v3528_v6  ;;  %v3530_v45 = vpop.f32.mrb[57].mxu0  ;;  %v13617_v62 = vld [vmem:[#allocation3 + $0x13a] sm:$0xff]  ;;  %v13619_v20 = vld [vmem:[#allocation3 + $0x142] sm:$0xff]  ;;  %v16644_v28 = vld [vmem:[#allocation72_spill] sm:$0xff]  ;;  %v13645_v51 = vpop.permute.xlu1 %9942 }
 0x2e1   : > { %10192 = vrot.lane.b32.xlu1 %v10146_v53, %s11076_s19  ;;  %4288 = vst.msk [vmem:[#allocation3 + $0x159] sm:$0xff] %vm365_vm0, %v4115_v44  ;;  %v3531_v8 = vpop.f32.mrb[58].mxu0  ;;  %v6857_v37 = vpack.c.bf16 %v13619_v20, %v13617_v62  ;;  %v16645_v44 = vld [vmem:[#allocation90_spill] sm:$0xff]  ;;  %v4790_v45 = vld [vmem:[#allocation3 + $0xf1] sm:$0xff] }
 0x2e2   : > { %v3532_v54 = vadd.f32 %v13503_v34, %v3531_v8  ;;  %v3818_v47 = vadd.f32 %v13151_v60, %v3529_v57  ;;  %v3533_v39 = vpop.f32.mrb[59].mxu0  ;;  %v10196_v19 = vpack.i.bf16 %v4791_v38, %v4790_v45  ;;  %v4869_v38 = vld [vmem:[#allocation3 + $0x1a2] sm:$0xff]  ;;  %v9945_v45 = vunpack.i.h.bf16 %v13645_v51 }
 0x2e4   : > { %10167 = vrot.lane.b32.xlu0 %v10166_v61, %s11077_s18  ;;  %vm3988_vm6 = vcmp.gt.f32.partialorder %v3818_v47, 0.0  ;;  %v4052_v18 = vmul.f32 0.01, %v3818_v47  ;;  %v3821_v12 = vadd.f32 %v13166_v41, %v3532_v54  ;;  %8849 = vmatmul.mubr.msk.bf16.gmra.mrb[148].mxu0 %vm365_vm0, %v6857_v37 }
 0x2e5   : > { %10202 = vrot.lane.b32.xlu1 %v10156_v14, %s11077_s18 }
 0x2e6   : > { %v4116_v13 = vsel %vm3988_vm6, %v3818_v47, %v4052_v18  ;;  %vm3989_vm7 = vcmp.gt.f32.partialorder %v3821_v12, 0.0  ;;  %v4053_v53 = vmul.f32 0.01, %v3821_v12  ;;  %v13658_v18 = vpop.permute.xlu1 %9952 }
 0x2e7   : > { %4289 = vst.msk [vmem:[#allocation3 + $0x169] sm:$0xff] %vm365_vm0, %v4116_v13  ;;  %v3536_v60 = vpop.f32.mrb[60].mxu0 }
 0x2e8   : > { %10177 = vrot.lane.b32.xlu0 %v10176_v30, %s11074_s12  ;;  %v4117_v49 = vsel %vm3989_vm7, %v3821_v12, %v4053_v53  ;;  %v3537_v26 = vadd.f32 %v13503_v34, %v3536_v60  ;;  %v3538_v41 = vpop.f32.mrb[61].mxu0  ;;  %v13636_v29 = vld [vmem:[#allocation3 + $0x152] sm:$0xff]  ;;  %v13638_v2 = vld [vmem:[#allocation3 + $0x15a] sm:$0xff]  ;;  %v10206_v60 = vpack.i.bf16 %v13565_v1, %v13563_v23 }
 0x2e9   : > { %10212 = vrot.lane.b32.xlu1 %v10166_v61, %s11074_s12  ;;  %4290 = vst.msk [vmem:[#allocation3 + $0x171] sm:$0xff] %vm365_vm0, %v4117_v49  ;;  %v3539_v36 = vpop.f32.mrb[62].mxu0  ;;  %v6860_v5 = vpack.c.bf16 %v13638_v2, %v13636_v29  ;;  %v13651_v37 = vpop.f32.mrb[56].mxu1 }
 0x2ea   : > { %v3826_v24 = vadd.f32 %v16644_v28, %v3537_v26  ;;  %v3540_v14 = vadd.f32 %v13503_v34, %v3539_v36  ;;  %v3541_v55 = vpop.f32.mrb[63].mxu0  ;;  %16646 = vst [vmem:[#allocation74_spill] sm:$0xff] %v13651_v37  ;;  %v13655_v54 = vpop.f32.mrb[57].mxu1  ;;  %v4729_v26 = vld [vmem:[#allocation3 + $0x110] sm:$0xff]  ;;  %v16648_v36 = vld [vmem:[#allocation91_spill] sm:$0xff] }
 0x2eb   : > { %8852 = vmatprep.mubr.msk.bf16.mxu0 %vm365_vm0, %v6860_v5  ;;  %v13670_v41 = vpop.f32.mrb[58].mxu1  ;;  %v4868_v55 = vld [vmem:[#allocation3 + $0x19a] sm:$0xff] }
 0x2ec   : > { %10187 = vrot.lane.b32.xlu0 %v10186_v11, %s11076_s19  ;;  %vm3990_vm8 = vcmp.gt.f32.partialorder %v3826_v24, 0.0  ;;  %v4054_v6 = vmul.f32 0.01, %v3826_v24  ;;  %v3829_v57 = vadd.f32 %v16645_v44, %v3540_v14  ;;  %16647 = vst [vmem:[#allocation75_spill] sm:$0xff] %v13670_v41  ;;  %v13676_v28 = vpop.f32.mrb[59].mxu1  ;;  %v4793_v44 = vld [vmem:[#allocation3 + $0x111] sm:$0xff] }
 0x2ed   : > { %10222 = vrot.lane.b32.xlu1 %v10176_v30, %s11076_s19  ;;  %16649 = vst [vmem:[#allocation76_spill] sm:$0xff] %v13676_v28  ;;  %v4795_v28 = vld [vmem:[#allocation3 + $0x129] sm:$0xff] }
 0x2ee   : > { %v4118_v8 = vsel %vm3990_vm8, %v3826_v24, %v4054_v6  ;;  %vm3991_vm9 = vcmp.gt.f32.partialorder %v3829_v57, 0.0  ;;  %v4055_v61 = vmul.f32 0.01, %v3829_v57  ;;  %v4728_v24 = vld [vmem:[#allocation3 + $0x108] sm:$0xff] }
 0x2ef   : > { %4291 = vst.msk [vmem:[#allocation3 + $0x181] sm:$0xff] %vm365_vm0, %v4118_v8  ;;  %v10216_v14 = vpack.i.bf16 %v4729_v26, %v4728_v24  ;;  %v9944_v26 = vunpack.i.l.bf16 %v13645_v51 }
 0x2f0   : > { %10197 = vrot.lane.b32.xlu0 %v10196_v19, %s11077_s18  ;;  %v4119_v47 = vsel %vm3991_vm9, %v3829_v57, %v4055_v61  ;;  %v3544_v39 = vpop.f32.mrb[64].mxu0  ;;  %v13660_v12 = vld [vmem:[#allocation3 + $0x16a] sm:$0xff]  ;;  %v13662_v30 = vld [vmem:[#allocation3 + $0x172] sm:$0xff] }
 0x2f1   : > { %10232 = vrot.lane.b32.xlu1 %v10186_v11, %s11077_s18  ;;  %4292 = vst.msk [vmem:[#allocation3 + $0x189] sm:$0xff] %vm365_vm0, %v4119_v47  ;;  %v3545_v13 = vadd.f32 %v13503_v34, %v3544_v39  ;;  %v3546_v53 = vpop.f32.mrb[65].mxu0  ;;  %v6863_v15 = vpack.c.bf16 %v13662_v30, %v13660_v12  ;;  %v4326_v57 = vld [vmem:[#allocation3 + $0x8] sm:$0xff]  ;;  %v6869_v39 = vpack.c.bf16 %v4869_v38, %v4868_v55 }
 0x2f2   : > { %v3547_v49 = vpop.f32.mrb[66].mxu0  ;;  %v4792_v47 = vld [vmem:[#allocation3 + $0x109] sm:$0xff] }
 0x2f3   : > { %v3548_v32 = vadd.f32 %v13503_v34, %v3547_v49  ;;  %v3834_v5 = vadd.f32 %v16648_v36, %v3545_v13  ;;  %v3549_v11 = vpop.f32.mrb[67].mxu0  ;;  %8853 = vmatmul.mubr.msk.bf16.gmra.mrb[152].mxu0 %vm365_vm0, %v6863_v15  ;;  %v10226_v49 = vpack.i.bf16 %v4793_v44, %v4792_v47 }
 0x2f4   : > { %10207 = vrot.lane.b32.xlu0 %v10206_v60, %s11074_s12 }
 0x2f5   : > { %10242 = vrot.lane.b32.xlu1 %v10196_v19, %s11074_s12  ;;  %vm3992_vm10 = vcmp.gt.f32.partialorder %v3834_v5, 0.0  ;;  %v4056_v23 = vmul.f32 0.01, %v3834_v5  ;;  %v3837_v1 = vadd.f32 %v13242_v40, %v3548_v32  ;;  %v9955_v32 = vunpack.i.h.bf16 %v13658_v18 }
 0x2f6   : > { %v9938_v53 = vpop.permute.xlu0 %9937 }
 0x2f7   : > { %v13680_v6 = vpop.permute.xlu1 %9962  ;;  %v4120_v8 = vsel %vm3992_vm10, %v3834_v5, %v4056_v23  ;;  %vm3993_vm11 = vcmp.gt.f32.partialorder %v3837_v1, 0.0  ;;  %v4057_v61 = vmul.f32 0.01, %v3837_v1  ;;  %v6439_v5 = vsel %vm365_vm0, %v4326_v57, %v9945_v45 }
 0x2f8   : > { %10217 = vrot.lane.b32.xlu0 %v10216_v14, %s11076_s19  ;;  %4293 = vst.msk [vmem:[#allocation3 + $0x1c9] sm:$0xff] %vm365_vm0, %v4120_v8  ;;  %v13686_v19 = vld [vmem:[#allocation3 + $0x182] sm:$0xff]  ;;  %v13688_v40 = vld [vmem:[#allocation3 + $0x18a] sm:$0xff]  ;;  %v9940_v55 = vunpack.i.h.bf16 %v9938_v53  ;;  %v10236_v57 = vpack.i.bf16 %v13583_v25, %v13581_v7  ;;  %v6503_v8 = vsel %vm2717_vm2, %v6439_v5, %v9955_v32 }
 0x2f9   : > { %10252 = vrot.lane.b32.xlu1 %v10206_v60, %s11076_s19  ;;  %v4121_v13 = vsel %vm3993_vm11, %v3837_v1, %v4057_v61  ;;  %v6866_v15 = vpack.c.bf16 %v13688_v40, %v13686_v19  ;;  %v4325_v60 = vld [vmem:[#allocation3] sm:$0xff]  ;;  %v9954_v1 = vunpack.i.l.bf16 %v13658_v18  ;;  %v16650_v61 = vld [vmem:[#allocation73_spill] sm:$0xff]  ;;  %v9965_v18 = vunpack.i.h.bf16 %v13680_v6 }
 0x2fa   : > { %4294 = vst.msk [vmem:[#allocation3 + $0x1d1] sm:$0xff] %vm365_vm0, %v4121_v13  ;;  %v6438_v45 = vsel %vm365_vm0, %v4325_v60, %v9944_v26  ;;  %v4582_v7 = vld [vmem:[#allocation3 + $0x21] sm:$0xff] }
 0x2fb   : > { %v13695_v36 = vpop.permute.xlu1 %9972  ;;  %v3552_v11 = vpop.f32.mrb[68].mxu0  ;;  %8856 = vmatprep.mubr.msk.bf16.mxu0 %vm365_vm0, %v6866_v15  ;;  %v4730_v60 = vld [vmem:[#allocation3 + $0x120] sm:$0xff]  ;;  %v6502_v5 = vsel %vm2717_vm2, %v6438_v45, %v9954_v1 }
 0x2fc   : > { %10227 = vrot.lane.b32.xlu0 %v10226_v49, %s11077_s18  ;;  %v3553_v23 = vadd.f32 %v13503_v34, %v3552_v11  ;;  %v3554_v51 = vpop.f32.mrb[69].mxu0  ;;  %8857 = vmatmul.mubr.msk.bf16.gmra.mrb[156].mxu0 %vm365_vm0, %v6869_v39  ;;  %v4731_v39 = vld [vmem:[#allocation3 + $0x128] sm:$0xff]  ;;  %v9939_v11 = vunpack.i.l.bf16 %v9938_v53  ;;  %v6631_v53 = vsel %vm365_vm0, %v4582_v7, %v9940_v55 }
 0x2fd   : > { %10262 = vrot.lane.b32.xlu1 %v10216_v14, %s11077_s18  ;;  %v3555_v38 = vpop.f32.mrb[70].mxu0  ;;  %v9948_v44 = vpop.permute.xlu0 %9947  ;;  %v9964_v51 = vunpack.i.l.bf16 %v13680_v6 }
 0x2fe   : > { %v3842_v47 = vadd.f32 %v16650_v61, %v3553_v23  ;;  %v3556_v14 = vadd.f32 %v13503_v34, %v3555_v38  ;;  %v3557_v15 = vpop.f32.mrb[71].mxu0  ;;  %v9950_v24 = vunpack.i.h.bf16 %v9948_v44  ;;  %v9949_v32 = vunpack.i.l.bf16 %v9948_v44  ;;  %v4581_v61 = vld [vmem:[#allocation3 + $0x19] sm:$0xff] }
 0x2ff   : > { %v13711_v13 = vpop.permute.xlu1 %9982  ;;  %v10246_v38 = vpack.i.bf16 %v4731_v39, %v4730_v60  ;;  %v6567_v44 = vsel %vm2782_vm3, %v6503_v8, %v9965_v18  ;;  %v6566_v55 = vsel %vm2782_vm3, %v6502_v5, %v9964_v51  ;;  %v9974_v51 = vunpack.i.l.bf16 %v13695_v36 }
 0x300   : > { %10237 = vrot.lane.b32.xlu0 %v10236_v57, %s11074_s12  ;;  %vm3994_vm12 = vcmp.gt.f32.partialorder %v3842_v47, 0.0  ;;  %v4058_v25 = vmul.f32 0.01, %v3842_v47  ;;  %v3845_v26 = vadd.f32 %v13233_v63, %v3556_v14  ;;  %v6630_v63 = vsel %vm365_vm0, %v4581_v61, %v9939_v11  ;;  %v4794_v11 = vld [vmem:[#allocation3 + $0x121] sm:$0xff] }
 0x301   : > { %10272 = vrot.lane.b32.xlu1 %v10226_v49, %s11074_s12  ;;  %v9958_v23 = vpop.permute.xlu0 %9957  ;;  %v6695_v1 = vsel %vm2717_vm2, %v6631_v53, %v9950_v24  ;;  %v6694_v14 = vsel %vm2717_vm2, %v6630_v63, %v9949_v32  ;;  %v6822_v32 = vpack.c.bf16 %v6567_v44, %v6566_v55  ;;  %v4733_v61 = vld [vmem:[#allocation3 + $0x140] sm:$0xff] }
 0x302   : > { %v4122_v6 = vsel %vm3994_vm12, %v3842_v47, %v4058_v25  ;;  %vm3995_vm13 = vcmp.gt.f32.partialorder %v3845_v26, 0.0  ;;  %v4059_v15 = vmul.f32 0.01, %v3845_v26  ;;  %v9960_v41 = vunpack.i.h.bf16 %v9958_v23 }
 0x303   : > { %v13721_v37 = vpop.permute.xlu1 %9992  ;;  %4295 = vst.msk [vmem:[#allocation3 + $0x1e1] sm:$0xff] %vm365_vm0, %v4122_v6  ;;  %v9959_v49 = vunpack.i.l.bf16 %v9958_v23  ;;  %v10256_v25 = vpack.i.bf16 %v4795_v28, %v4794_v11  ;;  %v9985_v28 = vunpack.i.h.bf16 %v13711_v13 }
 0x304   : > { %10247 = vrot.lane.b32.xlu0 %v10246_v38, %s11076_s19  ;;  %v4123_v45 = vsel %vm3995_vm13, %v3845_v26, %v4059_v15  ;;  %v3560_v47 = vpop.f32.mrb[72].mxu0  ;;  %v6759_v39 = vsel %vm2782_vm3, %v6695_v1, %v9960_v41  ;;  %v9975_v41 = vunpack.i.h.bf16 %v13695_v36  ;;  %v9984_v15 = vunpack.i.l.bf16 %v13711_v13  ;;  %v4732_v13 = vld [vmem:[#allocation3 + $0x138] sm:$0xff] }
 0x305   : > { %10282 = vrot.lane.b32.xlu1 %v10236_v57, %s11076_s19  ;;  %4296 = vst.msk [vmem:[#allocation3 + $0x1e9] sm:$0xff] %vm365_vm0, %v4123_v45  ;;  %v3561_v8 = vadd.f32 %v13503_v34, %v3560_v47  ;;  %v3562_v18 = vpop.f32.mrb[73].mxu0  ;;  %v13734_v7 = vpop.permute.xlu0 %9967  ;;  %v6758_v24 = vsel %vm2782_vm3, %v6694_v14, %v9959_v49  ;;  %v9995_v63 = vunpack.i.h.bf16 %v13721_v37  ;;  %v10266_v36 = vpack.i.bf16 %v13589_v59, %v13587_v52  ;;  %v4328_v14 = vld [vmem:[#allocation3 + $0x20] sm:$0xff] }
 0x306   : > { %v3563_v57 = vpop.f32.mrb[74].mxu0  ;;  %v6823_v60 = vpack.c.bf16 %v6759_v39, %v6758_v24  ;;  %v13744_v6 = vpop.f32.mrb[60].mxu1  ;;  %v9994_v49 = vunpack.i.l.bf16 %v13721_v37  ;;  %v9970_v1 = vunpack.i.h.bf16 %v13734_v7  ;;  %v9969_v39 = vunpack.i.l.bf16 %v13734_v7  ;;  %v4584_v7 = vld [vmem:[#allocation3 + $0x39] sm:$0xff] }
 0x307   : > { %v13738_v26 = vpop.permute.xlu1 %10002  ;;  %v3564_v5 = vadd.f32 %v13503_v34, %v3563_v57  ;;  %v3850_v53 = vadd.f32 %v13310_v33, %v3561_v8  ;;  %v3565_v23 = vpop.f32.mrb[75].mxu0  ;;  %v4327_v33 = vld [vmem:[#allocation3 + $0x18] sm:$0xff]  ;;  %v13763_v11 = vpack.i.bf16 %v4733_v61, %v4732_v13  ;;  %v10967_v8 = vld [vmem:[%s16378_s3 + $0x80] sm:$0xff]   ;;  %v6441_v18 = vsel %vm365_vm0, %v4328_v14, %v9975_v41 }
 0x308   : > { %10257 = vrot.lane.b32.xlu0 %v10256_v25, %s11077_s18  ;;  %7197 = vmatprep.mubr.bf16.mxu1 %v6823_v60  ;;  %v13752_v44 = vpop.f32.mrb[61].mxu1  ;;  %v6633_v23 = vsel %vm365_vm0, %v4584_v7, %v9970_v1  ;;  %v4583_v61 = vld [vmem:[#allocation3 + $0x31] sm:$0xff]  ;;  %v10004_v7 = vunpack.i.l.bf16 %v13738_v26 }
 0x309   : > { %10292 = vrot.lane.b32.xlu1 %v10246_v38, %s11077_s18  ;;  %vm3996_vm14 = vcmp.gt.f32.partialorder %v3850_v53, 0.0  ;;  %v4060_v55 = vmul.f32 0.01, %v3850_v53  ;;  %7198 = vmatmul.mubr.bf16.vlgmr.msra.gmra.mrb[64].mxu1 %v6822_v32  ;;  %v9978_v45 = vpop.permute.xlu0 %9977  ;;  %v13756_v47 = vpop.f32.mrb[62].mxu1  ;;  %v6440_v38 = vsel %vm365_vm0, %v4327_v33, %v9974_v51  ;;  %v3853_v52 = vadd.f32 %v13334_v48, %v3564_v5  ;;  %v10968_v48 = vld [vmem:[%s16378_s3 + $0x88] sm:$0xff]  }
 0x30a   : > { %16651 = vst [vmem:[#allocation77_spill] sm:$0xff] %v13756_v47  ;;  %v13765_v37 = vpop.f32.mrb[63].mxu1  ;;  %8916 = vmatpush3.bf16.msra.mxu1 %v10967_v8  ;;  %v9980_v51 = vunpack.i.h.bf16 %v9978_v45  ;;  %v9979_v57 = vunpack.i.l.bf16 %v9978_v45  ;;  %v6504_v5 = vsel %vm2717_vm2, %v6440_v38, %v9984_v15  ;;  %v4797_v15 = vld [vmem:[#allocation3 + $0x141] sm:$0xff] }
 0x30b   : > { %v13761_v59 = vpop.permute.xlu1 %10012  ;;  %v4124_v24 = vsel %vm3996_vm14, %v3850_v53, %v4060_v55  ;;  %8915 = vmatprep.subr.bf16.mxu1 %v10968_v48  ;;  %vm3997_vm15 = vcmp.gt.f32.partialorder %v3853_v52, 0.0  ;;  %v4061_v60 = vmul.f32 0.01, %v3853_v52  ;;  %v6505_v53 = vsel %vm2717_vm2, %v6441_v18, %v9985_v28 }
 0x30c   : > { %10267 = vrot.lane.b32.xlu0 %v10266_v36, %s11074_s12  ;;  %4297 = vst.msk [vmem:[#allocation3 + $0x1f9] sm:$0xff] %vm365_vm0, %v4124_v24  ;;  %v13778_v32 = vld [vmem:[#allocation3 + $0x1e2] sm:$0xff]  ;;  %v13780_v41 = vld [vmem:[#allocation3 + $0x1ea] sm:$0xff]  ;;  %v6568_v45 = vsel %vm2782_vm3, %v6504_v5, %v9994_v49  ;;  %v6569_v13 = vsel %vm2782_vm3, %v6505_v53, %v9995_v63  ;;  %v6697_v63 = vsel %vm2717_vm2, %v6633_v23, %v9980_v51 }
 0x30d   : > { %10302 = vrot.lane.b32.xlu1 %v10256_v25, %s11074_s12  ;;  %v9988_v33 = vpop.permute.xlu0 %9987  ;;  %v6872_v55 = vpack.c.bf16 %v13780_v41, %v13778_v32  ;;  %v6632_v25 = vsel %vm365_vm0, %v4583_v61, %v9969_v39  ;;  %v4125_v14 = vsel %vm3997_vm15, %v3853_v52, %v4061_v60  ;;  %v10446_v1 = vpack.i.bf16 %v13780_v41, %v13778_v32  ;;  %v4796_v52 = vld [vmem:[#allocation3 + $0x139] sm:$0xff] }
 0x30e   : > { %v9990_v8 = vunpack.i.h.bf16 %v9988_v33  ;;  %v9989_v24 = vunpack.i.l.bf16 %v9988_v33  ;;  %8917 = vmatpush3.bf16.msra.mxu1 %v10968_v48  ;;  %4298 = vst.msk [vmem:[#allocation3 + $0x201] sm:$0xff] %vm365_vm0, %v4125_v14  ;;  %v6696_v49 = vsel %vm2717_vm2, %v6632_v25, %v9979_v57  ;;  %v10286_v57 = vpack.i.bf16 %v4797_v15, %v4796_v52  ;;  %v4735_v52 = vld [vmem:[#allocation3 + $0x158] sm:$0xff] }
 0x30f   : > { %v13790_v47 = vpop.permute.xlu1 %10022  ;;  %v3568_v28 = vpop.f32.mrb[76].mxu0  ;;  %8860 = vmatprep.mubr.msk.bf16.mxu0 %vm365_vm0, %v6872_v55  ;;  %v10005_v55 = vunpack.i.h.bf16 %v13738_v26  ;;  %v10015_v25 = vunpack.i.h.bf16 %v13761_v59  ;;  %v10296_v14 = vpack.i.bf16 %v13619_v20, %v13617_v62  ;;  %v4330_v26 = vld [vmem:[#allocation3 + $0x38] sm:$0xff] }
 0x310   : > { %10277 = vrot.lane.b32.xlu0 %v13763_v11, %s11076_s19  ;;  %v3569_v38 = vadd.f32 %v13503_v34, %v3568_v28  ;;  %v3570_v39 = vpop.f32.mrb[77].mxu0  ;;  %v6760_v18 = vsel %vm2782_vm3, %v6696_v49, %v9989_v24  ;;  %v6761_v48 = vsel %vm2782_vm3, %v6697_v63, %v9990_v8  ;;  %v4329_v8 = vld [vmem:[#allocation3 + $0x30] sm:$0xff]  ;;  %v10014_v24 = vunpack.i.l.bf16 %v13761_v59 }
 0x311   : > { %10312 = vrot.lane.b32.xlu1 %v10266_v36, %s11076_s19  ;;  %v3571_v60 = vpop.f32.mrb[78].mxu0  ;;  %v9998_v5 = vpop.permute.xlu0 %9997  ;;  %v6826_v53 = vpack.c.bf16 %v6761_v48, %v6760_v18  ;;  %v6825_v36 = vpack.c.bf16 %v6569_v13, %v6568_v45  ;;  %v6442_v45 = vsel %vm365_vm0, %v4329_v8, %v10004_v7  ;;  %v10025_v13 = vunpack.i.h.bf16 %v13790_v47 }
 0x312   : > { %v3858_v51 = vadd.f32 %v13298_v0, %v3569_v38  ;;  %v3572_v23 = vadd.f32 %v13503_v34, %v3571_v60  ;;  %v3573_v33 = vpop.f32.mrb[79].mxu0  ;;  %v10024_v28 = vunpack.i.l.bf16 %v13790_v47  ;;  %v10000_v49 = vunpack.i.h.bf16 %v9998_v5 }
 0x313   : > { %v13807_v61 = vpop.permute.xlu1 %10032  ;;  %7205 = vmatprep.mubr.bf16.mxu1 %v6826_v53  ;;  %v9999_v63 = vunpack.i.l.bf16 %v9998_v5  ;;  %v4734_v53 = vld [vmem:[#allocation3 + $0x150] sm:$0xff]  ;;  %v6506_v5 = vsel %vm2717_vm2, %v6442_v45, %v10014_v24 }
 0x314   : > { %10287 = vrot.lane.b32.xlu0 %v10286_v57, %s11077_s18  ;;  %vm3998_vm1 = vcmp.gt.f32.partialorder %v3858_v51, 0.0  ;;  %v4062_v0 = vmul.f32 0.01, %v3858_v51  ;;  %v3861_v15 = vadd.f32 %v13331_v46, %v3572_v23  ;;  %7206 = vmatmul.mubr.bf16.gmra.mrb[68].mxu1 %v6825_v36  ;;  %v4585_v23 = vld [vmem:[#allocation3 + $0x49] sm:$0xff]  ;;  %v4586_v33 = vld [vmem:[#allocation3 + $0x51] sm:$0xff] }
 0x315   : > { %10322 = vrot.lane.b32.xlu1 %v13763_v11, %s11077_s18  ;;  %v4872_v46 = vld [vmem:[#allocation3 + $0x1fa] sm:$0xff]  ;;  %v4873_v39 = vld [vmem:[#allocation3 + $0x202] sm:$0xff]  ;;  %v6443_v11 = vsel %vm365_vm0, %v4330_v26, %v10005_v55  ;;  %v6635_v24 = vsel %vm365_vm0, %v4586_v33, %v10000_v49 }
 0x316   : > { %v10008_v62 = vpop.permute.xlu0 %10007  ;;  %v4126_v20 = vsel %vm3998_vm1, %v3858_v51, %v4062_v0  ;;  %vm3999_vm4 = vcmp.gt.f32.partialorder %v3861_v15, 0.0  ;;  %v4063_v59 = vmul.f32 0.01, %v3861_v15  ;;  %v6875_v47 = vpack.c.bf16 %v4873_v39, %v4872_v46 }
 0x317   : > { %v13821_v38 = vpop.permute.xlu1 %10042  ;;  %4299 = vst.msk [vmem:[#allocation3 + $0x211] sm:$0xff] %vm365_vm0, %v4126_v20  ;;  %v10010_v18 = vunpack.i.h.bf16 %v10008_v62  ;;  %v10009_v48 = vunpack.i.l.bf16 %v10008_v62  ;;  %v6507_v51 = vsel %vm2717_vm2, %v6443_v11, %v10015_v25  ;;  %v10306_v0 = vpack.i.bf16 %v4735_v52, %v4734_v53  ;;  %v4798_v52 = vld [vmem:[#allocation3 + $0x151] sm:$0xff] }
 0x318   : > { %10297 = vrot.lane.b32.xlu0 %v10296_v14, %s11074_s12  ;;  %v4127_v7 = vsel %vm3999_vm4, %v3861_v15, %v4063_v59  ;;  %v3576_v60 = vpop.f32.mrb[80].mxu0  ;;  %8861 = vmatmul.mubr.msk.bf16.gmra.mrb[160].mxu0 %vm365_vm0, %v6875_v47  ;;  %v4799_v15 = vld [vmem:[#allocation3 + $0x159] sm:$0xff]  ;;  %v6571_v26 = vsel %vm2782_vm3, %v6507_v51, %v10025_v13  ;;  %v6634_v25 = vsel %vm365_vm0, %v4585_v23, %v9999_v63  ;;  %v10034_v23 = vunpack.i.l.bf16 %v13807_v61 }
 0x319   : > { %10332 = vrot.lane.b32.xlu1 %v10286_v57, %s11074_s12  ;;  %4300 = vst.msk [vmem:[#allocation3 + $0x219] sm:$0xff] %vm365_vm0, %v4127_v7  ;;  %v3577_v36 = vadd.f32 %v13503_v34, %v3576_v60  ;;  %v3578_v55 = vpop.f32.mrb[81].mxu0  ;;  %v6570_v57 = vsel %vm2782_vm3, %v6506_v5, %v10024_v28  ;;  %v6698_v28 = vsel %vm2717_vm2, %v6634_v25, %v10009_v48  ;;  %v10044_v33 = vunpack.i.l.bf16 %v13821_v38  ;;  %v4332_v25 = vld [vmem:[#allocation3 + $0x50] sm:$0xff] }
 0x31a   : > { %v10018_v8 = vpop.permute.xlu0 %10017  ;;  %v3579_v59 = vpop.f32.mrb[82].mxu0  ;;  %v6699_v13 = vsel %vm2717_vm2, %v6635_v24, %v10010_v18  ;;  %v10316_v49 = vpack.i.bf16 %v4799_v15, %v4798_v52  ;;  %v6828_v5 = vpack.c.bf16 %v6571_v26, %v6570_v57  ;;  %v10035_v18 = vunpack.i.h.bf16 %v13807_v61  ;;  %v4331_v24 = vld [vmem:[#allocation3 + $0x48] sm:$0xff] }
 0x31b   : > { %v10020_v45 = vunpack.i.h.bf16 %v10018_v8  ;;  %v10019_v62 = vunpack.i.l.bf16 %v10018_v8  ;;  %v13836_v20 = vpop.permute.xlu1 %10052  ;;  %v3580_v46 = vadd.f32 %v13503_v34, %v3579_v59  ;;  %v3866_v39 = vadd.f32 %v13399_v10, %v3577_v36  ;;  %v3581_v11 = vpop.f32.mrb[83].mxu0  ;;  %v4587_v52 = vld [vmem:[#allocation3 + $0x61] sm:$0xff] }
 0x31c   : > { %10307 = vrot.lane.b32.xlu0 %v10306_v0, %s11076_s19  ;;  %v6444_v11 = vsel %vm365_vm0, %v4331_v24, %v10034_v23 }
 0x31d   : > { %10342 = vrot.lane.b32.xlu1 %v10296_v14, %s11076_s19  ;;  %v6762_v63 = vsel %vm2782_vm3, %v6698_v28, %v10019_v62  ;;  %v6763_v47 = vsel %vm2782_vm3, %v6699_v13, %v10020_v45  ;;  %vm4000_vm5 = vcmp.gt.f32.partialorder %v3866_v39, 0.0  ;;  %v4064_v7 = vmul.f32 0.01, %v3866_v39  ;;  %v4588_v28 = vld [vmem:[#allocation3 + $0x69] sm:$0xff]  ;;  %v13870_v13 = vld [vmem:[%s16377_s2] ss:$0 sm:$0xff] }
 0x31e   : > { %v3869_v34 = vadd.f32 %v13419_v22, %v3580_v46  ;;  %v10028_v10 = vpop.permute.xlu0 %10027  ;;  %v6829_v60 = vpack.c.bf16 %v6763_v47, %v6762_v63  ;;  %v10326_v14 = vpack.i.bf16 %v13638_v2, %v13636_v29  ;;  %v10045_v22 = vunpack.i.h.bf16 %v13821_v38  ;;  %v4737_v2 = vld [vmem:[#allocation3 + $0x170] sm:$0xff]  ;;  %v4736_v46 = vld [vmem:[#allocation3 + $0x168] sm:$0xff] }
 0x31f   : > { %v13847_v53 = vpop.permute.xlu1 %10062  ;;  %v4128_v51 = vsel %vm4000_vm5, %v3866_v39, %v4064_v7  ;;  %v10030_v15 = vunpack.i.h.bf16 %v10028_v10  ;;  %v10029_v57 = vunpack.i.l.bf16 %v10028_v10  ;;  %v10055_v38 = vunpack.i.h.bf16 %v13836_v20 }
 0x320   : > { %vm4001_vm6 = vcmp.gt.f32.partialorder %v3869_v34, 0.0  ;;  %v4065_v48 = vmul.f32 0.01, %v3869_v34  ;;  %10317 = vrot.lane.b32.xlu0 %v10316_v49, %s11077_s18  ;;  %7213 = vmatprep.mubr.bf16.mxu1 %v6829_v60  ;;  %4301 = vst.msk [vmem:[#allocation3 + $0x229] sm:$0xff] %vm365_vm0, %v4128_v51  ;;  %v4874_v36 = vld [vmem:[#allocation3 + $0x212] sm:$0xff]  ;;  %v4875_v55 = vld [vmem:[#allocation3 + $0x21a] sm:$0xff]  ;;  %v10054_v45 = vunpack.i.l.bf16 %v13836_v20  ;;  %v6445_v39 = vsel %vm365_vm0, %v4332_v25, %v10035_v18 }
 0x321   : > { %10352 = vrot.lane.b32.xlu1 %v10306_v0, %s11077_s18  ;;  %7214 = vmatmul.mubr.bf16.gmra.mrb[72].mxu1 %v6828_v5  ;;  %v6878_v29 = vpack.c.bf16 %v4875_v55, %v4874_v36  ;;  %v10336_v47 = vpack.i.bf16 %v4737_v2, %v4736_v46  ;;  %v6637_v7 = vsel %vm365_vm0, %v4588_v28, %v10030_v15 }
 0x322   : > { %v4129_v8 = vsel %vm4001_vm6, %v3869_v34, %v4065_v48  ;;  %v10038_v26 = vpop.permute.xlu0 %10037  ;;  %v6636_v34 = vsel %vm365_vm0, %v4587_v52, %v10029_v57  ;;  %v6508_v5 = vsel %vm2717_vm2, %v6444_v11, %v10044_v33  ;;  %v6509_v51 = vsel %vm2717_vm2, %v6445_v39, %v10045_v22  ;;  %v4739_v52 = vld [vmem:[#allocation3 + $0x188] sm:$0xff] }
 0x323   : > { %4302 = vst.msk [vmem:[#allocation3 + $0x231] sm:$0xff] %vm365_vm0, %v4129_v8  ;;  %v13859_v61 = vpop.permute.xlu1 %10072  ;;  %v10040_v0 = vunpack.i.h.bf16 %v10038_v26  ;;  %v10039_v62 = vunpack.i.l.bf16 %v10038_v26  ;;  %v3584_v59 = vpop.f32.mrb[84].mxu0  ;;  %8864 = vmatprep.mubr.msk.bf16.mxu0 %vm365_vm0, %v6878_v29  ;;  %v4801_v8 = vld [vmem:[#allocation3 + $0x171] sm:$0xff]  ;;  %v6572_v33 = vsel %vm2782_vm3, %v6508_v5, %v10054_v45  ;;  %v6573_v22 = vsel %vm2782_vm3, %v6509_v51, %v10055_v38  ;;  %v4800_v29 = vld [vmem:[#allocation3 + $0x169] sm:$0xff] }
 0x324   : > { %10327 = vrot.lane.b32.xlu0 %v10326_v14, %s11074_s12  ;;  %v3585_v20 = vadd.f32 %v13870_v13, %v3584_v59  ;;  %v3586_v63 = vpop.f32.mrb[85].mxu0  ;;  %v10346_v25 = vpack.i.bf16 %v4801_v8, %v4800_v29  ;;  %v6831_v11 = vpack.c.bf16 %v6573_v22, %v6572_v33  ;;  %v10075_v28 = vunpack.i.h.bf16 %v13859_v61  ;;  %v4589_v29 = vld [vmem:[#allocation3 + $0x79] sm:$0xff] }
 0x325   : > { %10362 = vrot.lane.b32.xlu1 %v10316_v49, %s11074_s12  ;;  %v3587_v10 = vpop.f32.mrb[86].mxu0  ;;  %v6700_v15 = vsel %vm2717_vm2, %v6636_v34, %v10039_v62  ;;  %v6701_v57 = vsel %vm2717_vm2, %v6637_v7, %v10040_v0  ;;  %v10065_v0 = vunpack.i.h.bf16 %v13847_v53 }
 0x326   : > { %v10048_v60 = vpop.permute.xlu0 %10047  ;;  %v3874_v48 = vadd.f32 %v13395_v21, %v3585_v20  ;;  %v3588_v18 = vadd.f32 %v13870_v13, %v3587_v10  ;;  %v3589_v49 = vpop.f32.mrb[87].mxu0  ;;  %v10074_v20 = vunpack.i.l.bf16 %v13859_v61  ;;  %v4334_v10 = vld [vmem:[#allocation3 + $0x68] sm:$0xff] }
 0x327   : > { %v10050_v23 = vunpack.i.h.bf16 %v10048_v60  ;;  %v10049_v36 = vunpack.i.l.bf16 %v10048_v60  ;;  %v13880_v55 = vpop.permute.xlu1 %10082  ;;  %v6447_v61 = vsel %vm365_vm0, %v4334_v10, %v10065_v0 }
 0x328   : > { %10337 = vrot.lane.b32.xlu0 %v10336_v47, %s11076_s19  ;;  %vm4002_vm7 = vcmp.gt.f32.partialorder %v3874_v48, 0.0  ;;  %v4066_v21 = vmul.f32 0.01, %v3874_v48  ;;  %v3877_v26 = vadd.f32 %v13414_v56, %v3588_v18  ;;  %v10064_v56 = vunpack.i.l.bf16 %v13847_v53  ;;  %v4738_v18 = vld [vmem:[#allocation3 + $0x180] sm:$0xff] }
 0x329   : > { %10372 = vrot.lane.b32.xlu1 %v10326_v14, %s11076_s19  ;;  %v6764_v2 = vsel %vm2782_vm3, %v6700_v15, %v10049_v36  ;;  %v6765_v59 = vsel %vm2782_vm3, %v6701_v57, %v10050_v23  ;;  %v4333_v23 = vld [vmem:[#allocation3 + $0x60] sm:$0xff]  ;;  %v10366_v15 = vpack.i.bf16 %v4739_v52, %v4738_v18 }
 0x32a   : > { %v10058_v24 = vpop.permute.xlu0 %10057  ;;  %v4876_v62 = vld [vmem:[#allocation3 + $0x22a] sm:$0xff]  ;;  %v4877_v46 = vld [vmem:[#allocation3 + $0x232] sm:$0xff]  ;;  %v4130_v45 = vsel %vm4002_vm7, %v3874_v48, %v4066_v21  ;;  %vm4003_vm8 = vcmp.gt.f32.partialorder %v3877_v26, 0.0  ;;  %v4067_v38 = vmul.f32 0.01, %v3877_v26  ;;  %v6832_v14 = vpack.c.bf16 %v6765_v59, %v6764_v2  ;;  %v4590_v59 = vld [vmem:[#allocation3 + $0x81] sm:$0xff] }
 0x32b   : > { %v13892_v39 = vpop.permute.xlu1 %10092  ;;  %4303 = vst.msk [vmem:[#allocation3 + $0x241] sm:$0xff] %vm365_vm0, %v4130_v45  ;;  %v6881_v34 = vpack.c.bf16 %v4877_v46, %v4876_v62  ;;  %v10059_v53 = vunpack.i.l.bf16 %v10058_v24  ;;  %v10356_v48 = vpack.i.bf16 %v13662_v30, %v13660_v12  ;;  %v10060_v36 = vunpack.i.h.bf16 %v10058_v24 }
 0x32c   : > { %10347 = vrot.lane.b32.xlu0 %v10346_v25, %s11077_s18  ;;  %v4131_v63 = vsel %vm4003_vm8, %v3877_v26, %v4067_v38  ;;  %v3592_v7 = vpop.f32.mrb[88].mxu0  ;;  %7221 = vmatprep.mubr.bf16.mxu1 %v6832_v14  ;;  %v6446_v57 = vsel %vm365_vm0, %v4333_v23, %v10064_v56  ;;  %v10085_v21 = vunpack.i.h.bf16 %v13880_v55  ;;  %v10084_v26 = vunpack.i.l.bf16 %v13880_v55  ;;  %v4803_v14 = vld [vmem:[#allocation3 + $0x189] sm:$0xff] }
 0x32d   : > { %10382 = vrot.lane.b32.xlu1 %v10336_v47, %s11077_s18  ;;  %4304 = vst.msk [vmem:[#allocation3 + $0x249] sm:$0xff] %vm365_vm0, %v4131_v63  ;;  %v3593_v60 = vadd.f32 %v13870_v13, %v3592_v7  ;;  %v3594_v5 = vpop.f32.mrb[89].mxu0  ;;  %7222 = vmatmul.mubr.bf16.gmra.mrb[76].mxu1 %v6831_v11  ;;  %v6510_v2 = vsel %vm2717_vm2, %v6446_v57, %v10074_v20  ;;  %v4421_v20 = vld [vmem:[#allocation3 + $0x1b1] sm:$0xff]  ;;  %v4802_v7 = vld [vmem:[#allocation3 + $0x181] sm:$0xff]  ;;  %v10094_v57 = vunpack.i.l.bf16 %v13892_v39 }
 0x32e   : > { %v10068_v51 = vpop.permute.xlu0 %10067  ;;  %8865 = vmatmul.mubr.msk.bf16.gmra.mrb[164].mxu0 %vm365_vm0, %v6881_v34  ;;  %v3595_v8 = vpop.f32.mrb[90].mxu0  ;;  %v6511_v24 = vsel %vm2717_vm2, %v6447_v61, %v10075_v28  ;;  %v6638_v62 = vsel %vm365_vm0, %v4589_v29, %v10059_v53  ;;  %v6639_v45 = vsel %vm365_vm0, %v4590_v59, %v10060_v36  ;;  %v6574_v53 = vsel %vm2782_vm3, %v6510_v2, %v10084_v26  ;;  %v4422_v36 = vld [vmem:[#allocation3 + $0x1b9] sm:$0xff] }
 0x32f   : > { %v10069_v47 = vunpack.i.l.bf16 %v10068_v51  ;;  %v13906_v49 = vpop.permute.xlu1 %10102  ;;  %v10070_v33 = vunpack.i.h.bf16 %v10068_v51  ;;  %v3596_v22 = vadd.f32 %v13870_v13, %v3595_v8  ;;  %v3882_v12 = vadd.f32 %v13468_v50, %v3593_v60  ;;  %v3597_v30 = vpop.f32.mrb[91].mxu0  ;;  %v4335_v59 = vld [vmem:[#allocation3 + $0x78] sm:$0xff] }
 0x330   : > { %10357 = vrot.lane.b32.xlu0 %v10356_v48, %s11074_s12  ;;  %v6575_v60 = vsel %vm2782_vm3, %v6511_v24, %v10085_v21  ;;  %v10376_v23 = vpack.i.bf16 %v4803_v14, %v4802_v7  ;;  %v10095_v8 = vunpack.i.h.bf16 %v13892_v39  ;;  %v10105_v30 = vunpack.i.h.bf16 %v13906_v49 }
 0x331   : > { %10392 = vrot.lane.b32.xlu1 %v10346_v25, %s11074_s12  ;;  %vm4004_vm9 = vcmp.gt.f32.partialorder %v3882_v12, 0.0  ;;  %v4068_v46 = vmul.f32 0.01, %v3882_v12  ;;  %v3885_v50 = vadd.f32 %v13492_v27, %v3596_v22  ;;  %v6702_v25 = vsel %vm2717_vm2, %v6638_v62, %v10069_v47  ;;  %v13933_v47 = vld [vmem:[#allocation3 + $0x198] sm:$0xff]  ;;  %v4336_v62 = vld [vmem:[#allocation3 + $0x80] sm:$0xff] }
 0x332   : > { %v10078_v0 = vpop.permute.xlu0 %10077  ;;  %v6703_v28 = vsel %vm2717_vm2, %v6639_v45, %v10070_v33  ;;  %v13940_v22 = vld [vmem:[#allocation3 + $0x1b2] sm:$0xff]  ;;  %v6834_v26 = vpack.c.bf16 %v6575_v60, %v6574_v53  ;;  %v10421_v2 = vpack.i.bf16 %v4422_v36, %v4421_v20  ;;  %v6448_v14 = vsel %vm365_vm0, %v4335_v59, %v10094_v57  ;;  %v4805_v20 = vld [vmem:[#allocation3 + $0x1a1] sm:$0xff] }
 0x333   : > { %v10080_v38 = vunpack.i.h.bf16 %v10078_v0  ;;  %v10079_v56 = vunpack.i.l.bf16 %v10078_v0  ;;  %v13920_v55 = vpop.permute.xlu1 %10112  ;;  %v4132_v11 = vsel %vm4004_vm9, %v3882_v12, %v4068_v46  ;;  %vm4005_vm10 = vcmp.gt.f32.partialorder %v3885_v50, 0.0  ;;  %v4486_v12 = vld [vmem:[#allocation3 + $0x1ba] sm:$0xff] }
 0x334   : > { %v4069_v52 = vmul.f32 0.01, %v3885_v50  ;;  %10367 = vrot.lane.b32.xlu0 %v10366_v15, %s11076_s19  ;;  %4305 = vst.msk [vmem:[#allocation3 + $0x259] sm:$0xff] %vm365_vm0, %v4132_v11  ;;  %v4878_v27 = vld [vmem:[#allocation3 + $0x242] sm:$0xff]  ;;  %v4879_v63 = vld [vmem:[#allocation3 + $0x24a] sm:$0xff]  ;;  %v10104_v46 = vunpack.i.l.bf16 %v13906_v49 }
 0x335   : > { %10402 = vrot.lane.b32.xlu1 %v10356_v48, %s11076_s19  ;;  %v6766_v34 = vsel %vm2782_vm3, %v6702_v25, %v10079_v56  ;;  %v6767_v10 = vsel %vm2782_vm3, %v6703_v28, %v10080_v38  ;;  %v6884_v18 = vpack.c.bf16 %v4879_v63, %v4878_v27  ;;  %v4741_v48 = vld [vmem:[#allocation3 + $0x1a0] sm:$0xff]  ;;  %v10431_v56 = vpack.i.bf16 %v4486_v12, %v13940_v22 }
 0x336   : > { %v4133_v5 = vsel %vm4005_vm10, %v3885_v50, %v4069_v52  ;;  %v13931_v51 = vpop.permute.xlu0 %10087  ;;  %v6835_v61 = vpack.c.bf16 %v6767_v10, %v6766_v34  ;;  %v10396_v24 = vpack.i.bf16 %v4741_v48, %v13933_v47  ;;  %v10115_v50 = vunpack.i.h.bf16 %v13920_v55  ;;  %v4804_v28 = vld [vmem:[#allocation3 + $0x199] sm:$0xff] }
 0x337   : > { %4306 = vst.msk [vmem:[#allocation3 + $0x261] sm:$0xff] %vm365_vm0, %v4133_v5  ;;  %v13938_v33 = vpop.permute.xlu1 %10122  ;;  %v3600_v21 = vpop.f32.mrb[92].mxu0  ;;  %8868 = vmatprep.mubr.msk.bf16.mxu0 %vm365_vm0, %v6884_v18  ;;  %v10090_v0 = vunpack.i.h.bf16 %v13931_v51  ;;  %v10114_v27 = vunpack.i.l.bf16 %v13920_v55  ;;  %v10089_v63 = vunpack.i.l.bf16 %v13931_v51  ;;  %v16652_v34 = vpack.i.bf16 %v13688_v40, %v13686_v19  ;;  %v4591_v40 = vld [vmem:[#allocation3 + $0x91] sm:$0xff] }
 0x338   : > { %10377 = vrot.lane.b32.xlu0 %v10376_v23, %s11077_s18  ;;  %v3601_v29 = vadd.f32 %v13870_v13, %v3600_v21  ;;  %7229 = vmatprep.mubr.bf16.mxu1 %v6835_v61  ;;  %v3602_v39 = vpop.f32.mrb[93].mxu0  ;;  %v10406_v61 = vpack.i.bf16 %v4805_v20, %v4804_v28  ;;  %v6512_v36 = vsel %vm2717_vm2, %v6448_v14, %v10104_v46  ;;  %v4678_v46 = vld [vmem:[#allocation3 + $0x1d2] sm:$0xff] }
 0x339   : > { %10412 = vrot.lane.b32.xlu1 %v10366_v15, %s11077_s18  ;;  %7230 = vmatmul.mubr.bf16.gmra.mrb[80].mxu1 %v6834_v26  ;;  %v3603_v45 = vpop.f32.mrb[94].mxu0  ;;  %v6449_v15 = vsel %vm365_vm0, %v4336_v62, %v10095_v8  ;;  %v6576_v59 = vsel %vm2782_vm3, %v6512_v36, %v10114_v27  ;;  %v4677_v62 = vld [vmem:[#allocation3 + $0x1ca] sm:$0xff] }
 0x33a   : > { %v10098_v38 = vpop.permute.xlu0 %10097  ;;  %v3890_v25 = vadd.f32 %v13462_v4, %v3601_v29  ;;  %v3604_v11 = vadd.f32 %v13870_v13, %v3603_v45  ;;  %v3605_v49 = vpop.f32.mrb[95].mxu0  ;;  %v6513_v10 = vsel %vm2717_vm2, %v6449_v15, %v10105_v30  ;;  %v4592_v4 = vld [vmem:[#allocation3 + $0x99] sm:$0xff]  ;;  %v4550_v30 = vld [vmem:[#allocation3 + $0x1d0] sm:$0xff]  ;;  %v4549_v45 = vld [vmem:[#allocation3 + $0x1c8] sm:$0xff]  ;;  %v10124_v15 = vunpack.i.l.bf16 %v13938_v33 }
 0x33b   : > { %v13956_v52 = vpop.permute.xlu1 %10132  ;;  %v10100_v7 = vunpack.i.h.bf16 %v10098_v38  ;;  %v10099_v5 = vunpack.i.l.bf16 %v10098_v38  ;;  %v6641_v55 = vsel %vm365_vm0, %v4592_v4, %v10090_v0  ;;  %v6577_v19 = vsel %vm2782_vm3, %v6513_v10, %v10115_v50  ;;  %v4743_v10 = vld [vmem:[#allocation3 + $0x1e8] sm:$0xff] }
 0x33c   : > { %10387 = vrot.lane.b32.xlu0 %v16652_v34, %s11074_s12  ;;  %vm4006_vm11 = vcmp.gt.f32.partialorder %v3890_v25, 0.0  ;;  %v4070_v53 = vmul.f32 0.01, %v3890_v25  ;;  %v3893_v60 = vadd.f32 %v13487_v31, %v3604_v11  ;;  %v6640_v31 = vsel %vm365_vm0, %v4591_v40, %v10089_v63  ;;  %v4423_v34 = vld [vmem:[#allocation3 + $0x1c9] sm:$0xff] }
 0x33d   : > { %10422 = vrot.lane.b32.xlu1 %v10421_v2, %s11074_s12  ;;  %v6705_v21 = vsel %vm2717_vm2, %v6641_v55, %v10100_v7  ;;  %v6704_v39 = vsel %vm2717_vm2, %v6640_v31, %v10099_v5  ;;  %v10441_v11 = vpack.i.bf16 %v4550_v30, %v4549_v45  ;;  %v6837_v63 = vpack.c.bf16 %v6577_v19, %v6576_v59  ;;  %v4337_v55 = vld [vmem:[#allocation3 + $0x90] sm:$0xff] }
 0x33e   : > { %v10108_v18 = vpop.permute.xlu0 %10107  ;;  %v4880_v51 = vld [vmem:[#allocation3 + $0x25a] sm:$0xff]  ;;  %v4881_v23 = vld [vmem:[#allocation3 + $0x262] sm:$0xff]  ;;  %v4134_v47 = vsel %vm4006_vm11, %v3890_v25, %v4070_v53  ;;  %vm4007_vm12 = vcmp.gt.f32.partialorder %v3893_v60, 0.0  ;;  %v4071_v48 = vmul.f32 0.01, %v3893_v60  ;;  %v10416_v7 = vpack.i.bf16 %v4678_v46, %v4677_v62  ;;  %v4594_v30 = vld [vmem:[#allocation3 + $0xb1] sm:$0xff] }
 0x33f   : > { %v10110_v8 = vunpack.i.h.bf16 %v10108_v18  ;;  %v13970_v57 = vpop.permute.xlu1 %10142  ;;  %4307 = vst.msk [vmem:[#allocation3 + $0x271] sm:$0xff] %vm365_vm0, %v4134_v47  ;;  %v10109_v22 = vunpack.i.l.bf16 %v10108_v18  ;;  %v6887_v12 = vpack.c.bf16 %v4881_v23, %v4880_v51  ;;  %v10125_v4 = vunpack.i.h.bf16 %v13938_v33  ;;  %v4338_v47 = vld [vmem:[#allocation3 + $0x98] sm:$0xff] }
 0x340   : > { %10397 = vrot.lane.b32.xlu0 %v10396_v24, %s11076_s19  ;;  %v4135_v26 = vsel %vm4007_vm12, %v3893_v60, %v4071_v48  ;;  %v3608_v29 = vpop.f32.mrb[96].mxu0  ;;  %v10135_v53 = vunpack.i.h.bf16 %v13956_v52  ;;  %v10134_v60 = vunpack.i.l.bf16 %v13956_v52  ;;  %v6450_v36 = vsel %vm365_vm0, %v4337_v55, %v10124_v15 }
 0x341   : > { %10432 = vrot.lane.b32.xlu1 %v10431_v56, %s11076_s19  ;;  %v6769_v2 = vsel %vm2782_vm3, %v6705_v21, %v10110_v8  ;;  %4308 = vst.msk [vmem:[#allocation3 + $0x279] sm:$0xff] %vm365_vm0, %v4135_v26  ;;  %v3609_v24 = vadd.f32 %v13870_v13, %v3608_v29  ;;  %8869 = vmatmul.mubr.msk.bf16.gmra.mrb[168].mxu0 %vm365_vm0, %v6887_v12  ;;  %v3610_v50 = vpop.f32.mrb[97].mxu0  ;;  %v4424_v56 = vld [vmem:[#allocation3 + $0x1d1] sm:$0xff]  ;;  %v10145_v48 = vunpack.i.h.bf16 %v13970_v57 }
 0x342   : > { %v10118_v0 = vpop.permute.xlu0 %10117  ;;  %v6768_v38 = vsel %vm2782_vm3, %v6704_v39, %v10109_v22  ;;  %v3611_v25 = vpop.f32.mrb[98].mxu0  ;;  %v10451_v5 = vpack.i.bf16 %v4424_v56, %v4423_v34  ;;  %v6451_v12 = vsel %vm365_vm0, %v4338_v47, %v10125_v4  ;;  %v6514_v29 = vsel %vm2717_vm2, %v6450_v36, %v10134_v60  ;;  %v4593_v39 = vld [vmem:[#allocation3 + $0xa9] sm:$0xff] }
 0x343   : > { %v13985_v14 = vpop.permute.xlu1 %10152  ;;  %v6838_v49 = vpack.c.bf16 %v6769_v2, %v6768_v38  ;;  %v3612_v28 = vadd.f32 %v13870_v13, %v3611_v25  ;;  %v3898_v20 = vadd.f32 %v13531_v16, %v3609_v24  ;;  %v3613_v27 = vpop.f32.mrb[99].mxu0  ;;  %v10144_v16 = vunpack.i.l.bf16 %v13970_v57  ;;  %v4807_v56 = vld [vmem:[#allocation3 + $0x1e9] sm:$0xff] }
 0x344   : > { %10407 = vrot.lane.b32.xlu0 %v10406_v61, %s11077_s18  ;;  %v10120_v18 = vunpack.i.h.bf16 %v10118_v0  ;;  %v4742_v61 = vld [vmem:[#allocation3 + $0x1e0] sm:$0xff]  ;;  %v10119_v33 = vunpack.i.l.bf16 %v10118_v0  ;;  %v6515_v62 = vsel %vm2717_vm2, %v6451_v12, %v10135_v53 }
 0x345   : > { %10442 = vrot.lane.b32.xlu1 %v10441_v11, %s11077_s18  ;;  %7237 = vmatprep.mubr.bf16.mxu1 %v6838_v49  ;;  %vm4008_vm13 = vcmp.gt.f32.partialorder %v3898_v20, 0.0  ;;  %v4072_v51 = vmul.f32 0.01, %v3898_v20  ;;  %v3901_v19 = vadd.f32 %v13544_v35, %v3612_v28  ;;  %v10426_v52 = vpack.i.bf16 %v4743_v10, %v4742_v61  ;;  %v4806_v27 = vld [vmem:[#allocation3 + $0x1e1] sm:$0xff] }
 0x346   : > { %7238 = vmatmul.mubr.bf16.gmra.mrb[84].mxu1 %v6837_v63  ;;  %v10128_v23 = vpop.permute.xlu0 %10127  ;;  %v6643_v57 = vsel %vm365_vm0, %v4594_v30, %v10120_v18  ;;  %v6578_v46 = vsel %vm2782_vm3, %v6514_v29, %v10144_v16  ;;  %v6642_v24 = vsel %vm365_vm0, %v4593_v39, %v10119_v33  ;;  %v6579_v49 = vsel %vm2782_vm3, %v6515_v62, %v10145_v48  ;;  %v4339_v61 = vld [vmem:[#allocation3 + $0xa8] sm:$0xff]  ;;  %v4340_v29 = vld [vmem:[#allocation3 + $0xb0] sm:$0xff] }
 0x347   : > { %v13997_v40 = vpop.permute.xlu1 %10162  ;;  %v4136_v8 = vsel %vm4008_vm13, %v3898_v20, %v4072_v51  ;;  %v10130_v31 = vunpack.i.h.bf16 %v10128_v23  ;;  %v10129_v22 = vunpack.i.l.bf16 %v10128_v23  ;;  %vm4009_vm14 = vcmp.gt.f32.partialorder %v3901_v19, 0.0 }
 0x348   : > { %10417 = vrot.lane.b32.xlu0 %v10416_v7, %s11074_s12  ;;  %4309 = vst.msk [vmem:[#allocation3 + $0x289] sm:$0xff] %vm365_vm0, %v4136_v8  ;;  %v4073_v21 = vmul.f32 0.01, %v3901_v19  ;;  %v4882_v35 = vld [vmem:[#allocation3 + $0x272] sm:$0xff]  ;;  %v4883_v26 = vld [vmem:[#allocation3 + $0x27a] sm:$0xff]  ;;  %v10154_v10 = vunpack.i.l.bf16 %v13985_v14  ;;  %v10436_v60 = vpack.i.bf16 %v4807_v56, %v4806_v27  ;;  %v10155_v23 = vunpack.i.h.bf16 %v13985_v14 }
 0x349   : > { %10452 = vrot.lane.b32.xlu1 %v10451_v5, %s11074_s12  ;;  %v6890_v59 = vpack.c.bf16 %v4883_v26, %v4882_v35  ;;  %v6706_v25 = vsel %vm2717_vm2, %v6642_v24, %v10129_v22  ;;  %v6707_v11 = vsel %vm2717_vm2, %v6643_v57, %v10130_v31  ;;  %v10164_v36 = vunpack.i.l.bf16 %v13997_v40  ;;  %v4489_v31 = vld [vmem:[#allocation3 + $0x1e2] sm:$0xff]  ;;  %v4490_v22 = vld [vmem:[#allocation3 + $0x1ea] sm:$0xff] }
 0x34a   : > { %v10138_v2 = vpop.permute.xlu0 %10137  ;;  %v4137_v50 = vsel %vm4009_vm14, %v3901_v19, %v4073_v21  ;;  %v10165_v47 = vunpack.i.h.bf16 %v13997_v40  ;;  %v10491_v56 = vpack.i.bf16 %v4490_v22, %v4489_v31 }
 0x34b   : > { %v10140_v0 = vunpack.i.h.bf16 %v10138_v2  ;;  %v10139_v45 = vunpack.i.l.bf16 %v10138_v2  ;;  %v14009_v38 = vpop.permute.xlu1 %10172  ;;  %4310 = vst.msk [vmem:[#allocation3 + $0x291] sm:$0xff] %vm365_vm0, %v4137_v50  ;;  %v3616_v15 = vpop.f32.mrb[100].mxu0  ;;  %8872 = vmatprep.mubr.msk.bf16.mxu0 %vm365_vm0, %v6890_v59  ;;  %v6453_v59 = vsel %vm365_vm0, %v4340_v29, %v10155_v23  ;;  %v4595_v50 = vld [vmem:[#allocation3 + $0xc1] sm:$0xff] }
 0x34c   : > { %10427 = vrot.lane.b32.xlu0 %v10426_v52, %s11076_s19  ;;  %v3617_v28 = vadd.f32 %v13870_v13, %v3616_v15  ;;  %v3618_v20 = vpop.f32.mrb[101].mxu0  ;;  %v10174_v48 = vunpack.i.l.bf16 %v14009_v38  ;;  %v10175_v39 = vunpack.i.h.bf16 %v14009_v38  ;;  %v6517_v32 = vsel %vm2717_vm2, %v6453_v59, %v10165_v47 }
 0x34d   : > { %10462 = vrot.lane.b32.xlu1 %v10416_v7, %s11076_s19  ;;  %v6770_v63 = vsel %vm2782_vm3, %v6706_v25, %v10139_v45  ;;  %v6771_v34 = vsel %vm2782_vm3, %v6707_v11, %v10140_v0  ;;  %v3619_v4 = vpop.f32.mrb[102].mxu0  ;;  %v6840_v7 = vpack.c.bf16 %v6579_v49, %v6578_v46  ;;  %v4744_v46 = vld [vmem:[#allocation3 + $0x1f8] sm:$0xff]  ;;  %v4596_v0 = vld [vmem:[#allocation3 + $0xc9] sm:$0xff]  ;;  %v4809_v20 = vld [vmem:[#allocation3 + $0x201] sm:$0xff] }
 0x34e   : > { %v10148_v53 = vpop.permute.xlu0 %10147  ;;  %v6841_v5 = vpack.c.bf16 %v6771_v34, %v6770_v63  ;;  %v3906_v55 = vadd.f32 %v13524_v43, %v3617_v28  ;;  %v3620_v16 = vadd.f32 %v13870_v13, %v3619_v4  ;;  %v3621_v51 = vpop.f32.mrb[103].mxu0  ;;  %v6452_v43 = vsel %vm365_vm0, %v4339_v61, %v10154_v10 }
 0x34f   : > { %v14024_v18 = vpop.permute.xlu1 %10182  ;;  %v10150_v14 = vunpack.i.h.bf16 %v10148_v53  ;;  %v10149_v21 = vunpack.i.l.bf16 %v10148_v53  ;;  %v6516_v24 = vsel %vm2717_vm2, %v6452_v43, %v10164_v36  ;;  %v6581_v4 = vsel %vm2782_vm3, %v6517_v32, %v10175_v39  ;;  %v4341_v39 = vld [vmem:[#allocation3 + $0xc0] sm:$0xff] }
 0x350   : > { %10437 = vrot.lane.b32.xlu0 %v10436_v60, %s11077_s18  ;;  %7245 = vmatprep.mubr.bf16.mxu1 %v6841_v5  ;;  %vm4010_vm15 = vcmp.gt.f32.partialorder %v3906_v55, 0.0  ;;  %v4074_v33 = vmul.f32 0.01, %v3906_v55  ;;  %v3909_v19 = vadd.f32 %v13541_v58, %v3620_v16  ;;  %v6580_v41 = vsel %vm2782_vm3, %v6516_v24, %v10174_v48 }
 0x351   : > { %10472 = vrot.lane.b32.xlu1 %v10426_v52, %s11077_s18  ;;  %7246 = vmatmul.mubr.bf16.gmra.mrb[88].mxu1 %v6840_v7  ;;  %v4745_v52 = vld [vmem:[#allocation3 + $0x200] sm:$0xff]  ;;  %v6644_v15 = vsel %vm365_vm0, %v4595_v50, %v10149_v21  ;;  %v10185_v43 = vunpack.i.h.bf16 %v14024_v18  ;;  %v6843_v48 = vpack.c.bf16 %v6581_v4, %v6580_v41 }
 0x352   : > { %v10158_v8 = vpop.permute.xlu0 %10157  ;;  %v4138_v12 = vsel %vm4010_vm15, %v3906_v55, %v4074_v33  ;;  %vm4011_vm1 = vcmp.gt.f32.partialorder %v3909_v19, 0.0  ;;  %v4075_v30 = vmul.f32 0.01, %v3909_v19  ;;  %v4884_v58 = vld [vmem:[#allocation3 + $0x28a] sm:$0xff]  ;;  %v4885_v26 = vld [vmem:[#allocation3 + $0x292] sm:$0xff]  ;;  %v10456_v38 = vpack.i.bf16 %v4745_v52, %v4744_v46  ;;  %v4681_v33 = vld [vmem:[#allocation3 + $0x1fa] sm:$0xff] }
 0x353   : > { %v14034_v35 = vpop.permute.xlu1 %10192  ;;  %4311 = vst.msk [vmem:[#allocation3 + $0x2a1] sm:$0xff] %vm365_vm0, %v4138_v12  ;;  %v10160_v40 = vunpack.i.h.bf16 %v10158_v8  ;;  %v10159_v57 = vunpack.i.l.bf16 %v10158_v8  ;;  %v6893_v2 = vpack.c.bf16 %v4885_v26, %v4884_v58  ;;  %v4597_v41 = vld [vmem:[#allocation3 + $0xd9] sm:$0xff] }
 0x354   : > { %10447 = vrot.lane.b32.xlu0 %v10446_v1, %s11074_s12  ;;  %v4139_v62 = vsel %vm4011_vm1, %v3909_v19, %v4075_v30  ;;  %v6645_v1 = vsel %vm365_vm0, %v4596_v0, %v10150_v14  ;;  %v4682_v19 = vld [vmem:[#allocation3 + $0x202] sm:$0xff]  ;;  %v10184_v14 = vunpack.i.l.bf16 %v14024_v18  ;;  %v10194_v22 = vunpack.i.l.bf16 %v14034_v35 }
 0x355   : > { %10482 = vrot.lane.b32.xlu1 %v10436_v60, %s11074_s12  ;;  %4312 = vst.msk [vmem:[#allocation3 + $0x2a9] sm:$0xff] %vm365_vm0, %v4139_v62  ;;  %8873 = vmatmul.mubr.msk.bf16.gmra.mrb[172].mxu0 %vm365_vm0, %v6893_v2  ;;  %v6708_v34 = vsel %vm2717_vm2, %v6644_v15, %v10159_v57  ;;  %v6709_v10 = vsel %vm2717_vm2, %v6645_v1, %v10160_v40  ;;  %v4808_v60 = vld [vmem:[#allocation3 + $0x1f9] sm:$0xff]  ;;  %v4342_v18 = vld [vmem:[#allocation3 + $0xc8] sm:$0xff]  ;;  %vm7971_vm1 = vcmask 1041408  }
 0x356   : > { %v10168_v45 = vpop.permute.xlu0 %10167  ;;  %v10466_v61 = vpack.i.bf16 %v4809_v20, %v4808_v60  ;;  %v10476_v58 = vpack.i.bf16 %v4682_v19, %v4681_v33  ;;  %v6455_v40 = vsel %vm365_vm0, %v4342_v18, %v10185_v43  ;;  %v4747_v62 = vld [vmem:[#allocation3 + $0x218] sm:$0xff]  ;;  %v6454_v46 = vsel %vm365_vm0, %v4341_v39, %v10184_v14  ;;  %v4598_v1 = vld [vmem:[#allocation3 + $0xe1] sm:$0xff] }
 0x357   : > { %v3624_v25 = vpop.f32.mrb[104].mxu0  ;;  %v10170_v11 = vunpack.i.h.bf16 %v10168_v45  ;;  %v10169_v49 = vunpack.i.l.bf16 %v10168_v45  ;;  %v14051_v28 = vpop.permute.xlu1 %10202 }
 0x358   : > { %v3625_v27 = vadd.f32 %v13870_v13, %v3624_v25  ;;  %v3626_v63 = vpop.f32.mrb[105].mxu0  ;;  %10457 = vrot.lane.b32.xlu0 %v10456_v38, %s11076_s19  ;;  %v10205_v12 = vunpack.i.h.bf16 %v14051_v28  ;;  %v10204_v26 = vunpack.i.l.bf16 %v14051_v28  ;;  %v4811_v28 = vld [vmem:[#allocation3 + $0x219] sm:$0xff] }
 0x359   : > { %v3627_v53 = vpop.f32.mrb[106].mxu0  ;;  %10492 = vrot.lane.b32.xlu1 %v10491_v56, %s11076_s19  ;;  %v6772_v5 = vsel %vm2782_vm3, %v6708_v34, %v10169_v49  ;;  %v6773_v55 = vsel %vm2782_vm3, %v6709_v10, %v10170_v11  ;;  %v6518_v56 = vsel %vm2717_vm2, %v6454_v46, %v10194_v22  ;;  %v4683_v22 = vld [vmem:[#allocation3 + $0x212] sm:$0xff] }
 0x35a   : > { %v3628_v16 = vadd.f32 %v13870_v13, %v3627_v53  ;;  %v3914_v51 = vadd.f32 %v13600_v3, %v3625_v27  ;;  %v3629_v7 = vpop.f32.mrb[107].mxu0  ;;  %v10178_v23 = vpop.permute.xlu0 %10177  ;;  %v6844_v36 = vpack.c.bf16 %v6773_v55, %v6772_v5  ;;  %v10195_v3 = vunpack.i.h.bf16 %v14034_v35 }
 0x35b   : > { %v14064_v47 = vpop.permute.xlu1 %10212  ;;  %v10180_v35 = vunpack.i.h.bf16 %v10178_v23  ;;  %v10179_v57 = vunpack.i.l.bf16 %v10178_v23  ;;  %v6582_v20 = vsel %vm2782_vm3, %v6518_v56, %v10204_v26 }
 0x35c   : > { %vm4012_vm4 = vcmp.gt.f32.partialorder %v3914_v51, 0.0  ;;  %v4076_v8 = vmul.f32 0.01, %v3914_v51  ;;  %v3917_v31 = vadd.f32 %v13613_v17, %v3628_v16  ;;  %10467 = vrot.lane.b32.xlu0 %v10466_v61, %s11077_s18  ;;  %7253 = vmatprep.mubr.bf16.mxu1 %v6844_v36  ;;  %v4886_v30 = vld [vmem:[#allocation3 + $0x2a2] sm:$0xff]  ;;  %v4887_v21 = vld [vmem:[#allocation3 + $0x2aa] sm:$0xff]  ;;  %v6519_v32 = vsel %vm2717_vm2, %v6455_v40, %v10195_v3 }
 0x35d   : > { %10502 = vrot.lane.b32.xlu1 %v10456_v38, %s11077_s18  ;;  %7254 = vmatmul.mubr.bf16.gmra.mrb[92].mxu1 %v6843_v48  ;;  %v6896_v59 = vpack.c.bf16 %v4887_v21, %v4886_v30  ;;  %v4746_v38 = vld [vmem:[#allocation3 + $0x210] sm:$0xff]  ;;  %v6583_v27 = vsel %vm2782_vm3, %v6519_v32, %v10205_v12  ;;  %v6647_v63 = vsel %vm365_vm0, %v4598_v1, %v10180_v35  ;;  %v10215_v14 = vunpack.i.h.bf16 %v14064_v47  ;;  %v4684_v12 = vld [vmem:[#allocation3 + $0x21a] sm:$0xff] }
 0x35e   : > { %v4140_v52 = vsel %vm4012_vm4, %v3914_v51, %v4076_v8  ;;  %vm4013_vm5 = vcmp.gt.f32.partialorder %v3917_v31, 0.0  ;;  %v4077_v17 = vmul.f32 0.01, %v3917_v31  ;;  %v10188_v29 = vpop.permute.xlu0 %10187  ;;  %v10486_v49 = vpack.i.bf16 %v4747_v62, %v4746_v38  ;;  %v4810_v51 = vld [vmem:[#allocation3 + $0x211] sm:$0xff]  ;;  %v4344_v62 = vld [vmem:[#allocation3 + $0xe0] sm:$0xff] }
 0x35f   : > { %4313 = vst.msk [vmem:[#allocation3 + $0x2b9] sm:$0xff] %vm365_vm0, %v4140_v52  ;;  %v14076_v2 = vpop.permute.xlu1 %10222  ;;  %v10190_v50 = vunpack.i.h.bf16 %v10188_v29  ;;  %v10189_v0 = vunpack.i.l.bf16 %v10188_v29  ;;  %8876 = vmatprep.mubr.msk.bf16.mxu0 %vm365_vm0, %v6896_v59  ;;  %v6646_v34 = vsel %vm365_vm0, %v4597_v41, %v10179_v57  ;;  %v10214_v8 = vunpack.i.l.bf16 %v14064_v47  ;;  %v4749_v59 = vld [vmem:[#allocation3 + $0x230] sm:$0xff]  ;;  %v4748_v41 = vld [vmem:[#allocation3 + $0x228] sm:$0xff] }
 0x360   : > { %v4141_v24 = vsel %vm4013_vm5, %v3917_v31, %v4077_v17  ;;  %10477 = vrot.lane.b32.xlu0 %v10476_v58, %s11074_s12  ;;  %v6846_v3 = vpack.c.bf16 %v6583_v27, %v6582_v20  ;;  %v10224_v30 = vunpack.i.l.bf16 %v14076_v2  ;;  %v10225_v26 = vunpack.i.h.bf16 %v14076_v2  ;;  %v4343_v17 = vld [vmem:[#allocation3 + $0xd8] sm:$0xff] }
 0x361   : > { %4314 = vst.msk [vmem:[#allocation3 + $0x2c1] sm:$0xff] %vm365_vm0, %v4141_v24  ;;  %v3632_v45 = vpop.f32.mrb[108].mxu0  ;;  %10512 = vrot.lane.b32.xlu1 %v10466_v61, %s11074_s12  ;;  %v6710_v7 = vsel %vm2717_vm2, %v6646_v34, %v10189_v0  ;;  %v6711_v23 = vsel %vm2717_vm2, %v6647_v63, %v10190_v50  ;;  %v10496_v61 = vpack.i.bf16 %v4811_v28, %v4810_v51  ;;  %v4600_v20 = vld [vmem:[#allocation3 + $0xf9] sm:$0xff]  ;;  %vm7967_vm5 = vcmask 15360  }
 0x362   : > { %v3633_v15 = vadd.f32 %v13870_v13, %v3632_v45  ;;  %v3634_v25 = vpop.f32.mrb[109].mxu0  ;;  %v10198_v11 = vpop.permute.xlu0 %10197  ;;  %v10506_v57 = vpack.i.bf16 %v4684_v12, %v4683_v22  ;;  %v6456_v46 = vsel %vm365_vm0, %v4343_v17, %v10214_v8  ;;  %v6457_v45 = vsel %vm365_vm0, %v4344_v62, %v10215_v14  ;;  %v4346_v17 = vld [vmem:[#allocation3 + $0xf8] sm:$0xff]  ;;  %v4345_v62 = vld [vmem:[#allocation3 + $0xf0] sm:$0xff] }
 0x363   : > { %v3635_v10 = vpop.f32.mrb[110].mxu0  ;;  %v10200_v4 = vunpack.i.h.bf16 %v10198_v11  ;;  %v10199_v53 = vunpack.i.l.bf16 %v10198_v11  ;;  %v14090_v60 = vpop.permute.xlu1 %10232  ;;  %v6520_v1 = vsel %vm2717_vm2, %v6456_v46, %v10224_v30  ;;  %v10516_v11 = vpack.i.bf16 %v4749_v59, %v4748_v41  ;;  %v4685_v30 = vld [vmem:[#allocation3 + $0x22a] sm:$0xff]  ;;  %v4750_v59 = vld [vmem:[#allocation3 + $0x240] sm:$0xff] }
 0x364   : > { %v3922_v5 = vadd.f32 %v13594_v42, %v3633_v15  ;;  %v3636_v55 = vadd.f32 %v13870_v13, %v3635_v10  ;;  %v3637_v16 = vpop.f32.mrb[111].mxu0  ;;  %10487 = vrot.lane.b32.xlu0 %v10486_v49, %s11076_s19  ;;  %v10234_v47 = vunpack.i.l.bf16 %v14090_v60  ;;  %v10235_v39 = vunpack.i.h.bf16 %v14090_v60  ;;  %v4599_v15 = vld [vmem:[#allocation3 + $0xf1] sm:$0xff] }
 0x365   : > { %10522 = vrot.lane.b32.xlu1 %v10476_v58, %s11076_s19  ;;  %v6774_v36 = vsel %vm2782_vm3, %v6710_v7, %v10199_v53  ;;  %v6775_v33 = vsel %vm2782_vm3, %v6711_v23, %v10200_v4  ;;  %v4813_v53 = vld [vmem:[#allocation3 + $0x231] sm:$0xff] }
 0x366   : > { %vm4014_vm6 = vcmp.gt.f32.partialorder %v3922_v5, 0.0  ;;  %v4078_v19 = vmul.f32 0.01, %v3922_v5  ;;  %v3925_v42 = vadd.f32 %v13609_v9, %v3636_v55  ;;  %v10208_v43 = vpop.permute.xlu0 %10207  ;;  %v6847_v48 = vpack.c.bf16 %v6775_v33, %v6774_v36 }
 0x367   : > { %v14103_v31 = vpop.permute.xlu1 %10242  ;;  %v10209_v40 = vunpack.i.l.bf16 %v10208_v43  ;;  %v10210_v2 = vunpack.i.h.bf16 %v10208_v43  ;;  %v6584_v28 = vsel %vm2782_vm3, %v6520_v1, %v10234_v47 }
 0x368   : > { %v4142_v21 = vsel %vm4014_vm6, %v3922_v5, %v4078_v19  ;;  %vm4015_vm7 = vcmp.gt.f32.partialorder %v3925_v42, 0.0  ;;  %v4079_v58 = vmul.f32 0.01, %v3925_v42  ;;  %10497 = vrot.lane.b32.xlu0 %v10496_v61, %s11077_s18  ;;  %7261 = vmatprep.mubr.bf16.mxu1 %v6847_v48  ;;  %v4888_v9 = vld [vmem:[#allocation3 + $0x2ba] sm:$0xff]  ;;  %v4889_v18 = vld [vmem:[#allocation3 + $0x2c2] sm:$0xff] }
 0x369   : > { %4315 = vst.msk [vmem:[#allocation3 + $0x2d1] sm:$0xff] %vm365_vm0, %v4142_v21  ;;  %10532 = vrot.lane.b32.xlu1 %v10486_v49, %s11077_s18  ;;  %7262 = vmatmul.mubr.bf16.gmra.mrb[96].mxu1 %v6846_v3  ;;  %v6899_v52 = vpack.c.bf16 %v4889_v18, %v4888_v9  ;;  %v6521_v49 = vsel %vm2717_vm2, %v6457_v45, %v10225_v26  ;;  %v10245_v3 = vunpack.i.h.bf16 %v14103_v31  ;;  %v4686_v21 = vld [vmem:[#allocation3 + $0x232] sm:$0xff]  ;;  %v4751_v18 = vld [vmem:[#allocation3 + $0x248] sm:$0xff] }
 0x36a   : > { %v4143_v29 = vsel %vm4015_vm7, %v3925_v42, %v4079_v58  ;;  %v10218_v35 = vpop.permute.xlu0 %10217  ;;  %v6648_v27 = vsel %vm365_vm0, %v4599_v15, %v10209_v40  ;;  %v6585_v60 = vsel %vm2782_vm3, %v6521_v49, %v10235_v39  ;;  %v6649_v5 = vsel %vm365_vm0, %v4600_v20, %v10210_v2  ;;  %v4601_v49 = vld [vmem:[#allocation3 + $0x109] sm:$0xff] }
 0x36b   : > { %4316 = vst.msk [vmem:[#allocation3 + $0x2d9] sm:$0xff] %vm365_vm0, %v4143_v29  ;;  %v3640_v24 = vpop.f32.mrb[112].mxu0  ;;  %8877 = vmatmul.mubr.msk.bf16.gmra.mrb[176].mxu0 %vm365_vm0, %v6899_v52  ;;  %v10219_v50 = vunpack.i.l.bf16 %v10218_v35  ;;  %v14115_v0 = vpop.permute.xlu1 %10252  ;;  %v10220_v32 = vunpack.i.h.bf16 %v10218_v35  ;;  %v6849_v12 = vpack.c.bf16 %v6585_v60, %v6584_v28  ;;  %v10244_v58 = vunpack.i.l.bf16 %v14103_v31  ;;  %v14151_v31 = vld [vmem:[%s16377_s2] ss:$0 sm:$0xff] }
 0x36c   : > { %v3641_v38 = vadd.f32 %v13870_v13, %v3640_v24  ;;  %v3642_v56 = vpop.f32.mrb[113].mxu0  ;;  %10507 = vrot.lane.b32.xlu0 %v10506_v57, %s11074_s12  ;;  %v10255_v26 = vunpack.i.h.bf16 %v14115_v0  ;;  %v10254_v47 = vunpack.i.l.bf16 %v14115_v0  ;;  %v6459_v46 = vsel %vm365_vm0, %v4346_v17, %v10245_v3 }
 0x36d   : > { %v3643_v25 = vpop.f32.mrb[114].mxu0  ;;  %10542 = vrot.lane.b32.xlu1 %v10496_v61, %s11074_s12  ;;  %v6712_v7 = vsel %vm2717_vm2, %v6648_v27, %v10219_v50  ;;  %v16653_v61 = vld [vmem:[#allocation76_spill] sm:$0xff]  ;;  %v10546_v45 = vpack.i.bf16 %v4751_v18, %v4750_v59  ;;  %v16654_v56 = vld [vmem:[#allocation74_spill] sm:$0xff] }
 0x36e   : > { %v3644_v63 = vadd.f32 %v13870_v13, %v3643_v25  ;;  %v3930_v34 = vadd.f32 %v13655_v54, %v3641_v38  ;;  %v3645_v10 = vpop.f32.mrb[115].mxu0  ;;  %v10228_v4 = vpop.permute.xlu0 %10227  ;;  %v4812_v54 = vld [vmem:[#allocation3 + $0x229] sm:$0xff]  ;;  %v6713_v13 = vsel %vm2717_vm2, %v6649_v5, %v10220_v32  ;;  %v6458_v38 = vsel %vm365_vm0, %v4345_v62, %v10244_v58  ;;  %v4602_v27 = vld [vmem:[#allocation3 + $0x111] sm:$0xff] }
 0x36f   : > { %v10230_v55 = vunpack.i.h.bf16 %v10228_v4  ;;  %v10229_v16 = vunpack.i.l.bf16 %v10228_v4  ;;  %v14129_v51 = vpop.permute.xlu1 %10262  ;;  %v10526_v33 = vpack.i.bf16 %v4813_v53, %v4812_v54  ;;  %v6522_v28 = vsel %vm2717_vm2, %v6458_v38, %v10254_v47  ;;  %v16655_v10 = vld [vmem:[#allocation75_spill] sm:$0xff] }
 0x370   : > { %vm4016_vm8 = vcmp.gt.f32.partialorder %v3930_v34, 0.0  ;;  %v4080_v23 = vmul.f32 0.01, %v3930_v34  ;;  %v3933_v36 = vadd.f32 %v16653_v61, %v3644_v63  ;;  %10517 = vrot.lane.b32.xlu0 %v10516_v11, %s11076_s19  ;;  %v10265_v25 = vunpack.i.h.bf16 %v14129_v51  ;;  %v4814_v54 = vld [vmem:[#allocation3 + $0x241] sm:$0xff] }
 0x371   : > { %10552 = vrot.lane.b32.xlu1 %v10506_v57, %s11076_s19  ;;  %v6776_v19 = vsel %vm2782_vm3, %v6712_v7, %v10229_v16  ;;  %v6777_v42 = vsel %vm2782_vm3, %v6713_v13, %v10230_v55  ;;  %v10536_v57 = vpack.i.bf16 %v4686_v21, %v4685_v30  ;;  %v6523_v20 = vsel %vm2717_vm2, %v6459_v46, %v10255_v26  ;;  %v4687_v30 = vld [vmem:[#allocation3 + $0x242] sm:$0xff]  ;;  %v4688_v21 = vld [vmem:[#allocation3 + $0x24a] sm:$0xff] }
 0x372   : > { %v4144_v43 = vsel %vm4016_vm8, %v3930_v34, %v4080_v23  ;;  %vm4017_vm9 = vcmp.gt.f32.partialorder %v3933_v36, 0.0  ;;  %v4081_v48 = vmul.f32 0.01, %v3933_v36  ;;  %v10238_v14 = vpop.permute.xlu0 %10237  ;;  %v6850_v8 = vpack.c.bf16 %v6777_v42, %v6776_v19 }
 0x373   : > { %4317 = vst.msk [vmem:[#allocation3 + $0x2e9] sm:$0xff] %vm365_vm0, %v4144_v43  ;;  %v14140_v22 = vpop.permute.xlu1 %10272  ;;  %v10239_v29 = vunpack.i.l.bf16 %v10238_v14  ;;  %v10240_v2 = vunpack.i.h.bf16 %v10238_v14  ;;  %v6587_v42 = vsel %vm2782_vm3, %v6523_v20, %v10265_v25 }
 0x374   : > { %v4145_v9 = vsel %vm4017_vm9, %v3933_v36, %v4081_v48  ;;  %10527 = vrot.lane.b32.xlu0 %v10526_v33, %s11077_s18  ;;  %7269 = vmatprep.mubr.bf16.mxu1 %v6850_v8  ;;  %v10275_v43 = vunpack.i.h.bf16 %v14140_v22  ;;  %v10274_v17 = vunpack.i.l.bf16 %v14140_v22 }
 0x375   : > { %4318 = vst.msk [vmem:[#allocation3 + $0x2f1] sm:$0xff] %vm365_vm0, %v4145_v9  ;;  %v3648_v52 = vpop.f32.mrb[116].mxu0  ;;  %10562 = vrot.lane.b32.xlu1 %v10516_v11, %s11077_s18  ;;  %7270 = vmatmul.mubr.bf16.gmra.mrb[100].mxu1 %v6849_v12  ;;  %v10264_v11 = vunpack.i.l.bf16 %v14129_v51  ;;  %v6650_v63 = vsel %vm365_vm0, %v4601_v49, %v10239_v29  ;;  %v6651_v60 = vsel %vm365_vm0, %v4602_v27, %v10240_v2  ;;  %v4815_v51 = vld [vmem:[#allocation3 + $0x249] sm:$0xff]  ;;  %v4603_v49 = vld [vmem:[#allocation3 + $0x121] sm:$0xff] }
 0x376   : > { %v3649_v39 = vadd.f32 %v14151_v31, %v3648_v52  ;;  %v3650_v40 = vpop.f32.mrb[117].mxu0  ;;  %v10248_v35 = vpop.permute.xlu0 %10247  ;;  %v10556_v3 = vpack.i.bf16 %v4815_v51, %v4814_v54  ;;  %v4348_v52 = vld [vmem:[#allocation3 + $0x110] sm:$0xff] }
 0x377   : > { %v3651_v24 = vpop.f32.mrb[118].mxu0  ;;  %v10249_v50 = vunpack.i.l.bf16 %v10248_v35  ;;  %v14155_v0 = vpop.permute.xlu1 %10282  ;;  %v10250_v1 = vunpack.i.h.bf16 %v10248_v35  ;;  %v6586_v19 = vsel %vm2782_vm3, %v6522_v28, %v10264_v11  ;;  %v10566_v35 = vpack.i.bf16 %v4688_v21, %v4687_v30 }
 0x378   : > { %v3938_v32 = vadd.f32 %v16654_v56, %v3649_v39  ;;  %v3652_v41 = vadd.f32 %v14151_v31, %v3651_v24  ;;  %v3653_v15 = vpop.f32.mrb[119].mxu0  ;;  %10537 = vrot.lane.b32.xlu0 %v10536_v57, %s11074_s12  ;;  %v6852_v47 = vpack.c.bf16 %v6587_v42, %v6586_v19  ;;  %v10285_v59 = vunpack.i.h.bf16 %v14155_v0  ;;  %v4347_v56 = vld [vmem:[#allocation3 + $0x108] sm:$0xff] }
 0x379   : > { %10572 = vrot.lane.b32.xlu1 %v10526_v33, %s11074_s12  ;;  %v6714_v7 = vsel %vm2717_vm2, %v6650_v63, %v10249_v50  ;;  %v6715_v36 = vsel %vm2717_vm2, %v6651_v60, %v10250_v1  ;;  %v10284_v62 = vunpack.i.l.bf16 %v14155_v0  ;;  %v6460_v0 = vsel %vm365_vm0, %v4347_v56, %v10274_v17  ;;  %v4604_v15 = vld [vmem:[#allocation3 + $0x129] sm:$0xff]  ;;  %v16656_v17 = vld [vmem:[#allocation77_spill] sm:$0xff] }
 0x37a   : > { %vm4018_vm10 = vcmp.gt.f32.partialorder %v3938_v32, 0.0  ;;  %v4082_v34 = vmul.f32 0.01, %v3938_v32  ;;  %v3941_v4 = vadd.f32 %v16655_v10, %v3652_v41  ;;  %v10258_v53 = vpop.permute.xlu0 %10257 }
 0x37b   : > { %v10260_v5 = vunpack.i.h.bf16 %v10258_v53  ;;  %v10259_v55 = vunpack.i.l.bf16 %v10258_v53  ;;  %v14169_v16 = vpop.permute.xlu1 %10292  ;;  %v6524_v63 = vsel %vm2717_vm2, %v6460_v0, %v10284_v62  ;;  %v4754_v0 = vld [vmem:[#allocation3 + $0x270] sm:$0xff] }
 0x37c   : > { %v4146_v23 = vsel %vm4018_vm10, %v3938_v32, %v4082_v34  ;;  %vm4019_vm11 = vcmp.gt.f32.partialorder %v3941_v4, 0.0  ;;  %v4083_v61 = vmul.f32 0.01, %v3941_v4  ;;  %10547 = vrot.lane.b32.xlu0 %v10546_v45, %s11076_s19  ;;  %v10294_v32 = vunpack.i.l.bf16 %v14169_v16 }
 0x37d   : > { %4319 = vst.msk [vmem:[#allocation3 + $0x301] sm:$0xff] %vm365_vm0, %v4146_v23  ;;  %10582 = vrot.lane.b32.xlu1 %v10536_v57, %s11076_s19  ;;  %v6778_v13 = vsel %vm2782_vm3, %v6714_v7, %v10259_v55  ;;  %v6779_v33 = vsel %vm2782_vm3, %v6715_v36, %v10260_v5  ;;  %v6461_v57 = vsel %vm365_vm0, %v4348_v52, %v10275_v43  ;;  %v4817_v55 = vld [vmem:[#allocation3 + $0x261] sm:$0xff] }
 0x37e   : > { %v4147_v48 = vsel %vm4019_vm11, %v3941_v4, %v4083_v61  ;;  %v3656_v14 = vpop.f32.mrb[120].mxu0  ;;  %v10268_v8 = vpop.permute.xlu0 %10267  ;;  %v6853_v12 = vpack.c.bf16 %v6779_v33, %v6778_v13  ;;  %v6525_v34 = vsel %vm2717_vm2, %v6461_v57, %v10285_v59  ;;  %v6588_v23 = vsel %vm2782_vm3, %v6524_v63, %v10294_v32  ;;  %v4816_v13 = vld [vmem:[#allocation3 + $0x259] sm:$0xff] }
 0x37f   : > { %4320 = vst.msk [vmem:[#allocation3 + $0x309] sm:$0xff] %vm365_vm0, %v4147_v48  ;;  %v3657_v58 = vadd.f32 %v14151_v31, %v3656_v14  ;;  %v3658_v9 = vpop.f32.mrb[121].mxu0  ;;  %v14183_v18 = vpop.permute.xlu1 %10302  ;;  %v10270_v46 = vunpack.i.h.bf16 %v10268_v8  ;;  %v10269_v24 = vunpack.i.l.bf16 %v10268_v8  ;;  %v10586_v48 = vpack.i.bf16 %v4817_v55, %v4816_v13 }
 0x380   : > { %v3659_v26 = vpop.f32.mrb[122].mxu0  ;;  %10557 = vrot.lane.b32.xlu0 %v10556_v3, %s11077_s18  ;;  %7277 = vmatprep.mubr.bf16.mxu1 %v6853_v12  ;;  %v4690_v9 = vld [vmem:[#allocation3 + $0x262] sm:$0xff] }
 0x381   : > { %v3660_v29 = vadd.f32 %v14151_v31, %v3659_v26  ;;  %v3946_v39 = vadd.f32 %v13752_v44, %v3657_v58  ;;  %v3661_v40 = vpop.f32.mrb[123].mxu0  ;;  %10592 = vrot.lane.b32.xlu1 %v10546_v45, %s11077_s18  ;;  %7278 = vmatmul.mubr.bf16.gmra.mrb[104].mxu1 %v6852_v47  ;;  %v4753_v44 = vld [vmem:[#allocation3 + $0x260] sm:$0xff]  ;;  %v10295_v45 = vunpack.i.h.bf16 %v14169_v16  ;;  %v6653_v28 = vsel %vm365_vm0, %v4604_v15, %v10270_v46 }
 0x382   : > { %v10278_v2 = vpop.permute.xlu0 %10277  ;;  %v6652_v10 = vsel %vm365_vm0, %v4603_v49, %v10269_v24  ;;  %v4689_v58 = vld [vmem:[#allocation3 + $0x25a] sm:$0xff]  ;;  %v10305_v26 = vunpack.i.h.bf16 %v14183_v18  ;;  %v10304_v47 = vunpack.i.l.bf16 %v14183_v18  ;;  %v4350_v24 = vld [vmem:[#allocation3 + $0x128] sm:$0xff] }
 0x383   : > { %vm4020_vm12 = vcmp.gt.f32.partialorder %v3946_v39, 0.0  ;;  %v4084_v22 = vmul.f32 0.01, %v3946_v39  ;;  %v3949_v50 = vadd.f32 %v13765_v37, %v3660_v29  ;;  %v14194_v38 = vpop.permute.xlu1 %10312  ;;  %v10280_v41 = vunpack.i.h.bf16 %v10278_v2  ;;  %v4752_v37 = vld [vmem:[#allocation3 + $0x258] sm:$0xff] }
 0x384   : > { %v10279_v1 = vunpack.i.l.bf16 %v10278_v2  ;;  %10567 = vrot.lane.b32.xlu0 %v10566_v35, %s11074_s12  ;;  %v10576_v27 = vpack.i.bf16 %v4753_v44, %v4752_v37  ;;  %v6589_v61 = vsel %vm2782_vm3, %v6525_v34, %v10295_v45  ;;  %v4755_v18 = vld [vmem:[#allocation3 + $0x278] sm:$0xff]  ;;  %v4349_v2 = vld [vmem:[#allocation3 + $0x120] sm:$0xff]  ;;  %v6463_v45 = vsel %vm365_vm0, %v4350_v24, %v10305_v26 }
 0x385   : > { %v4148_v25 = vsel %vm4020_vm12, %v3946_v39, %v4084_v22  ;;  %vm4021_vm13 = vcmp.gt.f32.partialorder %v3949_v50, 0.0  ;;  %v4085_v11 = vmul.f32 0.01, %v3949_v50  ;;  %10602 = vrot.lane.b32.xlu1 %v10556_v3, %s11074_s12  ;;  %v6717_v7 = vsel %vm2717_vm2, %v6653_v28, %v10280_v41  ;;  %v4605_v15 = vld [vmem:[#allocation3 + $0x139] sm:$0xff] }
 0x386   : > { %4321 = vst.msk [vmem:[#allocation3 + $0x319] sm:$0xff] %vm365_vm0, %v4148_v25  ;;  %v10288_v20 = vpop.permute.xlu0 %10287  ;;  %v6716_v51 = vsel %vm2717_vm2, %v6652_v10, %v10279_v1  ;;  %v6855_v21 = vpack.c.bf16 %v6589_v61, %v6588_v23  ;;  %v6462_v32 = vsel %vm365_vm0, %v4349_v2, %v10304_v47  ;;  %v4606_v25 = vld [vmem:[#allocation3 + $0x141] sm:$0xff]  ;;  %v10606_v49 = vpack.i.bf16 %v4755_v18, %v4754_v0  ;;  %v4607_v18 = vld [vmem:[#allocation3 + $0x151] sm:$0xff]  ;;  %v4608_v2 = vld [vmem:[#allocation3 + $0x159] sm:$0xff] }
 0x387   : > { %v4149_v4 = vsel %vm4021_vm13, %v3949_v50, %v4085_v11  ;;  %v10290_v53 = vunpack.i.h.bf16 %v10288_v20  ;;  %v10289_v60 = vunpack.i.l.bf16 %v10288_v20  ;;  %v14206_v5 = vpop.permute.xlu1 %10322  ;;  %v3664_v16 = vpop.f32.mrb[124].mxu0 }
 0x388   : > { %4322 = vst.msk [vmem:[#allocation3 + $0x321] sm:$0xff] %vm365_vm0, %v4149_v4  ;;  %10577 = vrot.lane.b32.xlu0 %v10576_v27, %s11076_s19  ;;  %v3665_v36 = vadd.f32 %v14151_v31, %v3664_v16  ;;  %v3666_v54 = vpop.f32.mrb[125].mxu0  ;;  %v10325_v22 = vunpack.i.h.bf16 %v14206_v5  ;;  %v10324_v50 = vunpack.i.l.bf16 %v14206_v5 }
 0x389   : > { %10612 = vrot.lane.b32.xlu1 %v10566_v35, %s11076_s19  ;;  %v6780_v33 = vsel %vm2782_vm3, %v6716_v51, %v10289_v60  ;;  %v6781_v19 = vsel %vm2782_vm3, %v6717_v7, %v10290_v53  ;;  %v3667_v42 = vpop.f32.mrb[126].mxu0  ;;  %v10596_v35 = vpack.i.bf16 %v4690_v9, %v4689_v58  ;;  %v4819_v60 = vld [vmem:[#allocation3 + $0x279] sm:$0xff]  ;;  %v4818_v7 = vld [vmem:[#allocation3 + $0x271] sm:$0xff] }
 0x38a   : > { %v10298_v43 = vpop.permute.xlu0 %10297  ;;  %v6856_v14 = vpack.c.bf16 %v6781_v19, %v6780_v33  ;;  %v3954_v8 = vadd.f32 %v13744_v6, %v3665_v36  ;;  %v3668_v3 = vadd.f32 %v14151_v31, %v3667_v42  ;;  %v3669_v30 = vpop.f32.mrb[127].mxu0  ;;  %v10315_v6 = vunpack.i.h.bf16 %v14194_v38  ;;  %v4691_v42 = vld [vmem:[#allocation3 + $0x272] sm:$0xff] }
 0x38b   : > { %v14220_v12 = vpop.permute.xlu1 %10332  ;;  %v10314_v31 = vunpack.i.l.bf16 %v14194_v38  ;;  %v10300_v39 = vunpack.i.h.bf16 %v10298_v43  ;;  %v10299_v62 = vunpack.i.l.bf16 %v10298_v43  ;;  %v10616_v54 = vpack.i.bf16 %v4819_v60, %v4818_v7  ;;  %v4692_v43 = vld [vmem:[#allocation3 + $0x27a] sm:$0xff] }
 0x38c   : > { %10587 = vrot.lane.b32.xlu0 %v10586_v48, %s11077_s18  ;;  %7285 = vmatprep.mubr.bf16.mxu1 %v6856_v14  ;;  %vm4022_vm14 = vcmp.gt.f32.partialorder %v3954_v8, 0.0  ;;  %v4086_v52 = vmul.f32 0.01, %v3954_v8  ;;  %v3957_v29 = vadd.f32 %v16656_v17, %v3668_v3  ;;  %v6527_v20 = vsel %vm2717_vm2, %v6463_v45, %v10315_v6  ;;  %v4351_v6 = vld [vmem:[#allocation3 + $0x138] sm:$0xff] }
 0x38d   : > { %10622 = vrot.lane.b32.xlu1 %v10576_v27, %s11077_s18  ;;  %7286 = vmatmul.mubr.bf16.gmra.mrb[108].mxu1 %v6855_v21  ;;  %v6526_v28 = vsel %vm2717_vm2, %v6462_v32, %v10314_v31  ;;  %v6655_v27 = vsel %vm365_vm0, %v4606_v25, %v10300_v39  ;;  %v6654_v63 = vsel %vm365_vm0, %v4605_v15, %v10299_v62  ;;  %v10335_v14 = vunpack.i.h.bf16 %v14220_v12  ;;  %v4352_v31 = vld [vmem:[#allocation3 + $0x140] sm:$0xff]  ;;  %v4821_v15 = vld [vmem:[#allocation3 + $0x291] sm:$0xff] }
 0x38e   : > { %v10308_v40 = vpop.permute.xlu0 %10307  ;;  %v4150_v57 = vsel %vm4022_vm14, %v3954_v8, %v4086_v52  ;;  %vm4023_vm15 = vcmp.gt.f32.partialorder %v3957_v29, 0.0  ;;  %v4087_v59 = vmul.f32 0.01, %v3957_v29  ;;  %v6590_v16 = vsel %vm2782_vm3, %v6526_v28, %v10324_v50 }
 0x38f   : > { %v14229_v46 = vpop.permute.xlu1 %10342  ;;  %4323 = vst.msk [vmem:[#allocation3 + $0x331] sm:$0xff] %vm365_vm0, %v4150_v57  ;;  %v10310_v44 = vunpack.i.h.bf16 %v10308_v40  ;;  %v10309_v38 = vunpack.i.l.bf16 %v10308_v40  ;;  %v14234_v56 = vpop.f32.mrb[128].mxu0  ;;  %v6591_v51 = vsel %vm2782_vm3, %v6527_v20, %v10325_v22  ;;  %v10334_v8 = vunpack.i.l.bf16 %v14220_v12  ;;  %v4757_v12 = vld [vmem:[#allocation3 + $0x290] sm:$0xff] }
 0x390   : > { %10597 = vrot.lane.b32.xlu0 %v10596_v35, %s11074_s12  ;;  %v4151_v41 = vsel %vm4023_vm15, %v3957_v29, %v4087_v59  ;;  %v14241_v1 = vpop.f32.mrb[129].mxu0  ;;  %v6858_v19 = vpack.c.bf16 %v6591_v51, %v6590_v16  ;;  %v10345_v30 = vunpack.i.h.bf16 %v14229_v46  ;;  %v10344_v21 = vunpack.i.l.bf16 %v14229_v46  ;;  %v4756_v46 = vld [vmem:[#allocation3 + $0x288] sm:$0xff] }
 0x391   : > { %10632 = vrot.lane.b32.xlu1 %v10586_v48, %s11074_s12  ;;  %4324 = vst.msk [vmem:[#allocation3 + $0x339] sm:$0xff] %vm365_vm0, %v4151_v41  ;;  %v14244_v11 = vpop.f32.mrb[130].mxu0  ;;  %v6718_v5 = vsel %vm2717_vm2, %v6654_v63, %v10309_v38  ;;  %v6719_v55 = vsel %vm2717_vm2, %v6655_v27, %v10310_v44  ;;  %v10626_v26 = vpack.i.bf16 %v4692_v43, %v4691_v42  ;;  %v4820_v63 = vld [vmem:[#allocation3 + $0x289] sm:$0xff] }
 0x392   : > { %v10318_v37 = vpop.permute.xlu0 %10317  ;;  %v14252_v53 = vpop.f32.mrb[131].mxu0  ;;  %v6465_v59 = vsel %vm365_vm0, %v4352_v31, %v10335_v14  ;;  %v6464_v62 = vsel %vm365_vm0, %v4351_v6, %v10334_v8  ;;  %v10636_v22 = vpack.i.bf16 %v4757_v12, %v4756_v46 }
 0x393   : > { %v10320_v34 = vunpack.i.h.bf16 %v10318_v37  ;;  %v10319_v10 = vunpack.i.l.bf16 %v10318_v37  ;;  %v14250_v4 = vpop.permute.xlu1 %10352  ;;  %v6528_v50 = vsel %vm2717_vm2, %v6464_v62, %v10344_v21  ;;  %v6529_v44 = vsel %vm2717_vm2, %v6465_v59, %v10345_v30  ;;  %v4759_v21 = vld [vmem:[#allocation3 + $0x2a8] sm:$0xff] }
 0x394   : > { %10607 = vrot.lane.b32.xlu0 %v10606_v49, %s11076_s19  ;;  %v10355_v39 = vunpack.i.h.bf16 %v14250_v4  ;;  %v10354_v40 = vunpack.i.l.bf16 %v14250_v4 }
 0x395   : > { %10642 = vrot.lane.b32.xlu1 %v10596_v35, %s11076_s19  ;;  %v6782_v23 = vsel %vm2782_vm3, %v6718_v5, %v10319_v10  ;;  %v6783_v61 = vsel %vm2782_vm3, %v6719_v55, %v10320_v34  ;;  %v10646_v5 = vpack.i.bf16 %v4821_v15, %v4820_v63 }
 0x396   : > { %v10328_v36 = vpop.permute.xlu0 %10327  ;;  %v6859_v13 = vpack.c.bf16 %v6783_v61, %v6782_v23  ;;  %v6592_v28 = vsel %vm2782_vm3, %v6528_v50, %v10354_v40  ;;  %v6593_v20 = vsel %vm2782_vm3, %v6529_v44, %v10355_v39  ;;  %v4693_v23 = vld [vmem:[#allocation3 + $0x28a] sm:$0xff]  ;;  %v4694_v61 = vld [vmem:[#allocation3 + $0x292] sm:$0xff]  ;;  %v4758_v40 = vld [vmem:[#allocation3 + $0x2a0] sm:$0xff] }
 0x397   : > { %v14262_v33 = vpop.permute.xlu1 %10362  ;;  %v14264_v48 = vpop.f32.mrb[132].mxu0  ;;  %v10330_v47 = vunpack.i.h.bf16 %v10328_v36  ;;  %v10329_v52 = vunpack.i.l.bf16 %v10328_v36  ;;  %v6861_v7 = vpack.c.bf16 %v6593_v20, %v6592_v28  ;;  %v10656_v43 = vpack.i.bf16 %v4694_v61, %v4693_v23 }
 0x398   : > { %10617 = vrot.lane.b32.xlu0 %v10616_v54, %s11077_s18  ;;  %7293 = vmatprep.mubr.bf16.mxu1 %v6859_v13  ;;  %v14270_v3 = vpop.f32.mrb[133].mxu0  ;;  %v10365_v36 = vunpack.i.h.bf16 %v14262_v33  ;;  %v10666_v46 = vpack.i.bf16 %v4759_v21, %v4758_v40 }
 0x399   : > { %10652 = vrot.lane.b32.xlu1 %v10606_v49, %s11077_s18  ;;  %7294 = vmatmul.mubr.bf16.gmra.mrb[112].mxu1 %v6858_v19  ;;  %v14274_v58 = vpop.f32.mrb[134].mxu0  ;;  %v6657_v38 = vsel %vm365_vm0, %v4608_v2, %v10330_v47  ;;  %v6656_v45 = vsel %vm365_vm0, %v4607_v18, %v10329_v52 }
 0x39a   : > { %v10338_v9 = vpop.permute.xlu0 %10337  ;;  %v14278_v29 = vpop.f32.mrb[135].mxu0 }
 0x39b   : > { %v14276_v17 = vpop.permute.xlu1 %10372  ;;  %v10340_v35 = vunpack.i.h.bf16 %v10338_v9  ;;  %v10339_v57 = vunpack.i.l.bf16 %v10338_v9  ;;  %v4353_v9 = vld [vmem:[#allocation3 + $0x150] sm:$0xff] }
 0x39c   : > { %10627 = vrot.lane.b32.xlu0 %v10626_v26, %s11074_s12  ;;  %v10375_v13 = vunpack.i.h.bf16 %v14276_v17  ;;  %v10374_v19 = vunpack.i.l.bf16 %v14276_v17 }
 0x39d   : > { %10662 = vrot.lane.b32.xlu1 %v10616_v54, %s11074_s12  ;;  %v6720_v37 = vsel %vm2717_vm2, %v6656_v45, %v10339_v57  ;;  %v6721_v49 = vsel %vm2717_vm2, %v6657_v38, %v10340_v35  ;;  %v10364_v54 = vunpack.i.l.bf16 %v14262_v33  ;;  %v4609_v35 = vld [vmem:[#allocation3 + $0x169] sm:$0xff]  ;;  %v4610_v57 = vld [vmem:[#allocation3 + $0x171] sm:$0xff] }
 0x39e   : > { %v10348_v24 = vpop.permute.xlu0 %10347 }
 0x39f   : > { %v10350_v32 = vunpack.i.h.bf16 %v10348_v24  ;;  %v10349_v41 = vunpack.i.l.bf16 %v10348_v24  ;;  %v14290_v0 = vpop.permute.xlu1 %10382  ;;  %v14292_v25 = vpop.f32.mrb[136].mxu0  ;;  %v6466_v31 = vsel %vm365_vm0, %v4353_v9, %v10364_v54 }
 0x3a0   : > { %10637 = vrot.lane.b32.xlu0 %v10636_v22, %s11076_s19  ;;  %v14300_v27 = vpop.f32.mrb[137].mxu0  ;;  %v10385_v47 = vunpack.i.h.bf16 %v14290_v0  ;;  %v10384_v33 = vunpack.i.l.bf16 %v14290_v0  ;;  %v6530_v18 = vsel %vm2717_vm2, %v6466_v31, %v10374_v19 }
 0x3a1   : > { %10672 = vrot.lane.b32.xlu1 %v10626_v26, %s11076_s19  ;;  %v6784_v34 = vsel %vm2782_vm3, %v6720_v37, %v10349_v41  ;;  %v6785_v10 = vsel %vm2782_vm3, %v6721_v49, %v10350_v32  ;;  %v14304_v4 = vpop.f32.mrb[138].mxu0  ;;  %v4354_v26 = vld [vmem:[#allocation3 + $0x158] sm:$0xff]  ;;  %v4823_v32 = vld [vmem:[#allocation3 + $0x2a9] sm:$0xff]  ;;  %v4822_v49 = vld [vmem:[#allocation3 + $0x2a1] sm:$0xff] }
 0x3a2   : > { %v10358_v60 = vpop.permute.xlu0 %10357  ;;  %v6862_v55 = vpack.c.bf16 %v6785_v10, %v6784_v34  ;;  %v14308_v51 = vpop.f32.mrb[139].mxu0  ;;  %v6467_v17 = vsel %vm365_vm0, %v4354_v26, %v10365_v36  ;;  %v6594_v15 = vsel %vm2782_vm3, %v6530_v18, %v10384_v33  ;;  %v10676_v34 = vpack.i.bf16 %v4823_v32, %v4822_v49  ;;  %v4356_v33 = vld [vmem:[#allocation3 + $0x170] sm:$0xff] }
 0x3a3   : > { %v14306_v16 = vpop.permute.xlu1 %10392  ;;  %v10360_v14 = vunpack.i.h.bf16 %v10358_v60  ;;  %v10359_v8 = vunpack.i.l.bf16 %v10358_v60  ;;  %v6531_v2 = vsel %vm2717_vm2, %v6467_v17, %v10375_v13 }
 0x3a4   : > { %10647 = vrot.lane.b32.xlu0 %v10646_v5, %s11077_s18  ;;  %7301 = vmatprep.mubr.bf16.mxu1 %v6862_v55  ;;  %v6595_v37 = vsel %vm2782_vm3, %v6531_v2, %v10385_v47  ;;  %v4695_v55 = vld [vmem:[#allocation3 + $0x2a2] sm:$0xff]  ;;  %v10395_v61 = vunpack.i.h.bf16 %v14306_v16  ;;  %v10394_v36 = vunpack.i.l.bf16 %v14306_v16 }
 0x3a5   : > { %10682 = vrot.lane.b32.xlu1 %v10636_v22, %s11077_s18  ;;  %7302 = vmatmul.mubr.bf16.gmra.mrb[116].mxu1 %v6861_v7  ;;  %v6659_v24 = vsel %vm365_vm0, %v4610_v57, %v10360_v14  ;;  %v6658_v22 = vsel %vm365_vm0, %v4609_v35, %v10359_v8  ;;  %v4696_v7 = vld [vmem:[#allocation3 + $0x2aa] sm:$0xff]  ;;  %v4761_v16 = vld [vmem:[#allocation3 + $0x2c0] sm:$0xff]  ;;  %v4760_v35 = vld [vmem:[#allocation3 + $0x2b8] sm:$0xff] }
 0x3a6   : > { %v10368_v42 = vpop.permute.xlu0 %10367  ;;  %v10686_v14 = vpack.i.bf16 %v4696_v7, %v4695_v55  ;;  %v4355_v47 = vld [vmem:[#allocation3 + $0x168] sm:$0xff]  ;;  %v10696_v18 = vpack.i.bf16 %v4761_v16, %v4760_v35  ;;  %v4697_v16 = vld [vmem:[#allocation3 + $0x2ba] sm:$0xff] }
 0x3a7   : > { %v14316_v30 = vpop.permute.xlu1 %10402  ;;  %v10370_v52 = vunpack.i.h.bf16 %v10368_v42  ;;  %v10369_v12 = vunpack.i.l.bf16 %v10368_v42  ;;  %v14320_v6 = vpop.f32.mrb[140].mxu0  ;;  %v6468_v40 = vsel %vm365_vm0, %v4355_v47, %v10394_v36  ;;  %v4611_v57 = vld [vmem:[#allocation3 + $0x181] sm:$0xff] }
 0x3a8   : > { %10657 = vrot.lane.b32.xlu0 %v10656_v43, %s11074_s12  ;;  %v14326_v39 = vpop.f32.mrb[141].mxu0  ;;  %v10405_v13 = vunpack.i.h.bf16 %v14316_v30  ;;  %v10404_v19 = vunpack.i.l.bf16 %v14316_v30  ;;  %v6469_v30 = vsel %vm365_vm0, %v4356_v33, %v10395_v61  ;;  %v4698_v47 = vld [vmem:[#allocation3 + $0x2c2] sm:$0xff] }
 0x3a9   : > { %10692 = vrot.lane.b32.xlu1 %v10646_v5, %s11074_s12  ;;  %v14328_v59 = vpop.f32.mrb[142].mxu0  ;;  %v6722_v41 = vsel %vm2717_vm2, %v6658_v22, %v10369_v12  ;;  %v6723_v0 = vsel %vm2717_vm2, %v6659_v24, %v10370_v52  ;;  %v6864_v5 = vpack.c.bf16 %v6595_v37, %v6594_v15 }
 0x3aa   : > { %v10378_v62 = vpop.permute.xlu0 %10377  ;;  %v14336_v45 = vpop.f32.mrb[143].mxu0  ;;  %v6532_v2 = vsel %vm2717_vm2, %v6468_v40, %v10404_v19  ;;  %v6533_v24 = vsel %vm2717_vm2, %v6469_v30, %v10405_v13 }
 0x3ab   : > { %v10380_v50 = vunpack.i.h.bf16 %v10378_v62  ;;  %v10379_v44 = vunpack.i.l.bf16 %v10378_v62  ;;  %v14334_v38 = vpop.permute.xlu1 %10412  ;;  %v4612_v62 = vld [vmem:[#allocation3 + $0x189] sm:$0xff] }
 0x3ac   : > { %10667 = vrot.lane.b32.xlu0 %v10666_v46, %s11076_s19  ;;  %v10415_v52 = vunpack.i.h.bf16 %v14334_v38  ;;  %v10414_v12 = vunpack.i.l.bf16 %v14334_v38 }
 0x3ad   : > { %10702 = vrot.lane.b32.xlu1 %v10656_v43, %s11076_s19  ;;  %v6786_v28 = vsel %vm2782_vm3, %v6722_v41, %v10379_v44  ;;  %v6787_v20 = vsel %vm2782_vm3, %v6723_v0, %v10380_v50  ;;  %v4825_v41 = vld [vmem:[#allocation3 + $0x2c1] sm:$0xff] }
 0x3ae   : > { %v10388_v63 = vpop.permute.xlu0 %10387  ;;  %v6865_v10 = vpack.c.bf16 %v6787_v20, %v6786_v28  ;;  %v6596_v49 = vsel %vm2782_vm3, %v6532_v2, %v10414_v12  ;;  %v6597_v28 = vsel %vm2782_vm3, %v6533_v24, %v10415_v52 }
 0x3af   : > { %v14346_v60 = vpop.permute.xlu1 %10422  ;;  %v14348_v23 = vpop.f32.mrb[144].mxu0  ;;  %v10390_v8 = vunpack.i.h.bf16 %v10388_v63  ;;  %v10389_v21 = vunpack.i.l.bf16 %v10388_v63  ;;  %v4824_v63 = vld [vmem:[#allocation3 + $0x2b9] sm:$0xff] }
 0x3b0   : > { %10677 = vrot.lane.b32.xlu0 %v10676_v34, %s11077_s18  ;;  %7309 = vmatprep.mubr.bf16.mxu1 %v6865_v10  ;;  %v14354_v54 = vpop.f32.mrb[145].mxu0  ;;  %v10425_v55 = vunpack.i.h.bf16 %v14346_v60  ;;  %v10424_v7 = vunpack.i.l.bf16 %v14346_v60  ;;  %v10706_v13 = vpack.i.bf16 %v4825_v41, %v4824_v63  ;;  %v4827_v63 = vld [vmem:[#allocation3 + $0x2d9] sm:$0xff] }
 0x3b1   : > { %10712 = vrot.lane.b32.xlu1 %v10666_v46, %s11077_s18  ;;  %7310 = vmatmul.mubr.bf16.gmra.mrb[120].mxu1 %v6864_v5  ;;  %v14358_v42 = vpop.f32.mrb[146].mxu0  ;;  %v6661_v22 = vsel %vm365_vm0, %v4612_v62, %v10390_v8  ;;  %v6660_v50 = vsel %vm365_vm0, %v4611_v57, %v10389_v21  ;;  %v4357_v5 = vld [vmem:[#allocation3 + $0x1b0] sm:$0xff]  ;;  %v6867_v21 = vpack.c.bf16 %v6597_v28, %v6596_v49  ;;  %v4763_v57 = vld [vmem:[#allocation3 + $0x2d8] sm:$0xff] }
 0x3b2   : > { %v10398_v43 = vpop.permute.xlu0 %10397  ;;  %v14362_v26 = vpop.f32.mrb[147].mxu0  ;;  %v6470_v12 = vsel %vm365_vm0, %v4357_v5, %v10424_v7  ;;  %v4826_v7 = vld [vmem:[#allocation3 + $0x2d1] sm:$0xff] }
 0x3b3   : > { %v14360_v9 = vpop.permute.xlu1 %10432  ;;  %v10400_v17 = vunpack.i.h.bf16 %v10398_v43  ;;  %v10399_v31 = vunpack.i.l.bf16 %v10398_v43  ;;  %v4358_v43 = vld [vmem:[#allocation3 + $0x1b8] sm:$0xff] }
 0x3b4   : > { %10687 = vrot.lane.b32.xlu0 %v10686_v14, %s11074_s12  ;;  %v10435_v33 = vunpack.i.h.bf16 %v14360_v9  ;;  %v10434_v60 = vunpack.i.l.bf16 %v14360_v9  ;;  %v6471_v52 = vsel %vm365_vm0, %v4358_v43, %v10425_v55  ;;  %v10736_v43 = vpack.i.bf16 %v4827_v63, %v4826_v7 }
 0x3b5   : > { %10722 = vrot.lane.b32.xlu1 %v10676_v34, %s11074_s12  ;;  %v6724_v15 = vsel %vm2717_vm2, %v6660_v50, %v10399_v31  ;;  %v6725_v37 = vsel %vm2717_vm2, %v6661_v22, %v10400_v17  ;;  %v10716_v31 = vpack.i.bf16 %v4698_v47, %v4697_v16  ;;  %v4762_v22 = vld [vmem:[#allocation3 + $0x2d0] sm:$0xff] }
 0x3b6   : > { %v10408_v46 = vpop.permute.xlu0 %10407  ;;  %v6535_v24 = vsel %vm2717_vm2, %v6471_v52, %v10435_v33  ;;  %v4613_v50 = vld [vmem:[#allocation3 + $0x1c9] sm:$0xff]  ;;  %v10726_v41 = vpack.i.bf16 %v4763_v57, %v4762_v22  ;;  %v4700_v52 = vld [vmem:[#allocation3 + $0x2da] sm:$0xff] }
 0x3b7   : > { %v10410_v44 = vunpack.i.h.bf16 %v10408_v46  ;;  %v10409_v38 = vunpack.i.l.bf16 %v10408_v46  ;;  %v14374_v32 = vpop.permute.xlu1 %10442  ;;  %v14376_v0 = vpop.f32.mrb[148].mxu0  ;;  %v4765_v22 = vld [vmem:[#allocation3 + $0x2f0] sm:$0xff] }
 0x3b8   : > { %10697 = vrot.lane.b32.xlu0 %v10696_v18, %s11076_s19  ;;  %v14384_v20 = vpop.f32.mrb[149].mxu0  ;;  %v10445_v62 = vunpack.i.h.bf16 %v14374_v32  ;;  %v10444_v46 = vunpack.i.l.bf16 %v14374_v32 }
 0x3b9   : > { %10732 = vrot.lane.b32.xlu1 %v10686_v14, %s11076_s19  ;;  %v6788_v34 = vsel %vm2782_vm3, %v6724_v15, %v10409_v38  ;;  %v6789_v10 = vsel %vm2782_vm3, %v6725_v37, %v10410_v44  ;;  %v14390_v61 = vpop.f32.mrb[150].mxu0  ;;  %v4614_v44 = vld [vmem:[#allocation3 + $0x1d1] sm:$0xff] }
 0x3ba   : > { %v10418_v36 = vpop.permute.xlu0 %10417  ;;  %v6868_v19 = vpack.c.bf16 %v6789_v10, %v6788_v34  ;;  %v14394_v14 = vpop.f32.mrb[151].mxu0  ;;  %v6599_v55 = vsel %vm2782_vm3, %v6535_v24, %v10445_v62 }
 0x3bb   : > { %v14392_v8 = vpop.permute.xlu1 %10452  ;;  %v10420_v30 = vunpack.i.h.bf16 %v10418_v36  ;;  %v10419_v40 = vunpack.i.l.bf16 %v10418_v36 }
 0x3bc   : > { %10707 = vrot.lane.b32.xlu0 %v10706_v13, %s11077_s18  ;;  %7317 = vmatprep.mubr.bf16.mxu1 %v6868_v19 }
 0x3bd   : > { %10742 = vrot.lane.b32.xlu1 %v10696_v18, %s11077_s18  ;;  %7318 = vmatmul.mubr.bf16.gmra.mrb[124].mxu1 %v6867_v21  ;;  %v6534_v18 = vsel %vm2717_vm2, %v6470_v12, %v10434_v60  ;;  %v6663_v15 = vsel %vm365_vm0, %v4614_v44, %v10420_v30  ;;  %v6662_v37 = vsel %vm365_vm0, %v4613_v50, %v10419_v40  ;;  %v4699_v60 = vld [vmem:[#allocation3 + $0x2d2] sm:$0xff]  ;;  %v4359_v50 = vld [vmem:[#allocation3 + $0x1c8] sm:$0xff] }
 0x3be   : > { %v10428_v17 = vpop.permute.xlu0 %10427  ;;  %v6598_v5 = vsel %vm2782_vm3, %v6534_v18, %v10444_v46 }
 0x3bf   : > { %v14402_v35 = vpop.permute.xlu1 %10462  ;;  %v10430_v2 = vunpack.i.h.bf16 %v10428_v17  ;;  %v10429_v9 = vunpack.i.l.bf16 %v10428_v17  ;;  %v6870_v33 = vpack.c.bf16 %v6599_v55, %v6598_v5  ;;  %v10455_v17 = vunpack.i.h.bf16 %v14392_v8 }
 0x3c0   : > { %10717 = vrot.lane.b32.xlu0 %v10716_v31, %s11074_s12  ;;  %v10465_v40 = vunpack.i.h.bf16 %v14402_v35  ;;  %v10464_v57 = vunpack.i.l.bf16 %v14402_v35 }
 0x3c1   : > { %10752 = vrot.lane.b32.xlu1 %v10706_v13, %s11074_s12  ;;  %v6726_v34 = vsel %vm2717_vm2, %v6662_v37, %v10429_v9  ;;  %v6727_v10 = vsel %vm2717_vm2, %v6663_v15, %v10430_v2  ;;  %v10746_v2 = vpack.i.bf16 %v4700_v52, %v4699_v60 }
 0x3c2   : > { %v10438_v38 = vpop.permute.xlu0 %10437 }
 0x3c3   : > { %v10440_v32 = vunpack.i.h.bf16 %v10438_v38  ;;  %v10439_v49 = vunpack.i.l.bf16 %v10438_v38  ;;  %v14412_v28 = vpop.permute.xlu1 %10472 }
 0x3c4   : > { %10727 = vrot.lane.b32.xlu0 %v10726_v41, %s11076_s19  ;;  %v10475_v44 = vunpack.i.h.bf16 %v14412_v28  ;;  %v10474_v38 = vunpack.i.l.bf16 %v14412_v28 }
 0x3c5   : > { %10762 = vrot.lane.b32.xlu1 %v10716_v31, %s11076_s19  ;;  %v6790_v36 = vsel %vm2782_vm3, %v6726_v34, %v10439_v49  ;;  %v6791_v13 = vsel %vm2782_vm3, %v6727_v10, %v10440_v32  ;;  %v10454_v31 = vunpack.i.l.bf16 %v14392_v8  ;;  %v4360_v8 = vld [vmem:[#allocation3 + $0x1d0] sm:$0xff]  ;;  %v4764_v32 = vld [vmem:[#allocation3 + $0x2e8] sm:$0xff] }
 0x3c6   : > { %v10448_v19 = vpop.permute.xlu0 %10447  ;;  %v6871_v21 = vpack.c.bf16 %v6791_v13, %v6790_v36  ;;  %v14424_v47 = vpop.f32.mrb[152].mxu0  ;;  %v6473_v35 = vsel %vm365_vm0, %v4360_v8, %v10455_v17  ;;  %v4615_v34 = vld [vmem:[#allocation3 + $0x1e1] sm:$0xff]  ;;  %v4616_v10 = vld [vmem:[#allocation3 + $0x1e9] sm:$0xff]  ;;  %v10756_v55 = vpack.i.bf16 %v4765_v22, %v4764_v32 }
 0x3c7   : > { %v14422_v16 = vpop.permute.xlu1 %10482  ;;  %v14426_v12 = vpop.f32.mrb[153].mxu0  ;;  %v10450_v9 = vunpack.i.h.bf16 %v10448_v19  ;;  %v10449_v18 = vunpack.i.l.bf16 %v10448_v19  ;;  %v6472_v37 = vsel %vm365_vm0, %v4359_v50, %v10454_v31  ;;  %v6537_v63 = vsel %vm2717_vm2, %v6473_v35, %v10465_v40  ;;  %v4828_v31 = vld [vmem:[#allocation3 + $0x2e9] sm:$0xff] }
 0x3c8   : > { %10737 = vrot.lane.b32.xlu0 %v10736_v43, %s11077_s18  ;;  %7325 = vmatprep.mubr.bf16.mxu1 %v6871_v21  ;;  %v14432_v30 = vpop.f32.mrb[154].mxu0  ;;  %v6536_v49 = vsel %vm2717_vm2, %v6472_v37, %v10464_v57  ;;  %v4829_v21 = vld [vmem:[#allocation3 + $0x2f1] sm:$0xff]  ;;  %v6601_v52 = vsel %vm2782_vm3, %v6537_v63, %v10475_v44  ;;  %v10484_v35 = vunpack.i.l.bf16 %v14422_v16 }
 0x3c9   : > { %10772 = vrot.lane.b32.xlu1 %v10726_v41, %s11077_s18  ;;  %7326 = vmatmul.mubr.bf16.gmra.mrb[128].mxu1 %v6870_v33  ;;  %v14436_v62 = vpop.f32.mrb[155].mxu0  ;;  %v6665_v28 = vsel %vm365_vm0, %v4616_v10, %v10450_v9  ;;  %v6664_v7 = vsel %vm365_vm0, %v4615_v34, %v10449_v18  ;;  %v6600_v60 = vsel %vm2782_vm3, %v6536_v49, %v10474_v38  ;;  %v4701_v44 = vld [vmem:[#allocation3 + $0x2ea] sm:$0xff] }
 0x3ca   : > { %v10458_v46 = vpop.permute.xlu0 %10457  ;;  %v10766_v18 = vpack.i.bf16 %v4829_v21, %v4828_v31  ;;  %v6873_v38 = vpack.c.bf16 %v6601_v52, %v6600_v60  ;;  %v4617_v31 = vld [vmem:[#allocation3 + $0x1f9] sm:$0xff] }
 0x3cb   : > { %v14438_v24 = vpop.permute.xlu1 %10492  ;;  %v10460_v41 = vunpack.i.h.bf16 %v10458_v46  ;;  %v10459_v15 = vunpack.i.l.bf16 %v10458_v46 }
 0x3cc   : > { %10747 = vrot.lane.b32.xlu0 %v10746_v2, %s11074_s12  ;;  %v10495_v37 = vunpack.i.h.bf16 %v14438_v24  ;;  %v10494_v32 = vunpack.i.l.bf16 %v14438_v24 }
 0x3cd   : > { %10782 = vrot.lane.b32.xlu1 %v10736_v43, %s11074_s12  ;;  %v6728_v43 = vsel %vm2717_vm2, %v6664_v7, %v10459_v15  ;;  %v6729_v33 = vsel %vm2717_vm2, %v6665_v28, %v10460_v41  ;;  %v4702_v41 = vld [vmem:[#allocation3 + $0x2f2] sm:$0xff]  ;;  %v4767_v28 = vld [vmem:[#allocation3 + $0x308] sm:$0xff]  ;;  %v4361_v7 = vld [vmem:[#allocation3 + $0x1e0] sm:$0xff] }
 0x3ce   : > { %v10468_v5 = vpop.permute.xlu0 %10467  ;;  %v10776_v63 = vpack.i.bf16 %v4702_v41, %v4701_v44  ;;  %v6474_v24 = vsel %vm365_vm0, %v4361_v7, %v10484_v35 }
 0x3cf   : > { %v10470_v36 = vunpack.i.h.bf16 %v10468_v5  ;;  %v10469_v13 = vunpack.i.l.bf16 %v10468_v5  ;;  %v14450_v19 = vpop.permute.xlu1 %10502  ;;  %v14457_v17 = vpop.f32.mrb[156].mxu0  ;;  %v6538_v60 = vsel %vm2717_vm2, %v6474_v24, %v10494_v32 }
 0x3d0   : > { %10757 = vrot.lane.b32.xlu0 %v10756_v55, %s11076_s19  ;;  %v14462_v46 = vpop.f32.mrb[157].mxu0 }
 0x3d1   : > { %10792 = vrot.lane.b32.xlu1 %v10746_v2, %s11076_s19  ;;  %v6792_v40 = vsel %vm2782_vm3, %v6728_v43, %v10469_v13  ;;  %v6793_v57 = vsel %vm2782_vm3, %v6729_v33, %v10470_v36  ;;  %v14464_v50 = vpop.f32.mrb[158].mxu0  ;;  %v10485_v2 = vunpack.i.h.bf16 %v14422_v16  ;;  %v4362_v36 = vld [vmem:[#allocation3 + $0x1e8] sm:$0xff]  ;;  %v10505_v13 = vunpack.i.h.bf16 %v14450_v19  ;;  %v4766_v33 = vld [vmem:[#allocation3 + $0x300] sm:$0xff] }
 0x3d2   : > { %v10478_v9 = vpop.permute.xlu0 %10477  ;;  %v6874_v22 = vpack.c.bf16 %v6793_v57, %v6792_v40  ;;  %v14468_v15 = vpop.f32.mrb[159].mxu0  ;;  %v10504_v16 = vunpack.i.l.bf16 %v14450_v19  ;;  %v4618_v40 = vld [vmem:[#allocation3 + $0x201] sm:$0xff] }
 0x3d3   : > { %v14466_v8 = vpop.permute.xlu1 %10512  ;;  %v10480_v34 = vunpack.i.h.bf16 %v10478_v9  ;;  %v10479_v10 = vunpack.i.l.bf16 %v10478_v9  ;;  %v6475_v43 = vsel %vm365_vm0, %v4362_v36, %v10485_v2  ;;  %v10786_v9 = vpack.i.bf16 %v4767_v28, %v4766_v33  ;;  %v4831_v2 = vld [vmem:[#allocation3 + $0x309] sm:$0xff] }
 0x3d4   : > { %10767 = vrot.lane.b32.xlu0 %v10766_v18, %s11077_s18  ;;  %7333 = vmatprep.mubr.bf16.mxu1 %v6874_v22  ;;  %v6539_v52 = vsel %vm2717_vm2, %v6475_v43, %v10495_v37  ;;  %v6602_v32 = vsel %vm2782_vm3, %v6538_v60, %v10504_v16  ;;  %v4703_v60 = vld [vmem:[#allocation3 + $0x302] sm:$0xff] }
 0x3d5   : > { %10802 = vrot.lane.b32.xlu1 %v10756_v55, %s11077_s18  ;;  %7334 = vmatmul.mubr.bf16.gmra.mrb[132].mxu1 %v6873_v38  ;;  %v6667_v19 = vsel %vm365_vm0, %v4618_v40, %v10480_v34  ;;  %v6666_v22 = vsel %vm365_vm0, %v4617_v31, %v10479_v10  ;;  %v4830_v10 = vld [vmem:[#allocation3 + $0x301] sm:$0xff] }
 0x3d6   : > { %v10488_v49 = vpop.permute.xlu0 %10487  ;;  %v10796_v24 = vpack.i.bf16 %v4831_v2, %v4830_v10  ;;  %v4364_v10 = vld [vmem:[#allocation3 + $0x200] sm:$0xff] }
 0x3d7   : > { %v14476_v5 = vpop.permute.xlu1 %10522  ;;  %v10490_v21 = vunpack.i.h.bf16 %v10488_v49  ;;  %v10489_v55 = vunpack.i.l.bf16 %v10488_v49  ;;  %v6603_v49 = vsel %vm2782_vm3, %v6539_v52, %v10505_v13  ;;  %v4704_v13 = vld [vmem:[#allocation3 + $0x30a] sm:$0xff] }
 0x3d8   : > { %10777 = vrot.lane.b32.xlu0 %v10776_v63, %s11074_s12  ;;  %v6876_v16 = vpack.c.bf16 %v6603_v49, %v6602_v32  ;;  %v10806_v2 = vpack.i.bf16 %v4704_v13, %v4703_v60  ;;  %v4769_v49 = vld [vmem:[#allocation3 + $0x320] sm:$0xff] }
 0x3d9   : > { %10812 = vrot.lane.b32.xlu1 %v10766_v18, %s11074_s12  ;;  %v14493_v18 = vld [vmem:[%s16379_s4] ss:$0 sm:$0xff]  ;;  %v6730_v35 = vsel %vm2717_vm2, %v6666_v22, %v10489_v55  ;;  %v6731_v37 = vsel %vm2717_vm2, %v6667_v19, %v10490_v21  ;;  %v10514_v19 = vunpack.i.l.bf16 %v14466_v8  ;;  %v10525_v22 = vunpack.i.h.bf16 %v14476_v5 }
 0x3da   : > { %v10498_v57 = vpop.permute.xlu0 %10497 }
 0x3db   : > { %v10500_v38 = vunpack.i.h.bf16 %v10498_v57  ;;  %v10499_v44 = vunpack.i.l.bf16 %v10498_v57  ;;  %v14488_v41 = vpop.permute.xlu1 %10532  ;;  %v10515_v57 = vunpack.i.h.bf16 %v14466_v8 }
 0x3dc   : > { %10787 = vrot.lane.b32.xlu0 %v10786_v9, %s11076_s19  ;;  %v7199_v34 = vpop.f32.mrb[64].mxu1  ;;  %v10535_v8 = vunpack.i.h.bf16 %v14488_v41 }
 0x3dd   : > { %10822 = vrot.lane.b32.xlu1 %v10776_v63, %s11076_s19  ;;  %v6794_v28 = vsel %vm2782_vm3, %v6730_v35, %v10499_v44  ;;  %v6795_v7 = vsel %vm2782_vm3, %v6731_v37, %v10500_v38  ;;  %v7200_v36 = vadd.f32 %v14493_v18, %v7199_v34  ;;  %v7201_v43 = vpop.f32.mrb[65].mxu1  ;;  %v10524_v38 = vunpack.i.l.bf16 %v14476_v5  ;;  %v4363_v34 = vld [vmem:[#allocation3 + $0x1f8] sm:$0xff] }
 0x3de   : > { %v10508_v55 = vpop.permute.xlu0 %10507  ;;  %v6877_v21 = vpack.c.bf16 %v6795_v7, %v6794_v28  ;;  %v7202_v33 = vpop.f32.mrb[66].mxu1  ;;  %v6476_v5 = vsel %vm365_vm0, %v4363_v34, %v10514_v19  ;;  %v4833_v19 = vld [vmem:[#allocation3 + $0x321] sm:$0xff]  ;;  %v4832_v34 = vld [vmem:[#allocation3 + $0x319] sm:$0xff] }
 0x3df   : > { %v14504_v31 = vpop.permute.xlu1 %10542  ;;  %v14507_v52 = vadd.f32 %v14241_v1, %v7200_v36  ;;  %v7203_v63 = vadd.f32 %v14493_v18, %v7202_v33  ;;  %v7204_v40 = vpop.f32.mrb[67].mxu1  ;;  %v10510_v35 = vunpack.i.h.bf16 %v10508_v55  ;;  %v10509_v37 = vunpack.i.l.bf16 %v10508_v55  ;;  %v4768_v36 = vld [vmem:[#allocation3 + $0x318] sm:$0xff] }
 0x3e0   : > { %10797 = vrot.lane.b32.xlu0 %v10796_v24, %s11077_s18  ;;  %7341 = vmatprep.mubr.bf16.mxu1 %v6877_v21  ;;  %v6540_v43 = vsel %vm2717_vm2, %v6476_v5, %v10524_v38  ;;  %v4619_v21 = vld [vmem:[#allocation3 + $0x211] sm:$0xff]  ;;  %v4620_v33 = vld [vmem:[#allocation3 + $0x219] sm:$0xff]  ;;  %v10816_v60 = vpack.i.bf16 %v4769_v49, %v4768_v36 }
 0x3e1   : > { %16657 = vst [vmem:[#allocation78_spill] sm:$0xff] %v14507_v52  ;;  %10832 = vrot.lane.b32.xlu1 %v10786_v9, %s11077_s18  ;;  %7342 = vmatmul.mubr.bf16.gmra.mrb[136].mxu1 %v6876_v16  ;;  %v14517_v1 = vadd.f32 %v14252_v53, %v7203_v63  ;;  %v10534_v9 = vunpack.i.l.bf16 %v14488_v41  ;;  %v6477_v53 = vsel %vm365_vm0, %v4364_v10, %v10515_v57 }
 0x3e2   : > { %v10518_v44 = vpop.permute.xlu0 %10517  ;;  %v6541_v55 = vsel %vm2717_vm2, %v6477_v53, %v10525_v22  ;;  %v6669_v41 = vsel %vm365_vm0, %v4620_v33, %v10510_v35  ;;  %v6668_v13 = vsel %vm365_vm0, %v4619_v21, %v10509_v37  ;;  %v4706_v33 = vld [vmem:[#allocation3 + $0x322] sm:$0xff] }
 0x3e3   : > { %v14519_v32 = vpop.permute.xlu1 %10552  ;;  %v10520_v28 = vunpack.i.h.bf16 %v10518_v44  ;;  %v10519_v7 = vunpack.i.l.bf16 %v10518_v44  ;;  %v6604_v38 = vsel %vm2782_vm3, %v6540_v43, %v10534_v9  ;;  %v6605_v49 = vsel %vm2782_vm3, %v6541_v55, %v10535_v8 }
 0x3e4   : > { %10807 = vrot.lane.b32.xlu0 %v10806_v2, %s11074_s12  ;;  %v6879_v55 = vpack.c.bf16 %v6605_v49, %v6604_v38 }
 0x3e5   : > { %10842 = vrot.lane.b32.xlu1 %v10796_v24, %s11074_s12  ;;  %v6732_v24 = vsel %vm2717_vm2, %v6668_v13, %v10519_v7  ;;  %v6733_v44 = vsel %vm2717_vm2, %v6669_v41, %v10520_v28  ;;  %v10826_v28 = vpack.i.bf16 %v4833_v19, %v4832_v34  ;;  %v10544_v41 = vunpack.i.l.bf16 %v14504_v31 }
 0x3e6   : > { %v10528_v16 = vpop.permute.xlu0 %10527 }
 0x3e7   : > { %v10530_v63 = vunpack.i.h.bf16 %v10528_v16  ;;  %v10529_v40 = vunpack.i.l.bf16 %v10528_v16  ;;  %v14531_v57 = vpop.permute.xlu1 %10562  ;;  %v7207_v22 = vpop.f32.mrb[68].mxu1  ;;  %v10545_v16 = vunpack.i.h.bf16 %v14504_v31 }
 0x3e8   : > { %10817 = vrot.lane.b32.xlu0 %v10816_v60, %s11076_s19  ;;  %v7208_v35 = vadd.f32 %v14493_v18, %v7207_v22  ;;  %v7209_v37 = vpop.f32.mrb[69].mxu1  ;;  %v10564_v34 = vunpack.i.l.bf16 %v14531_v57 }
 0x3e9   : > { %10852 = vrot.lane.b32.xlu1 %v10806_v2, %s11076_s19  ;;  %v6796_v10 = vsel %vm2782_vm3, %v6732_v24, %v10529_v40  ;;  %v6797_v53 = vsel %vm2782_vm3, %v6733_v44, %v10530_v63  ;;  %v7210_v5 = vpop.f32.mrb[70].mxu1  ;;  %v4705_v2 = vld [vmem:[#allocation3 + $0x31a] sm:$0xff]  ;;  %v10555_v63 = vunpack.i.h.bf16 %v14519_v32  ;;  %v10554_v40 = vunpack.i.l.bf16 %v14519_v32 }
 0x3ea   : > { %v10538_v7 = vpop.permute.xlu0 %10537  ;;  %v6880_v36 = vpack.c.bf16 %v6797_v53, %v6796_v10  ;;  %v14543_v21 = vadd.f32 %v14234_v56, %v7208_v35  ;;  %v7211_v9 = vadd.f32 %v14493_v18, %v7210_v5  ;;  %v7212_v43 = vpop.f32.mrb[71].mxu1  ;;  %v10836_v44 = vpack.i.bf16 %v4706_v33, %v4705_v2  ;;  %v4365_v35 = vld [vmem:[#allocation3 + $0x210] sm:$0xff]  ;;  %v4366_v37 = vld [vmem:[#allocation3 + $0x218] sm:$0xff] }
 0x3eb   : > { %v14546_v8 = vpop.permute.xlu1 %10572  ;;  %v14554_v56 = vpop.f32.mrb[160].mxu0  ;;  %v10540_v22 = vunpack.i.h.bf16 %v10538_v7  ;;  %v10539_v38 = vunpack.i.l.bf16 %v10538_v7  ;;  %v6479_v5 = vsel %vm365_vm0, %v4366_v37, %v10545_v16  ;;  %v6478_v7 = vsel %vm365_vm0, %v4365_v35, %v10544_v41  ;;  %v4622_v2 = vld [vmem:[#allocation3 + $0x231] sm:$0xff]  ;;  %v4835_v41 = vld [vmem:[#allocation3 + $0x339] sm:$0xff] }
 0x3ec   : > { %16658 = vst [vmem:[#allocation79_spill] sm:$0xff] %v14543_v21  ;;  %10827 = vrot.lane.b32.xlu0 %v10826_v28, %s11077_s18  ;;  %7349 = vmatprep.mubr.bf16.mxu1 %v6880_v36  ;;  %v14552_v13 = vadd.f32 %v14244_v11, %v7211_v9  ;;  %v14559_v19 = vpop.f32.mrb[161].mxu0  ;;  %v4771_v11 = vld [vmem:[#allocation3 + $0x338] sm:$0xff]  ;;  %v4770_v36 = vld [vmem:[#allocation3 + $0x330] sm:$0xff]  ;;  %v6542_v9 = vsel %vm2717_vm2, %v6478_v7, %v10554_v40 }
 0x3ed   : > { %10862 = vrot.lane.b32.xlu1 %v10816_v60, %s11077_s18  ;;  %7350 = vmatmul.mubr.bf16.gmra.mrb[140].mxu1 %v6879_v55  ;;  %v14561_v49 = vpop.f32.mrb[162].mxu0  ;;  %v10565_v60 = vunpack.i.h.bf16 %v14531_v57  ;;  %v6543_v43 = vsel %vm2717_vm2, %v6479_v5, %v10555_v63  ;;  %v4621_v55 = vld [vmem:[#allocation3 + $0x229] sm:$0xff]  ;;  %v10846_v33 = vpack.i.bf16 %v4771_v11, %v4770_v36  ;;  %v6606_v40 = vsel %vm2782_vm3, %v6542_v9, %v10564_v34  ;;  %v4834_v37 = vld [vmem:[#allocation3 + $0x331] sm:$0xff] }
 0x3ee   : > { %16659 = vst [vmem:[#allocation80_spill] sm:$0xff] %v14552_v13  ;;  %v10548_v24 = vpop.permute.xlu0 %10547  ;;  %v14567_v32 = vpop.f32.mrb[163].mxu0  ;;  %v6670_v13 = vsel %vm365_vm0, %v4621_v55, %v10539_v38 }
 0x3ef   : > { %v14563_v31 = vpop.permute.xlu1 %10582  ;;  %v10550_v10 = vunpack.i.h.bf16 %v10548_v24  ;;  %v10549_v53 = vunpack.i.l.bf16 %v10548_v24  ;;  %v6671_v24 = vsel %vm365_vm0, %v4622_v2, %v10540_v22  ;;  %v6607_v11 = vsel %vm2782_vm3, %v6543_v43, %v10565_v60  ;;  %v4707_v43 = vld [vmem:[#allocation3 + $0x332] sm:$0xff]  ;;  %v4708_v2 = vld [vmem:[#allocation3 + $0x33a] sm:$0xff] }
 0x3f0   : > { %10837 = vrot.lane.b32.xlu0 %v10836_v44, %s11074_s12  ;;  %v6882_v9 = vpack.c.bf16 %v6607_v11, %v6606_v40 }
 0x3f1   : > { %10872 = vrot.lane.b32.xlu1 %v10826_v28, %s11074_s12  ;;  %v6734_v28 = vsel %vm2717_vm2, %v6670_v13, %v10549_v53  ;;  %v6735_v35 = vsel %vm2717_vm2, %v6671_v24, %v10550_v10  ;;  %v10856_v10 = vpack.i.bf16 %v4835_v41, %v4834_v37  ;;  %v10574_v24 = vunpack.i.l.bf16 %v14546_v8  ;;  %v4836_v37 = vld [vmem:[#allocation3 + $0x349] sm:$0xff] }
 0x3f2   : > { %v10558_v57 = vpop.permute.xlu0 %10557  ;;  %v10585_v41 = vunpack.i.h.bf16 %v14563_v31 }
 0x3f3   : > { %v10560_v21 = vunpack.i.h.bf16 %v10558_v57  ;;  %v10559_v52 = vunpack.i.l.bf16 %v10558_v57  ;;  %v14577_v16 = vpop.permute.xlu1 %10592  ;;  %v10575_v57 = vunpack.i.h.bf16 %v14546_v8  ;;  %v4367_v8 = vld [vmem:[#allocation3 + $0x228] sm:$0xff] }
 0x3f4   : > { %10847 = vrot.lane.b32.xlu0 %v10846_v33, %s11076_s19  ;;  %v7215_v63 = vpop.f32.mrb[72].mxu1 }
 0x3f5   : > { %10882 = vrot.lane.b32.xlu1 %v10836_v44, %s11076_s19  ;;  %v7216_v22 = vadd.f32 %v14493_v18, %v7215_v63  ;;  %v7217_v38 = vpop.f32.mrb[73].mxu1  ;;  %v6798_v5 = vsel %vm2782_vm3, %v6734_v28, %v10559_v52  ;;  %v6799_v7 = vsel %vm2782_vm3, %v6735_v35, %v10560_v21  ;;  %v4772_v52 = vld [vmem:[#allocation3 + $0x348] sm:$0xff]  ;;  %v4773_v21 = vld [vmem:[#allocation3 + $0x350] sm:$0xff]  ;;  %v10584_v28 = vunpack.i.l.bf16 %v14563_v31 }
 0x3f6   : > { %v10568_v13 = vpop.permute.xlu0 %10567  ;;  %v7218_v53 = vpop.f32.mrb[74].mxu1  ;;  %v6883_v36 = vpack.c.bf16 %v6799_v7, %v6798_v5  ;;  %v10866_v63 = vpack.i.bf16 %v4708_v2, %v4707_v43  ;;  %v10876_v38 = vpack.i.bf16 %v4773_v21, %v4772_v52  ;;  %v4837_v5 = vld [vmem:[#allocation3 + $0x351] sm:$0xff] }
 0x3f7   : > { %v14589_v55 = vadd.f32 %v14270_v3, %v7216_v22  ;;  %v14591_v34 = vpop.permute.xlu1 %10602  ;;  %v7219_v60 = vadd.f32 %v14493_v18, %v7218_v53  ;;  %v7220_v44 = vpop.f32.mrb[75].mxu1  ;;  %v10570_v40 = vunpack.i.h.bf16 %v10568_v13  ;;  %v10569_v11 = vunpack.i.l.bf16 %v10568_v13  ;;  %v4368_v7 = vld [vmem:[#allocation3 + $0x230] sm:$0xff] }
 0x3f8   : > { %10857 = vrot.lane.b32.xlu0 %v10856_v10, %s11077_s18  ;;  %7357 = vmatprep.mubr.bf16.mxu1 %v6883_v36  ;;  %v6481_v31 = vsel %vm365_vm0, %v4368_v7, %v10575_v57  ;;  %v6480_v36 = vsel %vm365_vm0, %v4367_v8, %v10574_v24  ;;  %v4623_v44 = vld [vmem:[#allocation3 + $0x241] sm:$0xff]  ;;  %v10886_v2 = vpack.i.bf16 %v4837_v5, %v4836_v37 }
 0x3f9   : > { %16660 = vst [vmem:[#allocation81_spill] sm:$0xff] %v14589_v55  ;;  %v14598_v3 = vadd.f32 %v14278_v29, %v7219_v60  ;;  %10892 = vrot.lane.b32.xlu1 %v10846_v33, %s11077_s18  ;;  %7358 = vmatmul.mubr.bf16.gmra.mrb[144].mxu1 %v6882_v9  ;;  %v10595_v29 = vunpack.i.h.bf16 %v14577_v16  ;;  %v10594_v33 = vunpack.i.l.bf16 %v14577_v16  ;;  %v6544_v13 = vsel %vm2717_vm2, %v6480_v36, %v10584_v28  ;;  %v4624_v9 = vld [vmem:[#allocation3 + $0x249] sm:$0xff] }
 0x3fa   : > { %v10578_v35 = vpop.permute.xlu0 %10577  ;;  %v6545_v60 = vsel %vm2717_vm2, %v6481_v31, %v10585_v41  ;;  %v6673_v52 = vsel %vm365_vm0, %v4624_v9, %v10570_v40  ;;  %v6672_v16 = vsel %vm365_vm0, %v4623_v44, %v10569_v11 }
 0x3fb   : > { %16661 = vst [vmem:[#allocation82_spill] sm:$0xff] %v14598_v3  ;;  %v14603_v22 = vpop.permute.xlu1 %10612  ;;  %v10580_v53 = vunpack.i.h.bf16 %v10578_v35  ;;  %v10579_v10 = vunpack.i.l.bf16 %v10578_v35  ;;  %v6608_v24 = vsel %vm2782_vm3, %v6544_v13, %v10594_v33  ;;  %v6609_v41 = vsel %vm2782_vm3, %v6545_v60, %v10595_v29 }
 0x3fc   : > { %10867 = vrot.lane.b32.xlu0 %v10866_v63, %s11074_s12  ;;  %v10604_v13 = vunpack.i.l.bf16 %v14591_v34  ;;  %s15744_s12 = scalar_lea.vmem [#allocation7], %s8564_s17  ;;  %s8680_s17 = sshll.u32 %s11145_s28, 13 }
 0x3fd   : > { %v6736_v63 = vsel %vm2717_vm2, %v6672_v16, %v10579_v10  ;;  %v6737_v57 = vsel %vm2717_vm2, %v6673_v52, %v10580_v53  ;;  %v6885_v53 = vpack.c.bf16 %v6609_v41, %v6608_v24  ;;  %v10614_v52 = vunpack.i.l.bf16 %v14603_v22  ;;  %v4370_v41 = vld [vmem:[#allocation3 + $0x248] sm:$0xff]  ;;  %s16279_s8 = scalar_lea.hbm %s16382_s7, %s8680_s17 }
 0x3fe   : > { %v10588_v43 = vpop.permute.xlu0 %10587 }
 0x3ff   : > { %v10590_v21 = vunpack.i.h.bf16 %v10588_v43  ;;  %v10589_v35 = vunpack.i.l.bf16 %v10588_v43  ;;  %v10623_v3 = vpop.permute.xlu1 %10622  ;;  %v10605_v43 = vunpack.i.h.bf16 %v14591_v34 }
 0x400   : > { %10877 = vrot.lane.b32.xlu0 %v10876_v38, %s11076_s19  ;;  %v7223_v11 = vpop.f32.mrb[76].mxu1  ;;  %v10624_v16 = vunpack.i.l.bf16 %v10623_v3  ;;  %s8483_s19 = sshll.u32 %s15744_s12, 4  ;;  %s16281_s19 = int_to_ptr.vmem [resolvable:$true] %s8483_s19 }
 0x401   : > { %v6800_v28 = vsel %vm2782_vm3, %v6736_v63, %v10589_v35  ;;  %v6801_v37 = vsel %vm2782_vm3, %v6737_v57, %v10590_v21  ;;  %v14621_v40 = vpop.f32.mrb[164].mxu0  ;;  %v7224_v8 = vadd.f32 %v14493_v18, %v7223_v11  ;;  %v7225_v7 = vpop.f32.mrb[77].mxu1  ;;  %v4369_v35 = vld [vmem:[#allocation3 + $0x240] sm:$0xff]  ;;  %v6483_v34 = vsel %vm365_vm0, %v4370_v41, %v10605_v43  ;;  %s11002_s20 = scalar_lea.vmem %s16281_s19, 8192  ;;  %p11009_p8 = scmp.lt.s32.totalorder %s16281_s19, %s11007_s15 }
 0x402   : > { %v6886_v5 = vpack.c.bf16 %v6801_v37, %v6800_v28  ;;  %v14624_v10 = vpop.f32.mrb[165].mxu0  ;;  %v10598_v38 = vpop.permute.xlu0 %10597  ;;  %v6482_v28 = vsel %vm365_vm0, %v4369_v35, %v10604_v13  ;;  %v10625_v37 = vunpack.i.h.bf16 %v10623_v3  ;;  %v4625_v7 = vld [vmem:[#allocation3 + $0x259] sm:$0xff]  ;;  %p11003_p6 = scmp.ne.s32.totalorder %s16281_s19, %s11002_s20  ;;  %p11010_p10 = scmp.lt.s32.totalorder %s11008_s23, %s11002_s20 }
 0x403   : > { %v14626_v31 = vpop.f32.mrb[166].mxu0  ;;  %v14630_v29 = vadd.f32 %v14264_v48, %v7224_v8  ;;  %v14632_v33 = vpop.permute.xlu1 %10632  ;;  %v10600_v63 = vunpack.i.h.bf16 %v10598_v38  ;;  %v10599_v57 = vunpack.i.l.bf16 %v10598_v38  ;;  %v6546_v8 = vsel %vm2717_vm2, %v6482_v28, %v10614_v52 }
 0x404   : > { %10887 = vrot.lane.b32.xlu0 %v10886_v2, %s11077_s18  ;;  %7365 = vmatprep.mubr.bf16.mxu1 %v6886_v5  ;;  %v7226_v36 = vpop.f32.mrb[78].mxu1  ;;  %v14636_v9 = vpop.f32.mrb[167].mxu0  ;;  %v10615_v2 = vunpack.i.h.bf16 %v14603_v22  ;;  %p11004_p12 = pnand %p11003_p6, %p16942_p11  ;;  %p11011_p0 = por %p11010_p10, %p11009_p8 }
 0x405   : > { %16662 = vst [vmem:[#allocation83_spill] sm:$0xff] %v14630_v29  ;;  %7366 = vmatmul.mubr.bf16.gmra.mrb[148].mxu1 %v6885_v53  ;;  %v7227_v60 = vadd.f32 %v14493_v18, %v7226_v36  ;;  %v7228_v44 = vpop.f32.mrb[79].mxu1  ;;  %v6610_v36 = vsel %vm2782_vm3, %v6546_v8, %v10624_v16 }
 0x406   : > { %v10608_v21 = vpop.permute.xlu0 %10607  ;;  %v6547_v22 = vsel %vm2717_vm2, %v6483_v34, %v10615_v2  ;;  %p11005_p13 = pneg %p11004_p12 }
 0x407   : > { %v14642_v48 = vadd.f32 %v14274_v58, %v7227_v60  ;;  %v10643_v24 = vpop.permute.xlu1 %10642  ;;  %v10610_v11 = vunpack.i.h.bf16 %v10608_v21  ;;  %v10609_v5 = vunpack.i.l.bf16 %v10608_v21  ;;  %v4626_v58 = vld [vmem:[#allocation3 + $0x261] sm:$0xff]  ;;  %v6674_v60 = vsel %vm365_vm0, %v4625_v7, %v10599_v57 }
 0x408   : > { %v6675_v38 = vsel %vm365_vm0, %v4626_v58, %v10600_v63  ;;  %v6611_v41 = vsel %vm2782_vm3, %v6547_v22, %v10625_v37  ;;  %v10635_v22 = vunpack.i.h.bf16 %v14632_v33  ;;  %p11012_p2 = pnand %p11011_p0, %p11005_p13 }
 0x409   : > { %16663 = vst [vmem:[#allocation84_spill] sm:$0xff] %v14642_v48  ;;  %v6738_v21 = vsel %vm2717_vm2, %v6674_v60, %v10609_v5  ;;  %v6739_v43 = vsel %vm2717_vm2, %v6675_v38, %v10610_v11  ;;  %v6888_v11 = vpack.c.bf16 %v6611_v41, %v6610_v36  ;;  %v10644_v38 = vunpack.i.l.bf16 %v10643_v24  ;;  %v4372_v36 = vld [vmem:[#allocation3 + $0x260] sm:$0xff] }
 0x40a   : > { %v10618_v53 = vpop.permute.xlu0 %10617 }
 0x40b   : > { %v10620_v44 = vunpack.i.h.bf16 %v10618_v53  ;;  %v10619_v13 = vunpack.i.l.bf16 %v10618_v53  ;;  %v10653_v3 = vpop.permute.xlu1 %10652  ;;  %v10634_v53 = vunpack.i.l.bf16 %v14632_v33  ;;  %v6485_v33 = vsel %vm365_vm0, %v4372_v36, %v10635_v22 }
 0x40c   : > { %v7231_v35 = vpop.f32.mrb[80].mxu1  ;;  %v10654_v60 = vunpack.i.l.bf16 %v10653_v3  ;;  %v10655_v41 = vunpack.i.h.bf16 %v10653_v3 }
 0x40d   : > { %v7232_v52 = vadd.f32 %v14493_v18, %v7231_v35  ;;  %v7233_v2 = vpop.f32.mrb[81].mxu1  ;;  %v6802_v16 = vsel %vm2782_vm3, %v6738_v21, %v10619_v13  ;;  %v6803_v63 = vsel %vm2782_vm3, %v6739_v43, %v10620_v44  ;;  %v4371_v13 = vld [vmem:[#allocation3 + $0x258] sm:$0xff] }
 0x40e   : > { %v7234_v28 = vpop.f32.mrb[82].mxu1  ;;  %v10628_v34 = vpop.permute.xlu0 %10627  ;;  %v6889_v5 = vpack.c.bf16 %v6803_v63, %v6802_v16  ;;  %v6484_v2 = vsel %vm365_vm0, %v4371_v13, %v10634_v53 }
 0x40f   : > { %v14658_v57 = vadd.f32 %v14300_v27, %v7232_v52  ;;  %v7235_v8 = vadd.f32 %v14493_v18, %v7234_v28  ;;  %v7236_v7 = vpop.f32.mrb[83].mxu1  ;;  %v14661_v58 = vpop.permute.xlu1 %10662  ;;  %v10645_v27 = vunpack.i.h.bf16 %v10643_v24  ;;  %v10630_v35 = vunpack.i.h.bf16 %v10628_v34 }
 0x410   : > { %7373 = vmatprep.mubr.bf16.mxu1 %v6889_v5  ;;  %v10629_v21 = vunpack.i.l.bf16 %v10628_v34  ;;  %v6548_v24 = vsel %vm2717_vm2, %v6484_v2, %v10644_v38  ;;  %v4627_v34 = vld [vmem:[#allocation3 + $0x271] sm:$0xff]  ;;  %v4628_v7 = vld [vmem:[#allocation3 + $0x279] sm:$0xff] }
 0x411   : > { %16664 = vst [vmem:[#allocation85_spill] sm:$0xff] %v14658_v57  ;;  %v14665_v37 = vadd.f32 %v14308_v51, %v7235_v8  ;;  %7374 = vmatmul.mubr.bf16.gmra.mrb[152].mxu1 %v6888_v11  ;;  %v6549_v8 = vsel %vm2717_vm2, %v6485_v33, %v10645_v27  ;;  %v6612_v53 = vsel %vm2782_vm3, %v6548_v24, %v10654_v60 }
 0x412   : > { %v10638_v44 = vpop.permute.xlu0 %10637  ;;  %v6677_v3 = vsel %vm365_vm0, %v4628_v7, %v10630_v35  ;;  %v6613_v57 = vsel %vm2782_vm3, %v6549_v8, %v10655_v41  ;;  %v10665_v41 = vunpack.i.h.bf16 %v14661_v58 }
 0x413   : > { %16665 = vst [vmem:[#allocation86_spill] sm:$0xff] %v14665_v37  ;;  %v10673_v43 = vpop.permute.xlu1 %10672  ;;  %v10640_v51 = vunpack.i.h.bf16 %v10638_v44  ;;  %v10639_v28 = vunpack.i.l.bf16 %v10638_v44  ;;  %v6676_v44 = vsel %vm365_vm0, %v4627_v34, %v10629_v21 }
 0x414   : > { %v14668_v52 = vpop.f32.mrb[168].mxu0  ;;  %v10675_v8 = vunpack.i.h.bf16 %v10673_v43 }
 0x415   : > { %v14671_v16 = vpop.f32.mrb[169].mxu0  ;;  %v6740_v38 = vsel %vm2717_vm2, %v6676_v44, %v10639_v28  ;;  %v6741_v2 = vsel %vm2717_vm2, %v6677_v3, %v10640_v51  ;;  %v6891_v51 = vpack.c.bf16 %v6613_v57, %v6612_v53 }
 0x416   : > { %v14675_v63 = vpop.f32.mrb[170].mxu0  ;;  %v10648_v5 = vpop.permute.xlu0 %10647 }
 0x417   : > { %v14678_v11 = vpop.f32.mrb[171].mxu0  ;;  %v10650_v13 = vunpack.i.h.bf16 %v10648_v5  ;;  %v10649_v37 = vunpack.i.l.bf16 %v10648_v5  ;;  %v10683_v22 = vpop.permute.xlu1 %10682 }
 0x418   : > { %v10684_v57 = vunpack.i.l.bf16 %v10683_v22 }
 0x419   : > { %v7239_v36 = vpop.f32.mrb[84].mxu1  ;;  %v6804_v60 = vsel %vm2782_vm3, %v6740_v38, %v10649_v37  ;;  %v6805_v35 = vsel %vm2782_vm3, %v6741_v2, %v10650_v13  ;;  %v10664_v37 = vunpack.i.l.bf16 %v14661_v58  ;;  %v4373_v38 = vld [vmem:[#allocation3 + $0x270] sm:$0xff]  ;;  %v4374_v2 = vld [vmem:[#allocation3 + $0x278] sm:$0xff] }
 0x41a   : > { %v7240_v27 = vadd.f32 %v14493_v18, %v7239_v36  ;;  %v7241_v33 = vpop.f32.mrb[85].mxu1  ;;  %v10658_v24 = vpop.permute.xlu0 %10657  ;;  %v6892_v28 = vpack.c.bf16 %v6805_v35, %v6804_v60  ;;  %v4630_v35 = vld [vmem:[#allocation3 + $0x291] sm:$0xff] }
 0x41b   : > { %v7242_v48 = vpop.f32.mrb[86].mxu1  ;;  %v14693_v5 = vpop.permute.xlu1 %10692  ;;  %v10660_v44 = vunpack.i.h.bf16 %v10658_v24  ;;  %v10659_v36 = vunpack.i.l.bf16 %v10658_v24  ;;  %v6487_v33 = vsel %vm365_vm0, %v4374_v2, %v10665_v41  ;;  %v6486_v60 = vsel %vm365_vm0, %v4373_v38, %v10664_v37 }
 0x41c   : > { %v14690_v21 = vadd.f32 %v14292_v25, %v7240_v27  ;;  %v7243_v34 = vadd.f32 %v14493_v18, %v7242_v48  ;;  %v7244_v7 = vpop.f32.mrb[87].mxu1  ;;  %7381 = vmatprep.mubr.bf16.mxu1 %v6892_v28  ;;  %v10674_v25 = vunpack.i.l.bf16 %v10673_v43  ;;  %v10685_v27 = vunpack.i.h.bf16 %v10683_v22 }
 0x41d   : > { %7382 = vmatmul.mubr.bf16.gmra.mrb[156].mxu1 %v6891_v51  ;;  %v6551_v43 = vsel %vm2717_vm2, %v6487_v33, %v10675_v8  ;;  %v6679_v24 = vsel %vm365_vm0, %v4630_v35, %v10660_v44 }
 0x41e   : > { %16666 = vst [vmem:[#allocation87_spill] sm:$0xff] %v14690_v21  ;;  %v14696_v3 = vadd.f32 %v14304_v4, %v7243_v34  ;;  %v10668_v13 = vpop.permute.xlu0 %10667  ;;  %v6550_v58 = vsel %vm2717_vm2, %v6486_v60, %v10674_v25  ;;  %v4629_v34 = vld [vmem:[#allocation3 + $0x289] sm:$0xff]  ;;  %v6615_v2 = vsel %vm2782_vm3, %v6551_v43, %v10685_v27  ;;  %v10694_v43 = vunpack.i.l.bf16 %v14693_v5 }
 0x41f   : > { %v14700_v48 = vpop.permute.xlu1 %10702  ;;  %v10670_v53 = vunpack.i.h.bf16 %v10668_v13  ;;  %v10669_v4 = vunpack.i.l.bf16 %v10668_v13  ;;  %v6678_v51 = vsel %vm365_vm0, %v4629_v34, %v10659_v36  ;;  %v6614_v8 = vsel %vm2782_vm3, %v6550_v58, %v10684_v57 }
 0x420   : > { %16667 = vst [vmem:[#allocation88_spill] sm:$0xff] %v14696_v3  ;;  %v6894_v27 = vpack.c.bf16 %v6615_v2, %v6614_v8  ;;  %v10695_v58 = vunpack.i.h.bf16 %v14693_v5 }
 0x421   : > { %v6742_v37 = vsel %vm2717_vm2, %v6678_v51, %v10669_v4  ;;  %v6743_v38 = vsel %vm2717_vm2, %v6679_v24, %v10670_v53 }
 0x422   : > { %v10678_v7 = vpop.permute.xlu0 %10677 }
 0x423   : > { %v10680_v3 = vunpack.i.h.bf16 %v10678_v7  ;;  %v10679_v22 = vunpack.i.l.bf16 %v10678_v7  ;;  %v10713_v21 = vpop.permute.xlu1 %10712 }
 0x424   : > { %v7247_v28 = vpop.f32.mrb[88].mxu1  ;;  %v10714_v8 = vunpack.i.l.bf16 %v10713_v21 }
 0x425   : > { %v7248_v13 = vadd.f32 %v14493_v18, %v7247_v28  ;;  %v7249_v41 = vpop.f32.mrb[89].mxu1  ;;  %v6806_v60 = vsel %vm2782_vm3, %v6742_v37, %v10679_v22  ;;  %v6807_v35 = vsel %vm2782_vm3, %v6743_v38, %v10680_v3  ;;  %v10705_v3 = vunpack.i.h.bf16 %v14700_v48  ;;  %v4375_v37 = vld [vmem:[#allocation3 + $0x288] sm:$0xff]  ;;  %v4376_v38 = vld [vmem:[#allocation3 + $0x290] sm:$0xff] }
 0x426   : > { %v7250_v25 = vpop.f32.mrb[90].mxu1  ;;  %v10688_v34 = vpop.permute.xlu0 %10687  ;;  %v6895_v7 = vpack.c.bf16 %v6807_v35, %v6806_v60  ;;  %v10704_v28 = vunpack.i.l.bf16 %v14700_v48  ;;  %v6489_v5 = vsel %vm365_vm0, %v4376_v38, %v10695_v58  ;;  %v4632_v60 = vld [vmem:[#allocation3 + $0x2a9] sm:$0xff] }
 0x427   : > { %v14714_v44 = vadd.f32 %v14326_v39, %v7248_v13  ;;  %v7251_v36 = vadd.f32 %v14493_v18, %v7250_v25  ;;  %v7252_v33 = vpop.f32.mrb[91].mxu1  ;;  %v14719_v4 = vpop.permute.xlu1 %10722  ;;  %v10690_v51 = vunpack.i.h.bf16 %v10688_v34  ;;  %v10689_v13 = vunpack.i.l.bf16 %v10688_v34 }
 0x428   : > { %v14724_v57 = vpop.f32.mrb[172].mxu0  ;;  %7389 = vmatprep.mubr.bf16.mxu1 %v6895_v7  ;;  %v10715_v25 = vunpack.i.h.bf16 %v10713_v21  ;;  %v6488_v33 = vsel %vm365_vm0, %v4375_v37, %v10694_v43  ;;  %v6553_v48 = vsel %vm2717_vm2, %v6489_v5, %v10705_v3  ;;  %v4631_v7 = vld [vmem:[#allocation3 + $0x2a1] sm:$0xff] }
 0x429   : > { %16668 = vst [vmem:[#allocation89_spill] sm:$0xff] %v14714_v44  ;;  %v14722_v53 = vadd.f32 %v14336_v45, %v7251_v36  ;;  %v14726_v39 = vpop.f32.mrb[173].mxu0  ;;  %7390 = vmatmul.mubr.bf16.gmra.mrb[160].mxu1 %v6894_v27  ;;  %v6552_v35 = vsel %vm2717_vm2, %v6488_v33, %v10704_v28  ;;  %v6681_v27 = vsel %vm365_vm0, %v4632_v60, %v10690_v51 }
 0x42a   : > { %v14730_v24 = vpop.f32.mrb[174].mxu0  ;;  %v10698_v45 = vpop.permute.xlu0 %10697  ;;  %v6680_v44 = vsel %vm365_vm0, %v4631_v7, %v10689_v13  ;;  %v6616_v3 = vsel %vm2782_vm3, %v6552_v35, %v10714_v8  ;;  %v6617_v38 = vsel %vm2782_vm3, %v6553_v48, %v10715_v25  ;;  %v10725_v25 = vunpack.i.h.bf16 %v14719_v4 }
 0x42b   : > { %16669 = vst [vmem:[#allocation72_spill] sm:$0xff] %v14722_v53  ;;  %v14734_v22 = vpop.f32.mrb[175].mxu0  ;;  %v10733_v41 = vpop.permute.xlu1 %10732  ;;  %v10700_v2 = vunpack.i.h.bf16 %v10698_v45  ;;  %v10699_v36 = vunpack.i.l.bf16 %v10698_v45  ;;  %v6897_v8 = vpack.c.bf16 %v6617_v38, %v6616_v3  ;;  %v4634_v38 = vld [vmem:[#allocation3 + $0x2c1] sm:$0xff] }
 0x42c   : > { %v10734_v35 = vunpack.i.l.bf16 %v10733_v41 }
 0x42d   : > { %v6744_v43 = vsel %vm2717_vm2, %v6680_v44, %v10699_v36  ;;  %v6745_v37 = vsel %vm2717_vm2, %v6681_v27, %v10700_v2  ;;  %v10735_v36 = vunpack.i.h.bf16 %v10733_v41 }
 0x42e   : > { %v10708_v34 = vpop.permute.xlu0 %10707 }
 0x42f   : > { %v10710_v29 = vunpack.i.h.bf16 %v10708_v34  ;;  %v10709_v21 = vunpack.i.l.bf16 %v10708_v34  ;;  %v10743_v55 = vpop.permute.xlu1 %10742 }
 0x430   : > { %v7255_v53 = vpop.f32.mrb[92].mxu1 }
 0x431   : > { %v7256_v45 = vadd.f32 %v14493_v18, %v7255_v53  ;;  %v7257_v58 = vpop.f32.mrb[93].mxu1  ;;  %v6808_v33 = vsel %vm2782_vm3, %v6744_v43, %v10709_v21  ;;  %v6809_v53 = vsel %vm2782_vm3, %v6745_v37, %v10710_v29  ;;  %v4377_v21 = vld [vmem:[#allocation3 + $0x2a0] sm:$0xff]  ;;  %v10744_v43 = vunpack.i.l.bf16 %v10743_v55 }
 0x432   : > { %v7258_v28 = vpop.f32.mrb[94].mxu1  ;;  %v10718_v60 = vpop.permute.xlu0 %10717  ;;  %v6898_v7 = vpack.c.bf16 %v6809_v53, %v6808_v33  ;;  %v10745_v58 = vunpack.i.h.bf16 %v10743_v55 }
 0x433   : > { %v14748_v51 = vadd.f32 %v14320_v6, %v7256_v45  ;;  %v7259_v13 = vadd.f32 %v14493_v18, %v7258_v28  ;;  %v7260_v5 = vpop.f32.mrb[95].mxu1  ;;  %v14753_v44 = vpop.permute.xlu1 %10752  ;;  %v10724_v6 = vunpack.i.l.bf16 %v14719_v4  ;;  %v10720_v48 = vunpack.i.h.bf16 %v10718_v60  ;;  %v4378_v45 = vld [vmem:[#allocation3 + $0x2a8] sm:$0xff] }
 0x434   : > { %7397 = vmatprep.mubr.bf16.mxu1 %v6898_v7  ;;  %v10719_v34 = vunpack.i.l.bf16 %v10718_v60  ;;  %v6491_v28 = vsel %vm365_vm0, %v4378_v45, %v10725_v25 }
 0x435   : > { %16670 = vst [vmem:[#allocation90_spill] sm:$0xff] %v14748_v51  ;;  %v14756_v2 = vadd.f32 %v14328_v59, %v7259_v13  ;;  %7398 = vmatmul.mubr.bf16.gmra.mrb[164].mxu1 %v6897_v8  ;;  %v6490_v3 = vsel %vm365_vm0, %v4377_v21, %v10724_v6  ;;  %v6555_v41 = vsel %vm2717_vm2, %v6491_v28, %v10735_v36  ;;  %v4633_v13 = vld [vmem:[#allocation3 + $0x2b9] sm:$0xff] }
 0x436   : > { %v10728_v27 = vpop.permute.xlu0 %10727  ;;  %v6554_v4 = vsel %vm2717_vm2, %v6490_v3, %v10734_v35  ;;  %v6683_v5 = vsel %vm365_vm0, %v4634_v38, %v10720_v48  ;;  %v6682_v60 = vsel %vm365_vm0, %v4633_v13, %v10719_v34  ;;  %v6619_v48 = vsel %vm2782_vm3, %v6555_v41, %v10745_v58 }
 0x437   : > { %16671 = vst [vmem:[#allocation91_spill] sm:$0xff] %v14756_v2  ;;  %v14760_v29 = vpop.permute.xlu1 %10762  ;;  %v10730_v59 = vunpack.i.h.bf16 %v10728_v27  ;;  %v10729_v37 = vunpack.i.l.bf16 %v10728_v27  ;;  %v6618_v45 = vsel %vm2782_vm3, %v6554_v4, %v10744_v43  ;;  %v10755_v4 = vunpack.i.h.bf16 %v14753_v44 }
 0x438   : > { %v6900_v43 = vpack.c.bf16 %v6619_v48, %v6618_v45  ;;  %v10754_v41 = vunpack.i.l.bf16 %v14753_v44  ;;  %v4636_v44 = vld [vmem:[#allocation3 + $0x2d9] sm:$0xff] }
 0x439   : > { %v6746_v6 = vsel %vm2717_vm2, %v6682_v60, %v10729_v37  ;;  %v6747_v21 = vsel %vm2717_vm2, %v6683_v5, %v10730_v59  ;;  %v10765_v60 = vunpack.i.h.bf16 %v14760_v29 }
 0x43a   : > { %v10738_v33 = vpop.permute.xlu0 %10737 }
 0x43b   : > { %v10740_v7 = vunpack.i.h.bf16 %v10738_v33  ;;  %v10739_v55 = vunpack.i.l.bf16 %v10738_v33  ;;  %v10773_v8 = vpop.permute.xlu1 %10772 }
 0x43c   : > { %v7263_v53 = vpop.f32.mrb[96].mxu1 }
 0x43d   : > { %v7264_v27 = vadd.f32 %v14493_v18, %v7263_v53  ;;  %v7265_v25 = vpop.f32.mrb[97].mxu1  ;;  %v6810_v13 = vsel %vm2782_vm3, %v6746_v6, %v10739_v55  ;;  %v6811_v37 = vsel %vm2782_vm3, %v6747_v21, %v10740_v7  ;;  %v10764_v7 = vunpack.i.l.bf16 %v14760_v29  ;;  %v4379_v21 = vld [vmem:[#allocation3 + $0x2b8] sm:$0xff] }
 0x43e   : > { %v14771_v35 = vpop.f32.mrb[176].mxu0  ;;  %v7266_v36 = vpop.f32.mrb[98].mxu1  ;;  %v6901_v33 = vpack.c.bf16 %v6811_v37, %v6810_v13  ;;  %v6492_v13 = vsel %vm365_vm0, %v4379_v21, %v10754_v41  ;;  %v4635_v29 = vld [vmem:[#allocation3 + $0x2d1] sm:$0xff] }
 0x43f   : > { %v14776_v28 = vadd.f32 %v14354_v54, %v7264_v27  ;;  %v14778_v34 = vpop.f32.mrb[177].mxu0  ;;  %v7267_v3 = vadd.f32 %v14493_v18, %v7266_v36  ;;  %v7268_v38 = vpop.f32.mrb[99].mxu1  ;;  %v10775_v36 = vunpack.i.h.bf16 %v10773_v8  ;;  %v6556_v37 = vsel %vm2717_vm2, %v6492_v13, %v10764_v7 }
 0x440   : > { %v14783_v59 = vpop.f32.mrb[178].mxu0  ;;  %v10748_v5 = vpop.permute.xlu0 %10747  ;;  %7405 = vmatprep.mubr.bf16.mxu1 %v6901_v33 }
 0x441   : > { %16672 = vst [vmem:[#allocation73_spill] sm:$0xff] %v14776_v28  ;;  %v14785_v53 = vpop.permute.xlu1 %10782  ;;  %v14788_v58 = vadd.f32 %v14362_v26, %v7267_v3  ;;  %v14790_v54 = vpop.f32.mrb[179].mxu0  ;;  %7406 = vmatmul.mubr.bf16.gmra.mrb[168].mxu1 %v6900_v43  ;;  %v10750_v55 = vunpack.i.h.bf16 %v10748_v5  ;;  %v10749_v25 = vunpack.i.l.bf16 %v10748_v5  ;;  %v4380_v26 = vld [vmem:[#allocation3 + $0x2c0] sm:$0xff]  ;;  %v10774_v3 = vunpack.i.l.bf16 %v10773_v8 }
 0x442   : > { %v6493_v48 = vsel %vm365_vm0, %v4380_v26, %v10755_v4 }
 0x443   : > { %16673 = vst [vmem:[#allocation76_spill] sm:$0xff] %v14788_v58  ;;  %v6557_v33 = vsel %vm2717_vm2, %v6493_v48, %v10765_v60  ;;  %v6685_v43 = vsel %vm365_vm0, %v4636_v44, %v10750_v55  ;;  %v6684_v28 = vsel %vm365_vm0, %v4635_v29, %v10749_v25  ;;  %v6620_v60 = vsel %vm2782_vm3, %v6556_v37, %v10774_v3 }
 0x444   : > { %v10758_v27 = vpop.permute.xlu0 %10757  ;;  %v6621_v26 = vsel %vm2782_vm3, %v6557_v33, %v10775_v36  ;;  %v10784_v36 = vunpack.i.l.bf16 %v14785_v53 }
 0x445   : > { %v10793_v6 = vpop.permute.xlu1 %10792  ;;  %v10760_v38 = vunpack.i.h.bf16 %v10758_v27  ;;  %v10759_v45 = vunpack.i.l.bf16 %v10758_v27  ;;  %v6903_v3 = vpack.c.bf16 %v6621_v26, %v6620_v60  ;;  %v4637_v26 = vld [vmem:[#allocation3 + $0x2e9] sm:$0xff] }
 0x447   : > { %v6748_v41 = vsel %vm2717_vm2, %v6684_v28, %v10759_v45  ;;  %v6749_v21 = vsel %vm2717_vm2, %v6685_v43, %v10760_v38  ;;  %v10794_v45 = vunpack.i.l.bf16 %v10793_v6  ;;  %v4381_v43 = vld [vmem:[#allocation3 + $0x2d0] sm:$0xff] }
 0x448   : > { %v10768_v5 = vpop.permute.xlu0 %10767  ;;  %v7271_v58 = vpop.f32.mrb[100].mxu1 }
 0x449   : > { %v10770_v2 = vunpack.i.h.bf16 %v10768_v5  ;;  %v10769_v8 = vunpack.i.l.bf16 %v10768_v5  ;;  %v10803_v51 = vpop.permute.xlu1 %10802  ;;  %v7272_v27 = vadd.f32 %v14493_v18, %v7271_v58  ;;  %v7273_v4 = vpop.f32.mrb[101].mxu1 }
 0x44a   : > { %v7274_v7 = vpop.f32.mrb[102].mxu1  ;;  %v10804_v37 = vunpack.i.l.bf16 %v10803_v51  ;;  %v6494_v4 = vsel %vm365_vm0, %v4381_v43, %v10784_v36 }
 0x44b   : > { %v14808_v55 = vadd.f32 %v14348_v23, %v7272_v27  ;;  %v7275_v25 = vadd.f32 %v14493_v18, %v7274_v7  ;;  %v7276_v48 = vpop.f32.mrb[103].mxu1  ;;  %v6812_v13 = vsel %vm2782_vm3, %v6748_v41, %v10769_v8  ;;  %v6813_v58 = vsel %vm2782_vm3, %v6749_v21, %v10770_v2  ;;  %v4382_v27 = vld [vmem:[#allocation3 + $0x2d8] sm:$0xff] }
 0x44c   : > { %v10778_v44 = vpop.permute.xlu0 %10777  ;;  %v6904_v29 = vpack.c.bf16 %v6813_v58, %v6812_v13  ;;  %v10785_v23 = vunpack.i.h.bf16 %v14785_v53  ;;  %v10795_v18 = vunpack.i.h.bf16 %v10793_v6  ;;  %v6558_v60 = vsel %vm2717_vm2, %v6494_v4, %v10794_v45  ;;  %v4638_v6 = vld [vmem:[#allocation3 + $0x2f1] sm:$0xff]  ;;  %v14832_v45 = vld [vmem:[%s16379_s4] ss:$0 sm:$0xff] }
 0x44d   : > { %v14813_v28 = vpop.permute.xlu1 %10812  ;;  %v14816_v38 = vadd.f32 %v14358_v42, %v7275_v25  ;;  %v10780_v2 = vunpack.i.h.bf16 %v10778_v44  ;;  %v10779_v5 = vunpack.i.l.bf16 %v10778_v44  ;;  %v10805_v42 = vunpack.i.h.bf16 %v10803_v51 }
 0x44e   : > { %7413 = vmatprep.mubr.bf16.mxu1 %v6904_v29  ;;  %v6495_v7 = vsel %vm365_vm0, %v4382_v27, %v10785_v23  ;;  %v6622_v48 = vsel %vm2782_vm3, %v6558_v60, %v10804_v37 }
 0x44f   : > { %7414 = vmatmul.mubr.bf16.gmra.mrb[172].mxu1 %v6903_v3  ;;  %v6559_v53 = vsel %vm2717_vm2, %v6495_v7, %v10795_v18  ;;  %v6687_v13 = vsel %vm365_vm0, %v4638_v6, %v10780_v2  ;;  %v6686_v58 = vsel %vm365_vm0, %v4637_v26, %v10779_v5 }
 0x450   : > { %v10788_v33 = vpop.permute.xlu0 %10787 }
 0x451   : > { %v10823_v8 = vpop.permute.xlu1 %10822  ;;  %v10790_v41 = vunpack.i.h.bf16 %v10788_v33  ;;  %v10789_v21 = vunpack.i.l.bf16 %v10788_v33  ;;  %v6623_v33 = vsel %vm2782_vm3, %v6559_v53, %v10805_v42  ;;  %v10815_v42 = vunpack.i.h.bf16 %v14813_v28 }
 0x452   : > { %v6906_v26 = vpack.c.bf16 %v6623_v33, %v6622_v48  ;;  %v10814_v53 = vunpack.i.l.bf16 %v14813_v28 }
 0x453   : > { %v6750_v36 = vsel %vm2717_vm2, %v6686_v58, %v10789_v21  ;;  %v6751_v23 = vsel %vm2717_vm2, %v6687_v13, %v10790_v41 }
 0x454   : > { %v10798_v25 = vpop.permute.xlu0 %10797  ;;  %v7279_v3 = vpop.f32.mrb[104].mxu1 }
 0x455   : > { %v10800_v44 = vunpack.i.h.bf16 %v10798_v25  ;;  %v10799_v29 = vunpack.i.l.bf16 %v10798_v25  ;;  %v10833_v51 = vpop.permute.xlu1 %10832  ;;  %v7280_v18 = vadd.f32 %v14832_v45, %v7279_v3  ;;  %v7281_v37 = vpop.f32.mrb[105].mxu1  ;;  %v10825_v25 = vunpack.i.h.bf16 %v10823_v8  ;;  %v4383_v3 = vld [vmem:[#allocation3 + $0x2e8] sm:$0xff] }
 0x456   : > { %v7282_v43 = vpop.f32.mrb[106].mxu1  ;;  %v6496_v33 = vsel %vm365_vm0, %v4383_v3, %v10814_v53 }
 0x457   : > { %v6814_v2 = vsel %vm2782_vm3, %v6750_v36, %v10799_v29  ;;  %v6815_v5 = vsel %vm2782_vm3, %v6751_v23, %v10800_v44  ;;  %v14839_v27 = vadd.f32 %v14384_v20, %v7280_v18  ;;  %v7283_v41 = vadd.f32 %v14832_v45, %v7282_v43  ;;  %v7284_v21 = vpop.f32.mrb[107].mxu1  ;;  %v4384_v36 = vld [vmem:[#allocation3 + $0x2f0] sm:$0xff] }
 0x458   : > { %v10808_v4 = vpop.permute.xlu0 %10807  ;;  %v6907_v7 = vpack.c.bf16 %v6815_v5, %v6814_v2  ;;  %v10824_v20 = vunpack.i.l.bf16 %v10823_v8  ;;  %v10835_v23 = vunpack.i.h.bf16 %v10833_v51  ;;  %v10834_v18 = vunpack.i.l.bf16 %v10833_v51  ;;  %v4640_v43 = vld [vmem:[#allocation3 + $0x309] sm:$0xff]  ;;  %v4639_v8 = vld [vmem:[#allocation3 + $0x301] sm:$0xff] }
 0x459   : > { %v14842_v60 = vpop.permute.xlu1 %10842  ;;  %v14845_v6 = vadd.f32 %v14394_v14, %v7283_v41  ;;  %v10810_v13 = vunpack.i.h.bf16 %v10808_v4  ;;  %v10809_v44 = vunpack.i.l.bf16 %v10808_v4  ;;  %v6497_v14 = vsel %vm365_vm0, %v4384_v36, %v10815_v42 }
 0x45a   : > { %7421 = vmatprep.mubr.bf16.mxu1 %v6907_v7  ;;  %v6560_v28 = vsel %vm2717_vm2, %v6496_v33, %v10824_v20  ;;  %v6561_v2 = vsel %vm2717_vm2, %v6497_v14, %v10825_v25 }
 0x45b   : > { %7422 = vmatmul.mubr.bf16.gmra.mrb[176].mxu1 %v6906_v26  ;;  %v6689_v5 = vsel %vm365_vm0, %v4640_v43, %v10810_v13  ;;  %v6688_v21 = vsel %vm365_vm0, %v4639_v8, %v10809_v44  ;;  %v6624_v25 = vsel %vm2782_vm3, %v6560_v28, %v10834_v18  ;;  %v6625_v36 = vsel %vm2782_vm3, %v6561_v2, %v10835_v23 }
 0x45c   : > { %v10818_v58 = vpop.permute.xlu0 %10817  ;;  %v10845_v18 = vunpack.i.h.bf16 %v14842_v60  ;;  %v10844_v23 = vunpack.i.l.bf16 %v14842_v60 }
 0x45d   : > { %v10853_v29 = vpop.permute.xlu1 %10852  ;;  %v10820_v48 = vunpack.i.h.bf16 %v10818_v58  ;;  %v10819_v37 = vunpack.i.l.bf16 %v10818_v58 }
 0x45e   : > { %v10855_v28 = vunpack.i.h.bf16 %v10853_v29  ;;  %v10854_v2 = vunpack.i.l.bf16 %v10853_v29 }
 0x45f   : > { %v6752_v53 = vsel %vm2717_vm2, %v6688_v21, %v10819_v37  ;;  %v6753_v3 = vsel %vm2717_vm2, %v6689_v5, %v10820_v48  ;;  %v6909_v48 = vpack.c.bf16 %v6625_v36, %v6624_v25  ;;  %v4642_v25 = vld [vmem:[#allocation3 + $0x321] sm:$0xff] }
 0x460   : > { %v10828_v4 = vpop.permute.xlu0 %10827  ;;  %v7287_v41 = vpop.f32.mrb[108].mxu1 }
 0x461   : > { %v10830_v7 = vunpack.i.h.bf16 %v10828_v4  ;;  %v10829_v51 = vunpack.i.l.bf16 %v10828_v4  ;;  %v10863_v26 = vpop.permute.xlu1 %10862  ;;  %v7288_v58 = vadd.f32 %v14832_v45, %v7287_v41  ;;  %v7289_v42 = vpop.f32.mrb[109].mxu1 }
 0x462   : > { %v7290_v20 = vpop.f32.mrb[110].mxu1  ;;  %v10864_v42 = vunpack.i.l.bf16 %v10863_v26 }
 0x463   : > { %v14861_v13 = vadd.f32 %v14376_v0, %v7288_v58  ;;  %v7291_v44 = vadd.f32 %v14832_v45, %v7290_v20  ;;  %v7292_v14 = vpop.f32.mrb[111].mxu1  ;;  %v6816_v33 = vsel %vm2782_vm3, %v6752_v53, %v10829_v51  ;;  %v6817_v43 = vsel %vm2782_vm3, %v6753_v3, %v10830_v7  ;;  %v4385_v51 = vld [vmem:[#allocation3 + $0x300] sm:$0xff]  ;;  %v4386_v7 = vld [vmem:[#allocation3 + $0x308] sm:$0xff] }
 0x464   : > { %v10838_v8 = vpop.permute.xlu0 %10837  ;;  %v6910_v4 = vpack.c.bf16 %v6817_v43, %v6816_v33  ;;  %v10865_v58 = vunpack.i.h.bf16 %v10863_v26  ;;  %v6499_v3 = vsel %vm365_vm0, %v4386_v7, %v10845_v18  ;;  %v6498_v20 = vsel %vm365_vm0, %v4385_v51, %v10844_v23 }
 0x465   : > { %v14867_v37 = vadd.f32 %v14390_v61, %v7291_v44  ;;  %v10873_v0 = vpop.permute.xlu1 %10872  ;;  %v10840_v5 = vunpack.i.h.bf16 %v10838_v8  ;;  %v10839_v21 = vunpack.i.l.bf16 %v10838_v8  ;;  %v6562_v60 = vsel %vm2717_vm2, %v6498_v20, %v10854_v2  ;;  %v4641_v44 = vld [vmem:[#allocation3 + $0x319] sm:$0xff] }
 0x466   : > { %7429 = vmatprep.mubr.bf16.mxu1 %v6910_v4  ;;  %v6563_v36 = vsel %vm2717_vm2, %v6499_v3, %v10855_v28  ;;  %v6626_v28 = vsel %vm2782_vm3, %v6562_v60, %v10864_v42  ;;  %v10875_v42 = vunpack.i.h.bf16 %v10873_v0  ;;  %v10874_v60 = vunpack.i.l.bf16 %v10873_v0 }
 0x467   : > { %7430 = vmatmul.mubr.bf16.gmra.mrb[180].mxu1 %v6909_v48  ;;  %v6691_v29 = vsel %vm365_vm0, %v4642_v25, %v10840_v5  ;;  %v6690_v43 = vsel %vm365_vm0, %v4641_v44, %v10839_v21  ;;  %v6627_v51 = vsel %vm2782_vm3, %v6563_v36, %v10865_v58 }
 0x468   : > { %v10848_v41 = vpop.permute.xlu0 %10847 }
 0x469   : > { %v10850_v53 = vunpack.i.h.bf16 %v10848_v41  ;;  %v10849_v61 = vunpack.i.l.bf16 %v10848_v41  ;;  %v10883_v8 = vpop.permute.xlu1 %10882 }
 0x46a   : > { %v10884_v36 = vunpack.i.l.bf16 %v10883_v8 }
 0x46b   : > { %v6754_v23 = vsel %vm2717_vm2, %v6690_v43, %v10849_v61  ;;  %v6755_v41 = vsel %vm2717_vm2, %v6691_v29, %v10850_v53  ;;  %v6912_v53 = vpack.c.bf16 %v6627_v51, %v6626_v28  ;;  %v4387_v43 = vld [vmem:[#allocation3 + $0x318] sm:$0xff] }
 0x46c   : > { %v10858_v14 = vpop.permute.xlu0 %10857  ;;  %v7295_v33 = vpop.f32.mrb[112].mxu1  ;;  %v4643_v51 = vld [vmem:[#allocation3 + $0x331] sm:$0xff] }
 0x46d   : > { %v10860_v26 = vunpack.i.h.bf16 %v10858_v14  ;;  %v10859_v4 = vunpack.i.l.bf16 %v10858_v14  ;;  %v7296_v48 = vadd.f32 %v14832_v45, %v7295_v33  ;;  %v7297_v18 = vpop.f32.mrb[113].mxu1  ;;  %v10893_v58 = vpop.permute.xlu1 %10892 }
 0x46e   : > { %v7298_v2 = vpop.f32.mrb[114].mxu1 }
 0x46f   : > { %v14883_v5 = vadd.f32 %v14426_v12, %v7296_v48  ;;  %v7299_v21 = vadd.f32 %v14832_v45, %v7298_v2  ;;  %v7300_v7 = vpop.f32.mrb[115].mxu1  ;;  %v6818_v3 = vsel %vm2782_vm3, %v6754_v23, %v10859_v4  ;;  %v6819_v20 = vsel %vm2782_vm3, %v6755_v41, %v10860_v26  ;;  %v4388_v4 = vld [vmem:[#allocation3 + $0x320] sm:$0xff] }
 0x470   : > { %v10868_v25 = vpop.permute.xlu0 %10867  ;;  %v6913_v44 = vpack.c.bf16 %v6819_v20, %v6818_v3  ;;  %v10885_v12 = vunpack.i.h.bf16 %v10883_v8  ;;  %v10895_v48 = vunpack.i.h.bf16 %v10893_v58  ;;  %v10894_v26 = vunpack.i.l.bf16 %v10893_v58  ;;  %v4644_v2 = vld [vmem:[#allocation3 + $0x339] sm:$0xff] }
 0x471   : > { %v14889_v61 = vadd.f32 %v14436_v62, %v7299_v21  ;;  %v10870_v29 = vunpack.i.h.bf16 %v10868_v25  ;;  %v10869_v33 = vunpack.i.l.bf16 %v10868_v25  ;;  %v6501_v62 = vsel %vm365_vm0, %v4388_v4, %v10875_v42 }
 0x472   : > { %7437 = vmatprep.mubr.bf16.mxu1 %v6913_v44  ;;  %v6500_v41 = vsel %vm365_vm0, %v4387_v43, %v10874_v60  ;;  %v6565_v28 = vsel %vm2717_vm2, %v6501_v62, %v10885_v12  ;;  %v4890_v62 = vld [vmem:[#allocation3 + $0x2d2] sm:$0xff] }
 0x473   : > { %7438 = vmatmul.mubr.bf16.gmra.mrb[184].mxu1 %v6912_v53  ;;  %v6564_v0 = vsel %vm2717_vm2, %v6500_v41, %v10884_v36  ;;  %v6693_v8 = vsel %vm365_vm0, %v4644_v2, %v10870_v29  ;;  %v6692_v3 = vsel %vm365_vm0, %v4643_v51, %v10869_v33  ;;  %v6629_v12 = vsel %vm2782_vm3, %v6565_v28, %v10895_v48  ;;  %v4891_v41 = vld [vmem:[#allocation3 + $0x2da] sm:$0xff]  ;;  %v4893_v48 = vld [vmem:[#allocation3 + $0x2f2] sm:$0xff]  ;;  %v4895_v28 = vld [vmem:[#allocation3 + $0x30a] sm:$0xff] }
 0x474   : > { %v10878_v14 = vpop.permute.xlu0 %10877  ;;  %v6628_v36 = vsel %vm2782_vm3, %v6564_v0, %v10894_v26  ;;  %v6902_v26 = vpack.c.bf16 %v4891_v41, %v4890_v62  ;;  %v4894_v0 = vld [vmem:[#allocation3 + $0x302] sm:$0xff] }
 0x475   : > { %v10880_v18 = vunpack.i.h.bf16 %v10878_v14  ;;  %v10879_v23 = vunpack.i.l.bf16 %v10878_v14  ;;  %v6915_v2 = vpack.c.bf16 %v6629_v12, %v6628_v36  ;;  %v4899_v36 = vld [vmem:[#allocation3 + $0x33a] sm:$0xff] }
 0x477   : > { %v6756_v42 = vsel %vm2717_vm2, %v6692_v3, %v10879_v23  ;;  %v6757_v60 = vsel %vm2717_vm2, %v6693_v8, %v10880_v18  ;;  %vm11079_vm2 = vmmov 0  }
 0x478   : > { %v10888_v21 = vpop.permute.xlu0 %10887  ;;  %v7303_v7 = vpop.f32.mrb[116].mxu1 }
 0x479   : > { %v10890_v20 = vunpack.i.h.bf16 %v10888_v21  ;;  %v10889_v25 = vunpack.i.l.bf16 %v10888_v21  ;;  %v7304_v44 = vadd.f32 %v14832_v45, %v7303_v7  ;;  %v7305_v53 = vpop.f32.mrb[117].mxu1 }
 0x47a   : > { %v7306_v58 = vpop.f32.mrb[118].mxu1 }
 0x47b   : > { %v14903_v29 = vadd.f32 %v14424_v47, %v7304_v44  ;;  %v7307_v14 = vadd.f32 %v14832_v45, %v7306_v58  ;;  %v7308_v33 = vpop.f32.mrb[119].mxu1  ;;  %v6820_v43 = vsel %vm2782_vm3, %v6756_v42, %v10889_v25  ;;  %v6821_v4 = vsel %vm2782_vm3, %v6757_v60, %v10890_v20  ;;  %v4892_v47 = vld [vmem:[#allocation3 + $0x2ea] sm:$0xff]  ;;  %v4896_v42 = vld [vmem:[#allocation3 + $0x31a] sm:$0xff]  ;;  %v4897_v60 = vld [vmem:[#allocation3 + $0x322] sm:$0xff] }
 0x47c   : > { %v6916_v23 = vpack.c.bf16 %v6821_v4, %v6820_v43  ;;  %v6905_v7 = vpack.c.bf16 %v4893_v48, %v4892_v47  ;;  %v6908_v20 = vpack.c.bf16 %v4895_v28, %v4894_v0  ;;  %v4898_v58 = vld [vmem:[#allocation3 + $0x332] sm:$0xff]  ;;  %v6911_v12 = vpack.c.bf16 %v4897_v60, %v4896_v42  ;;  %v4900_v33 = vld [vmem:[#allocation3 + $0x34a] sm:$0xff] }
 0x47d   : > { %v14909_v18 = vadd.f32 %v14432_v30, %v7307_v14  ;;  %v6914_v14 = vpack.c.bf16 %v4899_v36, %v4898_v58  ;;  %v4901_v43 = vld [vmem:[#allocation3 + $0x352] sm:$0xff]  ;;  %vm7889_vm3 = vcmask 1041409  }
 0x47e   : > { %7445 = vmatprep.mubr.bf16.mxu1 %v6916_v23 }
 0x47f   : > { %7446 = vmatmul.mubr.bf16.gmra.mrb[188].mxu1 %v6915_v2 }
 0x480   : > { %8880 = vmatprep.mubr.msk.bf16.mxu1 %vm365_vm0, %v6902_v26  ;;  %v6917_v26 = vpack.c.bf16 %v4901_v43, %v4900_v33 }
 0x484   : > { %v7311_v51 = vpop.f32.mrb[120].mxu1 }
 0x485   : > { %v7312_v8 = vadd.f32 %v14832_v45, %v7311_v51  ;;  %v7313_v21 = vpop.f32.mrb[121].mxu1 }
 0x486   : > { %v7314_v3 = vpop.f32.mrb[122].mxu1 }
 0x487   : > { %v14914_v30 = vadd.f32 %v14462_v46, %v7312_v8  ;;  %8881 = vmatmul.mubr.msk.bf16.vlgmr.msra.gmra.mrb[192].mxu1 %vm365_vm0, %v6905_v7  ;;  %v7315_v25 = vadd.f32 %v14832_v45, %v7314_v3  ;;  %v7316_v44 = vpop.f32.mrb[123].mxu1 }
 0x488   : > { %8884 = vmatprep.mubr.msk.bf16.mxu1 %vm365_vm0, %v6908_v20 }
 0x489   : > { %v14920_v53 = vadd.f32 %v14468_v15, %v7315_v25 }
 0x48f   : > { %8885 = vmatmul.mubr.msk.bf16.gmra.mrb[196].mxu1 %vm365_vm0, %v6911_v12 }
 0x490   : > { %8888 = vmatprep.mubr.msk.bf16.mxu1 %vm365_vm0, %v6914_v14  ;;  %v7319_v46 = vpop.f32.mrb[124].mxu1 }
 0x491   : > { %v7320_v4 = vadd.f32 %v14832_v45, %v7319_v46  ;;  %v7321_v62 = vpop.f32.mrb[125].mxu1 }
 0x492   : > { %v7322_v41 = vpop.f32.mrb[126].mxu1 }
 0x493   : > { %v14926_v15 = vadd.f32 %v14457_v17, %v7320_v4  ;;  %v7323_v23 = vadd.f32 %v14832_v45, %v7322_v41  ;;  %v7324_v2 = vpop.f32.mrb[127].mxu1 }
 0x495   : > { %v14930_v47 = vadd.f32 %v14464_v50, %v7323_v23 }
 0x497   : > { %8889 = vmatmul.mubr.msk.bf16.gmra.mrb[200].mxu1 %vm365_vm0, %v6917_v26 }
 0x49c   : > { %v7327_v48 = vpop.f32.mrb[128].mxu1 }
 0x49d   : > { %v7328_v0 = vadd.f32 %v14832_v45, %v7327_v48  ;;  %v7329_v28 = vpop.f32.mrb[129].mxu1 }
 0x49e   : > { %v7330_v51 = vpop.f32.mrb[130].mxu1 }
 0x49f   : > { %v14935_v8 = vadd.f32 %v14559_v19, %v7328_v0  ;;  %v7331_v17 = vadd.f32 %v14832_v45, %v7330_v51  ;;  %v7332_v21 = vpop.f32.mrb[131].mxu1 }
 0x4a1   : > { %16674 = vst [vmem:[#allocation74_spill] sm:$0xff] %v14935_v8  ;;  %v14939_v7 = vadd.f32 %v14567_v32, %v7331_v17 }
 0x4a3   : > { %16675 = vst [vmem:[#allocation75_spill] sm:$0xff] %v14939_v7 }
 0x4a8   : > { %v7335_v3 = vpop.f32.mrb[132].mxu1 }
 0x4a9   : > { %v7336_v50 = vadd.f32 %v14832_v45, %v7335_v3  ;;  %v7337_v20 = vpop.f32.mrb[133].mxu1 }
 0x4aa   : > { %v7338_v25 = vpop.f32.mrb[134].mxu1 }
 0x4ab   : > { %v14943_v44 = vadd.f32 %v14554_v56, %v7336_v50  ;;  %v7339_v42 = vadd.f32 %v14832_v45, %v7338_v25  ;;  %v7340_v60 = vpop.f32.mrb[135].mxu1 }
 0x4ad   : > { %16676 = vst [vmem:[#allocation77_spill] sm:$0xff] %v14943_v44  ;;  %v14947_v19 = vadd.f32 %v14561_v49, %v7339_v42 }
 0x4af   : > { %16677 = vst [vmem:[#allocation94_spill] sm:$0xff] %v14947_v19 }
 0x4b4   : > { %v7343_v58 = vpop.f32.mrb[136].mxu1 }
 0x4b5   : > { %v7344_v36 = vadd.f32 %v14832_v45, %v7343_v58  ;;  %v7345_v12 = vpop.f32.mrb[137].mxu1 }
 0x4b6   : > { %v7346_v32 = vpop.f32.mrb[138].mxu1 }
 0x4b7   : > { %v14951_v14 = vadd.f32 %v14624_v10, %v7344_v36  ;;  %v7347_v46 = vadd.f32 %v14832_v45, %v7346_v32  ;;  %v7348_v33 = vpop.f32.mrb[139].mxu1 }
 0x4b9   : > { %16678 = vst [vmem:[#allocation95_spill] sm:$0xff] %v14951_v14  ;;  %v14955_v56 = vadd.f32 %v14636_v9, %v7347_v46 }
 0x4bb   : > { %16679 = vst [vmem:[#allocation96_spill] sm:$0xff] %v14955_v56 }
 0x4c0   : > { %v7351_v43 = vpop.f32.mrb[140].mxu1 }
 0x4c1   : > { %v7352_v4 = vadd.f32 %v14832_v45, %v7351_v43  ;;  %v7353_v62 = vpop.f32.mrb[141].mxu1 }
 0x4c2   : > { %v7354_v49 = vpop.f32.mrb[142].mxu1 }
 0x4c3   : > { %v14959_v41 = vadd.f32 %v14621_v40, %v7352_v4  ;;  %v7355_v23 = vadd.f32 %v14832_v45, %v7354_v49  ;;  %v7356_v2 = vpop.f32.mrb[143].mxu1 }
 0x4c5   : > { %v14963_v10 = vadd.f32 %v14626_v31, %v7355_v23 }
 0x4c7   : > { %16680 = vst [vmem:[#allocation97_spill] sm:$0xff] %v14963_v10 }
 0x4cc   : > { %v7359_v26 = vpop.f32.mrb[144].mxu1 }
 0x4cd   : > { %v7360_v48 = vadd.f32 %v14832_v45, %v7359_v26  ;;  %v7361_v0 = vpop.f32.mrb[145].mxu1 }
 0x4ce   : > { %v7362_v9 = vpop.f32.mrb[146].mxu1  ;;  %v7884_v0 = vld [vmem:[%s16380_s5 + $0x8] sm:$0xff] }
 0x4cf   : > { %v14967_v28 = vadd.f32 %v14671_v16, %v7360_v48  ;;  %v7363_v51 = vadd.f32 %v14832_v45, %v7362_v9  ;;  %v7364_v17 = vpop.f32.mrb[147].mxu1 }
 0x4d0   : > { %v7886_v17 = vld [vmem:[%s16380_s5 + $0x18] sm:$0xff] }
 0x4d1   : > { %v14971_v40 = vadd.f32 %v14678_v11, %v7363_v51  ;;  %v11078_v51 = vmov 0.0|0.0  }
 0x4d2   : > { %8908 = vmatprep.subr.bf16.mxu1 %v11078_v51 }
 0x4d3   : > { %16681 = vst [vmem:[#allocation98_spill] sm:$0xff] %v14971_v40 }
 0x4d8   : > { %v7367_v21 = vpop.f32.mrb[148].mxu1 }
 0x4d9   : > { %v7368_v3 = vadd.f32 %v14832_v45, %v7367_v21  ;;  %v7369_v50 = vpop.f32.mrb[149].mxu1  ;;  %v16686_v21 = vmov 0.0  }
 0x4da   : > { %v7370_v31 = vpop.f32.mrb[150].mxu1  ;;  %8900 = vmatprep.mubr.msk.f32.mxu1 %vm11079_vm2, %v16686_v21 }
 0x4db   : > { %v14975_v20 = vadd.f32 %v14668_v52, %v7368_v3  ;;  %v7371_v25 = vadd.f32 %v14832_v45, %v7370_v31  ;;  %v7372_v42 = vpop.f32.mrb[151].mxu1 }
 0x4dd   : > { %v14979_v16 = vadd.f32 %v14675_v63, %v7371_v25 }
 0x4df   : > { %16682 = vst [vmem:[#allocation99_spill] sm:$0xff] %v14979_v16 }
 0x4e4   : > { %v7375_v60 = vpop.f32.mrb[152].mxu1 }
 0x4e5   : > { %v7376_v58 = vadd.f32 %v14832_v45, %v7375_v60  ;;  %v7377_v36 = vpop.f32.mrb[153].mxu1  ;;  %v7744_v60 = vsel %vm365_vm0, %v14517_v1, 0.0 }
 0x4e6   : > { %v7378_v11 = vpop.f32.mrb[154].mxu1 }
 0x4e7   : > { %v14983_v12 = vadd.f32 %v14726_v39, %v7376_v58  ;;  %v7379_v32 = vadd.f32 %v14832_v45, %v7378_v11  ;;  %v7380_v46 = vpop.f32.mrb[155].mxu1  ;;  %v16688_v11 = vld [vmem:[#allocation78_spill] sm:$0xff] }
 0x4e8   : > { %v16689_v46 = vld [vmem:[#allocation79_spill] sm:$0xff] }
 0x4e9   : > { %v14987_v52 = vadd.f32 %v14734_v22, %v7379_v32  ;;  %v7883_v22 = vld [vmem:[%s16380_s5] sm:$0xff]  ;;  %v7743_v32 = vsel %vm365_vm0, %v16688_v11, 0.0 }
 0x4eb   : > { %16683 = vst [vmem:[#allocation100_spill] sm:$0xff] %v14987_v52 }
 0x4f0   : > { %v7383_v33 = vpop.f32.mrb[156].mxu1 }
 0x4f1   : > { %v7384_v43 = vadd.f32 %v14832_v45, %v7383_v33  ;;  %v7385_v4 = vpop.f32.mrb[157].mxu1  ;;  %v7746_v33 = vsel %vm365_vm0, %v16689_v46, 0.0 }
 0x4f2   : > { %v7386_v63 = vpop.f32.mrb[158].mxu1 }
 0x4f3   : > { %v14991_v62 = vadd.f32 %v14724_v57, %v7384_v43  ;;  %v7387_v49 = vadd.f32 %v14832_v45, %v7386_v63  ;;  %v7388_v23 = vpop.f32.mrb[159].mxu1  ;;  %v7885_v57 = vld [vmem:[%s16380_s5 + $0x10] sm:$0xff] }
 0x4f4   : > { %v8912_v25 = vpack.c.bf16 %v7886_v17, %v7885_v57 }
 0x4f5   : > { %16684 = vst [vmem:[#allocation101_spill] sm:$0xff] %v14991_v62  ;;  %v14995_v39 = vadd.f32 %v14730_v24, %v7387_v49  ;;  %v8909_v24 = vpack.c.bf16 %v7884_v0, %v7883_v22  ;;  %v16693_v22 = vld [vmem:[#allocation81_spill] sm:$0xff] }
 0x4f6   : > { %v7750_v0 = vsel %vm365_vm0, %v16693_v22, 0.0 }
 0x4f7   : > { %16685 = vst [vmem:[#allocation102_spill] sm:$0xff] %v14995_v39  ;;  %8910 = vmatpush3.bf16.msra.mxu1 %v8909_v24 }
 0x4f8   : > { %8911 = vmatprep.subr.bf16.mxu1 %v11078_v51  ;;  %v16694_v51 = vld [vmem:[#allocation82_spill] sm:$0xff] }
 0x4f9   : > { %v7752_v24 = vsel %vm365_vm0, %v16694_v51, 0.0 }
 0x4fb   : > { %8913 = vmatpush3.bf16.msra.mxu1 %v8912_v25 }
 0x4fc   : > { %v7391_v2 = vpop.f32.mrb[160].mxu1  ;;  %8903 = vmatprep.subr.mxu1 %v16686_v21 }
 0x4fd   : > { %v7392_v26 = vadd.f32 %v14832_v45, %v7391_v2  ;;  %v7393_v48 = vpop.f32.mrb[161].mxu1 }
 0x4fe   : > { %v7394_v9 = vpop.f32.mrb[162].mxu1 }
 0x4ff   : > { %v15013_v3 = vadd.f32 %v14778_v34, %v7392_v26  ;;  %v7395_v50 = vadd.f32 %v14832_v45, %v7394_v9  ;;  %v7396_v31 = vpop.f32.mrb[163].mxu1  ;;  %v16692_v26 = vld [vmem:[#allocation80_spill] sm:$0xff] }
 0x500   : > { %v7748_v48 = vsel %vm365_vm0, %v16692_v26, 0.0 }
 0x501   : > { %v15017_v42 = vadd.f32 %v14790_v54, %v7395_v50  ;;  %v7745_v54 = vadd.f32 %v7744_v60, %v7743_v32  ;;  %v16695_v50 = vld [vmem:[#allocation83_spill] sm:$0xff]  ;;  %v16697_v32 = vld [vmem:[#allocation85_spill] sm:$0xff] }
 0x502   : > { %v7754_v31 = vsel %vm365_vm0, %v16695_v50, 0.0 }
 0x503   : > { %16687 = vst [vmem:[#allocation103_spill] sm:$0xff] %v15017_v42  ;;  %v7747_v23 = vadd.f32 %v7746_v33, %v7745_v54  ;;  %v7758_v33 = vsel %vm365_vm0, %v16697_v32, 0.0  ;;  %v16702_v32 = vld [vmem:[#allocation72_spill] sm:$0xff] }
 0x505   : > { %v7749_v57 = vadd.f32 %v7748_v48, %v7747_v23 }
 0x507   : > { %v7751_v9 = vadd.f32 %v7750_v0, %v7749_v57  ;;  %v16699_v0 = vld [vmem:[#allocation87_spill] sm:$0xff] }
 0x508   : > { %v7399_v58 = vpop.f32.mrb[164].mxu1  ;;  %v7762_v57 = vsel %vm365_vm0, %v16699_v0, 0.0  ;;  %v16701_v0 = vld [vmem:[#allocation89_spill] sm:$0xff] }
 0x509   : > { %v7400_v36 = vadd.f32 %v14832_v45, %v7399_v58  ;;  %v7401_v34 = vpop.f32.mrb[165].mxu1 }
 0x50a   : > { %v7402_v43 = vpop.f32.mrb[166].mxu1 }
 0x50b   : > { %v15028_v4 = vadd.f32 %v14771_v35, %v7400_v36  ;;  %v7403_v63 = vadd.f32 %v14832_v45, %v7402_v43  ;;  %v7404_v49 = vpop.f32.mrb[167].mxu1  ;;  %v16696_v36 = vld [vmem:[#allocation84_spill] sm:$0xff] }
 0x50c   : > { %v7756_v34 = vsel %vm365_vm0, %v16696_v36, 0.0 }
 0x50d   : > { %16690 = vst [vmem:[#allocation78_spill] sm:$0xff] %v15028_v4  ;;  %v15032_v2 = vadd.f32 %v14783_v59, %v7403_v63  ;;  %v7753_v59 = vadd.f32 %v7752_v24, %v7751_v9  ;;  %v16698_v63 = vld [vmem:[#allocation86_spill] sm:$0xff]  ;;  %v7813_v9 = vsel %vm365_vm0, %v14939_v7, 0.0  ;;  %v7817_v7 = vsel %vm365_vm0, %v14947_v19, 0.0 }
 0x50e   : > { %v7760_v49 = vsel %vm365_vm0, %v16698_v63, 0.0  ;;  %v7766_v63 = vsel %vm365_vm0, %v16701_v0, 0.0 }
 0x50f   : > { %16691 = vst [vmem:[#allocation79_spill] sm:$0xff] %v15032_v2  ;;  %v7755_v58 = vadd.f32 %v7754_v31, %v7753_v59  ;;  %v7812_v59 = vsel %vm365_vm0, %v14935_v8, 0.0 }
 0x511   : > { %v7757_v43 = vadd.f32 %v7756_v34, %v7755_v58  ;;  %v7814_v34 = vadd.f32 %v7813_v9, %v7812_v59 }
 0x513   : > { %v7759_v54 = vadd.f32 %v7758_v33, %v7757_v43  ;;  %v16700_v33 = vld [vmem:[#allocation88_spill] sm:$0xff] }
 0x514   : > { %v15040_v35 = vpop.f32.mrb[168].mxu1  ;;  %v7764_v43 = vsel %vm365_vm0, %v16700_v33, 0.0 }
 0x515   : > { %v7409_v17 = vpop.f32.mrb[169].mxu1 }
 0x516   : > { %v15044_v25 = vpop.f32.mrb[170].mxu1  ;;  %v7761_v17 = vadd.f32 %v7760_v49, %v7759_v54  ;;  %v7819_v49 = vsel %vm365_vm0, %v14951_v14, 0.0 }
 0x517   : > { %v7412_v60 = vpop.f32.mrb[171].mxu1 }
 0x518   : > { %v7815_v60 = vsel %vm365_vm0, %v14943_v44, 0.0  ;;  %v7763_v58 = vadd.f32 %v7762_v57, %v7761_v17  ;;  %v7768_v57 = vsel %vm365_vm0, %v16702_v32, 0.0  ;;  %v7821_v44 = vsel %vm365_vm0, %v14955_v56, 0.0  ;;  %v16706_v32 = vld [vmem:[#allocation76_spill] sm:$0xff] }
 0x51a   : > { %v7765_v54 = vadd.f32 %v7764_v43, %v7763_v58 }
 0x522   : > { %v15052_v23 = vpop.f32.mrb[172].mxu1 }
 0x523   : > { %v7417_v48 = vpop.f32.mrb[173].mxu1 }
 0x524   : > { %v15058_v24 = vpop.f32.mrb[174].mxu1  ;;  %v7816_v48 = vadd.f32 %v7815_v60, %v7814_v34  ;;  %v16703_v60 = vld [vmem:[#allocation90_spill] sm:$0xff] }
 0x525   : > { %v7420_v31 = vpop.f32.mrb[175].mxu1  ;;  %v7770_v34 = vsel %vm365_vm0, %v16703_v60, 0.0  ;;  %v7825_v60 = vsel %vm365_vm0, %v14963_v10, 0.0 }
 0x526   : > { %v7767_v31 = vadd.f32 %v7766_v63, %v7765_v54  ;;  %v7818_v8 = vadd.f32 %v7817_v7, %v7816_v48  ;;  %v7823_v7 = vsel %vm365_vm0, %v14959_v41, 0.0  ;;  %v16704_v54 = vld [vmem:[#allocation91_spill] sm:$0xff] }
 0x527   : > { %v7772_v14 = vsel %vm365_vm0, %v16704_v54, 0.0 }
 0x528   : > { %v7820_v17 = vadd.f32 %v7819_v49, %v7818_v8  ;;  %v7769_v58 = vadd.f32 %v7768_v57, %v7767_v31  ;;  %v16705_v49 = vld [vmem:[#allocation73_spill] sm:$0xff]  ;;  %v7827_v31 = vsel %vm365_vm0, %v14967_v28, 0.0 }
 0x52a   : > { %v7771_v63 = vadd.f32 %v7770_v34, %v7769_v58  ;;  %v7822_v48 = vadd.f32 %v7821_v44, %v7820_v17  ;;  %v7776_v34 = vsel %vm365_vm0, %v16706_v32, 0.0 }
 0x52c   : > { %v7824_v8 = vadd.f32 %v7823_v7, %v7822_v48  ;;  %v7773_v56 = vadd.f32 %v7772_v14, %v7771_v63  ;;  %v7778_v7 = vsel %vm365_vm0, %v14808_v55, 0.0  ;;  %v7829_v48 = vsel %vm365_vm0, %v14971_v40, 0.0 }
 0x52e   : > { %v15074_v9 = vpop.f32.mrb[176].mxu1 }
 0x52f   : > { %v7425_v59 = vpop.f32.mrb[177].mxu1 }
 0x530   : > { %v15080_v19 = vpop.f32.mrb[178].mxu1  ;;  %v7774_v59 = vsel %vm365_vm0, %v16705_v49, 0.0 }
 0x531   : > { %v7428_v43 = vpop.f32.mrb[179].mxu1  ;;  %v7775_v57 = vadd.f32 %v7774_v59, %v7773_v56  ;;  %v7831_v56 = vsel %vm365_vm0, %v14975_v20, 0.0  ;;  %v7780_v59 = vsel %vm365_vm0, %v14816_v38, 0.0 }
 0x532   : > { %v7826_v43 = vadd.f32 %v7825_v60, %v7824_v8 }
 0x533   : > { %v7777_v14 = vadd.f32 %v7776_v34, %v7775_v57  ;;  %v7835_v57 = vsel %vm365_vm0, %v14983_v12, 0.0 }
 0x534   : > { %v7828_v17 = vadd.f32 %v7827_v31, %v7826_v43  ;;  %v7782_v43 = vsel %vm365_vm0, %v14839_v27, 0.0 }
 0x535   : > { %v7779_v60 = vadd.f32 %v7778_v7, %v7777_v14  ;;  %v7784_v7 = vsel %vm365_vm0, %v14845_v6, 0.0 }
 0x536   : > { %v7830_v8 = vadd.f32 %v7829_v48, %v7828_v17 }
 0x537   : > { %v7781_v40 = vadd.f32 %v7780_v59, %v7779_v60 }
 0x538   : > { %v7832_v31 = vadd.f32 %v7831_v56, %v7830_v8  ;;  %v7786_v56 = vsel %vm365_vm0, %v14861_v13, 0.0  ;;  %v7837_v8 = vsel %vm365_vm0, %v14987_v52, 0.0 }
 0x539   : > { %v7783_v34 = vadd.f32 %v7782_v43, %v7781_v40  ;;  %v7839_v40 = vsel %vm365_vm0, %v14991_v62, 0.0 }
 0x53a   : > { %v15094_v44 = vpop.f32.mrb[180].mxu1 }
 0x53b   : > { %v7433_v58 = vpop.f32.mrb[181].mxu1  ;;  %v7785_v60 = vadd.f32 %v7784_v7, %v7783_v34  ;;  %v7843_v34 = vsel %vm365_vm0, %v15013_v3, 0.0 }
 0x53c   : > { %v15100_v10 = vpop.f32.mrb[182].mxu1  ;;  %v7833_v58 = vsel %vm365_vm0, %v14979_v16, 0.0 }
 0x53d   : > { %v7436_v63 = vpop.f32.mrb[183].mxu1 }
 0x53e   : > { %v7834_v63 = vadd.f32 %v7833_v58, %v7832_v31  ;;  %v7787_v31 = vadd.f32 %v7786_v56, %v7785_v60  ;;  %v7788_v58 = vsel %vm365_vm0, %v14867_v37, 0.0  ;;  %v7792_v56 = vsel %vm365_vm0, %v14889_v61, 0.0 }
 0x540   : > { %v7836_v48 = vadd.f32 %v7835_v57, %v7834_v63  ;;  %v7790_v63 = vsel %vm365_vm0, %v14883_v5, 0.0  ;;  %v7789_v52 = vadd.f32 %v7788_v58, %v7787_v31  ;;  %v7847_v58 = vsel %vm365_vm0, %v15028_v4, 0.0 }
 0x542   : > { %v7838_v43 = vadd.f32 %v7837_v8, %v7836_v48  ;;  %v7791_v7 = vadd.f32 %v7790_v63, %v7789_v52  ;;  %v7796_v63 = vsel %vm365_vm0, %v14909_v18, 0.0 }
 0x544   : > { %v7840_v57 = vadd.f32 %v7839_v40, %v7838_v43  ;;  %v7794_v40 = vsel %vm365_vm0, %v14903_v29, 0.0  ;;  %v7845_v43 = vsel %vm365_vm0, %v15017_v42, 0.0 }
 0x546   : > { %v15114_v17 = vpop.f32.mrb[184].mxu1 }
 0x547   : > { %v7441_v14 = vpop.f32.mrb[185].mxu1 }
 0x548   : > { %v15120_v16 = vpop.f32.mrb[186].mxu1  ;;  %v7841_v14 = vsel %vm365_vm0, %v14995_v39, 0.0  ;;  %v7793_v39 = vadd.f32 %v7792_v56, %v7791_v7  ;;  %v7408_v7 = vadd.f32 %v14832_v45, %v15040_v35  ;;  %v7800_v35 = vsel %vm365_vm0, %v14920_v53, 0.0 }
 0x549   : > { %v7444_v59 = vpop.f32.mrb[187].mxu1 }
 0x54a   : > { %v7842_v59 = vadd.f32 %v7841_v14, %v7840_v57  ;;  %v7795_v52 = vadd.f32 %v7794_v40, %v7793_v39  ;;  %v7419_v39 = vadd.f32 %v14832_v45, %v15058_v24 }
 0x54c   : > { %v7844_v8 = vadd.f32 %v7843_v34, %v7842_v59  ;;  %v7416_v34 = vadd.f32 %v14832_v45, %v15052_v23  ;;  %v7798_v59 = vsel %vm365_vm0, %v14914_v30, 0.0  ;;  %v7411_v23 = vadd.f32 %v14832_v45, %v15044_v25 }
 0x54d   : > { %v7802_v25 = vsel %vm365_vm0, %v14926_v15, 0.0 }
 0x54e   : > { %v7846_v57 = vadd.f32 %v7845_v43, %v7844_v8 }
 0x550   : > { %v7848_v14 = vadd.f32 %v7847_v58, %v7846_v57 }
 0x552   : > { %v7447_v48 = vpop.f32.mrb[188].mxu1 }
 0x553   : > { %v7449_v60 = vpop.f32.mrb[189].mxu1 }
 0x554   : > { %v7450_v62 = vpop.f32.mrb[190].mxu1  ;;  %v7849_v60 = vsel %vm365_vm0, %v15032_v2, 0.0 }
 0x555   : > { %v7452_v31 = vpop.f32.mrb[191].mxu1  ;;  %v7850_v4 = vadd.f32 %v7849_v60, %v7848_v14  ;;  %v7432_v14 = vadd.f32 %v14832_v45, %v15094_v44  ;;  %v7427_v44 = vadd.f32 %v14832_v45, %v15080_v19 }
 0x556   : > { %v7797_v31 = vadd.f32 %v7796_v63, %v7795_v52 }
 0x558   : > { %v7799_v57 = vadd.f32 %v7798_v59, %v7797_v31 }
 0x55a   : > { %v8882_v56 = vpop.f32.mrb[192].mxu1  ;;  %v7801_v59 = vadd.f32 %v7800_v35, %v7799_v57 }
 0x55b   : > { %v15152_v8 = vadd.f32 %v8882_v56, %v7416_v34  ;;  %v7696_v40 = vpop.f32.mrb[193].mxu1 }
 0x55c   : > { %v15156_v43 = vadd.f32 %v7696_v40, %v7408_v7  ;;  %v8883_v58 = vpop.f32.mrb[194].mxu1  ;;  %v7424_v7 = vadd.f32 %v14832_v45, %v15074_v9  ;;  %v7803_v31 = vadd.f32 %v7802_v25, %v7801_v59 }
 0x55d   : > { %v15158_v2 = vadd.f32 %v8883_v58, %v7419_v39  ;;  %v7699_v42 = vpop.f32.mrb[195].mxu1  ;;  %v7855_v56 = vsel %vm365_vm0, %v15152_v8, 0.0  ;;  %v7804_v58 = vsel %vm365_vm0, %v14930_v47, 0.0 }
 0x55e   : > { %v7851_v24 = vsel %vm365_vm0, %v15156_v43, 0.0  ;;  %v15164_v52 = vadd.f32 %v7699_v42, %v7411_v23  ;;  %v7805_v59 = vadd.f32 %v7804_v58, %v7803_v31  ;;  %v7443_v58 = vadd.f32 %v14832_v45, %v15120_v16 }
 0x55f   : > { %v7852_v63 = vadd.f32 %v7851_v24, %v7850_v4  ;;  %v7435_v4 = vadd.f32 %v14832_v45, %v15100_v10  ;;  %v7857_v9 = vsel %vm365_vm0, %v15158_v2, 0.0 }
 0x560   : > { %v7853_v34 = vsel %vm365_vm0, %v15164_v52, 0.0 }
 0x561   : > { %v7854_v60 = vadd.f32 %v7853_v34, %v7852_v63 }
 0x562   : > { %v8886_v42 = vpop.f32.mrb[196].mxu1 }
 0x563   : > { %v7856_v39 = vadd.f32 %v7855_v56, %v7854_v60  ;;  %v15178_v40 = vadd.f32 %v8886_v42, %v7432_v14  ;;  %v7712_v23 = vpop.f32.mrb[197].mxu1  ;;  %v7448_v60 = vadd.f32 %v14832_v45, %v7447_v48 }
 0x564   : > { %v15186_v57 = vadd.f32 %v7712_v23, %v7424_v7  ;;  %v8887_v35 = vpop.f32.mrb[198].mxu1  ;;  %v7440_v7 = vadd.f32 %v14832_v45, %v15114_v17  ;;  %v7451_v23 = vadd.f32 %v14832_v45, %v7450_v62 }
 0x565   : > { %v7858_v24 = vadd.f32 %v7857_v9, %v7856_v39  ;;  %v15188_v63 = vadd.f32 %v8887_v35, %v7435_v4  ;;  %v7715_v10 = vpop.f32.mrb[199].mxu1  ;;  %v7863_v42 = vsel %vm365_vm0, %v15178_v40, 0.0  ;;  %v7806_v39 = vrot.slane %v7805_v59, 4 }
 0x566   : > { %v7859_v25 = vsel %vm365_vm0, %v15186_v57, 0.0  ;;  %v15192_v34 = vadd.f32 %v7715_v10, %v7427_v44 }
 0x567   : > { %v7860_v14 = vadd.f32 %v7859_v25, %v7858_v24  ;;  %v7865_v48 = vsel %vm365_vm0, %v15188_v63, 0.0 }
 0x568   : > { %v7861_v19 = vsel %vm365_vm0, %v15192_v34, 0.0 }
 0x569   : > { %v7862_v56 = vadd.f32 %v7861_v19, %v7860_v14  ;;  %v7807_v19 = vadd.f32 %v7806_v39, %v7805_v59 }
 0x56a   : > { %v8890_v4 = vpop.f32.mrb[200].mxu1 }
 0x56b   : > { %v7864_v44 = vadd.f32 %v7863_v42, %v7862_v56  ;;  %v15202_v9 = vadd.f32 %v8890_v4, %v7448_v60  ;;  %v7728_v31 = vpop.f32.mrb[201].mxu1 }
 0x56c   : > { %v15208_v35 = vadd.f32 %v7728_v31, %v7440_v7  ;;  %v8891_v17 = vpop.f32.mrb[202].mxu1  ;;  %v7808_v7 = vrot.slane %v7807_v19, 2 }
 0x56d   : > { %v7866_v24 = vadd.f32 %v7865_v48, %v7864_v44  ;;  %v15210_v10 = vadd.f32 %v8891_v17, %v7451_v23  ;;  %v7731_v25 = vpop.f32.mrb[203].mxu1  ;;  %v7871_v56 = vsel %vm365_vm0, %v15202_v9, 0.0 }
 0x56e   : > { %v7867_v62 = vsel %vm365_vm0, %v15208_v35, 0.0  ;;  %v15214_v14 = vadd.f32 %v7731_v25, %v7443_v58  ;;  %v7809_v44 = vadd.f32 %v7808_v7, %v7807_v19  ;;  %v7966_v19 = vld [vmem:[%s16381_s6] sm:$0x3] }
 0x56f   : > { %v7868_v60 = vadd.f32 %v7867_v62, %v7866_v24  ;;  %v7873_v4 = vsel %vm365_vm0, %v15210_v10, 0.0 }
 0x570   : > { %v7869_v45 = vsel %vm365_vm0, %v15214_v14, 0.0  ;;  %v7810_v58 = vrot.slane %v7809_v44, 1 }
 0x571   : > { %v7870_v16 = vadd.f32 %v7869_v45, %v7868_v60 }
 0x572   : > { %v7811_v39 = vadd.f32 %v7810_v58, %v7809_v44  ;;  %v11080_v58 = vmov 1966171168  }
 0x573   : > { %v7872_v42 = vadd.f32 %v7871_v56, %v7870_v16 }
 0x574   : > { %v7881_v62 = vmul.f32 0.00390625, %v7811_v39 }
 0x575   : > { %v7874_v23 = vadd.f32 %v7873_v4, %v7872_v42 }
 0x577   : > { %v7875_v31 = vrot.slane %v7874_v23, 4 }
 0x579   : > { %v7876_v48 = vadd.f32 %v7875_v31, %v7874_v23 }
 0x57b   : > { %v7877_v17 = vrot.slane %v7876_v48, 2 }
 0x57d   : > { %v7878_v59 = vadd.f32 %v7877_v17, %v7876_v48  ;;  %v8053_v17 = vunpack.c.l.s4 %v11080_v58 }
 0x57f   : > { %v7879_v24 = vrot.slane %v7878_v59, 1  ;;  %v8054_v39 = vunpack.c.0.s8 %v8053_v17 }
 0x581   : > { %v7880_v25 = vadd.f32 %v7879_v24, %v7878_v59  ;;  %v8055_v59 = vlaneseq }
 0x583   : > { %v7882_v60 = vmul.f32 0.00390625, %v7880_v25  ;;  %v8056_v24 = vshrl.u32 %v8055_v59, 7 }
 0x585   : > { %v7890_v45 = vsel %vm7889_vm3, %v7882_v60, %v7881_v62  ;;  %v8057_v25 = vsub.s32 %v8054_v39, %v8056_v24 }
 0x586   : > { %8901 = vmatmul.mubr.msk.f32.vlgmr.msra.gmra.mrb[204].mxu1 %vm365_vm0, %v7890_v45 }
 0x587   : > { %8905 = vmatprep.mubr.msk.f32.mxu1 %vm11079_vm2, %v16686_v21  ;;  %8904 = vmatpush3.msk.msra.mxu1 %vm7971_vm1, %v7966_v19 }
 0x659   : > { %v7959_v16 = vpop.f32.mrb[204].mxu1 }
 0x65a   : > { %vm7963_vm4 = vcmp.gt.f32.partialorder %v7959_v16, 0.0  ;;  %v7964_v56 = vmul.f32 0.01, %v7959_v16  ;;  %v8902_v7 = vpop.f32.mrb[205].mxu1 }
 0x65c   : > { %v7965_v42 = vsel %vm7963_vm4, %v7959_v16, %v7964_v56  ;;  %v8076_v16 = vsub.s32 0, %v8056_v24 }
 0x65d   : > { %8906 = vmatmul.mubr.msk.f32.vlgmr.msra.gmra.mrb[206].mxu1 %vm7967_vm5, %v7965_v42 }
 0x730   : > { %v8041_v4 = vpop.f32.mrb[206].mxu1 }
 0x731   : > { %v8045_v23 = vsub.f32 0.0, %v8041_v4  ;;  %v8907_v44 = vpop.f32.mrb[207].mxu1 }
 0x733   : > { %v8046_v31 = vmul.f32 1.442695, %v8045_v23 }
 0x735   : > { %10932 = vpow2.f32 %v8046_v31 }
 0x73f   : > { %v10933_v48 = vpop.eup %10932 }
 0x740   : > { %v8048_v21 = vadd.f32 1.0, %v10933_v48 }
 0x742   : > { %10934 = vrcp.f32 %v8048_v21 }
 0x74c   : > { %v10935_v62 = vpop.eup %10934 }
 0x74d   : > { %v8058_v60 = vrot.slane %v10935_v62, %v8057_v25 }
 0x74f   : > { %v8059_v45 = vcombine.high %v8058_v60, %v8058_v60  ;;  %v8066_v19 = vrot.slane %v8058_v60, %v8057_v25 }
 0x751   : > { %v8073_v56 = vrot.slane %v8059_v45, %v8057_v25  ;;  %v8077_v7 = vrot.slane %v8066_v19, %v8076_v16 }
 0x753   : > { %v15228_v42 = vrot.slane %v8073_v56, %v8076_v16  ;;  %v15231_v4 = vmul.f32 %v8077_v7, %v16688_v11  ;;  %v15234_v23 = vmul.f32 %v8077_v7, %v14517_v1  ;;  %v15237_v44 = vmul.f32 %v8077_v7, %v16689_v46  ;;  %v16707_v1 = vld [vmem:[#allocation85_spill] sm:$0xff]  ;;  %v16708_v46 = vld [vmem:[#allocation86_spill] sm:$0xff] }
 0x754   : > { %v15240_v31 = vmul.f32 %v8077_v7, %v16692_v26  ;;  %v15243_v48 = vmul.f32 %v8077_v7, %v16693_v22  ;;  %v15246_v21 = vmul.f32 %v8077_v7, %v16694_v51  ;;  %v15249_v58 = vmul.f32 %v8077_v7, %v16695_v50  ;;  %v16709_v26 = vld [vmem:[#allocation87_spill] sm:$0xff]  ;;  %v16710_v50 = vld [vmem:[#allocation72_spill] sm:$0xff] }
 0x755   : > { %v15252_v11 = vmul.f32 %v8077_v7, %v16696_v36  ;;  %v15255_v17 = vmul.f32 %v8077_v7, %v16707_v1  ;;  %v15258_v59 = vmul.f32 %v8077_v7, %v16708_v46  ;;  %v15261_v39 = vmul.f32 %v8077_v7, %v16709_v26  ;;  %v16711_v36 = vld [vmem:[#allocation90_spill] sm:$0xff]  ;;  %v16714_v1 = vld [vmem:[#allocation77_spill] sm:$0xff] }
 0x756   : > { %v15264_v22 = vmul.f32 %v8077_v7, %v16700_v33  ;;  %v15267_v51 = vmul.f32 %v8077_v7, %v16701_v0  ;;  %v15270_v24 = vmul.f32 %v8077_v7, %v16710_v50  ;;  %v15273_v25 = vmul.f32 %v8077_v7, %v16711_v36  ;;  %v16718_v36 = vld [vmem:[#allocation97_spill] sm:$0xff] }
 0x757   : > { %v15276_v62 = vmul.f32 %v8077_v7, %v16704_v54  ;;  %v15279_v60 = vmul.f32 %v8077_v7, %v16705_v49  ;;  %v15282_v45 = vmul.f32 %v8077_v7, %v16706_v32  ;;  %v15285_v33 = vmul.f32 %v8077_v7, %v14808_v55 }
 0x758   : > { %v15288_v0 = vmul.f32 %v8077_v7, %v14816_v38  ;;  %v15291_v19 = vmul.f32 %v8077_v7, %v14839_v27  ;;  %v15294_v16 = vmul.f32 %v8077_v7, %v14845_v6  ;;  %v15297_v54 = vmul.f32 %v8077_v7, %v14861_v13 }
 0x759   : > { %v15300_v49 = vmul.f32 %v8077_v7, %v14867_v37  ;;  %v15303_v32 = vmul.f32 %v8077_v7, %v14883_v5  ;;  %v15306_v55 = vmul.f32 %v8077_v7, %v14889_v61  ;;  %v15309_v38 = vmul.f32 %v8077_v7, %v14903_v29  ;;  %v16712_v61 = vld [vmem:[#allocation74_spill] sm:$0xff]  ;;  %v16713_v29 = vld [vmem:[#allocation75_spill] sm:$0xff] }
 0x75a   : > { %v15312_v27 = vmul.f32 %v8077_v7, %v14909_v18  ;;  %v15315_v6 = vmul.f32 %v8077_v7, %v14914_v30  ;;  %v15318_v13 = vmul.f32 %v8077_v7, %v14920_v53  ;;  %v15321_v37 = vmul.f32 %v8077_v7, %v14926_v15  ;;  %v16715_v53 = vld [vmem:[#allocation94_spill] sm:$0xff]  ;;  %v16716_v15 = vld [vmem:[#allocation95_spill] sm:$0xff] }
 0x75b   : > { %v15324_v5 = vmul.f32 %v8077_v7, %v14930_v47  ;;  %v15328_v56 = vmul.f32 %v15228_v42, %v16712_v61  ;;  %v15332_v18 = vmul.f32 %v15228_v42, %v16713_v29  ;;  %v15336_v30 = vmul.f32 %v15228_v42, %v16714_v1  ;;  %v16717_v7 = vld [vmem:[#allocation96_spill] sm:$0xff]  ;;  %v16721_v1 = vld [vmem:[#allocation98_spill] sm:$0xff] }
 0x75c   : > { %v15340_v46 = vmul.f32 %v15228_v42, %v16715_v53  ;;  %v15344_v47 = vmul.f32 %v15228_v42, %v16716_v15  ;;  %v15348_v26 = vmul.f32 %v15228_v42, %v16717_v7  ;;  %v15352_v50 = vmul.f32 %v15228_v42, %v14959_v41  ;;  %v16723_v7 = vld [vmem:[#allocation99_spill] sm:$0xff] }
 0x75d   : > { %v15356_v61 = vmul.f32 %v15228_v42, %v16718_v36  ;;  %v15360_v29 = vmul.f32 %v15228_v42, %v14967_v28  ;;  %v15364_v53 = vmul.f32 %v15228_v42, %v16721_v1  ;;  %v15368_v15 = vmul.f32 %v15228_v42, %v14975_v20 }
 0x75e   : > { %v15372_v41 = vmul.f32 %v15228_v42, %v16723_v7  ;;  %v15376_v36 = vmul.f32 %v15228_v42, %v14983_v12  ;;  %v15392_v7 = vmul.f32 %v15228_v42, %v15013_v3  ;;  %v15412_v3 = vmul.f32 %v15228_v42, %v15164_v52 }
 0x75f   : > { %16719 = vst [vmem:[#allocation80_spill] sm:$0xff] %v15356_v61  ;;  %16720 = vst [vmem:[#allocation81_spill] sm:$0xff] %v15360_v29  ;;  %v16726_v61 = vld [vmem:[#allocation100_spill] sm:$0xff]  ;;  %v16728_v29 = vld [vmem:[#allocation101_spill] sm:$0xff]  ;;  %v15432_v52 = vmul.f32 %v15228_v42, %v15178_v40  ;;  %v15452_v40 = vmul.f32 %v15228_v42, %v15210_v10 }
 0x760   : > { %16722 = vst [vmem:[#allocation82_spill] sm:$0xff] %v15364_v53  ;;  %16724 = vst [vmem:[#allocation83_spill] sm:$0xff] %v15372_v41  ;;  %v15380_v28 = vmul.f32 %v15228_v42, %v16726_v61  ;;  %v15384_v1 = vmul.f32 %v15228_v42, %v16728_v29  ;;  %v16729_v53 = vld [vmem:[#allocation102_spill] sm:$0xff]  ;;  %v16730_v41 = vld [vmem:[#allocation103_spill] sm:$0xff] }
 0x761   : > { %16725 = vst [vmem:[#allocation84_spill] sm:$0xff] %v15376_v36  ;;  %v15388_v20 = vmul.f32 %v15228_v42, %v16729_v53  ;;  %v15396_v12 = vmul.f32 %v15228_v42, %v16730_v41  ;;  %v16731_v36 = vld [vmem:[#allocation78_spill] sm:$0xff]  ;;  %v15408_v53 = vmul.f32 %v15228_v42, %v15156_v43  ;;  %v15416_v41 = vmul.f32 %v15228_v42, %v15152_v8 }
 0x762   : > { %16727 = vst [vmem:[#allocation88_spill] sm:$0xff] %v15380_v28  ;;  %v15400_v61 = vmul.f32 %v15228_v42, %v16731_v36  ;;  %v16732_v28 = vld [vmem:[#allocation79_spill] sm:$0xff]  ;;  %v15420_v36 = vmul.f32 %v15228_v42, %v15158_v2  ;;  %v15428_v43 = vmul.f32 %v15228_v42, %v15192_v34  ;;  %16733 = vst [vmem:[#allocation89_spill] sm:$0xff] %v15432_v52  ;;  %v16738_v52 = vld [vmem:[#allocation12_spill] sm:$0xff] }
 0x763   : > { %v15404_v29 = vmul.f32 %v15228_v42, %v16732_v28  ;;  %v15424_v28 = vmul.f32 %v15228_v42, %v15186_v57  ;;  %v15436_v8 = vmul.f32 %v15228_v42, %v15188_v63  ;;  %v15440_v2 = vmul.f32 %v15228_v42, %v15208_v35 }
 0x764   : > { %v15444_v57 = vmul.f32 %v15228_v42, %v15214_v14  ;;  %v15448_v34 = vmul.f32 %v15228_v42, %v15202_v9  ;;  %v15456_v63 = vadd.f32 %v15231_v4, %v16738_v52  ;;  %v16743_v42 = vld [vmem:[#allocation15_spill] sm:$0xff]  ;;  %v16744_v52 = vld [vmem:[#allocation16_spill] sm:$0xff] }
 0x765   : > { %16734 = vst [vmem:[#allocation91_spill] sm:$0xff] %v15436_v8  ;;  %16735 = vst [vmem:[#allocation73_spill] sm:$0xff] %v15440_v2  ;;  %v16739_v8 = vld [vmem:[#allocation13_spill] sm:$0xff]  ;;  %v16740_v2 = vld [vmem:[#allocation10_spill] sm:$0xff]  ;;  %v15476_v4 = vadd.f32 %v15246_v21, %v16743_v42 }
 0x766   : > { %16736 = vst [vmem:[#allocation76_spill] sm:$0xff] %v15444_v57  ;;  %16737 = vst [vmem:[#allocation85_spill] sm:$0xff] %v15448_v34  ;;  %v15460_v35 = vadd.f32 %v15234_v23, %v16739_v8  ;;  %v15464_v14 = vadd.f32 %v15237_v44, %v16740_v2  ;;  %v16741_v57 = vld [vmem:[#allocation11_spill] sm:$0xff]  ;;  %v16742_v34 = vld [vmem:[#allocation14_spill] sm:$0xff]  ;;  %v15480_v23 = vadd.f32 %v15249_v58, %v16744_v52  ;;  %vm8212_vm6 = vcmp.gt.f32.partialorder %v15456_v63, 0.0 }
 0x767   : > { %v15468_v9 = vadd.f32 %v15240_v31, %v16741_v57  ;;  %v15472_v10 = vadd.f32 %v15243_v48, %v16742_v34  ;;  %v16745_v8 = vld [vmem:[#allocation17_spill] sm:$0xff]  ;;  %v16746_v2 = vld [vmem:[#allocation18_spill] sm:$0xff]  ;;  %v16747_v57 = vld [vmem:[#allocation19_spill] sm:$0xff]  ;;  %vm8217_vm11 = vcmp.gt.f32.partialorder %v15476_v4, 0.0 }
 0x768   : > { %v15484_v44 = vadd.f32 %v15252_v11, %v16745_v8  ;;  %v15488_v31 = vadd.f32 %v15255_v17, %v16746_v2  ;;  %v15492_v48 = vadd.f32 %v15258_v59, %v16747_v57  ;;  %v16748_v34 = vld [vmem:[#allocation20_spill] sm:$0xff]  ;;  %v16749_v42 = vld [vmem:[#allocation21_spill] sm:$0xff]  ;;  %v16750_v52 = vld [vmem:[#allocation22_spill] sm:$0xff]  ;;  %vm8213_vm7 = vcmp.gt.f32.partialorder %v15460_v35, 0.0 }
 0x769   : > { %v15496_v21 = vadd.f32 %v15261_v39, %v16748_v34  ;;  %v15500_v58 = vadd.f32 %v15264_v22, %v16749_v42  ;;  %v15504_v11 = vadd.f32 %v15267_v51, %v16750_v52  ;;  %v16751_v8 = vld [vmem:[#allocation23_spill] sm:$0xff]  ;;  %v16752_v2 = vld [vmem:[#allocation24_spill] sm:$0xff]  ;;  %v16753_v57 = vld [vmem:[#allocation25_spill] sm:$0xff]  ;;  %vm8214_vm8 = vcmp.gt.f32.partialorder %v15464_v14, 0.0 }
 0x76a   : > { %v15508_v17 = vadd.f32 %v15270_v24, %v16751_v8  ;;  %v15512_v59 = vadd.f32 %v15273_v25, %v16752_v2  ;;  %v15516_v39 = vadd.f32 %v15276_v62, %v16753_v57  ;;  %v16754_v34 = vld [vmem:[#allocation26_spill] sm:$0xff]  ;;  %v16755_v42 = vld [vmem:[#allocation27_spill] sm:$0xff]  ;;  %v16756_v52 = vld [vmem:[#allocation28_spill] sm:$0xff]  ;;  %vm8215_vm9 = vcmp.gt.f32.partialorder %v15468_v9, 0.0 }
 0x76b   : > { %v15520_v22 = vadd.f32 %v15279_v60, %v16754_v34  ;;  %v15524_v51 = vadd.f32 %v15282_v45, %v16755_v42  ;;  %v15528_v24 = vadd.f32 %v15285_v33, %v16756_v52  ;;  %v16757_v8 = vld [vmem:[#allocation29_spill] sm:$0xff]  ;;  %v16758_v2 = vld [vmem:[#allocation30_spill] sm:$0xff]  ;;  %v16759_v57 = vld [vmem:[#allocation31_spill] sm:$0xff]  ;;  %vm8216_vm10 = vcmp.gt.f32.partialorder %v15472_v10, 0.0 }
 0x76c   : > { %v15532_v25 = vadd.f32 %v15288_v0, %v16757_v8  ;;  %v15536_v62 = vadd.f32 %v15291_v19, %v16758_v2  ;;  %v15540_v60 = vadd.f32 %v15294_v16, %v16759_v57  ;;  %v16760_v34 = vld [vmem:[#allocation32_spill] sm:$0xff]  ;;  %v16761_v42 = vld [vmem:[#allocation33_spill] sm:$0xff]  ;;  %v16762_v52 = vld [vmem:[#allocation34_spill] sm:$0xff]  ;;  %vm8218_vm12 = vcmp.gt.f32.partialorder %v15480_v23, 0.0 }
 0x76d   : > { %v15544_v45 = vadd.f32 %v15297_v54, %v16760_v34  ;;  %v15548_v33 = vadd.f32 %v15300_v49, %v16761_v42  ;;  %v15552_v0 = vadd.f32 %v15303_v32, %v16762_v52  ;;  %v16763_v8 = vld [vmem:[#allocation35_spill] sm:$0xff]  ;;  %v16764_v2 = vld [vmem:[#allocation36_spill] sm:$0xff]  ;;  %v16765_v57 = vld [vmem:[#allocation37_spill] sm:$0xff]  ;;  %vm8219_vm13 = vcmp.gt.f32.partialorder %v15484_v44, 0.0 }
 0x76e   : > { %v15556_v19 = vadd.f32 %v15306_v55, %v16763_v8  ;;  %v15560_v16 = vadd.f32 %v15309_v38, %v16764_v2  ;;  %v15564_v54 = vadd.f32 %v15312_v27, %v16765_v57  ;;  %v16766_v34 = vld [vmem:[#allocation38_spill] sm:$0xff]  ;;  %v16767_v42 = vld [vmem:[#allocation39_spill] sm:$0xff]  ;;  %v16770_v2 = vld [vmem:[#allocation40_spill] sm:$0xff]  ;;  %vm8220_vm14 = vcmp.gt.f32.partialorder %v15488_v31, 0.0 }
 0x76f   : > { %v15568_v49 = vadd.f32 %v15315_v6, %v16766_v34  ;;  %v15572_v32 = vadd.f32 %v15318_v13, %v16767_v42  ;;  %v16768_v52 = vld [vmem:[#allocation70_spill] sm:$0xff]  ;;  %v16769_v8 = vld [vmem:[#allocation71_spill] sm:$0xff]  ;;  %v15584_v27 = vadd.f32 %v15328_v56, %v16770_v2  ;;  %v16771_v57 = vld [vmem:[#allocation41_spill] sm:$0xff]  ;;  %vm8221_vm15 = vcmp.gt.f32.partialorder %v15492_v48, 0.0 }
 0x770   : > { %v15576_v55 = vadd.f32 %v15321_v37, %v16768_v52  ;;  %v15580_v38 = vadd.f32 %v15324_v5, %v16769_v8  ;;  %v15588_v6 = vadd.f32 %v15332_v18, %v16771_v57  ;;  %v16773_v34 = vld [vmem:[#allocation42_spill] sm:$0xff]  ;;  %v16775_v42 = vld [vmem:[#allocation43_spill] sm:$0xff]  ;;  %v16777_v52 = vld [vmem:[#allocation44_spill] sm:$0xff]  ;;  %vm8222_vm2 = vcmp.gt.f32.partialorder %v15496_v21, 0.0 }
 0x771   : > { %v15592_v13 = vadd.f32 %v15336_v30, %v16773_v34  ;;  %v15596_v37 = vadd.f32 %v15340_v46, %v16775_v42  ;;  %v15600_v5 = vadd.f32 %v15344_v47, %v16777_v52  ;;  %v16778_v8 = vld [vmem:[#allocation45_spill] sm:$0xff]  ;;  %v16780_v2 = vld [vmem:[#allocation46_spill] sm:$0xff]  ;;  %v16782_v57 = vld [vmem:[#allocation47_spill] sm:$0xff]  ;;  %vm8223_vm3 = vcmp.gt.f32.partialorder %v15500_v58, 0.0 }
 0x772   : > { %16772 = vst [vmem:[#allocation86_spill] sm:$0xff] %v15588_v6  ;;  %v15604_v56 = vadd.f32 %v15348_v26, %v16778_v8  ;;  %v15608_v18 = vadd.f32 %v15352_v50, %v16780_v2  ;;  %v16783_v6 = vld [vmem:[#allocation80_spill] sm:$0xff]  ;;  %v16787_v42 = vld [vmem:[#allocation49_spill] sm:$0xff]  ;;  %v16789_v52 = vld [vmem:[#allocation50_spill] sm:$0xff]  ;;  %vm8224_vm1 = vcmp.gt.f32.partialorder %v15504_v11, 0.0  ;;  %vm8225_vm4 = vcmp.gt.f32.partialorder %v15508_v17, 0.0 }
 0x773   : > { %16774 = vst [vmem:[#allocation87_spill] sm:$0xff] %v15592_v13  ;;  %16776 = vst [vmem:[#allocation72_spill] sm:$0xff] %v15596_v37  ;;  %v15612_v30 = vadd.f32 %v16783_v6, %v16782_v57  ;;  %v16785_v34 = vld [vmem:[#allocation48_spill] sm:$0xff]  ;;  %v16786_v13 = vld [vmem:[#allocation81_spill] sm:$0xff]  ;;  %v15624_v26 = vadd.f32 %v15368_v15, %v16789_v52  ;;  %vm8226_vm5 = vcmp.gt.f32.partialorder %v15512_v59, 0.0 }
 0x774   : > { %16779 = vst [vmem:[#allocation90_spill] sm:$0xff] %v15604_v56  ;;  %16781 = vst [vmem:[#allocation74_spill] sm:$0xff] %v15608_v18  ;;  %v15616_v46 = vadd.f32 %v16786_v13, %v16785_v34  ;;  %v16788_v37 = vld [vmem:[#allocation82_spill] sm:$0xff]  ;;  %v16790_v8 = vld [vmem:[#allocation51_spill] sm:$0xff] }
 0x775   : > { %16784 = vst [vmem:[#allocation75_spill] sm:$0xff] %v15612_v30  ;;  %v15620_v47 = vadd.f32 %v16788_v37, %v16787_v42  ;;  %v16791_v56 = vld [vmem:[#allocation83_spill] sm:$0xff]  ;;  %v16792_v2 = vld [vmem:[#allocation52_spill] sm:$0xff]  ;;  %v16794_v57 = vld [vmem:[#allocation53_spill] sm:$0xff] }
 0x776   : > { %v15628_v50 = vadd.f32 %v16791_v56, %v16790_v8  ;;  %v16793_v18 = vld [vmem:[#allocation84_spill] sm:$0xff]  ;;  %v16796_v34 = vld [vmem:[#allocation54_spill] sm:$0xff]  ;;  %v16797_v42 = vld [vmem:[#allocation55_spill] sm:$0xff] }
 0x777   : > { %v15632_v6 = vadd.f32 %v16793_v18, %v16792_v2  ;;  %v16795_v30 = vld [vmem:[#allocation88_spill] sm:$0xff]  ;;  %v15640_v37 = vadd.f32 %v15384_v1, %v16796_v34  ;;  %v15644_v15 = vadd.f32 %v15388_v20, %v16797_v42  ;;  %v16800_v8 = vld [vmem:[#allocation57_spill] sm:$0xff]  ;;  %v16801_v2 = vld [vmem:[#allocation58_spill] sm:$0xff] }
 0x778   : > { %v15636_v13 = vadd.f32 %v16795_v30, %v16794_v57  ;;  %v16798_v52 = vld [vmem:[#allocation56_spill] sm:$0xff]  ;;  %v15652_v18 = vadd.f32 %v15396_v12, %v16800_v8  ;;  %v15656_v30 = vadd.f32 %v15400_v61, %v16801_v2  ;;  %v16802_v57 = vld [vmem:[#allocation59_spill] sm:$0xff]  ;;  %v16805_v42 = vld [vmem:[#allocation61_spill] sm:$0xff] }
 0x779   : > { %v15648_v56 = vadd.f32 %v15392_v7, %v16798_v52  ;;  %v15660_v1 = vadd.f32 %v15404_v29, %v16802_v57  ;;  %v16803_v34 = vld [vmem:[#allocation60_spill] sm:$0xff]  ;;  %v15668_v7 = vadd.f32 %v15412_v3, %v16805_v42  ;;  %v16807_v52 = vld [vmem:[#allocation62_spill] sm:$0xff]  ;;  %v16809_v8 = vld [vmem:[#allocation63_spill] sm:$0xff] }
 0x77a   : > { %v15664_v20 = vadd.f32 %v15408_v53, %v16803_v34  ;;  %v15672_v12 = vadd.f32 %v15416_v41, %v16807_v52  ;;  %v15676_v61 = vadd.f32 %v15420_v36, %v16809_v8  ;;  %v16811_v2 = vld [vmem:[#allocation64_spill] sm:$0xff]  ;;  %v16813_v57 = vld [vmem:[#allocation65_spill] sm:$0xff]  ;;  %v16814_v34 = vld [vmem:[#allocation66_spill] sm:$0xff] }
 0x77b   : > { %16799 = vst [vmem:[#allocation77_spill] sm:$0xff] %v15648_v56  ;;  %16806 = vst [vmem:[#allocation95_spill] sm:$0xff] %v15668_v7  ;;  %v15680_v29 = vadd.f32 %v15424_v28, %v16811_v2  ;;  %v15684_v53 = vadd.f32 %v15428_v43, %v16813_v57  ;;  %v16817_v42 = vld [vmem:[#allocation67_spill] sm:$0xff]  ;;  %v16820_v52 = vld [vmem:[#allocation68_spill] sm:$0xff]  ;;  %v8279_v57 = vmul.f32 0.01, %v15468_v9 }
 0x77c   : > { %16804 = vst [vmem:[#allocation94_spill] sm:$0xff] %v15664_v20  ;;  %16808 = vst [vmem:[#allocation96_spill] sm:$0xff] %v15672_v12  ;;  %v16815_v20 = vld [vmem:[#allocation89_spill] sm:$0xff]  ;;  %v16818_v7 = vld [vmem:[#allocation91_spill] sm:$0xff] }
 0x77d   : > { %16810 = vst [vmem:[#allocation97_spill] sm:$0xff] %v15676_v61  ;;  %16812 = vst [vmem:[#allocation98_spill] sm:$0xff] %v15680_v29  ;;  %v15688_v3 = vadd.f32 %v16815_v20, %v16814_v34  ;;  %v15692_v41 = vadd.f32 %v16818_v7, %v16817_v42  ;;  %v16821_v12 = vld [vmem:[#allocation73_spill] sm:$0xff]  ;;  %v16824_v61 = vld [vmem:[#allocation76_spill] sm:$0xff]  ;;  %v8276_v20 = vmul.f32 0.01, %v15456_v63 }
 0x77e   : > { %v15696_v36 = vadd.f32 %v16821_v12, %v16820_v52  ;;  %v16823_v8 = vld [vmem:[#allocation69_spill] sm:$0xff]  ;;  %v16826_v2 = vld [vmem:[#allocation92_spill] sm:$0xff]  ;;  %v8277_v7 = vmul.f32 0.01, %v15460_v35  ;;  %v8280_v34 = vmul.f32 0.01, %v15472_v10 }
 0x77f   : > { %16816 = vst [vmem:[#allocation99_spill] sm:$0xff] %v15688_v3  ;;  %16819 = vst [vmem:[#allocation100_spill] sm:$0xff] %v15692_v41  ;;  %v15700_v28 = vadd.f32 %v16824_v61, %v16823_v8  ;;  %v16827_v29 = vld [vmem:[#allocation85_spill] sm:$0xff]  ;;  %v8281_v42 = vmul.f32 0.01, %v15476_v4  ;;  %v8343_v41 = vsel %vm8215_vm9, %v15468_v9, %v8279_v57  ;;  %vm8230_vm9 = vcmp.gt.f32.partialorder %v15528_v24, 0.0 }
 0x780   : > { %16822 = vst [vmem:[#allocation101_spill] sm:$0xff] %v15696_v36  ;;  %v15704_v43 = vadd.f32 %v16827_v29, %v16826_v2  ;;  %v16829_v12 = vld [vmem:[#allocation93_spill] sm:$0xff]  ;;  %v8278_v29 = vmul.f32 0.01, %v15464_v14  ;;  %v8282_v52 = vmul.f32 0.01, %v15480_v23  ;;  %v8344_v3 = vsel %vm8216_vm10, %v15472_v10, %v8280_v34 }
 0x781   : > { %16825 = vst [vmem:[#allocation102_spill] sm:$0xff] %v15700_v28  ;;  %v15720_v61 = vadd.f32 %v15452_v40, %v16829_v12  ;;  %v8283_v8 = vmul.f32 0.01, %v15484_v44  ;;  %v8340_v40 = vsel %vm8212_vm6, %v15456_v63, %v8276_v20  ;;  %v8284_v2 = vmul.f32 0.01, %v15488_v31  ;;  %8407 = vst.msk [vmem:[%s15744_s12 + $0x18] sm:$0xff] %vm365_vm0, %v8343_v41 }
 0x782   : > { %16828 = vst [vmem:[#allocation103_spill] sm:$0xff] %v15704_v43  ;;  %v8285_v12 = vmul.f32 0.01, %v15492_v48  ;;  %v8341_v43 = vsel %vm8213_vm7, %v15460_v35, %v8277_v7  ;;  %8404 = vst.msk [vmem:[%s15744_s12] sm:$0xff] %vm365_vm0, %v8340_v40  ;;  %v15750_v63 = vmul.f32 0.01, %v15500_v58  ;;  %v8342_v35 = vsel %vm8214_vm8, %v15464_v14, %v8278_v29 }
 0x783   : > { %16830 = vst [vmem:[#allocation78_spill] sm:$0xff] %v15720_v61  ;;  %v15737_v61 = vmul.f32 0.01, %v15496_v21  ;;  %v15753_v20 = vmul.f32 0.01, %v15504_v11  ;;  %8405 = vst.msk [vmem:[%s15744_s12 + $0x8] sm:$0xff] %vm365_vm0, %v8341_v43 }
 0x784   : > { %v15756_v28 = vmul.f32 0.01, %v15508_v17  ;;  %v15765_v7 = vmul.f32 0.01, %v15512_v59  ;;  %v15768_v40 = vmul.f32 0.01, %v15516_v39 }
 0x785   : > { %v15771_v36 = vmul.f32 0.01, %v15520_v22  ;;  %8406 = vst.msk [vmem:[%s15744_s12 + $0x10] sm:$0xff] %vm365_vm0, %v8342_v35  ;;  %vm8227_vm6 = vcmp.gt.f32.partialorder %v15516_v39, 0.0  ;;  %v15780_v14 = vmul.f32 0.01, %v15524_v51 }
 0x786   : > { %v15783_v43 = vmul.f32 0.01, %v15528_v24  ;;  %v15786_v29 = vmul.f32 0.01, %v15532_v25  ;;  %vm8228_vm7 = vcmp.gt.f32.partialorder %v15520_v22, 0.0  ;;  %8408 = vst.msk [vmem:[%s15744_s12 + $0x20] sm:$0xff] %vm365_vm0, %v8344_v3 }
 0x787   : > { %v15795_v9 = vmul.f32 0.01, %v15536_v62  ;;  %v15798_v57 = vmul.f32 0.01, %v15540_v60  ;;  %v15801_v35 = vmul.f32 0.01, %v15544_v45 }
 0x788   : > { %16831 = vst [vmem:[#allocation79_spill] sm:$0xff] %v15786_v29  ;;  %v8345_v29 = vsel %vm8217_vm11, %v15476_v4, %v8281_v42  ;;  %vm8229_vm8 = vcmp.gt.f32.partialorder %v15524_v51, 0.0  ;;  %v15810_v10 = vmul.f32 0.01, %v15548_v33  ;;  %v15813_v41 = vmul.f32 0.01, %v15552_v0 }
 0x789   : > { %16832 = vst [vmem:[#allocation12_spill] sm:$0xff] %v15801_v35  ;;  %v15816_v34 = vmul.f32 0.01, %v15556_v19  ;;  %v8346_v35 = vsel %vm8218_vm12, %v15480_v23, %v8282_v52  ;;  %8409 = vst.msk [vmem:[%s15744_s12 + $0x28] sm:$0xff] %vm365_vm0, %v8345_v29  ;;  %v15825_v4 = vmul.f32 0.01, %v15560_v16 }
 0x78a   : > { %v15828_v3 = vmul.f32 0.01, %v15564_v54  ;;  %v15831_v42 = vmul.f32 0.01, %v15568_v49  ;;  %8410 = vst.msk [vmem:[%s15744_s12 + $0x30] sm:$0xff] %vm365_vm0, %v8346_v35  ;;  %vm8233_vm12 = vcmp.gt.f32.partialorder %v15540_v60, 0.0 }
 0x78b   : > { %16833 = vst [vmem:[#allocation13_spill] sm:$0xff] %v15816_v34  ;;  %v8347_v34 = vsel %vm8219_vm13, %v15484_v44, %v8283_v8  ;;  %v15841_v23 = vmul.f32 0.01, %v15572_v32  ;;  %v15844_v52 = vmul.f32 0.01, %v15576_v55  ;;  %v8348_v44 = vsel %vm8220_vm14, %v15488_v31, %v8284_v2  ;;  %v16838_v35 = vld [vmem:[#allocation86_spill] sm:$0xff] }
 0x78c   : > { %v15847_v29 = vmul.f32 0.01, %v15580_v38  ;;  %8411 = vst.msk [vmem:[%s15744_s12 + $0x38] sm:$0xff] %vm365_vm0, %v8347_v34  ;;  %v15859_v8 = vmul.f32 0.01, %v15584_v27  ;;  %v8349_v31 = vsel %vm8221_vm15, %v15492_v48, %v8285_v12  ;;  %8412 = vst.msk [vmem:[%s15744_s12 + $0x40] sm:$0xff] %vm365_vm0, %v8348_v44  ;;  %v8350_v48 = vsel %vm8222_vm2, %v15496_v21, %v15737_v61 }
 0x78d   : > { %16834 = vst [vmem:[#allocation10_spill] sm:$0xff] %v15841_v23  ;;  %16835 = vst [vmem:[#allocation11_spill] sm:$0xff] %v15844_v52  ;;  %v16840_v52 = vld [vmem:[#allocation87_spill] sm:$0xff]  ;;  %vm8237_vm14 = vcmp.gt.f32.partialorder %v15556_v19, 0.0  ;;  %v16842_v2 = vld [vmem:[#allocation72_spill] sm:$0xff]  ;;  %vm8241_vm15 = vcmp.gt.f32.partialorder %v15572_v32, 0.0  ;;  %v8351_v21 = vsel %vm8223_vm3, %v15500_v58, %v15750_v63  ;;  %v8352_v58 = vsel %vm8224_vm1, %v15504_v11, %v15753_v20 }
 0x78e   : > { %16836 = vst [vmem:[#allocation14_spill] sm:$0xff] %v15847_v29  ;;  %16837 = vst [vmem:[#allocation15_spill] sm:$0xff] %v15859_v8  ;;  %v15862_v29 = vmul.f32 0.01, %v16838_v35  ;;  %v15865_v23 = vmul.f32 0.01, %v16840_v52  ;;  %v8353_v11 = vsel %vm8225_vm4, %v15508_v17, %v15756_v28  ;;  %v8354_v17 = vsel %vm8226_vm5, %v15512_v59, %v15765_v7 }
 0x78f   : > { %v15877_v34 = vmul.f32 0.01, %v16842_v2  ;;  %8413 = vst.msk [vmem:[%s15744_s12 + $0x48] sm:$0xff] %vm365_vm0, %v8349_v31  ;;  %v16847_v12 = vld [vmem:[#allocation74_spill] sm:$0xff]  ;;  %8414 = vst.msk [vmem:[%s15744_s12 + $0x50] sm:$0xff] %vm365_vm0, %v8350_v48  ;;  %vm8245_vm2 = vcmp.gt.f32.partialorder %v16838_v35, 0.0  ;;  %v8355_v59 = vsel %vm8227_vm6, %v15516_v39, %v15768_v40  ;;  %v8356_v39 = vsel %vm8228_vm7, %v15520_v22, %v15771_v36 }
 0x790   : > { %16839 = vst [vmem:[#allocation16_spill] sm:$0xff] %v15862_v29  ;;  %16841 = vst [vmem:[#allocation17_spill] sm:$0xff] %v15865_v23  ;;  %v15880_v23 = vmul.f32 0.01, %v15600_v5  ;;  %v16845_v29 = vld [vmem:[#allocation90_spill] sm:$0xff]  ;;  %vm8253_vm1 = vcmp.gt.f32.partialorder %v15620_v47, 0.0  ;;  %v8357_v22 = vsel %vm8229_vm8, %v15524_v51, %v15780_v14  ;;  %v8358_v14 = vsel %vm8230_vm9, %v15528_v24, %v15783_v43 }
 0x791   : > { %16843 = vst [vmem:[#allocation18_spill] sm:$0xff] %v15877_v34  ;;  %v15883_v8 = vmul.f32 0.01, %v16845_v29  ;;  %v15896_v44 = vmul.f32 0.01, %v16847_v12  ;;  %8415 = vst.msk [vmem:[%s15744_s12 + $0x58] sm:$0xff] %vm365_vm0, %v8351_v21 }
 0x792   : > { %16844 = vst [vmem:[#allocation19_spill] sm:$0xff] %v15880_v23  ;;  %v15902_v34 = vmul.f32 0.01, %v15616_v46  ;;  %v15915_v61 = vmul.f32 0.01, %v15620_v47  ;;  %vm8249_vm3 = vcmp.gt.f32.partialorder %v16845_v29, 0.0 }
 0x793   : > { %16846 = vst [vmem:[#allocation20_spill] sm:$0xff] %v15883_v8  ;;  %v16848_v8 = vld [vmem:[#allocation75_spill] sm:$0xff]  ;;  %v15918_v31 = vmul.f32 0.01, %v15624_v26  ;;  %v15934_v63 = vmul.f32 0.01, %v15632_v6 }
 0x794   : > { %v15899_v23 = vmul.f32 0.01, %v16848_v8  ;;  %16849 = vst [vmem:[#allocation21_spill] sm:$0xff] %v15902_v34  ;;  %v15921_v34 = vmul.f32 0.01, %v15628_v50  ;;  %8416 = vst.msk [vmem:[%s15744_s12 + $0x60] sm:$0xff] %vm365_vm0, %v8352_v58 }
 0x795   : > { %v15937_v48 = vmul.f32 0.01, %v15636_v13  ;;  %v15953_v20 = vmul.f32 0.01, %v15644_v15  ;;  %v15956_v21 = vmul.f32 0.01, %v15648_v56 }
 0x796   : > { %16850 = vst [vmem:[#allocation22_spill] sm:$0xff] %v15921_v34  ;;  %v15940_v34 = vmul.f32 0.01, %v15640_v37  ;;  %8417 = vst.msk [vmem:[%s15744_s12 + $0x68] sm:$0xff] %vm365_vm0, %v8353_v11  ;;  %vm8257_vm4 = vcmp.gt.f32.partialorder %v15636_v13, 0.0  ;;  %vm8261_vm5 = vcmp.gt.f32.partialorder %v15652_v18, 0.0 }
 0x797   : > { %16852 = vst [vmem:[#allocation24_spill] sm:$0xff] %v15956_v21  ;;  %v15972_v28 = vmul.f32 0.01, %v15656_v30  ;;  %v15975_v58 = vmul.f32 0.01, %v15660_v1  ;;  %8418 = vst.msk [vmem:[%s15744_s12 + $0x70] sm:$0xff] %vm365_vm0, %v8354_v17 }
 0x798   : > { %16851 = vst [vmem:[#allocation23_spill] sm:$0xff] %v15940_v34  ;;  %v15959_v34 = vmul.f32 0.01, %v15652_v18  ;;  %v16858_v7 = vld [vmem:[#allocation95_spill] sm:$0xff]  ;;  %8419 = vst.msk [vmem:[%s15744_s12 + $0x78] sm:$0xff] %vm365_vm0, %v8355_v59  ;;  %v16864_v40 = vld [vmem:[#allocation98_spill] sm:$0xff] }
 0x799   : > { %16854 = vst [vmem:[#allocation26_spill] sm:$0xff] %v15972_v28  ;;  %16855 = vst [vmem:[#allocation27_spill] sm:$0xff] %v15975_v58  ;;  %v15991_v11 = vmul.f32 0.01, %v16858_v7  ;;  %v16862_v28 = vld [vmem:[#allocation97_spill] sm:$0xff]  ;;  %vm8265_vm6 = vcmp.gt.f32.partialorder %v16858_v7, 0.0 }
 0x79a   : > { %16853 = vst [vmem:[#allocation25_spill] sm:$0xff] %v15959_v34  ;;  %v16856_v34 = vld [vmem:[#allocation94_spill] sm:$0xff]  ;;  %v15997_v56 = vmul.f32 0.01, %v16862_v28  ;;  %v16010_v17 = vmul.f32 0.01, %v16864_v40 }
 0x79b   : > { %v15978_v21 = vmul.f32 0.01, %v16856_v34  ;;  %16859 = vst [vmem:[#allocation29_spill] sm:$0xff] %v15991_v11  ;;  %8420 = vst.msk [vmem:[%s15744_s12 + $0x80] sm:$0xff] %vm365_vm0, %v8356_v39  ;;  %vm8269_vm7 = vcmp.gt.f32.partialorder %v15684_v53, 0.0  ;;  %v16868_v36 = vld [vmem:[#allocation100_spill] sm:$0xff] }
 0x79c   : > { %16863 = vst [vmem:[#allocation31_spill] sm:$0xff] %v15997_v56  ;;  %v16013_v56 = vmul.f32 0.01, %v15684_v53  ;;  %v16869_v59 = vld [vmem:[#allocation101_spill] sm:$0xff]  ;;  %v16871_v40 = vld [vmem:[#allocation102_spill] sm:$0xff]  ;;  %8421 = vst.msk [vmem:[%s15744_s12 + $0x88] sm:$0xff] %vm365_vm0, %v8357_v22  ;;  %v8361_v22 = vsel %vm8233_vm12, %v15540_v60, %v15798_v57 }
 0x79d   : > { %16857 = vst [vmem:[#allocation28_spill] sm:$0xff] %v15978_v21  ;;  %v16860_v21 = vld [vmem:[#allocation96_spill] sm:$0xff]  ;;  %v16035_v51 = vmul.f32 0.01, %v16871_v40  ;;  %vm8273_vm8 = vcmp.gt.f32.partialorder %v16871_v40, 0.0  ;;  %v16873_v39 = vld [vmem:[#allocation103_spill] sm:$0xff] }
 0x79e   : > { %v15994_v58 = vmul.f32 0.01, %v16860_v21  ;;  %16865 = vst [vmem:[#allocation32_spill] sm:$0xff] %v16013_v56  ;;  %v16029_v56 = vmul.f32 0.01, %v16868_v36  ;;  %v16874_v36 = vld [vmem:[#allocation78_spill] sm:$0xff] }
 0x79f   : > { %16872 = vst [vmem:[#allocation35_spill] sm:$0xff] %v16035_v51  ;;  %v16050_v51 = vmul.f32 0.01, %v16874_v36  ;;  %vm16877_vm9 = vcmp.gt.f32.partialorder %v15532_v25, 0.0  ;;  %vm16878_vm13 = vcmp.gt.f32.partialorder %v15536_v62, 0.0  ;;  %8422 = vst.msk [vmem:[%s15744_s12 + $0x90] sm:$0xff] %vm365_vm0, %v8358_v14 }
 0x7a0   : > { %16861 = vst [vmem:[#allocation30_spill] sm:$0xff] %v15994_v58  ;;  %v16866_v58 = vld [vmem:[#allocation99_spill] sm:$0xff]  ;;  %v8360_v43 = vsel %vm16878_vm13, %v15536_v62, %v15795_v9  ;;  %v16879_v36 = vld [vmem:[#allocation12_spill] sm:$0xff]  ;;  %vm16880_vm10 = vcmp.gt.f32.partialorder %v15544_v45, 0.0  ;;  %vm16882_vm13 = vcmp.gt.f32.partialorder %v15552_v0, 0.0  ;;  %v16883_v60 = vld [vmem:[#allocation13_spill] sm:$0xff] }
 0x7a1   : > { %v16016_v11 = vmul.f32 0.01, %v16866_v58  ;;  %vm8270_vm11 = vcmp.gt.f32.partialorder %v16866_v58, 0.0  ;;  %16875 = vst [vmem:[#allocation36_spill] sm:$0xff] %v16050_v51  ;;  %v8362_v51 = vsel %vm16880_vm10, %v15544_v45, %v16879_v36  ;;  %v8364_v62 = vsel %vm16882_vm13, %v15552_v0, %v15813_v41  ;;  %8424 = vst.msk [vmem:[%s15744_s12 + $0xa0] sm:$0xff] %vm365_vm0, %v8360_v43  ;;  %v16890_v57 = vld [vmem:[#allocation14_spill] sm:$0xff] }
 0x7a2   : > { %v8365_v45 = vsel %vm8237_vm14, %v15556_v19, %v16883_v60  ;;  %vm16884_vm10 = vcmp.gt.f32.partialorder %v15560_v16, 0.0  ;;  %vm16885_vm12 = vcmp.gt.f32.partialorder %v15564_v54, 0.0  ;;  %8425 = vst.msk [vmem:[%s15744_s12 + $0xa8] sm:$0xff] %vm365_vm0, %v8361_v22  ;;  %8426 = vst.msk [vmem:[%s15744_s12 + $0xb0] sm:$0xff] %vm365_vm0, %v8362_v51  ;;  %v16887_v19 = vld [vmem:[#allocation10_spill] sm:$0xff]  ;;  %vm16889_vm14 = vcmp.gt.f32.partialorder %v15576_v55, 0.0 }
 0x7a3   : > { %16867 = vst [vmem:[#allocation33_spill] sm:$0xff] %v16016_v11  ;;  %v16032_v11 = vmul.f32 0.01, %v16869_v59  ;;  %v16047_v59 = vmul.f32 0.01, %v16873_v39  ;;  %v8367_v0 = vsel %vm16885_vm12, %v15564_v54, %v15828_v3  ;;  %8428 = vst.msk [vmem:[%s15744_s12 + $0xc0] sm:$0xff] %vm365_vm0, %v8364_v62 }
 0x7a4   : > { %v16888_v54 = vld [vmem:[#allocation11_spill] sm:$0xff]  ;;  %vm16891_vm13 = vcmp.gt.f32.partialorder %v15580_v38, 0.0  ;;  %8429 = vst.msk [vmem:[%s15744_s12 + $0xc8] sm:$0xff] %vm365_vm0, %v8365_v45  ;;  %8431 = vst.msk [vmem:[%s15744_s12 + $0xd8] sm:$0xff] %vm365_vm0, %v8367_v0  ;;  %v16897_v3 = vld [vmem:[#allocation18_spill] sm:$0xff]  ;;  %vm16898_vm12 = vcmp.gt.f32.partialorder %v16842_v2, 0.0 }
 0x7a5   : > { %16870 = vst [vmem:[#allocation34_spill] sm:$0xff] %v16032_v11  ;;  %v16876_v11 = vld [vmem:[#allocation79_spill] sm:$0xff]  ;;  %v16904_v51 = vld [vmem:[#allocation21_spill] sm:$0xff]  ;;  %v16928_v62 = vld [vmem:[#allocation98_spill] sm:$0xff] }
 0x7a6   : > { %v8359_v24 = vsel %vm16877_vm9, %v15532_v25, %v16876_v11  ;;  %vm16881_vm9 = vcmp.gt.f32.partialorder %v15548_v33, 0.0  ;;  %v16892_v41 = vld [vmem:[#allocation15_spill] sm:$0xff]  ;;  %v16932_v45 = vld [vmem:[#allocation100_spill] sm:$0xff] }
 0x7a7   : > { %v8363_v25 = vsel %vm16881_vm9, %v15548_v33, %v15810_v10  ;;  %8423 = vst.msk [vmem:[%s15744_s12 + $0x98] sm:$0xff] %vm365_vm0, %v8359_v24  ;;  %v8366_v33 = vsel %vm16884_vm10, %v15560_v16, %v15825_v4  ;;  %vm16886_vm9 = vcmp.gt.f32.partialorder %v15568_v49, 0.0  ;;  %v8369_v16 = vsel %vm8241_vm15, %v15572_v32, %v16887_v19  ;;  %v16894_v32 = vld [vmem:[#allocation16_spill] sm:$0xff]  ;;  %v16899_v11 = vld [vmem:[#allocation19_spill] sm:$0xff] }
 0x7a8   : > { %v8368_v9 = vsel %vm16886_vm9, %v15568_v49, %v15831_v42  ;;  %8427 = vst.msk [vmem:[%s15744_s12 + $0xb8] sm:$0xff] %vm365_vm0, %v8363_v25  ;;  %v8370_v49 = vsel %vm16889_vm14, %v15576_v55, %v16888_v54  ;;  %v8371_v10 = vsel %vm16891_vm13, %v15580_v38, %v16890_v57  ;;  %vm16893_vm10 = vcmp.gt.f32.partialorder %v15584_v27, 0.0  ;;  %8430 = vst.msk [vmem:[%s15744_s12 + $0xd0] sm:$0xff] %vm365_vm0, %v8366_v33  ;;  %v16895_v38 = vld [vmem:[#allocation17_spill] sm:$0xff]  ;;  %v16921_v24 = vld [vmem:[#allocation28_spill] sm:$0xff] }
 0x7a9   : > { %v8372_v4 = vsel %vm16893_vm10, %v15584_v27, %v16892_v41  ;;  %8432 = vst.msk [vmem:[%s15744_s12 + $0xe0] sm:$0xff] %vm365_vm0, %v8368_v9  ;;  %v8373_v55 = vsel %vm8245_vm2, %v16838_v35, %v16894_v32  ;;  %vm16896_vm15 = vcmp.gt.f32.partialorder %v16840_v52, 0.0  ;;  %v8375_v42 = vsel %vm16898_vm12, %v16842_v2, %v16897_v3  ;;  %8433 = vst.msk [vmem:[%s15744_s12 + $0xe8] sm:$0xff] %vm365_vm0, %v8369_v16  ;;  %v16926_v22 = vld [vmem:[#allocation31_spill] sm:$0xff]  ;;  %v16935_v9 = vld [vmem:[#allocation101_spill] sm:$0xff] }
 0x7aa   : > { %v8374_v27 = vsel %vm16896_vm15, %v16840_v52, %v16895_v38  ;;  %vm16900_vm9 = vcmp.gt.f32.partialorder %v15600_v5, 0.0  ;;  %8434 = vst.msk [vmem:[%s15744_s12 + $0xf0] sm:$0xff] %vm365_vm0, %v8370_v49  ;;  %8435 = vst.msk [vmem:[%s15744_s12 + $0xf8] sm:$0xff] %vm365_vm0, %v8371_v10  ;;  %v16901_v52 = vld [vmem:[#allocation20_spill] sm:$0xff]  ;;  %vm16902_vm2 = vcmp.gt.f32.partialorder %v16847_v12, 0.0  ;;  %vm16903_vm14 = vcmp.gt.f32.partialorder %v16848_v8, 0.0 }
 0x7ab   : > { %v8376_v36 = vsel %vm16900_vm9, %v15600_v5, %v16899_v11  ;;  %8436 = vst.msk [vmem:[%s15744_s12 + $0x100] sm:$0xff] %vm365_vm0, %v8372_v4  ;;  %v8377_v35 = vsel %vm8249_vm3, %v16845_v29, %v16901_v52  ;;  %v8378_v5 = vsel %vm16902_vm2, %v16847_v12, %v15896_v44  ;;  %v8379_v2 = vsel %vm16903_vm14, %v16848_v8, %v15899_v23  ;;  %v16907_v29 = vld [vmem:[#allocation22_spill] sm:$0xff]  ;;  %v16913_v44 = vld [vmem:[#allocation24_spill] sm:$0xff] }
 0x7ac   : > { %vm16905_vm13 = vcmp.gt.f32.partialorder %v15616_v46, 0.0  ;;  %8437 = vst.msk [vmem:[%s15744_s12 + $0x108] sm:$0xff] %vm365_vm0, %v8373_v55  ;;  %8438 = vst.msk [vmem:[%s15744_s12 + $0x110] sm:$0xff] %vm365_vm0, %v8374_v27  ;;  %v8381_v23 = vsel %vm8253_vm1, %v15620_v47, %v15915_v61  ;;  %vm16906_vm3 = vcmp.gt.f32.partialorder %v15624_v26, 0.0  ;;  %vm16908_vm10 = vcmp.gt.f32.partialorder %v15628_v50, 0.0  ;;  %v16914_v61 = vld [vmem:[#allocation77_spill] sm:$0xff] }
 0x7ad   : > { %v8380_v14 = vsel %vm16905_vm13, %v15616_v46, %v16904_v51  ;;  %8439 = vst.msk [vmem:[%s15744_s12 + $0x118] sm:$0xff] %vm365_vm0, %v8375_v42  ;;  %8440 = vst.msk [vmem:[%s15744_s12 + $0x120] sm:$0xff] %vm365_vm0, %v8376_v36  ;;  %v8382_v46 = vsel %vm16906_vm3, %v15624_v26, %v15918_v31  ;;  %v8383_v8 = vsel %vm16908_vm10, %v15628_v50, %v16907_v29  ;;  %vm16909_vm15 = vcmp.gt.f32.partialorder %v15632_v6, 0.0  ;;  %v16910_v26 = vld [vmem:[#allocation23_spill] sm:$0xff]  ;;  %v16934_v0 = vld [vmem:[#allocation34_spill] sm:$0xff] }
 0x7ae   : > { %v8384_v12 = vsel %vm16909_vm15, %v15632_v6, %v15934_v63  ;;  %8441 = vst.msk [vmem:[%s15744_s12 + $0x128] sm:$0xff] %vm365_vm0, %v8377_v35  ;;  %8442 = vst.msk [vmem:[%s15744_s12 + $0x130] sm:$0xff] %vm365_vm0, %v8378_v5  ;;  %v8385_v47 = vsel %vm8257_vm4, %v15636_v13, %v15937_v48  ;;  %vm16911_vm1 = vcmp.gt.f32.partialorder %v15640_v37, 0.0  ;;  %vm16912_vm12 = vcmp.gt.f32.partialorder %v15644_v15, 0.0  ;;  %v16916_v13 = vld [vmem:[#allocation25_spill] sm:$0xff]  ;;  %v16919_v48 = vld [vmem:[#allocation27_spill] sm:$0xff] }
 0x7af   : > { %8443 = vst.msk [vmem:[%s15744_s12 + $0x138] sm:$0xff] %vm365_vm0, %v8379_v2  ;;  %8444 = vst.msk [vmem:[%s15744_s12 + $0x140] sm:$0xff] %vm365_vm0, %v8380_v14  ;;  %v8386_v50 = vsel %vm16911_vm1, %v15640_v37, %v16910_v26  ;;  %v8387_v6 = vsel %vm16912_vm12, %v15644_v15, %v15953_v20  ;;  %vm16915_vm9 = vcmp.gt.f32.partialorder %v16914_v61, 0.0  ;;  %v8389_v37 = vsel %vm8261_vm5, %v15652_v18, %v16916_v13  ;;  %v16917_v15 = vld [vmem:[#allocation26_spill] sm:$0xff]  ;;  %v16923_v18 = vld [vmem:[#allocation29_spill] sm:$0xff] }
 0x7b0   : > { %v8388_v31 = vsel %vm16915_vm9, %v16914_v61, %v16913_v44  ;;  %8445 = vst.msk [vmem:[%s15744_s12 + $0x148] sm:$0xff] %vm365_vm0, %v8381_v23  ;;  %8446 = vst.msk [vmem:[%s15744_s12 + $0x150] sm:$0xff] %vm365_vm0, %v8382_v46  ;;  %vm16918_vm4 = vcmp.gt.f32.partialorder %v15656_v30, 0.0  ;;  %vm16920_vm2 = vcmp.gt.f32.partialorder %v15660_v1, 0.0  ;;  %vm16922_vm14 = vcmp.gt.f32.partialorder %v16856_v34, 0.0  ;;  %v16939_v16 = vld [vmem:[#allocation36_spill] sm:$0xff] }
 0x7b1   : > { %8447 = vst.msk [vmem:[%s15744_s12 + $0x158] sm:$0xff] %vm365_vm0, %v8383_v8  ;;  %8448 = vst.msk [vmem:[%s15744_s12 + $0x160] sm:$0xff] %vm365_vm0, %v8384_v12  ;;  %v8390_v63 = vsel %vm16918_vm4, %v15656_v30, %v16917_v15  ;;  %v8391_v20 = vsel %vm16920_vm2, %v15660_v1, %v16919_v48  ;;  %v8392_v43 = vsel %vm16922_vm14, %v16856_v34, %v16921_v24  ;;  %v16924_v1 = vld [vmem:[#allocation30_spill] sm:$0xff]  ;;  %vm16925_vm5 = vcmp.gt.f32.partialorder %v16860_v21, 0.0 }
 0x7b2   : > { %8449 = vst.msk [vmem:[%s15744_s12 + $0x168] sm:$0xff] %vm365_vm0, %v8385_v47  ;;  %8450 = vst.msk [vmem:[%s15744_s12 + $0x170] sm:$0xff] %vm365_vm0, %v8386_v50  ;;  %v8393_v30 = vsel %vm8265_vm6, %v16858_v7, %v16923_v18  ;;  %v8394_v34 = vsel %vm16925_vm5, %v16860_v21, %v16924_v1  ;;  %vm16927_vm13 = vcmp.gt.f32.partialorder %v16862_v28, 0.0  ;;  %vm16929_vm3 = vcmp.gt.f32.partialorder %v16928_v62, 0.0  ;;  %v16930_v21 = vld [vmem:[#allocation32_spill] sm:$0xff]  ;;  %v16931_v7 = vld [vmem:[#allocation33_spill] sm:$0xff] }
 0x7b3   : > { %8451 = vst.msk [vmem:[%s15744_s12 + $0x178] sm:$0xff] %vm365_vm0, %v8387_v6  ;;  %8452 = vst.msk [vmem:[%s15744_s12 + $0x180] sm:$0xff] %vm365_vm0, %v8388_v31  ;;  %v8395_v25 = vsel %vm16927_vm13, %v16862_v28, %v16926_v22  ;;  %v8396_v60 = vsel %vm16929_vm3, %v16928_v62, %v16010_v17  ;;  %v8397_v28 = vsel %vm8269_vm7, %v15684_v53, %v16930_v21  ;;  %vm16933_vm6 = vcmp.gt.f32.partialorder %v16932_v45, 0.0  ;;  %v16937_v53 = vld [vmem:[#allocation35_spill] sm:$0xff]  ;;  %v16940_v54 = vld [vmem:[#allocation78_spill] sm:$0xff] }
 0x7b4   : > { %8453 = vst.msk [vmem:[%s15744_s12 + $0x188] sm:$0xff] %vm365_vm0, %v8389_v37  ;;  %8454 = vst.msk [vmem:[%s15744_s12 + $0x190] sm:$0xff] %vm365_vm0, %v8390_v63  ;;  %v8398_v17 = vsel %vm8270_vm11, %v16866_v58, %v16931_v7  ;;  %v8399_v33 = vsel %vm16933_vm6, %v16932_v45, %v16029_v56  ;;  %vm16936_vm10 = vcmp.gt.f32.partialorder %v16935_v9, 0.0  ;;  %v8401_v56 = vsel %vm8273_vm8, %v16871_v40, %v16937_v53 }
 0x7b5   : > { %8455 = vst.msk [vmem:[%s15744_s12 + $0x198] sm:$0xff] %vm365_vm0, %v8391_v20  ;;  %8456 = vst.msk [vmem:[%s15744_s12 + $0x1a0] sm:$0xff] %vm365_vm0, %v8392_v43  ;;  %v8400_v19 = vsel %vm16936_vm10, %v16935_v9, %v16934_v0  ;;  %vm16938_vm11 = vcmp.gt.f32.partialorder %v16873_v39, 0.0  ;;  %vm16941_vm7 = vcmp.gt.f32.partialorder %v16940_v54, 0.0 }
 0x7b6   : > { %8457 = vst.msk [vmem:[%s15744_s12 + $0x1a8] sm:$0xff] %vm365_vm0, %v8393_v30  ;;  %8458 = vst.msk [vmem:[%s15744_s12 + $0x1b0] sm:$0xff] %vm365_vm0, %v8394_v34  ;;  %v8402_v58 = vsel %vm16938_vm11, %v16873_v39, %v16047_v59  ;;  %v8403_v49 = vsel %vm16941_vm7, %v16940_v54, %v16939_v16 }
 0x7b7   : > { %8459 = vst.msk [vmem:[%s15744_s12 + $0x1b8] sm:$0xff] %vm365_vm0, %v8395_v25  ;;  %8460 = vst.msk [vmem:[%s15744_s12 + $0x1c0] sm:$0xff] %vm365_vm0, %v8396_v60 }
 0x7b8   : > { %8461 = vst.msk [vmem:[%s15744_s12 + $0x1c8] sm:$0xff] %vm365_vm0, %v8397_v28  ;;  %8462 = vst.msk [vmem:[%s15744_s12 + $0x1d0] sm:$0xff] %vm365_vm0, %v8398_v17 }
 0x7b9   : > { %8463 = vst.msk [vmem:[%s15744_s12 + $0x1d8] sm:$0xff] %vm365_vm0, %v8399_v33  ;;  %8464 = vst.msk [vmem:[%s15744_s12 + $0x1e0] sm:$0xff] %vm365_vm0, %v8400_v19 }
 0x7ba   : > { %8465 = vst.msk [vmem:[%s15744_s12 + $0x1e8] sm:$0xff] %vm365_vm0, %v8401_v56  ;;  %8466 = vst.msk [vmem:[%s15744_s12 + $0x1f0] sm:$0xff] %vm365_vm0, %v8402_v58 }
 0x7bb   : > { %8467 = vst.msk [vmem:[%s15744_s12 + $0x1f8] sm:$0xff] %vm365_vm0, %v8403_v49 }
 0x7bc   : > { %11015 = shalt.err (!%p11012_p2)
}
 0x7bd   : > { %s11016_s29 = scalar_lea.hbm %s16279_s8, 8192  ;;  %s11020_s12 = scalar_lea.hbm %s16382_s7, 16384 }
 0x7be   : > { %p11017_p4 = scmp.ne.s32.totalorder %s16279_s8, %s11016_s29  ;;  %p11021_p9 = scmp.lt.u32.totalorder %s16279_s8, %s16382_s7 }
 0x7bf   : > { %p11022_p1 = scmp.lt.u32.totalorder %s11020_s12, %s11016_s29  ;;  %p11024_p6 = scmp.lt.u32.totalorder %s11016_s29, %s16279_s8 }
 0x7c0   : > { %p11018_p5 = pnand %p11017_p4, %p16942_p11 }
 0x7c1   : > { %p11023_p3 = por %p11022_p1, %p11021_p9 }
 0x7c2   : > { %p11019_p7 = pneg %p11018_p5 }
 0x7c3   : > { %p11025_p12 = por %p11024_p6, %p11023_p3 }
 0x7c5   : > { %p11026_p13 = pnand %p11025_p12, %p11019_p7 }
 0x7c7   : > { %11029 = shalt.err (!%p11026_p13)
}
 0x7c8   : > { %s11082_s18 = smov 128   ;;  %s11083_s20 = smov 8  }
 0x7c9   : > { %8920 = dma.vmem_to_hbm [thread:$0]  (%p16942_p11), %s16281_s19, 8192, %s16279_s8, %s8469_s11, %s11082_s18, %s11082_s18, %s11083_s20  }
 0x7ca PF: > { %s8498_s22 = sand.u32 1, %s11056_s24   ;;  %p16943_p8 = scmp.ne.s32.totalorder %s16531_s14, 0 }
 0x7cb   : > { %p16944_p10 = scmp.ge.s32.totalorder %s11068_s27, 2  ;;  %s8499_s15 = scalar_lea.sflag [#allocation6], %s8498_s22 }
 0x7cd   : > { %p8927_p0 = pnand %p16944_p10, %p16943_p8 }
 0x7cf   : > { %11051 = dma.done.wait (!%p8927_p0), %s8499_s15, 8192  }
 0x7d0   : > { %11053 = vsyncadd (!%p8927_p0), %s8499_s15, 4294959104  ;;  %p20_p2 = scmp.ge.s32.totalorder %s11149_s30, 4   ;;  %s16945_s24 = smov %s11060_s25 }
 0x7d1   : > { %s16946_s25 = smov %s11064_s26  ;;  %s16947_s26 = smov %s11161_s10 }
 0x7d2   : > { %s16948_s27 = smov %s11149_s30  ;;  %22 = sbr.rel (!%p20_p2) target bundleno = 5 (0x5), region = 97 }
 0x7d9   :  { %8504 = vsyncpa [#allocation5], 1 }
 0x7da   :  { %8506 = vsyncpa [#allocation5 + $0x1], 1 }
 0x7db   :  { %8507 = vsyncpa [#allocation6], 1 }
 0x7dc   :  { %8509 = vsyncpa [#allocation6 + $0x1], 1 }

</bundles_post_ra>
